<compile_context>
chip_gen: v6e
topology: v6e:2x2x1
jax: 0.10.0
libtpu: 0.0.40
codegen_flags: <defaults>
</compile_context>

<pallas_src>
import functools
import math

import jax
import jax.numpy as jnp
from jax.experimental import pallas as pl
from jax.experimental.pallas import tpu as pltpu


_LANE_CHUNK = 128      # the attention core is evaluated 128 lanes at a time
_MAX_BLOCK_N = 512     # largest per-grid-step lane block considered


# --------------------------------- kernel ---------------------------------------------- #

def _mha_kernel(bq_ref, xq_ref, xk_ref, xv_ref,
                aq_ref, ak_ref, av_ref, ao_ref,
                out_ref, k_s, v_s, o_s,
                *, num_heads, seq_len, approx_recip):
    """One grid step: block_n batch columns (lanes), full sequence (sublanes).

    Index conventions (n = batch lane, a = head, d = dim-within-head, l = query pos,
    m = key pos, e = embed):
      xq/xk/xv refs : (L*E, block_n) bf16, rows ordered (l, e)
      aq/ak/av refs : (L*E, L*E) bf16, map rows (l, e) -> rows (a, d, l|m); scale in aq
      ao ref        : (L*E, L*E) bf16, maps rows (a, d, l) -> rows (l, e)
      bq ref        : (nh*hd,) fp32 in SMEM (pre-scaled q bias, per (a, d))
      out ref       : (L*E, block_n) bf16, rows ordered (l, e)
      k_s/v_s/o_s   : (L*E, block_n) fp32 VMEM scratch
    """
    F, Mb = xq_ref.shape
    L = seq_len
    nh = num_heads
    hd = (F // L) // nh
    f32 = jnp.float32
    CH = _LANE_CHUNK
    n_chunks = Mb // CH

    # K / V projections over the whole lane block: bf16 MXU matmuls, fp32 accumulation,
    # results parked in fp32 VMEM scratch with rows ordered (a, d, m).
    k_s[...] = jnp.dot(ak_ref[...], xk_ref[...], preferred_element_type=f32)
    v_s[...] = jnp.dot(av_ref[...], xv_ref[...], preferred_element_type=f32)

    for c in range(n_chunks):                       # 128-lane chunks: bounds vreg pressure
        col = pl.ds(c * CH, CH)

        # Q projection for this chunk only (bf16 MXU, fp32 acc) -> stays in vregs.
        q_c = jnp.dot(aq_ref[...], xq_ref[:, col], preferred_element_type=f32)
        q_c = q_c.reshape(nh * hd, L, CH)           # rows (a, d) -> (L, CH) tiles

        for a in range(nh):
            # Biased, pre-scaled q tiles for this head; bq is a per-(a,d) SMEM scalar so
            # the add is a plain scalar-operand vadd (no lane/sublane splat of a vector).
            qd = [q_c[a * hd + d] + bq_ref[a * hd + d] for d in range(hd)]

            # Scores with the key position m unrolled: all softmax reductions become
            # element-wise VALU chains over L=8 (L, CH) vregs instead of XLU sublane
            # reductions.  (The (1, CH) k/v rows broadcast over the query sublanes in the
            # multiply; a pl.ds(row, L, stride=0) splat load would fold that broadcast
            # into the load slot if ever needed.)
            s_m = []
            for m in range(L):
                acc = None
                for d in range(hd):
                    row = (a * hd + d) * L + m
                    kb = k_s[pl.ds(row, 1), col]                 # (1, CH)
                    term = qd[d] * kb
                    acc = term if acc is None else acc + term
                s_m.append(acc)

            mx = s_m[0]
            for m in range(1, L):
                mx = jnp.maximum(mx, s_m[m])
            p_m = [jnp.exp(s_m[m] - mx) for m in range(L)]       # fp32 exp (v5e-safe)
            den = p_m[0]
            for m in range(1, L):
                den = den + p_m[m]
            inv = pl.reciprocal(den, approx=approx_recip)        # EUP slot

            # Weighted values, accumulated straight into the fp32 output scratch
            # (rows ordered (a, d, l) to match ao's column ordering).
            for d in range(hd):
                acc = None
                for m in range(L):
                    row = (a * hd + d) * L + m
                    vb = v_s[pl.ds(row, 1), col]                 # (1, CH)
                    term = p_m[m] * vb
                    acc = term if acc is None else acc + term
                o_s[pl.ds((a * hd + d) * L, L), col] = acc * inv

    # Output projection over the whole lane block (bf16 MXU, fp32 acc), lane-dense store.
    out = jnp.dot(ao_ref[...], o_s[...].astype(ao_ref.dtype), preferred_element_type=f32)
    out_ref[...] = out.astype(out_ref.dtype)


# --------------------------- operand folding / wrapper --------------------------------- #

def _build_projection_operands(params, *, num_heads, seq_len, weight_dtype=jnp.bfloat16):
    """Fold head split, per-head row ordering, the 1/sqrt(head_dim) scale and the
    removable biases into dense bf16 (L*E, L*E) projection matrices."""
    wq, wk, wv, wo, bq, bk, bv, bo = params
    E = wq.shape[0]
    nh = num_heads
    hd = E // nh
    L = seq_len
    scale = 1.0 / math.sqrt(hd)
    eye_l = jnp.eye(L, dtype=jnp.float32)

    def in_proj_mat(w, s):
        w3 = w.astype(jnp.float32).reshape(E, nh, hd)                 # [e_in, a, d]
        a = jnp.einsum('ead,lm->adlme', w3, eye_l) * s                # [a, d, l, m, e_in]
        return a.reshape(nh * hd * L, L * E).astype(weight_dtype)

    a_q = in_proj_mat(wq, scale)
    a_k = in_proj_mat(wk, 1.0)
    a_v = in_proj_mat(wv, 1.0)

    wo3 = wo.astype(jnp.float32).reshape(nh, hd, E)                   # [a, d, e_out]
    a_o = jnp.einsum('ade,lm->leadm', wo3, eye_l)                     # [l, e_out, a, d, m]
    a_o = a_o.reshape(L * E, nh * hd * L).astype(weight_dtype)

    # Q bias: added in-kernel as per-(a,d) SMEM scalars (carries the same scale as a_q).
    bq_vec = bq.astype(jnp.float32).reshape(nh * hd) * scale
    # K bias cancels in the softmax (constant across key positions).  V bias is constant
    # across key positions and softmax rows sum to one, so it folds into the output bias:
    b_out = (bv.astype(jnp.float32).reshape(1, E) @ wo.astype(jnp.float32)
             + bo.astype(jnp.float32).reshape(1, E)).reshape(E)
    return a_q, a_k, a_v, a_o, bq_vec, b_out


def _is_single_tensorcore_chip():
    try:
        kind = jax.devices()[0].device_kind.lower()
    except Exception:
        return False
    return ("lite" in kind) or ("v5e" in kind) or ("v6e" in kind)


def _pick_block_n(n_padded, max_block=_MAX_BLOCK_N, single_core=None):
    """n_padded is a multiple of 128.  Single-TC chips (v5e/v6e): fewest, biggest steps.
    Multi-TC chips: largest block that keeps the 'parallel' grid even (both cores busy)."""
    if single_core is None:
        single_core = _is_single_tensorcore_chip()
    candidates = [b for b in range(128, min(max_block, n_padded) + 1, 128)
                  if n_padded % b == 0]
    if not candidates:
        return n_padded
    if single_core:
        return max(candidates)
    even = [b for b in candidates if (n_padded // b) % 2 == 0]
    if even:
        return max(even)
    multi = [b for b in candidates if (n_padded // b) >= 2]
    return max(multi) if multi else max(candidates)


def mha_pallas(xq_t, xk_t, xv_t, a_q, a_k, a_v, a_o, bq_vec, *,
               num_heads, seq_len, block_n=None, approx_recip=True):
    """xq_t/xk_t/xv_t: (L*E, N) bf16 transposed slabs (MHA batch on lanes); N % 128 == 0.
    Returns the attention output slab (L*E, N) in bf16 (output bias NOT yet added)."""
    F, N = xq_t.shape
    if block_n is None:
        block_n = _pick_block_n(N)
    assert N % block_n == 0 and block_n % _LANE_CHUNK == 0, (N, block_n)

    x_spec = pl.BlockSpec((F, block_n), lambda i: (0, i))
    w_spec = pl.BlockSpec((F, F), lambda i: (0, 0))          # grid-invariant: DMA'd once
    smem_spec = pl.BlockSpec(memory_space=pltpu.MemorySpace.SMEM)

    kernel = functools.partial(_mha_kernel, num_heads=num_heads, seq_len=seq_len,
                               approx_recip=approx_recip)
    return pl.pallas_call(
        kernel,
        out_shape=jax.ShapeDtypeStruct((F, N), xq_t.dtype),
        grid=(N // block_n,),
        in_specs=[smem_spec, x_spec, x_spec, x_spec,
                  w_spec, w_spec, w_spec, w_spec],
        out_specs=x_spec,
        scratch_shapes=[
            pltpu.VMEM((F, block_n), jnp.float32),   # k (rows (a, d, m))
            pltpu.VMEM((F, block_n), jnp.float32),   # v (rows (a, d, m))
            pltpu.VMEM((F, block_n), jnp.float32),   # attention output (rows (a, d, l))
        ],
        compiler_params=pltpu.CompilerParams(
            dimension_semantics=("parallel",),
            vmem_limit_bytes=32 * 1024 * 1024),
    )(bq_vec, xq_t, xk_t, xv_t, a_q, a_k, a_v, a_o)


def cross_attention_forward(queries, key, values, params, *, num_heads,
                            block_n=None, approx_recip=True):
    """queries/key/values: (B, C, D, H, W) with H == W == embed_dim.  fp32 or bf16 in;
    output dtype matches the input dtype.  Matmuls run in bf16 with fp32 accumulation."""
    B, C, D, H, W = queries.shape
    assert H == W, "the module's output .view requires H == W"
    E, L = W, D
    assert E % num_heads == 0
    N = B * C * H
    out_dtype = queries.dtype
    slab_dtype = jnp.bfloat16

    # (B,C,D,H,W) -> (D,W,B,C,H) -> (D*W, B*C*H) in bf16: lane-dense transposed slab with
    # the MHA batch on lanes; the transpose + cast fuse into one XLA op (half the bytes
    # of the old fp32 slabs).
    # TODO(synk): fold this HBM-side permute into the kernel with a strided BlockSpec /
    # manual DMA over (b*c, D, 1, W) tiles to remove the extra HBM round trip entirely.
    def to_slab(x):
        return jnp.transpose(x, (2, 4, 0, 1, 3)).reshape(L * E, N).astype(slab_dtype)

    a_q, a_k, a_v, a_o, bq_vec, b_out = _build_projection_operands(
        params, num_heads=num_heads, seq_len=L, weight_dtype=slab_dtype)

    xq_t, xk_t, xv_t = to_slab(queries), to_slab(key), to_slab(values)

    # Pad the lane axis up to a multiple of 128 so every store stays lane-dense.
    n_pad = ((N + 127) // 128) * 128
    if n_pad != N:
        pad = ((0, 0), (0, n_pad - N))
        xq_t, xk_t, xv_t = (jnp.pad(t, pad) for t in (xq_t, xk_t, xv_t))

    out_t = mha_pallas(xq_t, xk_t, xv_t, a_q, a_k, a_v, a_o, bq_vec,
                       num_heads=num_heads, seq_len=L, block_n=block_n,
                       approx_recip=approx_recip)
    out_t = out_t[:, :N]

    # (D*W, B*C*H) -> (D,W,B,C,H) -> (B,C,D,H,W); the folded output bias (per embed
    # channel) is added here where it fuses into the epilogue transpose for free.
    out = jnp.transpose(out_t.reshape(L, E, B, C, H), (2, 3, 0, 4, 1))
    return (out.astype(jnp.float32) + b_out).astype(out_dtype)


# ------------------------------ pure-JAX reference ------------------------------------- #

def _reference_mha(q_nle, k_nle, v_nle, params, num_heads):
    wq, wk, wv, wo, bq, bk, bv, bo = params
    N, L, E = q_nle.shape
    hd = E // num_heads
    q = q_nle @ wq + bq
    k = k_nle @ wk + bk
    v = v_nle @ wv + bv
    q = q.reshape(N, L, num_heads, hd).transpose(0, 2, 1, 3)
    k = k.reshape(N, L, num_heads, hd).transpose(0, 2, 1, 3)
    v = v.reshape(N, L, num_heads, hd).transpose(0, 2, 1, 3)
    s = jnp.einsum('nhld,nhmd->nhlm', q, k) / math.sqrt(hd)
    p = jax.nn.softmax(s, axis=-1)
    o = jnp.einsum('nhlm,nhmd->nhld', p, v)
    o = o.transpose(0, 2, 1, 3).reshape(N, L, E)
    return o @ wo + bo


def _reference_cross_attention(queries, key, values, params, num_heads):
    B, C, D, H, W = queries.shape

    def to_nle(x):
        return jnp.transpose(x, (0, 1, 3, 2, 4)).reshape(B * C * H, D, W)

    ref_nle = _reference_mha(to_nle(queries), to_nle(key), to_nle(values),
                             params, num_heads)
    return jnp.transpose(ref_nle.reshape(B, C, H, D, W), (0, 1, 3, 2, 4))


# ------------------------------------ tests -------------------------------------------- #

if __name__ == "__main__":
    embed_dim, num_heads = 16, 4

    def make_inputs(B, C, D, H, W, seed=0):
        ks = jax.random.split(jax.random.PRNGKey(seed), 11)
        q = jax.random.normal(ks[0], (B, C, D, H, W), jnp.float32)
        k = jax.random.normal(ks[1], (B, C, D, H, W), jnp.float32)
        v = jax.random.normal(ks[2], (B, C, D, H, W), jnp.float32)
        # nn.MultiheadAttention-style params, stored pre-transposed so x @ W applies them.
        sc = 1.0 / math.sqrt(embed_dim)
        wq = jax.random.uniform(ks[3], (embed_dim, embed_dim), jnp.float32, -sc, sc)
        wk = jax.random.uniform(ks[4], (embed_dim, embed_dim), jnp.float32, -sc, sc)
        wv = jax.random.uniform(ks[5], (embed_dim, embed_dim), jnp.float32, -sc, sc)
        wo = jax.random.uniform(ks[6], (embed_dim, embed_dim), jnp.float32, -sc, sc)
        bq = jax.random.uniform(ks[7], (1, embed_dim), jnp.float32, -sc, sc)
        bk = jax.random.uniform(ks[8], (1, embed_dim), jnp.float32, -sc, sc)
        bv = jax.random.uniform(ks[9], (1, embed_dim), jnp.float32, -sc, sc)
        bo = jax.random.uniform(ks[10], (1, embed_dim), jnp.float32, -sc, sc)
        return (q, k, v), (wq, wk, wv, wo, bq, bk, bv, bo)

    # bf16 matmuls + fp32 accumulation/softmax -> tolerances are bf16-level.
    ATOL, RTOL = 5e-2, 5e-2

    # --- check 1: N = B*C*H = 256, forced block_n=256 (exercises the 2-chunk inner loop)
    B, C, D, H, W = 2, 8, 8, 16, 16
    (q, k, v), params = make_inputs(B, C, D, H, W, seed=0)
    out = jax.block_until_ready(
        cross_attention_forward(q, k, v, params, num_heads=num_heads, block_n=256))
    assert out.shape == (B, C, D, W, W), out.shape
    ref = _reference_cross_attention(q, k, v, params, num_heads)
    assert jnp.allclose(out, ref, atol=ATOL, rtol=RTOL), (
        "mismatch (N=256), max abs err = %e" % float(jnp.max(jnp.abs(out - ref))))

    # --- check 2: small shape N = 128, auto block_n (single full block) -----------------
    B2, C2 = 2, 4
    (q2, k2, v2), params2 = make_inputs(B2, C2, D, H, W, seed=1)
    out2 = jax.block_until_ready(
        cross_attention_forward(q2, k2, v2, params2, num_heads=num_heads))
    ref2 = _reference_cross_attention(q2, k2, v2, params2, num_heads)
    assert out2.shape == (B2, C2, D, W, W)
    assert jnp.allclose(out2, ref2, atol=ATOL, rtol=RTOL), (
        "mismatch (N=128), max abs err = %e" % float(jnp.max(jnp.abs(out2 - ref2))))

    # --- check 3: N = 48 (not a multiple of 128) -> lane padding path -------------------
    B3, C3 = 1, 3
    (q3, k3, v3), params3 = make_inputs(B3, C3, D, H, W, seed=2)
    out3 = jax.block_until_ready(
        cross_attention_forward(q3, k3, v3, params3, num_heads=num_heads))
    ref3 = _reference_cross_attention(q3, k3, v3, params3, num_heads)
    assert out3.shape == (B3, C3, D, W, W)
    assert jnp.allclose(out3, ref3, atol=ATOL, rtol=RTOL), (
        "mismatch (padded N), max abs err = %e" % float(jnp.max(jnp.abs(out3 - ref3))))

    # --- check 4: bf16 inputs, block_n=128 -> grid of 2 steps (pipelined path) ----------
    out_bf16 = jax.block_until_ready(
        cross_attention_forward(q.astype(jnp.bfloat16), k.astype(jnp.bfloat16),
                                v.astype(jnp.bfloat16), params,
                                num_heads=num_heads, block_n=128))
    assert out_bf16.shape == (B, C, D, W, W)
    assert out_bf16.dtype == jnp.bfloat16
    assert float(jnp.max(jnp.abs(out_bf16.astype(jnp.float32) - ref))) < 0.1

    print("KERNEL_OK")
</pallas_src>

<mosaic_0001>
module attributes {stable_mosaic.version = 11 : i64} {
  func.func @_mha_kernel(%arg0: i32, %arg1: memref<16xf32, #tpu.memory_space<smem>>, %arg2: memref<128x256xbf16, #tpu.memory_space<vmem>>, %arg3: memref<128x256xbf16, #tpu.memory_space<vmem>>, %arg4: memref<128x256xbf16, #tpu.memory_space<vmem>>, %arg5: memref<128x128xbf16, #tpu.memory_space<vmem>>, %arg6: memref<128x128xbf16, #tpu.memory_space<vmem>>, %arg7: memref<128x128xbf16, #tpu.memory_space<vmem>>, %arg8: memref<128x128xbf16, #tpu.memory_space<vmem>>, %arg9: memref<128x256xbf16, #tpu.memory_space<vmem>>, %arg10: memref<128x256xf32, #tpu.memory_space<vmem>>, %arg11: memref<128x256xf32, #tpu.memory_space<vmem>>, %arg12: memref<128x256xf32, #tpu.memory_space<vmem>>) attributes {dimension_semantics = [#tpu.dimension_semantics<parallel>], iteration_bounds = array<i64: 1>, scalar_prefetch = 0 : i64, scratch_operands = 3 : i64, tpu.core_type = #tpu.core_type<tc>, window_params = [{transform_indices = @transform_0, window_bounds = array<i64: 16>}, {transform_indices = @transform_1, window_bounds = array<i64: 128, 256>}, {transform_indices = @transform_2, window_bounds = array<i64: 128, 256>}, {transform_indices = @transform_3, window_bounds = array<i64: 128, 256>}, {pipeline_mode = #tpu.pipeline_mode<synchronous>, transform_indices = @transform_4, window_bounds = array<i64: 128, 128>}, {pipeline_mode = #tpu.pipeline_mode<synchronous>, transform_indices = @transform_5, window_bounds = array<i64: 128, 128>}, {pipeline_mode = #tpu.pipeline_mode<synchronous>, transform_indices = @transform_6, window_bounds = array<i64: 128, 128>}, {pipeline_mode = #tpu.pipeline_mode<synchronous>, transform_indices = @transform_7, window_bounds = array<i64: 128, 128>}, {transform_indices = @transform_8, window_bounds = array<i64: 128, 256>}]} {
    %c0 = arith.constant 0 : index
    %c0_0 = arith.constant 0 : index
    %0 = vector.load %arg6[%c0, %c0_0] : memref<128x128xbf16, #tpu.memory_space<vmem>>, vector<128x128xbf16>
    %c0_1 = arith.constant 0 : index
    %c0_2 = arith.constant 0 : index
    %1 = vector.load %arg3[%c0_1, %c0_2] : memref<128x256xbf16, #tpu.memory_space<vmem>>, vector<128x256xbf16>
    %cst = arith.constant dense<0.000000e+00> : vector<128x256xf32>
    %2 = tpu.matmul %0, %1, %cst {dimension_numbers = #tpu.dot_dimension_numbers<[1], [0], [0], [1], [0, 0, 1, 1], [], []>} : vector<128x128xbf16>, vector<128x256xbf16>, vector<128x256xf32> -> vector<128x256xf32>
    %c0_3 = arith.constant 0 : index
    %c0_4 = arith.constant 0 : index
    %3 = vector.load %arg10[%c0_3, %c0_4] : memref<128x256xf32, #tpu.memory_space<vmem>>, vector<128x256xf32>
    tpu.vector_store %arg10[%c0_3, %c0_4], %2 {strides = array<i32>} : memref<128x256xf32, #tpu.memory_space<vmem>>, vector<128x256xf32>,
    %c0_5 = arith.constant 0 : index
    %c0_6 = arith.constant 0 : index
    %4 = vector.load %arg7[%c0_5, %c0_6] : memref<128x128xbf16, #tpu.memory_space<vmem>>, vector<128x128xbf16>
    %c0_7 = arith.constant 0 : index
    %c0_8 = arith.constant 0 : index
    %5 = vector.load %arg4[%c0_7, %c0_8] : memref<128x256xbf16, #tpu.memory_space<vmem>>, vector<128x256xbf16>
    %cst_9 = arith.constant dense<0.000000e+00> : vector<128x256xf32>
    %6 = tpu.matmul %4, %5, %cst_9 {dimension_numbers = #tpu.dot_dimension_numbers<[1], [0], [0], [1], [0, 0, 1, 1], [], []>} : vector<128x128xbf16>, vector<128x256xbf16>, vector<128x256xf32> -> vector<128x256xf32>
    %c0_10 = arith.constant 0 : index
    %c0_11 = arith.constant 0 : index
    %7 = vector.load %arg11[%c0_10, %c0_11] : memref<128x256xf32, #tpu.memory_space<vmem>>, vector<128x256xf32>
    tpu.vector_store %arg11[%c0_10, %c0_11], %6 {strides = array<i32>} : memref<128x256xf32, #tpu.memory_space<vmem>>, vector<128x256xf32>,
    %c0_12 = arith.constant 0 : index
    %c0_13 = arith.constant 0 : index
    %8 = vector.load %arg5[%c0_12, %c0_13] : memref<128x128xbf16, #tpu.memory_space<vmem>>, vector<128x128xbf16>
    %c0_14 = arith.constant 0 : index
    %c0_15 = arith.constant 0 : index
    %9 = vector.load %arg2[%c0_14, %c0_15] : memref<128x256xbf16, #tpu.memory_space<vmem>>, vector<128x128xbf16>
    %cst_16 = arith.constant dense<0.000000e+00> : vector<128x128xf32>
    %10 = tpu.matmul %8, %9, %cst_16 {dimension_numbers = #tpu.dot_dimension_numbers<[1], [0], [0], [1], [0, 0, 1, 1], [], []>} : vector<128x128xbf16>, vector<128x128xbf16>, vector<128x128xf32> -> vector<128x128xf32>
    %11 = vector.shape_cast %10 : vector<128x128xf32> to vector<16x8x128xf32>
    %12 = vector.extract_strided_slice %11 {offsets = [0, 0, 0], sizes = [1, 8, 128], strides = [1, 1, 1]} : vector<16x8x128xf32> to vector<1x8x128xf32>
    %13 = vector.shape_cast %12 : vector<1x8x128xf32> to vector<8x128xf32>
    %c0_17 = arith.constant 0 : index
    %14 = memref.load %arg1[%c0_17] : memref<16xf32, #tpu.memory_space<smem>>
    %15 = vector.broadcast %14 : f32 to vector<8x128xf32>
    %16 = arith.addf %13, %15 : vector<8x128xf32>
    %17 = vector.extract_strided_slice %11 {offsets = [1, 0, 0], sizes = [1, 8, 128], strides = [1, 1, 1]} : vector<16x8x128xf32> to vector<1x8x128xf32>
    %18 = vector.shape_cast %17 : vector<1x8x128xf32> to vector<8x128xf32>
    %c1 = arith.constant 1 : index
    %19 = memref.load %arg1[%c1] : memref<16xf32, #tpu.memory_space<smem>>
    %20 = vector.broadcast %19 : f32 to vector<8x128xf32>
    %21 = arith.addf %18, %20 : vector<8x128xf32>
    %22 = vector.extract_strided_slice %11 {offsets = [2, 0, 0], sizes = [1, 8, 128], strides = [1, 1, 1]} : vector<16x8x128xf32> to vector<1x8x128xf32>
    %23 = vector.shape_cast %22 : vector<1x8x128xf32> to vector<8x128xf32>
    %c2 = arith.constant 2 : index
    %24 = memref.load %arg1[%c2] : memref<16xf32, #tpu.memory_space<smem>>
    %25 = vector.broadcast %24 : f32 to vector<8x128xf32>
    %26 = arith.addf %23, %25 : vector<8x128xf32>
    %27 = vector.extract_strided_slice %11 {offsets = [3, 0, 0], sizes = [1, 8, 128], strides = [1, 1, 1]} : vector<16x8x128xf32> to vector<1x8x128xf32>
    %28 = vector.shape_cast %27 : vector<1x8x128xf32> to vector<8x128xf32>
    %c3 = arith.constant 3 : index
    %29 = memref.load %arg1[%c3] : memref<16xf32, #tpu.memory_space<smem>>
    %30 = vector.broadcast %29 : f32 to vector<8x128xf32>
    %31 = arith.addf %28, %30 : vector<8x128xf32>
    %c0_18 = arith.constant 0 : index
    %c0_19 = arith.constant 0 : index
    %32 = vector.load %arg10[%c0_18, %c0_19] : memref<128x256xf32, #tpu.memory_space<vmem>>, vector<1x128xf32>
    %33 = vector.broadcast %32 : vector<1x128xf32> to vector<8x128xf32>
    %34 = arith.mulf %16, %33 : vector<8x128xf32>
    %c8 = arith.constant 8 : index
    %c0_20 = arith.constant 0 : index
    %35 = vector.load %arg10[%c8, %c0_20] : memref<128x256xf32, #tpu.memory_space<vmem>>, vector<1x128xf32>
    %36 = vector.broadcast %35 : vector<1x128xf32> to vector<8x128xf32>
    %37 = arith.mulf %21, %36 : vector<8x128xf32>
    %38 = arith.addf %34, %37 : vector<8x128xf32>
    %c16 = arith.constant 16 : index
    %c0_21 = arith.constant 0 : index
    %39 = vector.load %arg10[%c16, %c0_21] : memref<128x256xf32, #tpu.memory_space<vmem>>, vector<1x128xf32>
    %40 = vector.broadcast %39 : vector<1x128xf32> to vector<8x128xf32>
    %41 = arith.mulf %26, %40 : vector<8x128xf32>
    %42 = arith.addf %38, %41 : vector<8x128xf32>
    %c24 = arith.constant 24 : index
    %c0_22 = arith.constant 0 : index
    %43 = vector.load %arg10[%c24, %c0_22] : memref<128x256xf32, #tpu.memory_space<vmem>>, vector<1x128xf32>
    %44 = vector.broadcast %43 : vector<1x128xf32> to vector<8x128xf32>
    %45 = arith.mulf %31, %44 : vector<8x128xf32>
    %46 = arith.addf %42, %45 : vector<8x128xf32>
    %c1_23 = arith.constant 1 : index
    %c0_24 = arith.constant 0 : index
    %47 = vector.load %arg10[%c1_23, %c0_24] : memref<128x256xf32, #tpu.memory_space<vmem>>, vector<1x128xf32>
    %48 = vector.broadcast %47 : vector<1x128xf32> to vector<8x128xf32>
    %49 = arith.mulf %16, %48 : vector<8x128xf32>
    %c9 = arith.constant 9 : index
    %c0_25 = arith.constant 0 : index
    %50 = vector.load %arg10[%c9, %c0_25] : memref<128x256xf32, #tpu.memory_space<vmem>>, vector<1x128xf32>
    %51 = vector.broadcast %50 : vector<1x128xf32> to vector<8x128xf32>
    %52 = arith.mulf %21, %51 : vector<8x128xf32>
    %53 = arith.addf %49, %52 : vector<8x128xf32>
    %c17 = arith.constant 17 : index
    %c0_26 = arith.constant 0 : index
    %54 = vector.load %arg10[%c17, %c0_26] : memref<128x256xf32, #tpu.memory_space<vmem>>, vector<1x128xf32>
    %55 = vector.broadcast %54 : vector<1x128xf32> to vector<8x128xf32>
    %56 = arith.mulf %26, %55 : vector<8x128xf32>
    %57 = arith.addf %53, %56 : vector<8x128xf32>
    %c25 = arith.constant 25 : index
    %c0_27 = arith.constant 0 : index
    %58 = vector.load %arg10[%c25, %c0_27] : memref<128x256xf32, #tpu.memory_space<vmem>>, vector<1x128xf32>
    %59 = vector.broadcast %58 : vector<1x128xf32> to vector<8x128xf32>
    %60 = arith.mulf %31, %59 : vector<8x128xf32>
    %61 = arith.addf %57, %60 : vector<8x128xf32>
    %c2_28 = arith.constant 2 : index
    %c0_29 = arith.constant 0 : index
    %62 = vector.load %arg10[%c2_28, %c0_29] : memref<128x256xf32, #tpu.memory_space<vmem>>, vector<1x128xf32>
    %63 = vector.broadcast %62 : vector<1x128xf32> to vector<8x128xf32>
    %64 = arith.mulf %16, %63 : vector<8x128xf32>
    %c10 = arith.constant 10 : index
    %c0_30 = arith.constant 0 : index
    %65 = vector.load %arg10[%c10, %c0_30] : memref<128x256xf32, #tpu.memory_space<vmem>>, vector<1x128xf32>
    %66 = vector.broadcast %65 : vector<1x128xf32> to vector<8x128xf32>
    %67 = arith.mulf %21, %66 : vector<8x128xf32>
    %68 = arith.addf %64, %67 : vector<8x128xf32>
    %c18 = arith.constant 18 : index
    %c0_31 = arith.constant 0 : index
    %69 = vector.load %arg10[%c18, %c0_31] : memref<128x256xf32, #tpu.memory_space<vmem>>, vector<1x128xf32>
    %70 = vector.broadcast %69 : vector<1x128xf32> to vector<8x128xf32>
    %71 = arith.mulf %26, %70 : vector<8x128xf32>
    %72 = arith.addf %68, %71 : vector<8x128xf32>
    %c26 = arith.constant 26 : index
    %c0_32 = arith.constant 0 : index
    %73 = vector.load %arg10[%c26, %c0_32] : memref<128x256xf32, #tpu.memory_space<vmem>>, vector<1x128xf32>
    %74 = vector.broadcast %73 : vector<1x128xf32> to vector<8x128xf32>
    %75 = arith.mulf %31, %74 : vector<8x128xf32>
    %76 = arith.addf %72, %75 : vector<8x128xf32>
    %c3_33 = arith.constant 3 : index
    %c0_34 = arith.constant 0 : index
    %77 = vector.load %arg10[%c3_33, %c0_34] : memref<128x256xf32, #tpu.memory_space<vmem>>, vector<1x128xf32>
    %78 = vector.broadcast %77 : vector<1x128xf32> to vector<8x128xf32>
    %79 = arith.mulf %16, %78 : vector<8x128xf32>
    %c11 = arith.constant 11 : index
    %c0_35 = arith.constant 0 : index
    %80 = vector.load %arg10[%c11, %c0_35] : memref<128x256xf32, #tpu.memory_space<vmem>>, vector<1x128xf32>
    %81 = vector.broadcast %80 : vector<1x128xf32> to vector<8x128xf32>
    %82 = arith.mulf %21, %81 : vector<8x128xf32>
    %83 = arith.addf %79, %82 : vector<8x128xf32>
    %c19 = arith.constant 19 : index
    %c0_36 = arith.constant 0 : index
    %84 = vector.load %arg10[%c19, %c0_36] : memref<128x256xf32, #tpu.memory_space<vmem>>, vector<1x128xf32>
    %85 = vector.broadcast %84 : vector<1x128xf32> to vector<8x128xf32>
    %86 = arith.mulf %26, %85 : vector<8x128xf32>
    %87 = arith.addf %83, %86 : vector<8x128xf32>
    %c27 = arith.constant 27 : index
    %c0_37 = arith.constant 0 : index
    %88 = vector.load %arg10[%c27, %c0_37] : memref<128x256xf32, #tpu.memory_space<vmem>>, vector<1x128xf32>
    %89 = vector.broadcast %88 : vector<1x128xf32> to vector<8x128xf32>
    %90 = arith.mulf %31, %89 : vector<8x128xf32>
    %91 = arith.addf %87, %90 : vector<8x128xf32>
    %c4 = arith.constant 4 : index
    %c0_38 = arith.constant 0 : index
    %92 = vector.load %arg10[%c4, %c0_38] : memref<128x256xf32, #tpu.memory_space<vmem>>, vector<1x128xf32>
    %93 = vector.broadcast %92 : vector<1x128xf32> to vector<8x128xf32>
    %94 = arith.mulf %16, %93 : vector<8x128xf32>
    %c12 = arith.constant 12 : index
    %c0_39 = arith.constant 0 : index
    %95 = vector.load %arg10[%c12, %c0_39] : memref<128x256xf32, #tpu.memory_space<vmem>>, vector<1x128xf32>
    %96 = vector.broadcast %95 : vector<1x128xf32> to vector<8x128xf32>
    %97 = arith.mulf %21, %96 : vector<8x128xf32>
    %98 = arith.addf %94, %97 : vector<8x128xf32>
    %c20 = arith.constant 20 : index
    %c0_40 = arith.constant 0 : index
    %99 = vector.load %arg10[%c20, %c0_40] : memref<128x256xf32, #tpu.memory_space<vmem>>, vector<1x128xf32>
    %100 = vector.broadcast %99 : vector<1x128xf32> to vector<8x128xf32>
    %101 = arith.mulf %26, %100 : vector<8x128xf32>
    %102 = arith.addf %98, %101 : vector<8x128xf32>
    %c28 = arith.constant 28 : index
    %c0_41 = arith.constant 0 : index
    %103 = vector.load %arg10[%c28, %c0_41] : memref<128x256xf32, #tpu.memory_space<vmem>>, vector<1x128xf32>
    %104 = vector.broadcast %103 : vector<1x128xf32> to vector<8x128xf32>
    %105 = arith.mulf %31, %104 : vector<8x128xf32>
    %106 = arith.addf %102, %105 : vector<8x128xf32>
    %c5 = arith.constant 5 : index
    %c0_42 = arith.constant 0 : index
    %107 = vector.load %arg10[%c5, %c0_42] : memref<128x256xf32, #tpu.memory_space<vmem>>, vector<1x128xf32>
    %108 = vector.broadcast %107 : vector<1x128xf32> to vector<8x128xf32>
    %109 = arith.mulf %16, %108 : vector<8x128xf32>
    %c13 = arith.constant 13 : index
    %c0_43 = arith.constant 0 : index
    %110 = vector.load %arg10[%c13, %c0_43] : memref<128x256xf32, #tpu.memory_space<vmem>>, vector<1x128xf32>
    %111 = vector.broadcast %110 : vector<1x128xf32> to vector<8x128xf32>
    %112 = arith.mulf %21, %111 : vector<8x128xf32>
    %113 = arith.addf %109, %112 : vector<8x128xf32>
    %c21 = arith.constant 21 : index
    %c0_44 = arith.constant 0 : index
    %114 = vector.load %arg10[%c21, %c0_44] : memref<128x256xf32, #tpu.memory_space<vmem>>, vector<1x128xf32>
    %115 = vector.broadcast %114 : vector<1x128xf32> to vector<8x128xf32>
    %116 = arith.mulf %26, %115 : vector<8x128xf32>
    %117 = arith.addf %113, %116 : vector<8x128xf32>
    %c29 = arith.constant 29 : index
    %c0_45 = arith.constant 0 : index
    %118 = vector.load %arg10[%c29, %c0_45] : memref<128x256xf32, #tpu.memory_space<vmem>>, vector<1x128xf32>
    %119 = vector.broadcast %118 : vector<1x128xf32> to vector<8x128xf32>
    %120 = arith.mulf %31, %119 : vector<8x128xf32>
    %121 = arith.addf %117, %120 : vector<8x128xf32>
    %c6 = arith.constant 6 : index
    %c0_46 = arith.constant 0 : index
    %122 = vector.load %arg10[%c6, %c0_46] : memref<128x256xf32, #tpu.memory_space<vmem>>, vector<1x128xf32>
    %123 = vector.broadcast %122 : vector<1x128xf32> to vector<8x128xf32>
    %124 = arith.mulf %16, %123 : vector<8x128xf32>
    %c14 = arith.constant 14 : index
    %c0_47 = arith.constant 0 : index
    %125 = vector.load %arg10[%c14, %c0_47] : memref<128x256xf32, #tpu.memory_space<vmem>>, vector<1x128xf32>
    %126 = vector.broadcast %125 : vector<1x128xf32> to vector<8x128xf32>
    %127 = arith.mulf %21, %126 : vector<8x128xf32>
    %128 = arith.addf %124, %127 : vector<8x128xf32>
    %c22 = arith.constant 22 : index
    %c0_48 = arith.constant 0 : index
    %129 = vector.load %arg10[%c22, %c0_48] : memref<128x256xf32, #tpu.memory_space<vmem>>, vector<1x128xf32>
    %130 = vector.broadcast %129 : vector<1x128xf32> to vector<8x128xf32>
    %131 = arith.mulf %26, %130 : vector<8x128xf32>
    %132 = arith.addf %128, %131 : vector<8x128xf32>
    %c30 = arith.constant 30 : index
    %c0_49 = arith.constant 0 : index
    %133 = vector.load %arg10[%c30, %c0_49] : memref<128x256xf32, #tpu.memory_space<vmem>>, vector<1x128xf32>
    %134 = vector.broadcast %133 : vector<1x128xf32> to vector<8x128xf32>
    %135 = arith.mulf %31, %134 : vector<8x128xf32>
    %136 = arith.addf %132, %135 : vector<8x128xf32>
    %c7 = arith.constant 7 : index
    %c0_50 = arith.constant 0 : index
    %137 = vector.load %arg10[%c7, %c0_50] : memref<128x256xf32, #tpu.memory_space<vmem>>, vector<1x128xf32>
    %138 = vector.broadcast %137 : vector<1x128xf32> to vector<8x128xf32>
    %139 = arith.mulf %16, %138 : vector<8x128xf32>
    %c15 = arith.constant 15 : index
    %c0_51 = arith.constant 0 : index
    %140 = vector.load %arg10[%c15, %c0_51] : memref<128x256xf32, #tpu.memory_space<vmem>>, vector<1x128xf32>
    %141 = vector.broadcast %140 : vector<1x128xf32> to vector<8x128xf32>
    %142 = arith.mulf %21, %141 : vector<8x128xf32>
    %143 = arith.addf %139, %142 : vector<8x128xf32>
    %c23 = arith.constant 23 : index
    %c0_52 = arith.constant 0 : index
    %144 = vector.load %arg10[%c23, %c0_52] : memref<128x256xf32, #tpu.memory_space<vmem>>, vector<1x128xf32>
    %145 = vector.broadcast %144 : vector<1x128xf32> to vector<8x128xf32>
    %146 = arith.mulf %26, %145 : vector<8x128xf32>
    %147 = arith.addf %143, %146 : vector<8x128xf32>
    %c31 = arith.constant 31 : index
    %c0_53 = arith.constant 0 : index
    %148 = vector.load %arg10[%c31, %c0_53] : memref<128x256xf32, #tpu.memory_space<vmem>>, vector<1x128xf32>
    %149 = vector.broadcast %148 : vector<1x128xf32> to vector<8x128xf32>
    %150 = arith.mulf %31, %149 : vector<8x128xf32>
    %151 = arith.addf %147, %150 : vector<8x128xf32>
    %152 = arith.maximumf %46, %61 : vector<8x128xf32>
    %153 = arith.maximumf %152, %76 : vector<8x128xf32>
    %154 = arith.maximumf %153, %91 : vector<8x128xf32>
    %155 = arith.maximumf %154, %106 : vector<8x128xf32>
    %156 = arith.maximumf %155, %121 : vector<8x128xf32>
    %157 = arith.maximumf %156, %136 : vector<8x128xf32>
    %158 = arith.maximumf %157, %151 : vector<8x128xf32>
    %159 = arith.subf %46, %158 : vector<8x128xf32>
    %160 = math.exp %159 : vector<8x128xf32>
    %161 = arith.subf %61, %158 : vector<8x128xf32>
    %162 = math.exp %161 : vector<8x128xf32>
    %163 = arith.subf %76, %158 : vector<8x128xf32>
    %164 = math.exp %163 : vector<8x128xf32>
    %165 = arith.subf %91, %158 : vector<8x128xf32>
    %166 = math.exp %165 : vector<8x128xf32>
    %167 = arith.subf %106, %158 : vector<8x128xf32>
    %168 = math.exp %167 : vector<8x128xf32>
    %169 = arith.subf %121, %158 : vector<8x128xf32>
    %170 = math.exp %169 : vector<8x128xf32>
    %171 = arith.subf %136, %158 : vector<8x128xf32>
    %172 = math.exp %171 : vector<8x128xf32>
    %173 = arith.subf %151, %158 : vector<8x128xf32>
    %174 = math.exp %173 : vector<8x128xf32>
    %175 = arith.addf %160, %162 : vector<8x128xf32>
    %176 = arith.addf %175, %164 : vector<8x128xf32>
    %177 = arith.addf %176, %166 : vector<8x128xf32>
    %178 = arith.addf %177, %168 : vector<8x128xf32>
    %179 = arith.addf %178, %170 : vector<8x128xf32>
    %180 = arith.addf %179, %172 : vector<8x128xf32>
    %181 = arith.addf %180, %174 : vector<8x128xf32>
    %182 = tpu.reciprocal %181 {approx = true} : vector<8x128xf32> -> vector<8x128xf32>
    %c0_54 = arith.constant 0 : index
    %c0_55 = arith.constant 0 : index
    %183 = vector.load %arg11[%c0_54, %c0_55] : memref<128x256xf32, #tpu.memory_space<vmem>>, vector<1x128xf32>
    %184 = vector.broadcast %183 : vector<1x128xf32> to vector<8x128xf32>
    %185 = arith.mulf %160, %184 : vector<8x128xf32>
    %c1_56 = arith.constant 1 : index
    %c0_57 = arith.constant 0 : index
    %186 = vector.load %arg11[%c1_56, %c0_57] : memref<128x256xf32, #tpu.memory_space<vmem>>, vector<1x128xf32>
    %187 = vector.broadcast %186 : vector<1x128xf32> to vector<8x128xf32>
    %188 = arith.mulf %162, %187 : vector<8x128xf32>
    %189 = arith.addf %185, %188 : vector<8x128xf32>
    %c2_58 = arith.constant 2 : index
    %c0_59 = arith.constant 0 : index
    %190 = vector.load %arg11[%c2_58, %c0_59] : memref<128x256xf32, #tpu.memory_space<vmem>>, vector<1x128xf32>
    %191 = vector.broadcast %190 : vector<1x128xf32> to vector<8x128xf32>
    %192 = arith.mulf %164, %191 : vector<8x128xf32>
    %193 = arith.addf %189, %192 : vector<8x128xf32>
    %c3_60 = arith.constant 3 : index
    %c0_61 = arith.constant 0 : index
    %194 = vector.load %arg11[%c3_60, %c0_61] : memref<128x256xf32, #tpu.memory_space<vmem>>, vector<1x128xf32>
    %195 = vector.broadcast %194 : vector<1x128xf32> to vector<8x128xf32>
    %196 = arith.mulf %166, %195 : vector<8x128xf32>
    %197 = arith.addf %193, %196 : vector<8x128xf32>
    %c4_62 = arith.constant 4 : index
    %c0_63 = arith.constant 0 : index
    %198 = vector.load %arg11[%c4_62, %c0_63] : memref<128x256xf32, #tpu.memory_space<vmem>>, vector<1x128xf32>
    %199 = vector.broadcast %198 : vector<1x128xf32> to vector<8x128xf32>
    %200 = arith.mulf %168, %199 : vector<8x128xf32>
    %201 = arith.addf %197, %200 : vector<8x128xf32>
    %c5_64 = arith.constant 5 : index
    %c0_65 = arith.constant 0 : index
    %202 = vector.load %arg11[%c5_64, %c0_65] : memref<128x256xf32, #tpu.memory_space<vmem>>, vector<1x128xf32>
    %203 = vector.broadcast %202 : vector<1x128xf32> to vector<8x128xf32>
    %204 = arith.mulf %170, %203 : vector<8x128xf32>
    %205 = arith.addf %201, %204 : vector<8x128xf32>
    %c6_66 = arith.constant 6 : index
    %c0_67 = arith.constant 0 : index
    %206 = vector.load %arg11[%c6_66, %c0_67] : memref<128x256xf32, #tpu.memory_space<vmem>>, vector<1x128xf32>
    %207 = vector.broadcast %206 : vector<1x128xf32> to vector<8x128xf32>
    %208 = arith.mulf %172, %207 : vector<8x128xf32>
    %209 = arith.addf %205, %208 : vector<8x128xf32>
    %c7_68 = arith.constant 7 : index
    %c0_69 = arith.constant 0 : index
    %210 = vector.load %arg11[%c7_68, %c0_69] : memref<128x256xf32, #tpu.memory_space<vmem>>, vector<1x128xf32>
    %211 = vector.broadcast %210 : vector<1x128xf32> to vector<8x128xf32>
    %212 = arith.mulf %174, %211 : vector<8x128xf32>
    %213 = arith.addf %209, %212 : vector<8x128xf32>
    %214 = arith.mulf %213, %182 : vector<8x128xf32>
    %c0_70 = arith.constant 0 : index
    %c0_71 = arith.constant 0 : index
    %215 = vector.load %arg12[%c0_70, %c0_71] : memref<128x256xf32, #tpu.memory_space<vmem>>, vector<8x128xf32>
    tpu.vector_store %arg12[%c0_70, %c0_71], %214 {strides = array<i32>} : memref<128x256xf32, #tpu.memory_space<vmem>>, vector<8x128xf32>,
    %c8_72 = arith.constant 8 : index
    %c0_73 = arith.constant 0 : index
    %216 = vector.load %arg11[%c8_72, %c0_73] : memref<128x256xf32, #tpu.memory_space<vmem>>, vector<1x128xf32>
    %217 = vector.broadcast %216 : vector<1x128xf32> to vector<8x128xf32>
    %218 = arith.mulf %160, %217 : vector<8x128xf32>
    %c9_74 = arith.constant 9 : index
    %c0_75 = arith.constant 0 : index
    %219 = vector.load %arg11[%c9_74, %c0_75] : memref<128x256xf32, #tpu.memory_space<vmem>>, vector<1x128xf32>
    %220 = vector.broadcast %219 : vector<1x128xf32> to vector<8x128xf32>
    %221 = arith.mulf %162, %220 : vector<8x128xf32>
    %222 = arith.addf %218, %221 : vector<8x128xf32>
    %c10_76 = arith.constant 10 : index
    %c0_77 = arith.constant 0 : index
    %223 = vector.load %arg11[%c10_76, %c0_77] : memref<128x256xf32, #tpu.memory_space<vmem>>, vector<1x128xf32>
    %224 = vector.broadcast %223 : vector<1x128xf32> to vector<8x128xf32>
    %225 = arith.mulf %164, %224 : vector<8x128xf32>
    %226 = arith.addf %222, %225 : vector<8x128xf32>
    %c11_78 = arith.constant 11 : index
    %c0_79 = arith.constant 0 : index
    %227 = vector.load %arg11[%c11_78, %c0_79] : memref<128x256xf32, #tpu.memory_space<vmem>>, vector<1x128xf32>
    %228 = vector.broadcast %227 : vector<1x128xf32> to vector<8x128xf32>
    %229 = arith.mulf %166, %228 : vector<8x128xf32>
    %230 = arith.addf %226, %229 : vector<8x128xf32>
    %c12_80 = arith.constant 12 : index
    %c0_81 = arith.constant 0 : index
    %231 = vector.load %arg11[%c12_80, %c0_81] : memref<128x256xf32, #tpu.memory_space<vmem>>, vector<1x128xf32>
    %232 = vector.broadcast %231 : vector<1x128xf32> to vector<8x128xf32>
    %233 = arith.mulf %168, %232 : vector<8x128xf32>
    %234 = arith.addf %230, %233 : vector<8x128xf32>
    %c13_82 = arith.constant 13 : index
    %c0_83 = arith.constant 0 : index
    %235 = vector.load %arg11[%c13_82, %c0_83] : memref<128x256xf32, #tpu.memory_space<vmem>>, vector<1x128xf32>
    %236 = vector.broadcast %235 : vector<1x128xf32> to vector<8x128xf32>
    %237 = arith.mulf %170, %236 : vector<8x128xf32>
    %238 = arith.addf %234, %237 : vector<8x128xf32>
    %c14_84 = arith.constant 14 : index
    %c0_85 = arith.constant 0 : index
    %239 = vector.load %arg11[%c14_84, %c0_85] : memref<128x256xf32, #tpu.memory_space<vmem>>, vector<1x128xf32>
    %240 = vector.broadcast %239 : vector<1x128xf32> to vector<8x128xf32>
    %241 = arith.mulf %172, %240 : vector<8x128xf32>
    %242 = arith.addf %238, %241 : vector<8x128xf32>
    %c15_86 = arith.constant 15 : index
    %c0_87 = arith.constant 0 : index
    %243 = vector.load %arg11[%c15_86, %c0_87] : memref<128x256xf32, #tpu.memory_space<vmem>>, vector<1x128xf32>
    %244 = vector.broadcast %243 : vector<1x128xf32> to vector<8x128xf32>
    %245 = arith.mulf %174, %244 : vector<8x128xf32>
    %246 = arith.addf %242, %245 : vector<8x128xf32>
    %247 = arith.mulf %246, %182 : vector<8x128xf32>
    %c8_88 = arith.constant 8 : index
    %c0_89 = arith.constant 0 : index
    %248 = vector.load %arg12[%c8_88, %c0_89] : memref<128x256xf32, #tpu.memory_space<vmem>>, vector<8x128xf32>
    tpu.vector_store %arg12[%c8_88, %c0_89], %247 {strides = array<i32>} : memref<128x256xf32, #tpu.memory_space<vmem>>, vector<8x128xf32>,
    %c16_90 = arith.constant 16 : index
    %c0_91 = arith.constant 0 : index
    %249 = vector.load %arg11[%c16_90, %c0_91] : memref<128x256xf32, #tpu.memory_space<vmem>>, vector<1x128xf32>
    %250 = vector.broadcast %249 : vector<1x128xf32> to vector<8x128xf32>
    %251 = arith.mulf %160, %250 : vector<8x128xf32>
    %c17_92 = arith.constant 17 : index
    %c0_93 = arith.constant 0 : index
    %252 = vector.load %arg11[%c17_92, %c0_93] : memref<128x256xf32, #tpu.memory_space<vmem>>, vector<1x128xf32>
    %253 = vector.broadcast %252 : vector<1x128xf32> to vector<8x128xf32>
    %254 = arith.mulf %162, %253 : vector<8x128xf32>
    %255 = arith.addf %251, %254 : vector<8x128xf32>
    %c18_94 = arith.constant 18 : index
    %c0_95 = arith.constant 0 : index
    %256 = vector.load %arg11[%c18_94, %c0_95] : memref<128x256xf32, #tpu.memory_space<vmem>>, vector<1x128xf32>
    %257 = vector.broadcast %256 : vector<1x128xf32> to vector<8x128xf32>
    %258 = arith.mulf %164, %257 : vector<8x128xf32>
    %259 = arith.addf %255, %258 : vector<8x128xf32>
    %c19_96 = arith.constant 19 : index
    %c0_97 = arith.constant 0 : index
    %260 = vector.load %arg11[%c19_96, %c0_97] : memref<128x256xf32, #tpu.memory_space<vmem>>, vector<1x128xf32>
    %261 = vector.broadcast %260 : vector<1x128xf32> to vector<8x128xf32>
    %262 = arith.mulf %166, %261 : vector<8x128xf32>
    %263 = arith.addf %259, %262 : vector<8x128xf32>
    %c20_98 = arith.constant 20 : index
    %c0_99 = arith.constant 0 : index
    %264 = vector.load %arg11[%c20_98, %c0_99] : memref<128x256xf32, #tpu.memory_space<vmem>>, vector<1x128xf32>
    %265 = vector.broadcast %264 : vector<1x128xf32> to vector<8x128xf32>
    %266 = arith.mulf %168, %265 : vector<8x128xf32>
    %267 = arith.addf %263, %266 : vector<8x128xf32>
    %c21_100 = arith.constant 21 : index
    %c0_101 = arith.constant 0 : index
    %268 = vector.load %arg11[%c21_100, %c0_101] : memref<128x256xf32, #tpu.memory_space<vmem>>, vector<1x128xf32>
    %269 = vector.broadcast %268 : vector<1x128xf32> to vector<8x128xf32>
    %270 = arith.mulf %170, %269 : vector<8x128xf32>
    %271 = arith.addf %267, %270 : vector<8x128xf32>
    %c22_102 = arith.constant 22 : index
    %c0_103 = arith.constant 0 : index
    %272 = vector.load %arg11[%c22_102, %c0_103] : memref<128x256xf32, #tpu.memory_space<vmem>>, vector<1x128xf32>
    %273 = vector.broadcast %272 : vector<1x128xf32> to vector<8x128xf32>
    %274 = arith.mulf %172, %273 : vector<8x128xf32>
    %275 = arith.addf %271, %274 : vector<8x128xf32>
    %c23_104 = arith.constant 23 : index
    %c0_105 = arith.constant 0 : index
    %276 = vector.load %arg11[%c23_104, %c0_105] : memref<128x256xf32, #tpu.memory_space<vmem>>, vector<1x128xf32>
    %277 = vector.broadcast %276 : vector<1x128xf32> to vector<8x128xf32>
    %278 = arith.mulf %174, %277 : vector<8x128xf32>
    %279 = arith.addf %275, %278 : vector<8x128xf32>
    %280 = arith.mulf %279, %182 : vector<8x128xf32>
    %c16_106 = arith.constant 16 : index
    %c0_107 = arith.constant 0 : index
    %281 = vector.load %arg12[%c16_106, %c0_107] : memref<128x256xf32, #tpu.memory_space<vmem>>, vector<8x128xf32>
    tpu.vector_store %arg12[%c16_106, %c0_107], %280 {strides = array<i32>} : memref<128x256xf32, #tpu.memory_space<vmem>>, vector<8x128xf32>,
    %c24_108 = arith.constant 24 : index
    %c0_109 = arith.constant 0 : index
    %282 = vector.load %arg11[%c24_108, %c0_109] : memref<128x256xf32, #tpu.memory_space<vmem>>, vector<1x128xf32>
    %283 = vector.broadcast %282 : vector<1x128xf32> to vector<8x128xf32>
    %284 = arith.mulf %160, %283 : vector<8x128xf32>
    %c25_110 = arith.constant 25 : index
    %c0_111 = arith.constant 0 : index
    %285 = vector.load %arg11[%c25_110, %c0_111] : memref<128x256xf32, #tpu.memory_space<vmem>>, vector<1x128xf32>
    %286 = vector.broadcast %285 : vector<1x128xf32> to vector<8x128xf32>
    %287 = arith.mulf %162, %286 : vector<8x128xf32>
    %288 = arith.addf %284, %287 : vector<8x128xf32>
    %c26_112 = arith.constant 26 : index
    %c0_113 = arith.constant 0 : index
    %289 = vector.load %arg11[%c26_112, %c0_113] : memref<128x256xf32, #tpu.memory_space<vmem>>, vector<1x128xf32>
    %290 = vector.broadcast %289 : vector<1x128xf32> to vector<8x128xf32>
    %291 = arith.mulf %164, %290 : vector<8x128xf32>
    %292 = arith.addf %288, %291 : vector<8x128xf32>
    %c27_114 = arith.constant 27 : index
    %c0_115 = arith.constant 0 : index
    %293 = vector.load %arg11[%c27_114, %c0_115] : memref<128x256xf32, #tpu.memory_space<vmem>>, vector<1x128xf32>
    %294 = vector.broadcast %293 : vector<1x128xf32> to vector<8x128xf32>
    %295 = arith.mulf %166, %294 : vector<8x128xf32>
    %296 = arith.addf %292, %295 : vector<8x128xf32>
    %c28_116 = arith.constant 28 : index
    %c0_117 = arith.constant 0 : index
    %297 = vector.load %arg11[%c28_116, %c0_117] : memref<128x256xf32, #tpu.memory_space<vmem>>, vector<1x128xf32>
    %298 = vector.broadcast %297 : vector<1x128xf32> to vector<8x128xf32>
    %299 = arith.mulf %168, %298 : vector<8x128xf32>
    %300 = arith.addf %296, %299 : vector<8x128xf32>
    %c29_118 = arith.constant 29 : index
    %c0_119 = arith.constant 0 : index
    %301 = vector.load %arg11[%c29_118, %c0_119] : memref<128x256xf32, #tpu.memory_space<vmem>>, vector<1x128xf32>
    %302 = vector.broadcast %301 : vector<1x128xf32> to vector<8x128xf32>
    %303 = arith.mulf %170, %302 : vector<8x128xf32>
    %304 = arith.addf %300, %303 : vector<8x128xf32>
    %c30_120 = arith.constant 30 : index
    %c0_121 = arith.constant 0 : index
    %305 = vector.load %arg11[%c30_120, %c0_121] : memref<128x256xf32, #tpu.memory_space<vmem>>, vector<1x128xf32>
    %306 = vector.broadcast %305 : vector<1x128xf32> to vector<8x128xf32>
    %307 = arith.mulf %172, %306 : vector<8x128xf32>
    %308 = arith.addf %304, %307 : vector<8x128xf32>
    %c31_122 = arith.constant 31 : index
    %c0_123 = arith.constant 0 : index
    %309 = vector.load %arg11[%c31_122, %c0_123] : memref<128x256xf32, #tpu.memory_space<vmem>>, vector<1x128xf32>
    %310 = vector.broadcast %309 : vector<1x128xf32> to vector<8x128xf32>
    %311 = arith.mulf %174, %310 : vector<8x128xf32>
    %312 = arith.addf %308, %311 : vector<8x128xf32>
    %313 = arith.mulf %312, %182 : vector<8x128xf32>
    %c24_124 = arith.constant 24 : index
    %c0_125 = arith.constant 0 : index
    %314 = vector.load %arg12[%c24_124, %c0_125] : memref<128x256xf32, #tpu.memory_space<vmem>>, vector<8x128xf32>
    tpu.vector_store %arg12[%c24_124, %c0_125], %313 {strides = array<i32>} : memref<128x256xf32, #tpu.memory_space<vmem>>, vector<8x128xf32>,
    %315 = vector.extract_strided_slice %11 {offsets = [4, 0, 0], sizes = [1, 8, 128], strides = [1, 1, 1]} : vector<16x8x128xf32> to vector<1x8x128xf32>
    %316 = vector.shape_cast %315 : vector<1x8x128xf32> to vector<8x128xf32>
    %c4_126 = arith.constant 4 : index
    %317 = memref.load %arg1[%c4_126] : memref<16xf32, #tpu.memory_space<smem>>
    %318 = vector.broadcast %317 : f32 to vector<8x128xf32>
    %319 = arith.addf %316, %318 : vector<8x128xf32>
    %320 = vector.extract_strided_slice %11 {offsets = [5, 0, 0], sizes = [1, 8, 128], strides = [1, 1, 1]} : vector<16x8x128xf32> to vector<1x8x128xf32>
    %321 = vector.shape_cast %320 : vector<1x8x128xf32> to vector<8x128xf32>
    %c5_127 = arith.constant 5 : index
    %322 = memref.load %arg1[%c5_127] : memref<16xf32, #tpu.memory_space<smem>>
    %323 = vector.broadcast %322 : f32 to vector<8x128xf32>
    %324 = arith.addf %321, %323 : vector<8x128xf32>
    %325 = vector.extract_strided_slice %11 {offsets = [6, 0, 0], sizes = [1, 8, 128], strides = [1, 1, 1]} : vector<16x8x128xf32> to vector<1x8x128xf32>
    %326 = vector.shape_cast %325 : vector<1x8x128xf32> to vector<8x128xf32>
    %c6_128 = arith.constant 6 : index
    %327 = memref.load %arg1[%c6_128] : memref<16xf32, #tpu.memory_space<smem>>
    %328 = vector.broadcast %327 : f32 to vector<8x128xf32>
    %329 = arith.addf %326, %328 : vector<8x128xf32>
    %330 = vector.extract_strided_slice %11 {offsets = [7, 0, 0], sizes = [1, 8, 128], strides = [1, 1, 1]} : vector<16x8x128xf32> to vector<1x8x128xf32>
    %331 = vector.shape_cast %330 : vector<1x8x128xf32> to vector<8x128xf32>
    %c7_129 = arith.constant 7 : index
    %332 = memref.load %arg1[%c7_129] : memref<16xf32, #tpu.memory_space<smem>>
    %333 = vector.broadcast %332 : f32 to vector<8x128xf32>
    %334 = arith.addf %331, %333 : vector<8x128xf32>
    %c32 = arith.constant 32 : index
    %c0_130 = arith.constant 0 : index
    %335 = vector.load %arg10[%c32, %c0_130] : memref<128x256xf32, #tpu.memory_space<vmem>>, vector<1x128xf32>
    %336 = vector.broadcast %335 : vector<1x128xf32> to vector<8x128xf32>
    %337 = arith.mulf %319, %336 : vector<8x128xf32>
    %c40 = arith.constant 40 : index
    %c0_131 = arith.constant 0 : index
    %338 = vector.load %arg10[%c40, %c0_131] : memref<128x256xf32, #tpu.memory_space<vmem>>, vector<1x128xf32>
    %339 = vector.broadcast %338 : vector<1x128xf32> to vector<8x128xf32>
    %340 = arith.mulf %324, %339 : vector<8x128xf32>
    %341 = arith.addf %337, %340 : vector<8x128xf32>
    %c48 = arith.constant 48 : index
    %c0_132 = arith.constant 0 : index
    %342 = vector.load %arg10[%c48, %c0_132] : memref<128x256xf32, #tpu.memory_space<vmem>>, vector<1x128xf32>
    %343 = vector.broadcast %342 : vector<1x128xf32> to vector<8x128xf32>
    %344 = arith.mulf %329, %343 : vector<8x128xf32>
    %345 = arith.addf %341, %344 : vector<8x128xf32>
    %c56 = arith.constant 56 : index
    %c0_133 = arith.constant 0 : index
    %346 = vector.load %arg10[%c56, %c0_133] : memref<128x256xf32, #tpu.memory_space<vmem>>, vector<1x128xf32>
    %347 = vector.broadcast %346 : vector<1x128xf32> to vector<8x128xf32>
    %348 = arith.mulf %334, %347 : vector<8x128xf32>
    %349 = arith.addf %345, %348 : vector<8x128xf32>
    %c33 = arith.constant 33 : index
    %c0_134 = arith.constant 0 : index
    %350 = vector.load %arg10[%c33, %c0_134] : memref<128x256xf32, #tpu.memory_space<vmem>>, vector<1x128xf32>
    %351 = vector.broadcast %350 : vector<1x128xf32> to vector<8x128xf32>
    %352 = arith.mulf %319, %351 : vector<8x128xf32>
    %c41 = arith.constant 41 : index
    %c0_135 = arith.constant 0 : index
    %353 = vector.load %arg10[%c41, %c0_135] : memref<128x256xf32, #tpu.memory_space<vmem>>, vector<1x128xf32>
    %354 = vector.broadcast %353 : vector<1x128xf32> to vector<8x128xf32>
    %355 = arith.mulf %324, %354 : vector<8x128xf32>
    %356 = arith.addf %352, %355 : vector<8x128xf32>
    %c49 = arith.constant 49 : index
    %c0_136 = arith.constant 0 : index
    %357 = vector.load %arg10[%c49, %c0_136] : memref<128x256xf32, #tpu.memory_space<vmem>>, vector<1x128xf32>
    %358 = vector.broadcast %357 : vector<1x128xf32> to vector<8x128xf32>
    %359 = arith.mulf %329, %358 : vector<8x128xf32>
    %360 = arith.addf %356, %359 : vector<8x128xf32>
    %c57 = arith.constant 57 : index
    %c0_137 = arith.constant 0 : index
    %361 = vector.load %arg10[%c57, %c0_137] : memref<128x256xf32, #tpu.memory_space<vmem>>, vector<1x128xf32>
    %362 = vector.broadcast %361 : vector<1x128xf32> to vector<8x128xf32>
    %363 = arith.mulf %334, %362 : vector<8x128xf32>
    %364 = arith.addf %360, %363 : vector<8x128xf32>
    %c34 = arith.constant 34 : index
    %c0_138 = arith.constant 0 : index
    %365 = vector.load %arg10[%c34, %c0_138] : memref<128x256xf32, #tpu.memory_space<vmem>>, vector<1x128xf32>
    %366 = vector.broadcast %365 : vector<1x128xf32> to vector<8x128xf32>
    %367 = arith.mulf %319, %366 : vector<8x128xf32>
    %c42 = arith.constant 42 : index
    %c0_139 = arith.constant 0 : index
    %368 = vector.load %arg10[%c42, %c0_139] : memref<128x256xf32, #tpu.memory_space<vmem>>, vector<1x128xf32>
    %369 = vector.broadcast %368 : vector<1x128xf32> to vector<8x128xf32>
    %370 = arith.mulf %324, %369 : vector<8x128xf32>
    %371 = arith.addf %367, %370 : vector<8x128xf32>
    %c50 = arith.constant 50 : index
    %c0_140 = arith.constant 0 : index
    %372 = vector.load %arg10[%c50, %c0_140] : memref<128x256xf32, #tpu.memory_space<vmem>>, vector<1x128xf32>
    %373 = vector.broadcast %372 : vector<1x128xf32> to vector<8x128xf32>
    %374 = arith.mulf %329, %373 : vector<8x128xf32>
    %375 = arith.addf %371, %374 : vector<8x128xf32>
    %c58 = arith.constant 58 : index
    %c0_141 = arith.constant 0 : index
    %376 = vector.load %arg10[%c58, %c0_141] : memref<128x256xf32, #tpu.memory_space<vmem>>, vector<1x128xf32>
    %377 = vector.broadcast %376 : vector<1x128xf32> to vector<8x128xf32>
    %378 = arith.mulf %334, %377 : vector<8x128xf32>
    %379 = arith.addf %375, %378 : vector<8x128xf32>
    %c35 = arith.constant 35 : index
    %c0_142 = arith.constant 0 : index
    %380 = vector.load %arg10[%c35, %c0_142] : memref<128x256xf32, #tpu.memory_space<vmem>>, vector<1x128xf32>
    %381 = vector.broadcast %380 : vector<1x128xf32> to vector<8x128xf32>
    %382 = arith.mulf %319, %381 : vector<8x128xf32>
    %c43 = arith.constant 43 : index
    %c0_143 = arith.constant 0 : index
    %383 = vector.load %arg10[%c43, %c0_143] : memref<128x256xf32, #tpu.memory_space<vmem>>, vector<1x128xf32>
    %384 = vector.broadcast %383 : vector<1x128xf32> to vector<8x128xf32>
    %385 = arith.mulf %324, %384 : vector<8x128xf32>
    %386 = arith.addf %382, %385 : vector<8x128xf32>
    %c51 = arith.constant 51 : index
    %c0_144 = arith.constant 0 : index
    %387 = vector.load %arg10[%c51, %c0_144] : memref<128x256xf32, #tpu.memory_space<vmem>>, vector<1x128xf32>
    %388 = vector.broadcast %387 : vector<1x128xf32> to vector<8x128xf32>
    %389 = arith.mulf %329, %388 : vector<8x128xf32>
    %390 = arith.addf %386, %389 : vector<8x128xf32>
    %c59 = arith.constant 59 : index
    %c0_145 = arith.constant 0 : index
    %391 = vector.load %arg10[%c59, %c0_145] : memref<128x256xf32, #tpu.memory_space<vmem>>, vector<1x128xf32>
    %392 = vector.broadcast %391 : vector<1x128xf32> to vector<8x128xf32>
    %393 = arith.mulf %334, %392 : vector<8x128xf32>
    %394 = arith.addf %390, %393 : vector<8x128xf32>
    %c36 = arith.constant 36 : index
    %c0_146 = arith.constant 0 : index
    %395 = vector.load %arg10[%c36, %c0_146] : memref<128x256xf32, #tpu.memory_space<vmem>>, vector<1x128xf32>
    %396 = vector.broadcast %395 : vector<1x128xf32> to vector<8x128xf32>
    %397 = arith.mulf %319, %396 : vector<8x128xf32>
    %c44 = arith.constant 44 : index
    %c0_147 = arith.constant 0 : index
    %398 = vector.load %arg10[%c44, %c0_147] : memref<128x256xf32, #tpu.memory_space<vmem>>, vector<1x128xf32>
    %399 = vector.broadcast %398 : vector<1x128xf32> to vector<8x128xf32>
    %400 = arith.mulf %324, %399 : vector<8x128xf32>
    %401 = arith.addf %397, %400 : vector<8x128xf32>
    %c52 = arith.constant 52 : index
    %c0_148 = arith.constant 0 : index
    %402 = vector.load %arg10[%c52, %c0_148] : memref<128x256xf32, #tpu.memory_space<vmem>>, vector<1x128xf32>
    %403 = vector.broadcast %402 : vector<1x128xf32> to vector<8x128xf32>
    %404 = arith.mulf %329, %403 : vector<8x128xf32>
    %405 = arith.addf %401, %404 : vector<8x128xf32>
    %c60 = arith.constant 60 : index
    %c0_149 = arith.constant 0 : index
    %406 = vector.load %arg10[%c60, %c0_149] : memref<128x256xf32, #tpu.memory_space<vmem>>, vector<1x128xf32>
    %407 = vector.broadcast %406 : vector<1x128xf32> to vector<8x128xf32>
    %408 = arith.mulf %334, %407 : vector<8x128xf32>
    %409 = arith.addf %405, %408 : vector<8x128xf32>
    %c37 = arith.constant 37 : index
    %c0_150 = arith.constant 0 : index
    %410 = vector.load %arg10[%c37, %c0_150] : memref<128x256xf32, #tpu.memory_space<vmem>>, vector<1x128xf32>
    %411 = vector.broadcast %410 : vector<1x128xf32> to vector<8x128xf32>
    %412 = arith.mulf %319, %411 : vector<8x128xf32>
    %c45 = arith.constant 45 : index
    %c0_151 = arith.constant 0 : index
    %413 = vector.load %arg10[%c45, %c0_151] : memref<128x256xf32, #tpu.memory_space<vmem>>, vector<1x128xf32>
    %414 = vector.broadcast %413 : vector<1x128xf32> to vector<8x128xf32>
    %415 = arith.mulf %324, %414 : vector<8x128xf32>
    %416 = arith.addf %412, %415 : vector<8x128xf32>
    %c53 = arith.constant 53 : index
    %c0_152 = arith.constant 0 : index
    %417 = vector.load %arg10[%c53, %c0_152] : memref<128x256xf32, #tpu.memory_space<vmem>>, vector<1x128xf32>
    %418 = vector.broadcast %417 : vector<1x128xf32> to vector<8x128xf32>
    %419 = arith.mulf %329, %418 : vector<8x128xf32>
    %420 = arith.addf %416, %419 : vector<8x128xf32>
    %c61 = arith.constant 61 : index
    %c0_153 = arith.constant 0 : index
    %421 = vector.load %arg10[%c61, %c0_153] : memref<128x256xf32, #tpu.memory_space<vmem>>, vector<1x128xf32>
    %422 = vector.broadcast %421 : vector<1x128xf32> to vector<8x128xf32>
    %423 = arith.mulf %334, %422 : vector<8x128xf32>
    %424 = arith.addf %420, %423 : vector<8x128xf32>
    %c38 = arith.constant 38 : index
    %c0_154 = arith.constant 0 : index
    %425 = vector.load %arg10[%c38, %c0_154] : memref<128x256xf32, #tpu.memory_space<vmem>>, vector<1x128xf32>
    %426 = vector.broadcast %425 : vector<1x128xf32> to vector<8x128xf32>
    %427 = arith.mulf %319, %426 : vector<8x128xf32>
    %c46 = arith.constant 46 : index
    %c0_155 = arith.constant 0 : index
    %428 = vector.load %arg10[%c46, %c0_155] : memref<128x256xf32, #tpu.memory_space<vmem>>, vector<1x128xf32>
    %429 = vector.broadcast %428 : vector<1x128xf32> to vector<8x128xf32>
    %430 = arith.mulf %324, %429 : vector<8x128xf32>
    %431 = arith.addf %427, %430 : vector<8x128xf32>
    %c54 = arith.constant 54 : index
    %c0_156 = arith.constant 0 : index
    %432 = vector.load %arg10[%c54, %c0_156] : memref<128x256xf32, #tpu.memory_space<vmem>>, vector<1x128xf32>
    %433 = vector.broadcast %432 : vector<1x128xf32> to vector<8x128xf32>
    %434 = arith.mulf %329, %433 : vector<8x128xf32>
    %435 = arith.addf %431, %434 : vector<8x128xf32>
    %c62 = arith.constant 62 : index
    %c0_157 = arith.constant 0 : index
    %436 = vector.load %arg10[%c62, %c0_157] : memref<128x256xf32, #tpu.memory_space<vmem>>, vector<1x128xf32>
    %437 = vector.broadcast %436 : vector<1x128xf32> to vector<8x128xf32>
    %438 = arith.mulf %334, %437 : vector<8x128xf32>
    %439 = arith.addf %435, %438 : vector<8x128xf32>
    %c39 = arith.constant 39 : index
    %c0_158 = arith.constant 0 : index
    %440 = vector.load %arg10[%c39, %c0_158] : memref<128x256xf32, #tpu.memory_space<vmem>>, vector<1x128xf32>
    %441 = vector.broadcast %440 : vector<1x128xf32> to vector<8x128xf32>
    %442 = arith.mulf %319, %441 : vector<8x128xf32>
    %c47 = arith.constant 47 : index
    %c0_159 = arith.constant 0 : index
    %443 = vector.load %arg10[%c47, %c0_159] : memref<128x256xf32, #tpu.memory_space<vmem>>, vector<1x128xf32>
    %444 = vector.broadcast %443 : vector<1x128xf32> to vector<8x128xf32>
    %445 = arith.mulf %324, %444 : vector<8x128xf32>
    %446 = arith.addf %442, %445 : vector<8x128xf32>
    %c55 = arith.constant 55 : index
    %c0_160 = arith.constant 0 : index
    %447 = vector.load %arg10[%c55, %c0_160] : memref<128x256xf32, #tpu.memory_space<vmem>>, vector<1x128xf32>
    %448 = vector.broadcast %447 : vector<1x128xf32> to vector<8x128xf32>
    %449 = arith.mulf %329, %448 : vector<8x128xf32>
    %450 = arith.addf %446, %449 : vector<8x128xf32>
    %c63 = arith.constant 63 : index
    %c0_161 = arith.constant 0 : index
    %451 = vector.load %arg10[%c63, %c0_161] : memref<128x256xf32, #tpu.memory_space<vmem>>, vector<1x128xf32>
    %452 = vector.broadcast %451 : vector<1x128xf32> to vector<8x128xf32>
    %453 = arith.mulf %334, %452 : vector<8x128xf32>
    %454 = arith.addf %450, %453 : vector<8x128xf32>
    %455 = arith.maximumf %349, %364 : vector<8x128xf32>
    %456 = arith.maximumf %455, %379 : vector<8x128xf32>
    %457 = arith.maximumf %456, %394 : vector<8x128xf32>
    %458 = arith.maximumf %457, %409 : vector<8x128xf32>
    %459 = arith.maximumf %458, %424 : vector<8x128xf32>
    %460 = arith.maximumf %459, %439 : vector<8x128xf32>
    %461 = arith.maximumf %460, %454 : vector<8x128xf32>
    %462 = arith.subf %349, %461 : vector<8x128xf32>
    %463 = math.exp %462 : vector<8x128xf32>
    %464 = arith.subf %364, %461 : vector<8x128xf32>
    %465 = math.exp %464 : vector<8x128xf32>
    %466 = arith.subf %379, %461 : vector<8x128xf32>
    %467 = math.exp %466 : vector<8x128xf32>
    %468 = arith.subf %394, %461 : vector<8x128xf32>
    %469 = math.exp %468 : vector<8x128xf32>
    %470 = arith.subf %409, %461 : vector<8x128xf32>
    %471 = math.exp %470 : vector<8x128xf32>
    %472 = arith.subf %424, %461 : vector<8x128xf32>
    %473 = math.exp %472 : vector<8x128xf32>
    %474 = arith.subf %439, %461 : vector<8x128xf32>
    %475 = math.exp %474 : vector<8x128xf32>
    %476 = arith.subf %454, %461 : vector<8x128xf32>
    %477 = math.exp %476 : vector<8x128xf32>
    %478 = arith.addf %463, %465 : vector<8x128xf32>
    %479 = arith.addf %478, %467 : vector<8x128xf32>
    %480 = arith.addf %479, %469 : vector<8x128xf32>
    %481 = arith.addf %480, %471 : vector<8x128xf32>
    %482 = arith.addf %481, %473 : vector<8x128xf32>
    %483 = arith.addf %482, %475 : vector<8x128xf32>
    %484 = arith.addf %483, %477 : vector<8x128xf32>
    %485 = tpu.reciprocal %484 {approx = true} : vector<8x128xf32> -> vector<8x128xf32>
    %c32_162 = arith.constant 32 : index
    %c0_163 = arith.constant 0 : index
    %486 = vector.load %arg11[%c32_162, %c0_163] : memref<128x256xf32, #tpu.memory_space<vmem>>, vector<1x128xf32>
    %487 = vector.broadcast %486 : vector<1x128xf32> to vector<8x128xf32>
    %488 = arith.mulf %463, %487 : vector<8x128xf32>
    %c33_164 = arith.constant 33 : index
    %c0_165 = arith.constant 0 : index
    %489 = vector.load %arg11[%c33_164, %c0_165] : memref<128x256xf32, #tpu.memory_space<vmem>>, vector<1x128xf32>
    %490 = vector.broadcast %489 : vector<1x128xf32> to vector<8x128xf32>
    %491 = arith.mulf %465, %490 : vector<8x128xf32>
    %492 = arith.addf %488, %491 : vector<8x128xf32>
    %c34_166 = arith.constant 34 : index
    %c0_167 = arith.constant 0 : index
    %493 = vector.load %arg11[%c34_166, %c0_167] : memref<128x256xf32, #tpu.memory_space<vmem>>, vector<1x128xf32>
    %494 = vector.broadcast %493 : vector<1x128xf32> to vector<8x128xf32>
    %495 = arith.mulf %467, %494 : vector<8x128xf32>
    %496 = arith.addf %492, %495 : vector<8x128xf32>
    %c35_168 = arith.constant 35 : index
    %c0_169 = arith.constant 0 : index
    %497 = vector.load %arg11[%c35_168, %c0_169] : memref<128x256xf32, #tpu.memory_space<vmem>>, vector<1x128xf32>
    %498 = vector.broadcast %497 : vector<1x128xf32> to vector<8x128xf32>
    %499 = arith.mulf %469, %498 : vector<8x128xf32>
    %500 = arith.addf %496, %499 : vector<8x128xf32>
    %c36_170 = arith.constant 36 : index
    %c0_171 = arith.constant 0 : index
    %501 = vector.load %arg11[%c36_170, %c0_171] : memref<128x256xf32, #tpu.memory_space<vmem>>, vector<1x128xf32>
    %502 = vector.broadcast %501 : vector<1x128xf32> to vector<8x128xf32>
    %503 = arith.mulf %471, %502 : vector<8x128xf32>
    %504 = arith.addf %500, %503 : vector<8x128xf32>
    %c37_172 = arith.constant 37 : index
    %c0_173 = arith.constant 0 : index
    %505 = vector.load %arg11[%c37_172, %c0_173] : memref<128x256xf32, #tpu.memory_space<vmem>>, vector<1x128xf32>
    %506 = vector.broadcast %505 : vector<1x128xf32> to vector<8x128xf32>
    %507 = arith.mulf %473, %506 : vector<8x128xf32>
    %508 = arith.addf %504, %507 : vector<8x128xf32>
    %c38_174 = arith.constant 38 : index
    %c0_175 = arith.constant 0 : index
    %509 = vector.load %arg11[%c38_174, %c0_175] : memref<128x256xf32, #tpu.memory_space<vmem>>, vector<1x128xf32>
    %510 = vector.broadcast %509 : vector<1x128xf32> to vector<8x128xf32>
    %511 = arith.mulf %475, %510 : vector<8x128xf32>
    %512 = arith.addf %508, %511 : vector<8x128xf32>
    %c39_176 = arith.constant 39 : index
    %c0_177 = arith.constant 0 : index
    %513 = vector.load %arg11[%c39_176, %c0_177] : memref<128x256xf32, #tpu.memory_space<vmem>>, vector<1x128xf32>
    %514 = vector.broadcast %513 : vector<1x128xf32> to vector<8x128xf32>
    %515 = arith.mulf %477, %514 : vector<8x128xf32>
    %516 = arith.addf %512, %515 : vector<8x128xf32>
    %517 = arith.mulf %516, %485 : vector<8x128xf32>
    %c32_178 = arith.constant 32 : index
    %c0_179 = arith.constant 0 : index
    %518 = vector.load %arg12[%c32_178, %c0_179] : memref<128x256xf32, #tpu.memory_space<vmem>>, vector<8x128xf32>
    tpu.vector_store %arg12[%c32_178, %c0_179], %517 {strides = array<i32>} : memref<128x256xf32, #tpu.memory_space<vmem>>, vector<8x128xf32>,
    %c40_180 = arith.constant 40 : index
    %c0_181 = arith.constant 0 : index
    %519 = vector.load %arg11[%c40_180, %c0_181] : memref<128x256xf32, #tpu.memory_space<vmem>>, vector<1x128xf32>
    %520 = vector.broadcast %519 : vector<1x128xf32> to vector<8x128xf32>
    %521 = arith.mulf %463, %520 : vector<8x128xf32>
    %c41_182 = arith.constant 41 : index
    %c0_183 = arith.constant 0 : index
    %522 = vector.load %arg11[%c41_182, %c0_183] : memref<128x256xf32, #tpu.memory_space<vmem>>, vector<1x128xf32>
    %523 = vector.broadcast %522 : vector<1x128xf32> to vector<8x128xf32>
    %524 = arith.mulf %465, %523 : vector<8x128xf32>
    %525 = arith.addf %521, %524 : vector<8x128xf32>
    %c42_184 = arith.constant 42 : index
    %c0_185 = arith.constant 0 : index
    %526 = vector.load %arg11[%c42_184, %c0_185] : memref<128x256xf32, #tpu.memory_space<vmem>>, vector<1x128xf32>
    %527 = vector.broadcast %526 : vector<1x128xf32> to vector<8x128xf32>
    %528 = arith.mulf %467, %527 : vector<8x128xf32>
    %529 = arith.addf %525, %528 : vector<8x128xf32>
    %c43_186 = arith.constant 43 : index
    %c0_187 = arith.constant 0 : index
    %530 = vector.load %arg11[%c43_186, %c0_187] : memref<128x256xf32, #tpu.memory_space<vmem>>, vector<1x128xf32>
    %531 = vector.broadcast %530 : vector<1x128xf32> to vector<8x128xf32>
    %532 = arith.mulf %469, %531 : vector<8x128xf32>
    %533 = arith.addf %529, %532 : vector<8x128xf32>
    %c44_188 = arith.constant 44 : index
    %c0_189 = arith.constant 0 : index
    %534 = vector.load %arg11[%c44_188, %c0_189] : memref<128x256xf32, #tpu.memory_space<vmem>>, vector<1x128xf32>
    %535 = vector.broadcast %534 : vector<1x128xf32> to vector<8x128xf32>
    %536 = arith.mulf %471, %535 : vector<8x128xf32>
    %537 = arith.addf %533, %536 : vector<8x128xf32>
    %c45_190 = arith.constant 45 : index
    %c0_191 = arith.constant 0 : index
    %538 = vector.load %arg11[%c45_190, %c0_191] : memref<128x256xf32, #tpu.memory_space<vmem>>, vector<1x128xf32>
    %539 = vector.broadcast %538 : vector<1x128xf32> to vector<8x128xf32>
    %540 = arith.mulf %473, %539 : vector<8x128xf32>
    %541 = arith.addf %537, %540 : vector<8x128xf32>
    %c46_192 = arith.constant 46 : index
    %c0_193 = arith.constant 0 : index
    %542 = vector.load %arg11[%c46_192, %c0_193] : memref<128x256xf32, #tpu.memory_space<vmem>>, vector<1x128xf32>
    %543 = vector.broadcast %542 : vector<1x128xf32> to vector<8x128xf32>
    %544 = arith.mulf %475, %543 : vector<8x128xf32>
    %545 = arith.addf %541, %544 : vector<8x128xf32>
    %c47_194 = arith.constant 47 : index
    %c0_195 = arith.constant 0 : index
    %546 = vector.load %arg11[%c47_194, %c0_195] : memref<128x256xf32, #tpu.memory_space<vmem>>, vector<1x128xf32>
    %547 = vector.broadcast %546 : vector<1x128xf32> to vector<8x128xf32>
    %548 = arith.mulf %477, %547 : vector<8x128xf32>
    %549 = arith.addf %545, %548 : vector<8x128xf32>
    %550 = arith.mulf %549, %485 : vector<8x128xf32>
    %c40_196 = arith.constant 40 : index
    %c0_197 = arith.constant 0 : index
    %551 = vector.load %arg12[%c40_196, %c0_197] : memref<128x256xf32, #tpu.memory_space<vmem>>, vector<8x128xf32>
    tpu.vector_store %arg12[%c40_196, %c0_197], %550 {strides = array<i32>} : memref<128x256xf32, #tpu.memory_space<vmem>>, vector<8x128xf32>,
    %c48_198 = arith.constant 48 : index
    %c0_199 = arith.constant 0 : index
    %552 = vector.load %arg11[%c48_198, %c0_199] : memref<128x256xf32, #tpu.memory_space<vmem>>, vector<1x128xf32>
    %553 = vector.broadcast %552 : vector<1x128xf32> to vector<8x128xf32>
    %554 = arith.mulf %463, %553 : vector<8x128xf32>
    %c49_200 = arith.constant 49 : index
    %c0_201 = arith.constant 0 : index
    %555 = vector.load %arg11[%c49_200, %c0_201] : memref<128x256xf32, #tpu.memory_space<vmem>>, vector<1x128xf32>
    %556 = vector.broadcast %555 : vector<1x128xf32> to vector<8x128xf32>
    %557 = arith.mulf %465, %556 : vector<8x128xf32>
    %558 = arith.addf %554, %557 : vector<8x128xf32>
    %c50_202 = arith.constant 50 : index
    %c0_203 = arith.constant 0 : index
    %559 = vector.load %arg11[%c50_202, %c0_203] : memref<128x256xf32, #tpu.memory_space<vmem>>, vector<1x128xf32>
    %560 = vector.broadcast %559 : vector<1x128xf32> to vector<8x128xf32>
    %561 = arith.mulf %467, %560 : vector<8x128xf32>
    %562 = arith.addf %558, %561 : vector<8x128xf32>
    %c51_204 = arith.constant 51 : index
    %c0_205 = arith.constant 0 : index
    %563 = vector.load %arg11[%c51_204, %c0_205] : memref<128x256xf32, #tpu.memory_space<vmem>>, vector<1x128xf32>
    %564 = vector.broadcast %563 : vector<1x128xf32> to vector<8x128xf32>
    %565 = arith.mulf %469, %564 : vector<8x128xf32>
    %566 = arith.addf %562, %565 : vector<8x128xf32>
    %c52_206 = arith.constant 52 : index
    %c0_207 = arith.constant 0 : index
    %567 = vector.load %arg11[%c52_206, %c0_207] : memref<128x256xf32, #tpu.memory_space<vmem>>, vector<1x128xf32>
    %568 = vector.broadcast %567 : vector<1x128xf32> to vector<8x128xf32>
    %569 = arith.mulf %471, %568 : vector<8x128xf32>
    %570 = arith.addf %566, %569 : vector<8x128xf32>
    %c53_208 = arith.constant 53 : index
    %c0_209 = arith.constant 0 : index
    %571 = vector.load %arg11[%c53_208, %c0_209] : memref<128x256xf32, #tpu.memory_space<vmem>>, vector<1x128xf32>
    %572 = vector.broadcast %571 : vector<1x128xf32> to vector<8x128xf32>
    %573 = arith.mulf %473, %572 : vector<8x128xf32>
    %574 = arith.addf %570, %573 : vector<8x128xf32>
    %c54_210 = arith.constant 54 : index
    %c0_211 = arith.constant 0 : index
    %575 = vector.load %arg11[%c54_210, %c0_211] : memref<128x256xf32, #tpu.memory_space<vmem>>, vector<1x128xf32>
    %576 = vector.broadcast %575 : vector<1x128xf32> to vector<8x128xf32>
    %577 = arith.mulf %475, %576 : vector<8x128xf32>
    %578 = arith.addf %574, %577 : vector<8x128xf32>
    %c55_212 = arith.constant 55 : index
    %c0_213 = arith.constant 0 : index
    %579 = vector.load %arg11[%c55_212, %c0_213] : memref<128x256xf32, #tpu.memory_space<vmem>>, vector<1x128xf32>
    %580 = vector.broadcast %579 : vector<1x128xf32> to vector<8x128xf32>
    %581 = arith.mulf %477, %580 : vector<8x128xf32>
    %582 = arith.addf %578, %581 : vector<8x128xf32>
    %583 = arith.mulf %582, %485 : vector<8x128xf32>
    %c48_214 = arith.constant 48 : index
    %c0_215 = arith.constant 0 : index
    %584 = vector.load %arg12[%c48_214, %c0_215] : memref<128x256xf32, #tpu.memory_space<vmem>>, vector<8x128xf32>
    tpu.vector_store %arg12[%c48_214, %c0_215], %583 {strides = array<i32>} : memref<128x256xf32, #tpu.memory_space<vmem>>, vector<8x128xf32>,
    %c56_216 = arith.constant 56 : index
    %c0_217 = arith.constant 0 : index
    %585 = vector.load %arg11[%c56_216, %c0_217] : memref<128x256xf32, #tpu.memory_space<vmem>>, vector<1x128xf32>
    %586 = vector.broadcast %585 : vector<1x128xf32> to vector<8x128xf32>
    %587 = arith.mulf %463, %586 : vector<8x128xf32>
    %c57_218 = arith.constant 57 : index
    %c0_219 = arith.constant 0 : index
    %588 = vector.load %arg11[%c57_218, %c0_219] : memref<128x256xf32, #tpu.memory_space<vmem>>, vector<1x128xf32>
    %589 = vector.broadcast %588 : vector<1x128xf32> to vector<8x128xf32>
    %590 = arith.mulf %465, %589 : vector<8x128xf32>
    %591 = arith.addf %587, %590 : vector<8x128xf32>
    %c58_220 = arith.constant 58 : index
    %c0_221 = arith.constant 0 : index
    %592 = vector.load %arg11[%c58_220, %c0_221] : memref<128x256xf32, #tpu.memory_space<vmem>>, vector<1x128xf32>
    %593 = vector.broadcast %592 : vector<1x128xf32> to vector<8x128xf32>
    %594 = arith.mulf %467, %593 : vector<8x128xf32>
    %595 = arith.addf %591, %594 : vector<8x128xf32>
    %c59_222 = arith.constant 59 : index
    %c0_223 = arith.constant 0 : index
    %596 = vector.load %arg11[%c59_222, %c0_223] : memref<128x256xf32, #tpu.memory_space<vmem>>, vector<1x128xf32>
    %597 = vector.broadcast %596 : vector<1x128xf32> to vector<8x128xf32>
    %598 = arith.mulf %469, %597 : vector<8x128xf32>
    %599 = arith.addf %595, %598 : vector<8x128xf32>
    %c60_224 = arith.constant 60 : index
    %c0_225 = arith.constant 0 : index
    %600 = vector.load %arg11[%c60_224, %c0_225] : memref<128x256xf32, #tpu.memory_space<vmem>>, vector<1x128xf32>
    %601 = vector.broadcast %600 : vector<1x128xf32> to vector<8x128xf32>
    %602 = arith.mulf %471, %601 : vector<8x128xf32>
    %603 = arith.addf %599, %602 : vector<8x128xf32>
    %c61_226 = arith.constant 61 : index
    %c0_227 = arith.constant 0 : index
    %604 = vector.load %arg11[%c61_226, %c0_227] : memref<128x256xf32, #tpu.memory_space<vmem>>, vector<1x128xf32>
    %605 = vector.broadcast %604 : vector<1x128xf32> to vector<8x128xf32>
    %606 = arith.mulf %473, %605 : vector<8x128xf32>
    %607 = arith.addf %603, %606 : vector<8x128xf32>
    %c62_228 = arith.constant 62 : index
    %c0_229 = arith.constant 0 : index
    %608 = vector.load %arg11[%c62_228, %c0_229] : memref<128x256xf32, #tpu.memory_space<vmem>>, vector<1x128xf32>
    %609 = vector.broadcast %608 : vector<1x128xf32> to vector<8x128xf32>
    %610 = arith.mulf %475, %609 : vector<8x128xf32>
    %611 = arith.addf %607, %610 : vector<8x128xf32>
    %c63_230 = arith.constant 63 : index
    %c0_231 = arith.constant 0 : index
    %612 = vector.load %arg11[%c63_230, %c0_231] : memref<128x256xf32, #tpu.memory_space<vmem>>, vector<1x128xf32>
    %613 = vector.broadcast %612 : vector<1x128xf32> to vector<8x128xf32>
    %614 = arith.mulf %477, %613 : vector<8x128xf32>
    %615 = arith.addf %611, %614 : vector<8x128xf32>
    %616 = arith.mulf %615, %485 : vector<8x128xf32>
    %c56_232 = arith.constant 56 : index
    %c0_233 = arith.constant 0 : index
    %617 = vector.load %arg12[%c56_232, %c0_233] : memref<128x256xf32, #tpu.memory_space<vmem>>, vector<8x128xf32>
    tpu.vector_store %arg12[%c56_232, %c0_233], %616 {strides = array<i32>} : memref<128x256xf32, #tpu.memory_space<vmem>>, vector<8x128xf32>,
    %618 = vector.extract_strided_slice %11 {offsets = [8, 0, 0], sizes = [1, 8, 128], strides = [1, 1, 1]} : vector<16x8x128xf32> to vector<1x8x128xf32>
    %619 = vector.shape_cast %618 : vector<1x8x128xf32> to vector<8x128xf32>
    %c8_234 = arith.constant 8 : index
    %620 = memref.load %arg1[%c8_234] : memref<16xf32, #tpu.memory_space<smem>>
    %621 = vector.broadcast %620 : f32 to vector<8x128xf32>
    %622 = arith.addf %619, %621 : vector<8x128xf32>
    %623 = vector.extract_strided_slice %11 {offsets = [9, 0, 0], sizes = [1, 8, 128], strides = [1, 1, 1]} : vector<16x8x128xf32> to vector<1x8x128xf32>
    %624 = vector.shape_cast %623 : vector<1x8x128xf32> to vector<8x128xf32>
    %c9_235 = arith.constant 9 : index
    %625 = memref.load %arg1[%c9_235] : memref<16xf32, #tpu.memory_space<smem>>
    %626 = vector.broadcast %625 : f32 to vector<8x128xf32>
    %627 = arith.addf %624, %626 : vector<8x128xf32>
    %628 = vector.extract_strided_slice %11 {offsets = [10, 0, 0], sizes = [1, 8, 128], strides = [1, 1, 1]} : vector<16x8x128xf32> to vector<1x8x128xf32>
    %629 = vector.shape_cast %628 : vector<1x8x128xf32> to vector<8x128xf32>
    %c10_236 = arith.constant 10 : index
    %630 = memref.load %arg1[%c10_236] : memref<16xf32, #tpu.memory_space<smem>>
    %631 = vector.broadcast %630 : f32 to vector<8x128xf32>
    %632 = arith.addf %629, %631 : vector<8x128xf32>
    %633 = vector.extract_strided_slice %11 {offsets = [11, 0, 0], sizes = [1, 8, 128], strides = [1, 1, 1]} : vector<16x8x128xf32> to vector<1x8x128xf32>
    %634 = vector.shape_cast %633 : vector<1x8x128xf32> to vector<8x128xf32>
    %c11_237 = arith.constant 11 : index
    %635 = memref.load %arg1[%c11_237] : memref<16xf32, #tpu.memory_space<smem>>
    %636 = vector.broadcast %635 : f32 to vector<8x128xf32>
    %637 = arith.addf %634, %636 : vector<8x128xf32>
    %c64 = arith.constant 64 : index
    %c0_238 = arith.constant 0 : index
    %638 = vector.load %arg10[%c64, %c0_238] : memref<128x256xf32, #tpu.memory_space<vmem>>, vector<1x128xf32>
    %639 = vector.broadcast %638 : vector<1x128xf32> to vector<8x128xf32>
    %640 = arith.mulf %622, %639 : vector<8x128xf32>
    %c72 = arith.constant 72 : index
    %c0_239 = arith.constant 0 : index
    %641 = vector.load %arg10[%c72, %c0_239] : memref<128x256xf32, #tpu.memory_space<vmem>>, vector<1x128xf32>
    %642 = vector.broadcast %641 : vector<1x128xf32> to vector<8x128xf32>
    %643 = arith.mulf %627, %642 : vector<8x128xf32>
    %644 = arith.addf %640, %643 : vector<8x128xf32>
    %c80 = arith.constant 80 : index
    %c0_240 = arith.constant 0 : index
    %645 = vector.load %arg10[%c80, %c0_240] : memref<128x256xf32, #tpu.memory_space<vmem>>, vector<1x128xf32>
    %646 = vector.broadcast %645 : vector<1x128xf32> to vector<8x128xf32>
    %647 = arith.mulf %632, %646 : vector<8x128xf32>
    %648 = arith.addf %644, %647 : vector<8x128xf32>
    %c88 = arith.constant 88 : index
    %c0_241 = arith.constant 0 : index
    %649 = vector.load %arg10[%c88, %c0_241] : memref<128x256xf32, #tpu.memory_space<vmem>>, vector<1x128xf32>
    %650 = vector.broadcast %649 : vector<1x128xf32> to vector<8x128xf32>
    %651 = arith.mulf %637, %650 : vector<8x128xf32>
    %652 = arith.addf %648, %651 : vector<8x128xf32>
    %c65 = arith.constant 65 : index
    %c0_242 = arith.constant 0 : index
    %653 = vector.load %arg10[%c65, %c0_242] : memref<128x256xf32, #tpu.memory_space<vmem>>, vector<1x128xf32>
    %654 = vector.broadcast %653 : vector<1x128xf32> to vector<8x128xf32>
    %655 = arith.mulf %622, %654 : vector<8x128xf32>
    %c73 = arith.constant 73 : index
    %c0_243 = arith.constant 0 : index
    %656 = vector.load %arg10[%c73, %c0_243] : memref<128x256xf32, #tpu.memory_space<vmem>>, vector<1x128xf32>
    %657 = vector.broadcast %656 : vector<1x128xf32> to vector<8x128xf32>
    %658 = arith.mulf %627, %657 : vector<8x128xf32>
    %659 = arith.addf %655, %658 : vector<8x128xf32>
    %c81 = arith.constant 81 : index
    %c0_244 = arith.constant 0 : index
    %660 = vector.load %arg10[%c81, %c0_244] : memref<128x256xf32, #tpu.memory_space<vmem>>, vector<1x128xf32>
    %661 = vector.broadcast %660 : vector<1x128xf32> to vector<8x128xf32>
    %662 = arith.mulf %632, %661 : vector<8x128xf32>
    %663 = arith.addf %659, %662 : vector<8x128xf32>
    %c89 = arith.constant 89 : index
    %c0_245 = arith.constant 0 : index
    %664 = vector.load %arg10[%c89, %c0_245] : memref<128x256xf32, #tpu.memory_space<vmem>>, vector<1x128xf32>
    %665 = vector.broadcast %664 : vector<1x128xf32> to vector<8x128xf32>
    %666 = arith.mulf %637, %665 : vector<8x128xf32>
    %667 = arith.addf %663, %666 : vector<8x128xf32>
    %c66 = arith.constant 66 : index
    %c0_246 = arith.constant 0 : index
    %668 = vector.load %arg10[%c66, %c0_246] : memref<128x256xf32, #tpu.memory_space<vmem>>, vector<1x128xf32>
    %669 = vector.broadcast %668 : vector<1x128xf32> to vector<8x128xf32>
    %670 = arith.mulf %622, %669 : vector<8x128xf32>
    %c74 = arith.constant 74 : index
    %c0_247 = arith.constant 0 : index
    %671 = vector.load %arg10[%c74, %c0_247] : memref<128x256xf32, #tpu.memory_space<vmem>>, vector<1x128xf32>
    %672 = vector.broadcast %671 : vector<1x128xf32> to vector<8x128xf32>
    %673 = arith.mulf %627, %672 : vector<8x128xf32>
    %674 = arith.addf %670, %673 : vector<8x128xf32>
    %c82 = arith.constant 82 : index
    %c0_248 = arith.constant 0 : index
    %675 = vector.load %arg10[%c82, %c0_248] : memref<128x256xf32, #tpu.memory_space<vmem>>, vector<1x128xf32>
    %676 = vector.broadcast %675 : vector<1x128xf32> to vector<8x128xf32>
    %677 = arith.mulf %632, %676 : vector<8x128xf32>
    %678 = arith.addf %674, %677 : vector<8x128xf32>
    %c90 = arith.constant 90 : index
    %c0_249 = arith.constant 0 : index
    %679 = vector.load %arg10[%c90, %c0_249] : memref<128x256xf32, #tpu.memory_space<vmem>>, vector<1x128xf32>
    %680 = vector.broadcast %679 : vector<1x128xf32> to vector<8x128xf32>
    %681 = arith.mulf %637, %680 : vector<8x128xf32>
    %682 = arith.addf %678, %681 : vector<8x128xf32>
    %c67 = arith.constant 67 : index
    %c0_250 = arith.constant 0 : index
    %683 = vector.load %arg10[%c67, %c0_250] : memref<128x256xf32, #tpu.memory_space<vmem>>, vector<1x128xf32>
    %684 = vector.broadcast %683 : vector<1x128xf32> to vector<8x128xf32>
    %685 = arith.mulf %622, %684 : vector<8x128xf32>
    %c75 = arith.constant 75 : index
    %c0_251 = arith.constant 0 : index
    %686 = vector.load %arg10[%c75, %c0_251] : memref<128x256xf32, #tpu.memory_space<vmem>>, vector<1x128xf32>
    %687 = vector.broadcast %686 : vector<1x128xf32> to vector<8x128xf32>
    %688 = arith.mulf %627, %687 : vector<8x128xf32>
    %689 = arith.addf %685, %688 : vector<8x128xf32>
    %c83 = arith.constant 83 : index
    %c0_252 = arith.constant 0 : index
    %690 = vector.load %arg10[%c83, %c0_252] : memref<128x256xf32, #tpu.memory_space<vmem>>, vector<1x128xf32>
    %691 = vector.broadcast %690 : vector<1x128xf32> to vector<8x128xf32>
    %692 = arith.mulf %632, %691 : vector<8x128xf32>
    %693 = arith.addf %689, %692 : vector<8x128xf32>
    %c91 = arith.constant 91 : index
    %c0_253 = arith.constant 0 : index
    %694 = vector.load %arg10[%c91, %c0_253] : memref<128x256xf32, #tpu.memory_space<vmem>>, vector<1x128xf32>
    %695 = vector.broadcast %694 : vector<1x128xf32> to vector<8x128xf32>
    %696 = arith.mulf %637, %695 : vector<8x128xf32>
    %697 = arith.addf %693, %696 : vector<8x128xf32>
    %c68 = arith.constant 68 : index
    %c0_254 = arith.constant 0 : index
    %698 = vector.load %arg10[%c68, %c0_254] : memref<128x256xf32, #tpu.memory_space<vmem>>, vector<1x128xf32>
    %699 = vector.broadcast %698 : vector<1x128xf32> to vector<8x128xf32>
    %700 = arith.mulf %622, %699 : vector<8x128xf32>
    %c76 = arith.constant 76 : index
    %c0_255 = arith.constant 0 : index
    %701 = vector.load %arg10[%c76, %c0_255] : memref<128x256xf32, #tpu.memory_space<vmem>>, vector<1x128xf32>
    %702 = vector.broadcast %701 : vector<1x128xf32> to vector<8x128xf32>
    %703 = arith.mulf %627, %702 : vector<8x128xf32>
    %704 = arith.addf %700, %703 : vector<8x128xf32>
    %c84 = arith.constant 84 : index
    %c0_256 = arith.constant 0 : index
    %705 = vector.load %arg10[%c84, %c0_256] : memref<128x256xf32, #tpu.memory_space<vmem>>, vector<1x128xf32>
    %706 = vector.broadcast %705 : vector<1x128xf32> to vector<8x128xf32>
    %707 = arith.mulf %632, %706 : vector<8x128xf32>
    %708 = arith.addf %704, %707 : vector<8x128xf32>
    %c92 = arith.constant 92 : index
    %c0_257 = arith.constant 0 : index
    %709 = vector.load %arg10[%c92, %c0_257] : memref<128x256xf32, #tpu.memory_space<vmem>>, vector<1x128xf32>
    %710 = vector.broadcast %709 : vector<1x128xf32> to vector<8x128xf32>
    %711 = arith.mulf %637, %710 : vector<8x128xf32>
    %712 = arith.addf %708, %711 : vector<8x128xf32>
    %c69 = arith.constant 69 : index
    %c0_258 = arith.constant 0 : index
    %713 = vector.load %arg10[%c69, %c0_258] : memref<128x256xf32, #tpu.memory_space<vmem>>, vector<1x128xf32>
    %714 = vector.broadcast %713 : vector<1x128xf32> to vector<8x128xf32>
    %715 = arith.mulf %622, %714 : vector<8x128xf32>
    %c77 = arith.constant 77 : index
    %c0_259 = arith.constant 0 : index
    %716 = vector.load %arg10[%c77, %c0_259] : memref<128x256xf32, #tpu.memory_space<vmem>>, vector<1x128xf32>
    %717 = vector.broadcast %716 : vector<1x128xf32> to vector<8x128xf32>
    %718 = arith.mulf %627, %717 : vector<8x128xf32>
    %719 = arith.addf %715, %718 : vector<8x128xf32>
    %c85 = arith.constant 85 : index
    %c0_260 = arith.constant 0 : index
    %720 = vector.load %arg10[%c85, %c0_260] : memref<128x256xf32, #tpu.memory_space<vmem>>, vector<1x128xf32>
    %721 = vector.broadcast %720 : vector<1x128xf32> to vector<8x128xf32>
    %722 = arith.mulf %632, %721 : vector<8x128xf32>
    %723 = arith.addf %719, %722 : vector<8x128xf32>
    %c93 = arith.constant 93 : index
    %c0_261 = arith.constant 0 : index
    %724 = vector.load %arg10[%c93, %c0_261] : memref<128x256xf32, #tpu.memory_space<vmem>>, vector<1x128xf32>
    %725 = vector.broadcast %724 : vector<1x128xf32> to vector<8x128xf32>
    %726 = arith.mulf %637, %725 : vector<8x128xf32>
    %727 = arith.addf %723, %726 : vector<8x128xf32>
    %c70 = arith.constant 70 : index
    %c0_262 = arith.constant 0 : index
    %728 = vector.load %arg10[%c70, %c0_262] : memref<128x256xf32, #tpu.memory_space<vmem>>, vector<1x128xf32>
    %729 = vector.broadcast %728 : vector<1x128xf32> to vector<8x128xf32>
    %730 = arith.mulf %622, %729 : vector<8x128xf32>
    %c78 = arith.constant 78 : index
    %c0_263 = arith.constant 0 : index
    %731 = vector.load %arg10[%c78, %c0_263] : memref<128x256xf32, #tpu.memory_space<vmem>>, vector<1x128xf32>
    %732 = vector.broadcast %731 : vector<1x128xf32> to vector<8x128xf32>
    %733 = arith.mulf %627, %732 : vector<8x128xf32>
    %734 = arith.addf %730, %733 : vector<8x128xf32>
    %c86 = arith.constant 86 : index
    %c0_264 = arith.constant 0 : index
    %735 = vector.load %arg10[%c86, %c0_264] : memref<128x256xf32, #tpu.memory_space<vmem>>, vector<1x128xf32>
    %736 = vector.broadcast %735 : vector<1x128xf32> to vector<8x128xf32>
    %737 = arith.mulf %632, %736 : vector<8x128xf32>
    %738 = arith.addf %734, %737 : vector<8x128xf32>
    %c94 = arith.constant 94 : index
    %c0_265 = arith.constant 0 : index
    %739 = vector.load %arg10[%c94, %c0_265] : memref<128x256xf32, #tpu.memory_space<vmem>>, vector<1x128xf32>
    %740 = vector.broadcast %739 : vector<1x128xf32> to vector<8x128xf32>
    %741 = arith.mulf %637, %740 : vector<8x128xf32>
    %742 = arith.addf %738, %741 : vector<8x128xf32>
    %c71 = arith.constant 71 : index
    %c0_266 = arith.constant 0 : index
    %743 = vector.load %arg10[%c71, %c0_266] : memref<128x256xf32, #tpu.memory_space<vmem>>, vector<1x128xf32>
    %744 = vector.broadcast %743 : vector<1x128xf32> to vector<8x128xf32>
    %745 = arith.mulf %622, %744 : vector<8x128xf32>
    %c79 = arith.constant 79 : index
    %c0_267 = arith.constant 0 : index
    %746 = vector.load %arg10[%c79, %c0_267] : memref<128x256xf32, #tpu.memory_space<vmem>>, vector<1x128xf32>
    %747 = vector.broadcast %746 : vector<1x128xf32> to vector<8x128xf32>
    %748 = arith.mulf %627, %747 : vector<8x128xf32>
    %749 = arith.addf %745, %748 : vector<8x128xf32>
    %c87 = arith.constant 87 : index
    %c0_268 = arith.constant 0 : index
    %750 = vector.load %arg10[%c87, %c0_268] : memref<128x256xf32, #tpu.memory_space<vmem>>, vector<1x128xf32>
    %751 = vector.broadcast %750 : vector<1x128xf32> to vector<8x128xf32>
    %752 = arith.mulf %632, %751 : vector<8x128xf32>
    %753 = arith.addf %749, %752 : vector<8x128xf32>
    %c95 = arith.constant 95 : index
    %c0_269 = arith.constant 0 : index
    %754 = vector.load %arg10[%c95, %c0_269] : memref<128x256xf32, #tpu.memory_space<vmem>>, vector<1x128xf32>
    %755 = vector.broadcast %754 : vector<1x128xf32> to vector<8x128xf32>
    %756 = arith.mulf %637, %755 : vector<8x128xf32>
    %757 = arith.addf %753, %756 : vector<8x128xf32>
    %758 = arith.maximumf %652, %667 : vector<8x128xf32>
    %759 = arith.maximumf %758, %682 : vector<8x128xf32>
    %760 = arith.maximumf %759, %697 : vector<8x128xf32>
    %761 = arith.maximumf %760, %712 : vector<8x128xf32>
    %762 = arith.maximumf %761, %727 : vector<8x128xf32>
    %763 = arith.maximumf %762, %742 : vector<8x128xf32>
    %764 = arith.maximumf %763, %757 : vector<8x128xf32>
    %765 = arith.subf %652, %764 : vector<8x128xf32>
    %766 = math.exp %765 : vector<8x128xf32>
    %767 = arith.subf %667, %764 : vector<8x128xf32>
    %768 = math.exp %767 : vector<8x128xf32>
    %769 = arith.subf %682, %764 : vector<8x128xf32>
    %770 = math.exp %769 : vector<8x128xf32>
    %771 = arith.subf %697, %764 : vector<8x128xf32>
    %772 = math.exp %771 : vector<8x128xf32>
    %773 = arith.subf %712, %764 : vector<8x128xf32>
    %774 = math.exp %773 : vector<8x128xf32>
    %775 = arith.subf %727, %764 : vector<8x128xf32>
    %776 = math.exp %775 : vector<8x128xf32>
    %777 = arith.subf %742, %764 : vector<8x128xf32>
    %778 = math.exp %777 : vector<8x128xf32>
    %779 = arith.subf %757, %764 : vector<8x128xf32>
    %780 = math.exp %779 : vector<8x128xf32>
    %781 = arith.addf %766, %768 : vector<8x128xf32>
    %782 = arith.addf %781, %770 : vector<8x128xf32>
    %783 = arith.addf %782, %772 : vector<8x128xf32>
    %784 = arith.addf %783, %774 : vector<8x128xf32>
    %785 = arith.addf %784, %776 : vector<8x128xf32>
    %786 = arith.addf %785, %778 : vector<8x128xf32>
    %787 = arith.addf %786, %780 : vector<8x128xf32>
    %788 = tpu.reciprocal %787 {approx = true} : vector<8x128xf32> -> vector<8x128xf32>
    %c64_270 = arith.constant 64 : index
    %c0_271 = arith.constant 0 : index
    %789 = vector.load %arg11[%c64_270, %c0_271] : memref<128x256xf32, #tpu.memory_space<vmem>>, vector<1x128xf32>
    %790 = vector.broadcast %789 : vector<1x128xf32> to vector<8x128xf32>
    %791 = arith.mulf %766, %790 : vector<8x128xf32>
    %c65_272 = arith.constant 65 : index
    %c0_273 = arith.constant 0 : index
    %792 = vector.load %arg11[%c65_272, %c0_273] : memref<128x256xf32, #tpu.memory_space<vmem>>, vector<1x128xf32>
    %793 = vector.broadcast %792 : vector<1x128xf32> to vector<8x128xf32>
    %794 = arith.mulf %768, %793 : vector<8x128xf32>
    %795 = arith.addf %791, %794 : vector<8x128xf32>
    %c66_274 = arith.constant 66 : index
    %c0_275 = arith.constant 0 : index
    %796 = vector.load %arg11[%c66_274, %c0_275] : memref<128x256xf32, #tpu.memory_space<vmem>>, vector<1x128xf32>
    %797 = vector.broadcast %796 : vector<1x128xf32> to vector<8x128xf32>
    %798 = arith.mulf %770, %797 : vector<8x128xf32>
    %799 = arith.addf %795, %798 : vector<8x128xf32>
    %c67_276 = arith.constant 67 : index
    %c0_277 = arith.constant 0 : index
    %800 = vector.load %arg11[%c67_276, %c0_277] : memref<128x256xf32, #tpu.memory_space<vmem>>, vector<1x128xf32>
    %801 = vector.broadcast %800 : vector<1x128xf32> to vector<8x128xf32>
    %802 = arith.mulf %772, %801 : vector<8x128xf32>
    %803 = arith.addf %799, %802 : vector<8x128xf32>
    %c68_278 = arith.constant 68 : index
    %c0_279 = arith.constant 0 : index
    %804 = vector.load %arg11[%c68_278, %c0_279] : memref<128x256xf32, #tpu.memory_space<vmem>>, vector<1x128xf32>
    %805 = vector.broadcast %804 : vector<1x128xf32> to vector<8x128xf32>
    %806 = arith.mulf %774, %805 : vector<8x128xf32>
    %807 = arith.addf %803, %806 : vector<8x128xf32>
    %c69_280 = arith.constant 69 : index
    %c0_281 = arith.constant 0 : index
    %808 = vector.load %arg11[%c69_280, %c0_281] : memref<128x256xf32, #tpu.memory_space<vmem>>, vector<1x128xf32>
    %809 = vector.broadcast %808 : vector<1x128xf32> to vector<8x128xf32>
    %810 = arith.mulf %776, %809 : vector<8x128xf32>
    %811 = arith.addf %807, %810 : vector<8x128xf32>
    %c70_282 = arith.constant 70 : index
    %c0_283 = arith.constant 0 : index
    %812 = vector.load %arg11[%c70_282, %c0_283] : memref<128x256xf32, #tpu.memory_space<vmem>>, vector<1x128xf32>
    %813 = vector.broadcast %812 : vector<1x128xf32> to vector<8x128xf32>
    %814 = arith.mulf %778, %813 : vector<8x128xf32>
    %815 = arith.addf %811, %814 : vector<8x128xf32>
    %c71_284 = arith.constant 71 : index
    %c0_285 = arith.constant 0 : index
    %816 = vector.load %arg11[%c71_284, %c0_285] : memref<128x256xf32, #tpu.memory_space<vmem>>, vector<1x128xf32>
    %817 = vector.broadcast %816 : vector<1x128xf32> to vector<8x128xf32>
    %818 = arith.mulf %780, %817 : vector<8x128xf32>
    %819 = arith.addf %815, %818 : vector<8x128xf32>
    %820 = arith.mulf %819, %788 : vector<8x128xf32>
    %c64_286 = arith.constant 64 : index
    %c0_287 = arith.constant 0 : index
    %821 = vector.load %arg12[%c64_286, %c0_287] : memref<128x256xf32, #tpu.memory_space<vmem>>, vector<8x128xf32>
    tpu.vector_store %arg12[%c64_286, %c0_287], %820 {strides = array<i32>} : memref<128x256xf32, #tpu.memory_space<vmem>>, vector<8x128xf32>,
    %c72_288 = arith.constant 72 : index
    %c0_289 = arith.constant 0 : index
    %822 = vector.load %arg11[%c72_288, %c0_289] : memref<128x256xf32, #tpu.memory_space<vmem>>, vector<1x128xf32>
    %823 = vector.broadcast %822 : vector<1x128xf32> to vector<8x128xf32>
    %824 = arith.mulf %766, %823 : vector<8x128xf32>
    %c73_290 = arith.constant 73 : index
    %c0_291 = arith.constant 0 : index
    %825 = vector.load %arg11[%c73_290, %c0_291] : memref<128x256xf32, #tpu.memory_space<vmem>>, vector<1x128xf32>
    %826 = vector.broadcast %825 : vector<1x128xf32> to vector<8x128xf32>
    %827 = arith.mulf %768, %826 : vector<8x128xf32>
    %828 = arith.addf %824, %827 : vector<8x128xf32>
    %c74_292 = arith.constant 74 : index
    %c0_293 = arith.constant 0 : index
    %829 = vector.load %arg11[%c74_292, %c0_293] : memref<128x256xf32, #tpu.memory_space<vmem>>, vector<1x128xf32>
    %830 = vector.broadcast %829 : vector<1x128xf32> to vector<8x128xf32>
    %831 = arith.mulf %770, %830 : vector<8x128xf32>
    %832 = arith.addf %828, %831 : vector<8x128xf32>
    %c75_294 = arith.constant 75 : index
    %c0_295 = arith.constant 0 : index
    %833 = vector.load %arg11[%c75_294, %c0_295] : memref<128x256xf32, #tpu.memory_space<vmem>>, vector<1x128xf32>
    %834 = vector.broadcast %833 : vector<1x128xf32> to vector<8x128xf32>
    %835 = arith.mulf %772, %834 : vector<8x128xf32>
    %836 = arith.addf %832, %835 : vector<8x128xf32>
    %c76_296 = arith.constant 76 : index
    %c0_297 = arith.constant 0 : index
    %837 = vector.load %arg11[%c76_296, %c0_297] : memref<128x256xf32, #tpu.memory_space<vmem>>, vector<1x128xf32>
    %838 = vector.broadcast %837 : vector<1x128xf32> to vector<8x128xf32>
    %839 = arith.mulf %774, %838 : vector<8x128xf32>
    %840 = arith.addf %836, %839 : vector<8x128xf32>
    %c77_298 = arith.constant 77 : index
    %c0_299 = arith.constant 0 : index
    %841 = vector.load %arg11[%c77_298, %c0_299] : memref<128x256xf32, #tpu.memory_space<vmem>>, vector<1x128xf32>
    %842 = vector.broadcast %841 : vector<1x128xf32> to vector<8x128xf32>
    %843 = arith.mulf %776, %842 : vector<8x128xf32>
    %844 = arith.addf %840, %843 : vector<8x128xf32>
    %c78_300 = arith.constant 78 : index
    %c0_301 = arith.constant 0 : index
    %845 = vector.load %arg11[%c78_300, %c0_301] : memref<128x256xf32, #tpu.memory_space<vmem>>, vector<1x128xf32>
    %846 = vector.broadcast %845 : vector<1x128xf32> to vector<8x128xf32>
    %847 = arith.mulf %778, %846 : vector<8x128xf32>
    %848 = arith.addf %844, %847 : vector<8x128xf32>
    %c79_302 = arith.constant 79 : index
    %c0_303 = arith.constant 0 : index
    %849 = vector.load %arg11[%c79_302, %c0_303] : memref<128x256xf32, #tpu.memory_space<vmem>>, vector<1x128xf32>
    %850 = vector.broadcast %849 : vector<1x128xf32> to vector<8x128xf32>
    %851 = arith.mulf %780, %850 : vector<8x128xf32>
    %852 = arith.addf %848, %851 : vector<8x128xf32>
    %853 = arith.mulf %852, %788 : vector<8x128xf32>
    %c72_304 = arith.constant 72 : index
    %c0_305 = arith.constant 0 : index
    %854 = vector.load %arg12[%c72_304, %c0_305] : memref<128x256xf32, #tpu.memory_space<vmem>>, vector<8x128xf32>
    tpu.vector_store %arg12[%c72_304, %c0_305], %853 {strides = array<i32>} : memref<128x256xf32, #tpu.memory_space<vmem>>, vector<8x128xf32>,
    %c80_306 = arith.constant 80 : index
    %c0_307 = arith.constant 0 : index
    %855 = vector.load %arg11[%c80_306, %c0_307] : memref<128x256xf32, #tpu.memory_space<vmem>>, vector<1x128xf32>
    %856 = vector.broadcast %855 : vector<1x128xf32> to vector<8x128xf32>
    %857 = arith.mulf %766, %856 : vector<8x128xf32>
    %c81_308 = arith.constant 81 : index
    %c0_309 = arith.constant 0 : index
    %858 = vector.load %arg11[%c81_308, %c0_309] : memref<128x256xf32, #tpu.memory_space<vmem>>, vector<1x128xf32>
    %859 = vector.broadcast %858 : vector<1x128xf32> to vector<8x128xf32>
    %860 = arith.mulf %768, %859 : vector<8x128xf32>
    %861 = arith.addf %857, %860 : vector<8x128xf32>
    %c82_310 = arith.constant 82 : index
    %c0_311 = arith.constant 0 : index
    %862 = vector.load %arg11[%c82_310, %c0_311] : memref<128x256xf32, #tpu.memory_space<vmem>>, vector<1x128xf32>
    %863 = vector.broadcast %862 : vector<1x128xf32> to vector<8x128xf32>
    %864 = arith.mulf %770, %863 : vector<8x128xf32>
    %865 = arith.addf %861, %864 : vector<8x128xf32>
    %c83_312 = arith.constant 83 : index
    %c0_313 = arith.constant 0 : index
    %866 = vector.load %arg11[%c83_312, %c0_313] : memref<128x256xf32, #tpu.memory_space<vmem>>, vector<1x128xf32>
    %867 = vector.broadcast %866 : vector<1x128xf32> to vector<8x128xf32>
    %868 = arith.mulf %772, %867 : vector<8x128xf32>
    %869 = arith.addf %865, %868 : vector<8x128xf32>
    %c84_314 = arith.constant 84 : index
    %c0_315 = arith.constant 0 : index
    %870 = vector.load %arg11[%c84_314, %c0_315] : memref<128x256xf32, #tpu.memory_space<vmem>>, vector<1x128xf32>
    %871 = vector.broadcast %870 : vector<1x128xf32> to vector<8x128xf32>
    %872 = arith.mulf %774, %871 : vector<8x128xf32>
    %873 = arith.addf %869, %872 : vector<8x128xf32>
    %c85_316 = arith.constant 85 : index
    %c0_317 = arith.constant 0 : index
    %874 = vector.load %arg11[%c85_316, %c0_317] : memref<128x256xf32, #tpu.memory_space<vmem>>, vector<1x128xf32>
    %875 = vector.broadcast %874 : vector<1x128xf32> to vector<8x128xf32>
    %876 = arith.mulf %776, %875 : vector<8x128xf32>
    %877 = arith.addf %873, %876 : vector<8x128xf32>
    %c86_318 = arith.constant 86 : index
    %c0_319 = arith.constant 0 : index
    %878 = vector.load %arg11[%c86_318, %c0_319] : memref<128x256xf32, #tpu.memory_space<vmem>>, vector<1x128xf32>
    %879 = vector.broadcast %878 : vector<1x128xf32> to vector<8x128xf32>
    %880 = arith.mulf %778, %879 : vector<8x128xf32>
    %881 = arith.addf %877, %880 : vector<8x128xf32>
    %c87_320 = arith.constant 87 : index
    %c0_321 = arith.constant 0 : index
    %882 = vector.load %arg11[%c87_320, %c0_321] : memref<128x256xf32, #tpu.memory_space<vmem>>, vector<1x128xf32>
    %883 = vector.broadcast %882 : vector<1x128xf32> to vector<8x128xf32>
    %884 = arith.mulf %780, %883 : vector<8x128xf32>
    %885 = arith.addf %881, %884 : vector<8x128xf32>
    %886 = arith.mulf %885, %788 : vector<8x128xf32>
    %c80_322 = arith.constant 80 : index
    %c0_323 = arith.constant 0 : index
    %887 = vector.load %arg12[%c80_322, %c0_323] : memref<128x256xf32, #tpu.memory_space<vmem>>, vector<8x128xf32>
    tpu.vector_store %arg12[%c80_322, %c0_323], %886 {strides = array<i32>} : memref<128x256xf32, #tpu.memory_space<vmem>>, vector<8x128xf32>,
    %c88_324 = arith.constant 88 : index
    %c0_325 = arith.constant 0 : index
    %888 = vector.load %arg11[%c88_324, %c0_325] : memref<128x256xf32, #tpu.memory_space<vmem>>, vector<1x128xf32>
    %889 = vector.broadcast %888 : vector<1x128xf32> to vector<8x128xf32>
    %890 = arith.mulf %766, %889 : vector<8x128xf32>
    %c89_326 = arith.constant 89 : index
    %c0_327 = arith.constant 0 : index
    %891 = vector.load %arg11[%c89_326, %c0_327] : memref<128x256xf32, #tpu.memory_space<vmem>>, vector<1x128xf32>
    %892 = vector.broadcast %891 : vector<1x128xf32> to vector<8x128xf32>
    %893 = arith.mulf %768, %892 : vector<8x128xf32>
    %894 = arith.addf %890, %893 : vector<8x128xf32>
    %c90_328 = arith.constant 90 : index
    %c0_329 = arith.constant 0 : index
    %895 = vector.load %arg11[%c90_328, %c0_329] : memref<128x256xf32, #tpu.memory_space<vmem>>, vector<1x128xf32>
    %896 = vector.broadcast %895 : vector<1x128xf32> to vector<8x128xf32>
    %897 = arith.mulf %770, %896 : vector<8x128xf32>
    %898 = arith.addf %894, %897 : vector<8x128xf32>
    %c91_330 = arith.constant 91 : index
    %c0_331 = arith.constant 0 : index
    %899 = vector.load %arg11[%c91_330, %c0_331] : memref<128x256xf32, #tpu.memory_space<vmem>>, vector<1x128xf32>
    %900 = vector.broadcast %899 : vector<1x128xf32> to vector<8x128xf32>
    %901 = arith.mulf %772, %900 : vector<8x128xf32>
    %902 = arith.addf %898, %901 : vector<8x128xf32>
    %c92_332 = arith.constant 92 : index
    %c0_333 = arith.constant 0 : index
    %903 = vector.load %arg11[%c92_332, %c0_333] : memref<128x256xf32, #tpu.memory_space<vmem>>, vector<1x128xf32>
    %904 = vector.broadcast %903 : vector<1x128xf32> to vector<8x128xf32>
    %905 = arith.mulf %774, %904 : vector<8x128xf32>
    %906 = arith.addf %902, %905 : vector<8x128xf32>
    %c93_334 = arith.constant 93 : index
    %c0_335 = arith.constant 0 : index
    %907 = vector.load %arg11[%c93_334, %c0_335] : memref<128x256xf32, #tpu.memory_space<vmem>>, vector<1x128xf32>
    %908 = vector.broadcast %907 : vector<1x128xf32> to vector<8x128xf32>
    %909 = arith.mulf %776, %908 : vector<8x128xf32>
    %910 = arith.addf %906, %909 : vector<8x128xf32>
    %c94_336 = arith.constant 94 : index
    %c0_337 = arith.constant 0 : index
    %911 = vector.load %arg11[%c94_336, %c0_337] : memref<128x256xf32, #tpu.memory_space<vmem>>, vector<1x128xf32>
    %912 = vector.broadcast %911 : vector<1x128xf32> to vector<8x128xf32>
    %913 = arith.mulf %778, %912 : vector<8x128xf32>
    %914 = arith.addf %910, %913 : vector<8x128xf32>
    %c95_338 = arith.constant 95 : index
    %c0_339 = arith.constant 0 : index
    %915 = vector.load %arg11[%c95_338, %c0_339] : memref<128x256xf32, #tpu.memory_space<vmem>>, vector<1x128xf32>
    %916 = vector.broadcast %915 : vector<1x128xf32> to vector<8x128xf32>
    %917 = arith.mulf %780, %916 : vector<8x128xf32>
    %918 = arith.addf %914, %917 : vector<8x128xf32>
    %919 = arith.mulf %918, %788 : vector<8x128xf32>
    %c88_340 = arith.constant 88 : index
    %c0_341 = arith.constant 0 : index
    %920 = vector.load %arg12[%c88_340, %c0_341] : memref<128x256xf32, #tpu.memory_space<vmem>>, vector<8x128xf32>
    tpu.vector_store %arg12[%c88_340, %c0_341], %919 {strides = array<i32>} : memref<128x256xf32, #tpu.memory_space<vmem>>, vector<8x128xf32>,
    %921 = vector.extract_strided_slice %11 {offsets = [12, 0, 0], sizes = [1, 8, 128], strides = [1, 1, 1]} : vector<16x8x128xf32> to vector<1x8x128xf32>
    %922 = vector.shape_cast %921 : vector<1x8x128xf32> to vector<8x128xf32>
    %c12_342 = arith.constant 12 : index
    %923 = memref.load %arg1[%c12_342] : memref<16xf32, #tpu.memory_space<smem>>
    %924 = vector.broadcast %923 : f32 to vector<8x128xf32>
    %925 = arith.addf %922, %924 : vector<8x128xf32>
    %926 = vector.extract_strided_slice %11 {offsets = [13, 0, 0], sizes = [1, 8, 128], strides = [1, 1, 1]} : vector<16x8x128xf32> to vector<1x8x128xf32>
    %927 = vector.shape_cast %926 : vector<1x8x128xf32> to vector<8x128xf32>
    %c13_343 = arith.constant 13 : index
    %928 = memref.load %arg1[%c13_343] : memref<16xf32, #tpu.memory_space<smem>>
    %929 = vector.broadcast %928 : f32 to vector<8x128xf32>
    %930 = arith.addf %927, %929 : vector<8x128xf32>
    %931 = vector.extract_strided_slice %11 {offsets = [14, 0, 0], sizes = [1, 8, 128], strides = [1, 1, 1]} : vector<16x8x128xf32> to vector<1x8x128xf32>
    %932 = vector.shape_cast %931 : vector<1x8x128xf32> to vector<8x128xf32>
    %c14_344 = arith.constant 14 : index
    %933 = memref.load %arg1[%c14_344] : memref<16xf32, #tpu.memory_space<smem>>
    %934 = vector.broadcast %933 : f32 to vector<8x128xf32>
    %935 = arith.addf %932, %934 : vector<8x128xf32>
    %936 = vector.extract_strided_slice %11 {offsets = [15, 0, 0], sizes = [1, 8, 128], strides = [1, 1, 1]} : vector<16x8x128xf32> to vector<1x8x128xf32>
    %937 = vector.shape_cast %936 : vector<1x8x128xf32> to vector<8x128xf32>
    %c15_345 = arith.constant 15 : index
    %938 = memref.load %arg1[%c15_345] : memref<16xf32, #tpu.memory_space<smem>>
    %939 = vector.broadcast %938 : f32 to vector<8x128xf32>
    %940 = arith.addf %937, %939 : vector<8x128xf32>
    %c96 = arith.constant 96 : index
    %c0_346 = arith.constant 0 : index
    %941 = vector.load %arg10[%c96, %c0_346] : memref<128x256xf32, #tpu.memory_space<vmem>>, vector<1x128xf32>
    %942 = vector.broadcast %941 : vector<1x128xf32> to vector<8x128xf32>
    %943 = arith.mulf %925, %942 : vector<8x128xf32>
    %c104 = arith.constant 104 : index
    %c0_347 = arith.constant 0 : index
    %944 = vector.load %arg10[%c104, %c0_347] : memref<128x256xf32, #tpu.memory_space<vmem>>, vector<1x128xf32>
    %945 = vector.broadcast %944 : vector<1x128xf32> to vector<8x128xf32>
    %946 = arith.mulf %930, %945 : vector<8x128xf32>
    %947 = arith.addf %943, %946 : vector<8x128xf32>
    %c112 = arith.constant 112 : index
    %c0_348 = arith.constant 0 : index
    %948 = vector.load %arg10[%c112, %c0_348] : memref<128x256xf32, #tpu.memory_space<vmem>>, vector<1x128xf32>
    %949 = vector.broadcast %948 : vector<1x128xf32> to vector<8x128xf32>
    %950 = arith.mulf %935, %949 : vector<8x128xf32>
    %951 = arith.addf %947, %950 : vector<8x128xf32>
    %c120 = arith.constant 120 : index
    %c0_349 = arith.constant 0 : index
    %952 = vector.load %arg10[%c120, %c0_349] : memref<128x256xf32, #tpu.memory_space<vmem>>, vector<1x128xf32>
    %953 = vector.broadcast %952 : vector<1x128xf32> to vector<8x128xf32>
    %954 = arith.mulf %940, %953 : vector<8x128xf32>
    %955 = arith.addf %951, %954 : vector<8x128xf32>
    %c97 = arith.constant 97 : index
    %c0_350 = arith.constant 0 : index
    %956 = vector.load %arg10[%c97, %c0_350] : memref<128x256xf32, #tpu.memory_space<vmem>>, vector<1x128xf32>
    %957 = vector.broadcast %956 : vector<1x128xf32> to vector<8x128xf32>
    %958 = arith.mulf %925, %957 : vector<8x128xf32>
    %c105 = arith.constant 105 : index
    %c0_351 = arith.constant 0 : index
    %959 = vector.load %arg10[%c105, %c0_351] : memref<128x256xf32, #tpu.memory_space<vmem>>, vector<1x128xf32>
    %960 = vector.broadcast %959 : vector<1x128xf32> to vector<8x128xf32>
    %961 = arith.mulf %930, %960 : vector<8x128xf32>
    %962 = arith.addf %958, %961 : vector<8x128xf32>
    %c113 = arith.constant 113 : index
    %c0_352 = arith.constant 0 : index
    %963 = vector.load %arg10[%c113, %c0_352] : memref<128x256xf32, #tpu.memory_space<vmem>>, vector<1x128xf32>
    %964 = vector.broadcast %963 : vector<1x128xf32> to vector<8x128xf32>
    %965 = arith.mulf %935, %964 : vector<8x128xf32>
    %966 = arith.addf %962, %965 : vector<8x128xf32>
    %c121 = arith.constant 121 : index
    %c0_353 = arith.constant 0 : index
    %967 = vector.load %arg10[%c121, %c0_353] : memref<128x256xf32, #tpu.memory_space<vmem>>, vector<1x128xf32>
    %968 = vector.broadcast %967 : vector<1x128xf32> to vector<8x128xf32>
    %969 = arith.mulf %940, %968 : vector<8x128xf32>
    %970 = arith.addf %966, %969 : vector<8x128xf32>
    %c98 = arith.constant 98 : index
    %c0_354 = arith.constant 0 : index
    %971 = vector.load %arg10[%c98, %c0_354] : memref<128x256xf32, #tpu.memory_space<vmem>>, vector<1x128xf32>
    %972 = vector.broadcast %971 : vector<1x128xf32> to vector<8x128xf32>
    %973 = arith.mulf %925, %972 : vector<8x128xf32>
    %c106 = arith.constant 106 : index
    %c0_355 = arith.constant 0 : index
    %974 = vector.load %arg10[%c106, %c0_355] : memref<128x256xf32, #tpu.memory_space<vmem>>, vector<1x128xf32>
    %975 = vector.broadcast %974 : vector<1x128xf32> to vector<8x128xf32>
    %976 = arith.mulf %930, %975 : vector<8x128xf32>
    %977 = arith.addf %973, %976 : vector<8x128xf32>
    %c114 = arith.constant 114 : index
    %c0_356 = arith.constant 0 : index
    %978 = vector.load %arg10[%c114, %c0_356] : memref<128x256xf32, #tpu.memory_space<vmem>>, vector<1x128xf32>
    %979 = vector.broadcast %978 : vector<1x128xf32> to vector<8x128xf32>
    %980 = arith.mulf %935, %979 : vector<8x128xf32>
    %981 = arith.addf %977, %980 : vector<8x128xf32>
    %c122 = arith.constant 122 : index
    %c0_357 = arith.constant 0 : index
    %982 = vector.load %arg10[%c122, %c0_357] : memref<128x256xf32, #tpu.memory_space<vmem>>, vector<1x128xf32>
    %983 = vector.broadcast %982 : vector<1x128xf32> to vector<8x128xf32>
    %984 = arith.mulf %940, %983 : vector<8x128xf32>
    %985 = arith.addf %981, %984 : vector<8x128xf32>
    %c99 = arith.constant 99 : index
    %c0_358 = arith.constant 0 : index
    %986 = vector.load %arg10[%c99, %c0_358] : memref<128x256xf32, #tpu.memory_space<vmem>>, vector<1x128xf32>
    %987 = vector.broadcast %986 : vector<1x128xf32> to vector<8x128xf32>
    %988 = arith.mulf %925, %987 : vector<8x128xf32>
    %c107 = arith.constant 107 : index
    %c0_359 = arith.constant 0 : index
    %989 = vector.load %arg10[%c107, %c0_359] : memref<128x256xf32, #tpu.memory_space<vmem>>, vector<1x128xf32>
    %990 = vector.broadcast %989 : vector<1x128xf32> to vector<8x128xf32>
    %991 = arith.mulf %930, %990 : vector<8x128xf32>
    %992 = arith.addf %988, %991 : vector<8x128xf32>
    %c115 = arith.constant 115 : index
    %c0_360 = arith.constant 0 : index
    %993 = vector.load %arg10[%c115, %c0_360] : memref<128x256xf32, #tpu.memory_space<vmem>>, vector<1x128xf32>
    %994 = vector.broadcast %993 : vector<1x128xf32> to vector<8x128xf32>
    %995 = arith.mulf %935, %994 : vector<8x128xf32>
    %996 = arith.addf %992, %995 : vector<8x128xf32>
    %c123 = arith.constant 123 : index
    %c0_361 = arith.constant 0 : index
    %997 = vector.load %arg10[%c123, %c0_361] : memref<128x256xf32, #tpu.memory_space<vmem>>, vector<1x128xf32>
    %998 = vector.broadcast %997 : vector<1x128xf32> to vector<8x128xf32>
    %999 = arith.mulf %940, %998 : vector<8x128xf32>
    %1000 = arith.addf %996, %999 : vector<8x128xf32>
    %c100 = arith.constant 100 : index
    %c0_362 = arith.constant 0 : index
    %1001 = vector.load %arg10[%c100, %c0_362] : memref<128x256xf32, #tpu.memory_space<vmem>>, vector<1x128xf32>
    %1002 = vector.broadcast %1001 : vector<1x128xf32> to vector<8x128xf32>
    %1003 = arith.mulf %925, %1002 : vector<8x128xf32>
    %c108 = arith.constant 108 : index
    %c0_363 = arith.constant 0 : index
    %1004 = vector.load %arg10[%c108, %c0_363] : memref<128x256xf32, #tpu.memory_space<vmem>>, vector<1x128xf32>
    %1005 = vector.broadcast %1004 : vector<1x128xf32> to vector<8x128xf32>
    %1006 = arith.mulf %930, %1005 : vector<8x128xf32>
    %1007 = arith.addf %1003, %1006 : vector<8x128xf32>
    %c116 = arith.constant 116 : index
    %c0_364 = arith.constant 0 : index
    %1008 = vector.load %arg10[%c116, %c0_364] : memref<128x256xf32, #tpu.memory_space<vmem>>, vector<1x128xf32>
    %1009 = vector.broadcast %1008 : vector<1x128xf32> to vector<8x128xf32>
    %1010 = arith.mulf %935, %1009 : vector<8x128xf32>
    %1011 = arith.addf %1007, %1010 : vector<8x128xf32>
    %c124 = arith.constant 124 : index
    %c0_365 = arith.constant 0 : index
    %1012 = vector.load %arg10[%c124, %c0_365] : memref<128x256xf32, #tpu.memory_space<vmem>>, vector<1x128xf32>
    %1013 = vector.broadcast %1012 : vector<1x128xf32> to vector<8x128xf32>
    %1014 = arith.mulf %940, %1013 : vector<8x128xf32>
    %1015 = arith.addf %1011, %1014 : vector<8x128xf32>
    %c101 = arith.constant 101 : index
    %c0_366 = arith.constant 0 : index
    %1016 = vector.load %arg10[%c101, %c0_366] : memref<128x256xf32, #tpu.memory_space<vmem>>, vector<1x128xf32>
    %1017 = vector.broadcast %1016 : vector<1x128xf32> to vector<8x128xf32>
    %1018 = arith.mulf %925, %1017 : vector<8x128xf32>
    %c109 = arith.constant 109 : index
    %c0_367 = arith.constant 0 : index
    %1019 = vector.load %arg10[%c109, %c0_367] : memref<128x256xf32, #tpu.memory_space<vmem>>, vector<1x128xf32>
    %1020 = vector.broadcast %1019 : vector<1x128xf32> to vector<8x128xf32>
    %1021 = arith.mulf %930, %1020 : vector<8x128xf32>
    %1022 = arith.addf %1018, %1021 : vector<8x128xf32>
    %c117 = arith.constant 117 : index
    %c0_368 = arith.constant 0 : index
    %1023 = vector.load %arg10[%c117, %c0_368] : memref<128x256xf32, #tpu.memory_space<vmem>>, vector<1x128xf32>
    %1024 = vector.broadcast %1023 : vector<1x128xf32> to vector<8x128xf32>
    %1025 = arith.mulf %935, %1024 : vector<8x128xf32>
    %1026 = arith.addf %1022, %1025 : vector<8x128xf32>
    %c125 = arith.constant 125 : index
    %c0_369 = arith.constant 0 : index
    %1027 = vector.load %arg10[%c125, %c0_369] : memref<128x256xf32, #tpu.memory_space<vmem>>, vector<1x128xf32>
    %1028 = vector.broadcast %1027 : vector<1x128xf32> to vector<8x128xf32>
    %1029 = arith.mulf %940, %1028 : vector<8x128xf32>
    %1030 = arith.addf %1026, %1029 : vector<8x128xf32>
    %c102 = arith.constant 102 : index
    %c0_370 = arith.constant 0 : index
    %1031 = vector.load %arg10[%c102, %c0_370] : memref<128x256xf32, #tpu.memory_space<vmem>>, vector<1x128xf32>
    %1032 = vector.broadcast %1031 : vector<1x128xf32> to vector<8x128xf32>
    %1033 = arith.mulf %925, %1032 : vector<8x128xf32>
    %c110 = arith.constant 110 : index
    %c0_371 = arith.constant 0 : index
    %1034 = vector.load %arg10[%c110, %c0_371] : memref<128x256xf32, #tpu.memory_space<vmem>>, vector<1x128xf32>
    %1035 = vector.broadcast %1034 : vector<1x128xf32> to vector<8x128xf32>
    %1036 = arith.mulf %930, %1035 : vector<8x128xf32>
    %1037 = arith.addf %1033, %1036 : vector<8x128xf32>
    %c118 = arith.constant 118 : index
    %c0_372 = arith.constant 0 : index
    %1038 = vector.load %arg10[%c118, %c0_372] : memref<128x256xf32, #tpu.memory_space<vmem>>, vector<1x128xf32>
    %1039 = vector.broadcast %1038 : vector<1x128xf32> to vector<8x128xf32>
    %1040 = arith.mulf %935, %1039 : vector<8x128xf32>
    %1041 = arith.addf %1037, %1040 : vector<8x128xf32>
    %c126 = arith.constant 126 : index
    %c0_373 = arith.constant 0 : index
    %1042 = vector.load %arg10[%c126, %c0_373] : memref<128x256xf32, #tpu.memory_space<vmem>>, vector<1x128xf32>
    %1043 = vector.broadcast %1042 : vector<1x128xf32> to vector<8x128xf32>
    %1044 = arith.mulf %940, %1043 : vector<8x128xf32>
    %1045 = arith.addf %1041, %1044 : vector<8x128xf32>
    %c103 = arith.constant 103 : index
    %c0_374 = arith.constant 0 : index
    %1046 = vector.load %arg10[%c103, %c0_374] : memref<128x256xf32, #tpu.memory_space<vmem>>, vector<1x128xf32>
    %1047 = vector.broadcast %1046 : vector<1x128xf32> to vector<8x128xf32>
    %1048 = arith.mulf %925, %1047 : vector<8x128xf32>
    %c111 = arith.constant 111 : index
    %c0_375 = arith.constant 0 : index
    %1049 = vector.load %arg10[%c111, %c0_375] : memref<128x256xf32, #tpu.memory_space<vmem>>, vector<1x128xf32>
    %1050 = vector.broadcast %1049 : vector<1x128xf32> to vector<8x128xf32>
    %1051 = arith.mulf %930, %1050 : vector<8x128xf32>
    %1052 = arith.addf %1048, %1051 : vector<8x128xf32>
    %c119 = arith.constant 119 : index
    %c0_376 = arith.constant 0 : index
    %1053 = vector.load %arg10[%c119, %c0_376] : memref<128x256xf32, #tpu.memory_space<vmem>>, vector<1x128xf32>
    %1054 = vector.broadcast %1053 : vector<1x128xf32> to vector<8x128xf32>
    %1055 = arith.mulf %935, %1054 : vector<8x128xf32>
    %1056 = arith.addf %1052, %1055 : vector<8x128xf32>
    %c127 = arith.constant 127 : index
    %c0_377 = arith.constant 0 : index
    %1057 = vector.load %arg10[%c127, %c0_377] : memref<128x256xf32, #tpu.memory_space<vmem>>, vector<1x128xf32>
    %1058 = vector.broadcast %1057 : vector<1x128xf32> to vector<8x128xf32>
    %1059 = arith.mulf %940, %1058 : vector<8x128xf32>
    %1060 = arith.addf %1056, %1059 : vector<8x128xf32>
    %1061 = arith.maximumf %955, %970 : vector<8x128xf32>
    %1062 = arith.maximumf %1061, %985 : vector<8x128xf32>
    %1063 = arith.maximumf %1062, %1000 : vector<8x128xf32>
    %1064 = arith.maximumf %1063, %1015 : vector<8x128xf32>
    %1065 = arith.maximumf %1064, %1030 : vector<8x128xf32>
    %1066 = arith.maximumf %1065, %1045 : vector<8x128xf32>
    %1067 = arith.maximumf %1066, %1060 : vector<8x128xf32>
    %1068 = arith.subf %955, %1067 : vector<8x128xf32>
    %1069 = math.exp %1068 : vector<8x128xf32>
    %1070 = arith.subf %970, %1067 : vector<8x128xf32>
    %1071 = math.exp %1070 : vector<8x128xf32>
    %1072 = arith.subf %985, %1067 : vector<8x128xf32>
    %1073 = math.exp %1072 : vector<8x128xf32>
    %1074 = arith.subf %1000, %1067 : vector<8x128xf32>
    %1075 = math.exp %1074 : vector<8x128xf32>
    %1076 = arith.subf %1015, %1067 : vector<8x128xf32>
    %1077 = math.exp %1076 : vector<8x128xf32>
    %1078 = arith.subf %1030, %1067 : vector<8x128xf32>
    %1079 = math.exp %1078 : vector<8x128xf32>
    %1080 = arith.subf %1045, %1067 : vector<8x128xf32>
    %1081 = math.exp %1080 : vector<8x128xf32>
    %1082 = arith.subf %1060, %1067 : vector<8x128xf32>
    %1083 = math.exp %1082 : vector<8x128xf32>
    %1084 = arith.addf %1069, %1071 : vector<8x128xf32>
    %1085 = arith.addf %1084, %1073 : vector<8x128xf32>
    %1086 = arith.addf %1085, %1075 : vector<8x128xf32>
    %1087 = arith.addf %1086, %1077 : vector<8x128xf32>
    %1088 = arith.addf %1087, %1079 : vector<8x128xf32>
    %1089 = arith.addf %1088, %1081 : vector<8x128xf32>
    %1090 = arith.addf %1089, %1083 : vector<8x128xf32>
    %1091 = tpu.reciprocal %1090 {approx = true} : vector<8x128xf32> -> vector<8x128xf32>
    %c96_378 = arith.constant 96 : index
    %c0_379 = arith.constant 0 : index
    %1092 = vector.load %arg11[%c96_378, %c0_379] : memref<128x256xf32, #tpu.memory_space<vmem>>, vector<1x128xf32>
    %1093 = vector.broadcast %1092 : vector<1x128xf32> to vector<8x128xf32>
    %1094 = arith.mulf %1069, %1093 : vector<8x128xf32>
    %c97_380 = arith.constant 97 : index
    %c0_381 = arith.constant 0 : index
    %1095 = vector.load %arg11[%c97_380, %c0_381] : memref<128x256xf32, #tpu.memory_space<vmem>>, vector<1x128xf32>
    %1096 = vector.broadcast %1095 : vector<1x128xf32> to vector<8x128xf32>
    %1097 = arith.mulf %1071, %1096 : vector<8x128xf32>
    %1098 = arith.addf %1094, %1097 : vector<8x128xf32>
    %c98_382 = arith.constant 98 : index
    %c0_383 = arith.constant 0 : index
    %1099 = vector.load %arg11[%c98_382, %c0_383] : memref<128x256xf32, #tpu.memory_space<vmem>>, vector<1x128xf32>
    %1100 = vector.broadcast %1099 : vector<1x128xf32> to vector<8x128xf32>
    %1101 = arith.mulf %1073, %1100 : vector<8x128xf32>
    %1102 = arith.addf %1098, %1101 : vector<8x128xf32>
    %c99_384 = arith.constant 99 : index
    %c0_385 = arith.constant 0 : index
    %1103 = vector.load %arg11[%c99_384, %c0_385] : memref<128x256xf32, #tpu.memory_space<vmem>>, vector<1x128xf32>
    %1104 = vector.broadcast %1103 : vector<1x128xf32> to vector<8x128xf32>
    %1105 = arith.mulf %1075, %1104 : vector<8x128xf32>
    %1106 = arith.addf %1102, %1105 : vector<8x128xf32>
    %c100_386 = arith.constant 100 : index
    %c0_387 = arith.constant 0 : index
    %1107 = vector.load %arg11[%c100_386, %c0_387] : memref<128x256xf32, #tpu.memory_space<vmem>>, vector<1x128xf32>
    %1108 = vector.broadcast %1107 : vector<1x128xf32> to vector<8x128xf32>
    %1109 = arith.mulf %1077, %1108 : vector<8x128xf32>
    %1110 = arith.addf %1106, %1109 : vector<8x128xf32>
    %c101_388 = arith.constant 101 : index
    %c0_389 = arith.constant 0 : index
    %1111 = vector.load %arg11[%c101_388, %c0_389] : memref<128x256xf32, #tpu.memory_space<vmem>>, vector<1x128xf32>
    %1112 = vector.broadcast %1111 : vector<1x128xf32> to vector<8x128xf32>
    %1113 = arith.mulf %1079, %1112 : vector<8x128xf32>
    %1114 = arith.addf %1110, %1113 : vector<8x128xf32>
    %c102_390 = arith.constant 102 : index
    %c0_391 = arith.constant 0 : index
    %1115 = vector.load %arg11[%c102_390, %c0_391] : memref<128x256xf32, #tpu.memory_space<vmem>>, vector<1x128xf32>
    %1116 = vector.broadcast %1115 : vector<1x128xf32> to vector<8x128xf32>
    %1117 = arith.mulf %1081, %1116 : vector<8x128xf32>
    %1118 = arith.addf %1114, %1117 : vector<8x128xf32>
    %c103_392 = arith.constant 103 : index
    %c0_393 = arith.constant 0 : index
    %1119 = vector.load %arg11[%c103_392, %c0_393] : memref<128x256xf32, #tpu.memory_space<vmem>>, vector<1x128xf32>
    %1120 = vector.broadcast %1119 : vector<1x128xf32> to vector<8x128xf32>
    %1121 = arith.mulf %1083, %1120 : vector<8x128xf32>
    %1122 = arith.addf %1118, %1121 : vector<8x128xf32>
    %1123 = arith.mulf %1122, %1091 : vector<8x128xf32>
    %c96_394 = arith.constant 96 : index
    %c0_395 = arith.constant 0 : index
    %1124 = vector.load %arg12[%c96_394, %c0_395] : memref<128x256xf32, #tpu.memory_space<vmem>>, vector<8x128xf32>
    tpu.vector_store %arg12[%c96_394, %c0_395], %1123 {strides = array<i32>} : memref<128x256xf32, #tpu.memory_space<vmem>>, vector<8x128xf32>,
    %c104_396 = arith.constant 104 : index
    %c0_397 = arith.constant 0 : index
    %1125 = vector.load %arg11[%c104_396, %c0_397] : memref<128x256xf32, #tpu.memory_space<vmem>>, vector<1x128xf32>
    %1126 = vector.broadcast %1125 : vector<1x128xf32> to vector<8x128xf32>
    %1127 = arith.mulf %1069, %1126 : vector<8x128xf32>
    %c105_398 = arith.constant 105 : index
    %c0_399 = arith.constant 0 : index
    %1128 = vector.load %arg11[%c105_398, %c0_399] : memref<128x256xf32, #tpu.memory_space<vmem>>, vector<1x128xf32>
    %1129 = vector.broadcast %1128 : vector<1x128xf32> to vector<8x128xf32>
    %1130 = arith.mulf %1071, %1129 : vector<8x128xf32>
    %1131 = arith.addf %1127, %1130 : vector<8x128xf32>
    %c106_400 = arith.constant 106 : index
    %c0_401 = arith.constant 0 : index
    %1132 = vector.load %arg11[%c106_400, %c0_401] : memref<128x256xf32, #tpu.memory_space<vmem>>, vector<1x128xf32>
    %1133 = vector.broadcast %1132 : vector<1x128xf32> to vector<8x128xf32>
    %1134 = arith.mulf %1073, %1133 : vector<8x128xf32>
    %1135 = arith.addf %1131, %1134 : vector<8x128xf32>
    %c107_402 = arith.constant 107 : index
    %c0_403 = arith.constant 0 : index
    %1136 = vector.load %arg11[%c107_402, %c0_403] : memref<128x256xf32, #tpu.memory_space<vmem>>, vector<1x128xf32>
    %1137 = vector.broadcast %1136 : vector<1x128xf32> to vector<8x128xf32>
    %1138 = arith.mulf %1075, %1137 : vector<8x128xf32>
    %1139 = arith.addf %1135, %1138 : vector<8x128xf32>
    %c108_404 = arith.constant 108 : index
    %c0_405 = arith.constant 0 : index
    %1140 = vector.load %arg11[%c108_404, %c0_405] : memref<128x256xf32, #tpu.memory_space<vmem>>, vector<1x128xf32>
    %1141 = vector.broadcast %1140 : vector<1x128xf32> to vector<8x128xf32>
    %1142 = arith.mulf %1077, %1141 : vector<8x128xf32>
    %1143 = arith.addf %1139, %1142 : vector<8x128xf32>
    %c109_406 = arith.constant 109 : index
    %c0_407 = arith.constant 0 : index
    %1144 = vector.load %arg11[%c109_406, %c0_407] : memref<128x256xf32, #tpu.memory_space<vmem>>, vector<1x128xf32>
    %1145 = vector.broadcast %1144 : vector<1x128xf32> to vector<8x128xf32>
    %1146 = arith.mulf %1079, %1145 : vector<8x128xf32>
    %1147 = arith.addf %1143, %1146 : vector<8x128xf32>
    %c110_408 = arith.constant 110 : index
    %c0_409 = arith.constant 0 : index
    %1148 = vector.load %arg11[%c110_408, %c0_409] : memref<128x256xf32, #tpu.memory_space<vmem>>, vector<1x128xf32>
    %1149 = vector.broadcast %1148 : vector<1x128xf32> to vector<8x128xf32>
    %1150 = arith.mulf %1081, %1149 : vector<8x128xf32>
    %1151 = arith.addf %1147, %1150 : vector<8x128xf32>
    %c111_410 = arith.constant 111 : index
    %c0_411 = arith.constant 0 : index
    %1152 = vector.load %arg11[%c111_410, %c0_411] : memref<128x256xf32, #tpu.memory_space<vmem>>, vector<1x128xf32>
    %1153 = vector.broadcast %1152 : vector<1x128xf32> to vector<8x128xf32>
    %1154 = arith.mulf %1083, %1153 : vector<8x128xf32>
    %1155 = arith.addf %1151, %1154 : vector<8x128xf32>
    %1156 = arith.mulf %1155, %1091 : vector<8x128xf32>
    %c104_412 = arith.constant 104 : index
    %c0_413 = arith.constant 0 : index
    %1157 = vector.load %arg12[%c104_412, %c0_413] : memref<128x256xf32, #tpu.memory_space<vmem>>, vector<8x128xf32>
    tpu.vector_store %arg12[%c104_412, %c0_413], %1156 {strides = array<i32>} : memref<128x256xf32, #tpu.memory_space<vmem>>, vector<8x128xf32>,
    %c112_414 = arith.constant 112 : index
    %c0_415 = arith.constant 0 : index
    %1158 = vector.load %arg11[%c112_414, %c0_415] : memref<128x256xf32, #tpu.memory_space<vmem>>, vector<1x128xf32>
    %1159 = vector.broadcast %1158 : vector<1x128xf32> to vector<8x128xf32>
    %1160 = arith.mulf %1069, %1159 : vector<8x128xf32>
    %c113_416 = arith.constant 113 : index
    %c0_417 = arith.constant 0 : index
    %1161 = vector.load %arg11[%c113_416, %c0_417] : memref<128x256xf32, #tpu.memory_space<vmem>>, vector<1x128xf32>
    %1162 = vector.broadcast %1161 : vector<1x128xf32> to vector<8x128xf32>
    %1163 = arith.mulf %1071, %1162 : vector<8x128xf32>
    %1164 = arith.addf %1160, %1163 : vector<8x128xf32>
    %c114_418 = arith.constant 114 : index
    %c0_419 = arith.constant 0 : index
    %1165 = vector.load %arg11[%c114_418, %c0_419] : memref<128x256xf32, #tpu.memory_space<vmem>>, vector<1x128xf32>
    %1166 = vector.broadcast %1165 : vector<1x128xf32> to vector<8x128xf32>
    %1167 = arith.mulf %1073, %1166 : vector<8x128xf32>
    %1168 = arith.addf %1164, %1167 : vector<8x128xf32>
    %c115_420 = arith.constant 115 : index
    %c0_421 = arith.constant 0 : index
    %1169 = vector.load %arg11[%c115_420, %c0_421] : memref<128x256xf32, #tpu.memory_space<vmem>>, vector<1x128xf32>
    %1170 = vector.broadcast %1169 : vector<1x128xf32> to vector<8x128xf32>
    %1171 = arith.mulf %1075, %1170 : vector<8x128xf32>
    %1172 = arith.addf %1168, %1171 : vector<8x128xf32>
    %c116_422 = arith.constant 116 : index
    %c0_423 = arith.constant 0 : index
    %1173 = vector.load %arg11[%c116_422, %c0_423] : memref<128x256xf32, #tpu.memory_space<vmem>>, vector<1x128xf32>
    %1174 = vector.broadcast %1173 : vector<1x128xf32> to vector<8x128xf32>
    %1175 = arith.mulf %1077, %1174 : vector<8x128xf32>
    %1176 = arith.addf %1172, %1175 : vector<8x128xf32>
    %c117_424 = arith.constant 117 : index
    %c0_425 = arith.constant 0 : index
    %1177 = vector.load %arg11[%c117_424, %c0_425] : memref<128x256xf32, #tpu.memory_space<vmem>>, vector<1x128xf32>
    %1178 = vector.broadcast %1177 : vector<1x128xf32> to vector<8x128xf32>
    %1179 = arith.mulf %1079, %1178 : vector<8x128xf32>
    %1180 = arith.addf %1176, %1179 : vector<8x128xf32>
    %c118_426 = arith.constant 118 : index
    %c0_427 = arith.constant 0 : index
    %1181 = vector.load %arg11[%c118_426, %c0_427] : memref<128x256xf32, #tpu.memory_space<vmem>>, vector<1x128xf32>
    %1182 = vector.broadcast %1181 : vector<1x128xf32> to vector<8x128xf32>
    %1183 = arith.mulf %1081, %1182 : vector<8x128xf32>
    %1184 = arith.addf %1180, %1183 : vector<8x128xf32>
    %c119_428 = arith.constant 119 : index
    %c0_429 = arith.constant 0 : index
    %1185 = vector.load %arg11[%c119_428, %c0_429] : memref<128x256xf32, #tpu.memory_space<vmem>>, vector<1x128xf32>
    %1186 = vector.broadcast %1185 : vector<1x128xf32> to vector<8x128xf32>
    %1187 = arith.mulf %1083, %1186 : vector<8x128xf32>
    %1188 = arith.addf %1184, %1187 : vector<8x128xf32>
    %1189 = arith.mulf %1188, %1091 : vector<8x128xf32>
    %c112_430 = arith.constant 112 : index
    %c0_431 = arith.constant 0 : index
    %1190 = vector.load %arg12[%c112_430, %c0_431] : memref<128x256xf32, #tpu.memory_space<vmem>>, vector<8x128xf32>
    tpu.vector_store %arg12[%c112_430, %c0_431], %1189 {strides = array<i32>} : memref<128x256xf32, #tpu.memory_space<vmem>>, vector<8x128xf32>,
    %c120_432 = arith.constant 120 : index
    %c0_433 = arith.constant 0 : index
    %1191 = vector.load %arg11[%c120_432, %c0_433] : memref<128x256xf32, #tpu.memory_space<vmem>>, vector<1x128xf32>
    %1192 = vector.broadcast %1191 : vector<1x128xf32> to vector<8x128xf32>
    %1193 = arith.mulf %1069, %1192 : vector<8x128xf32>
    %c121_434 = arith.constant 121 : index
    %c0_435 = arith.constant 0 : index
    %1194 = vector.load %arg11[%c121_434, %c0_435] : memref<128x256xf32, #tpu.memory_space<vmem>>, vector<1x128xf32>
    %1195 = vector.broadcast %1194 : vector<1x128xf32> to vector<8x128xf32>
    %1196 = arith.mulf %1071, %1195 : vector<8x128xf32>
    %1197 = arith.addf %1193, %1196 : vector<8x128xf32>
    %c122_436 = arith.constant 122 : index
    %c0_437 = arith.constant 0 : index
    %1198 = vector.load %arg11[%c122_436, %c0_437] : memref<128x256xf32, #tpu.memory_space<vmem>>, vector<1x128xf32>
    %1199 = vector.broadcast %1198 : vector<1x128xf32> to vector<8x128xf32>
    %1200 = arith.mulf %1073, %1199 : vector<8x128xf32>
    %1201 = arith.addf %1197, %1200 : vector<8x128xf32>
    %c123_438 = arith.constant 123 : index
    %c0_439 = arith.constant 0 : index
    %1202 = vector.load %arg11[%c123_438, %c0_439] : memref<128x256xf32, #tpu.memory_space<vmem>>, vector<1x128xf32>
    %1203 = vector.broadcast %1202 : vector<1x128xf32> to vector<8x128xf32>
    %1204 = arith.mulf %1075, %1203 : vector<8x128xf32>
    %1205 = arith.addf %1201, %1204 : vector<8x128xf32>
    %c124_440 = arith.constant 124 : index
    %c0_441 = arith.constant 0 : index
    %1206 = vector.load %arg11[%c124_440, %c0_441] : memref<128x256xf32, #tpu.memory_space<vmem>>, vector<1x128xf32>
    %1207 = vector.broadcast %1206 : vector<1x128xf32> to vector<8x128xf32>
    %1208 = arith.mulf %1077, %1207 : vector<8x128xf32>
    %1209 = arith.addf %1205, %1208 : vector<8x128xf32>
    %c125_442 = arith.constant 125 : index
    %c0_443 = arith.constant 0 : index
    %1210 = vector.load %arg11[%c125_442, %c0_443] : memref<128x256xf32, #tpu.memory_space<vmem>>, vector<1x128xf32>
    %1211 = vector.broadcast %1210 : vector<1x128xf32> to vector<8x128xf32>
    %1212 = arith.mulf %1079, %1211 : vector<8x128xf32>
    %1213 = arith.addf %1209, %1212 : vector<8x128xf32>
    %c126_444 = arith.constant 126 : index
    %c0_445 = arith.constant 0 : index
    %1214 = vector.load %arg11[%c126_444, %c0_445] : memref<128x256xf32, #tpu.memory_space<vmem>>, vector<1x128xf32>
    %1215 = vector.broadcast %1214 : vector<1x128xf32> to vector<8x128xf32>
    %1216 = arith.mulf %1081, %1215 : vector<8x128xf32>
    %1217 = arith.addf %1213, %1216 : vector<8x128xf32>
    %c127_446 = arith.constant 127 : index
    %c0_447 = arith.constant 0 : index
    %1218 = vector.load %arg11[%c127_446, %c0_447] : memref<128x256xf32, #tpu.memory_space<vmem>>, vector<1x128xf32>
    %1219 = vector.broadcast %1218 : vector<1x128xf32> to vector<8x128xf32>
    %1220 = arith.mulf %1083, %1219 : vector<8x128xf32>
    %1221 = arith.addf %1217, %1220 : vector<8x128xf32>
    %1222 = arith.mulf %1221, %1091 : vector<8x128xf32>
    %c120_448 = arith.constant 120 : index
    %c0_449 = arith.constant 0 : index
    %1223 = vector.load %arg12[%c120_448, %c0_449] : memref<128x256xf32, #tpu.memory_space<vmem>>, vector<8x128xf32>
    tpu.vector_store %arg12[%c120_448, %c0_449], %1222 {strides = array<i32>} : memref<128x256xf32, #tpu.memory_space<vmem>>, vector<8x128xf32>,
    %c0_450 = arith.constant 0 : index
    %c0_451 = arith.constant 0 : index
    %1224 = vector.load %arg5[%c0_450, %c0_451] : memref<128x128xbf16, #tpu.memory_space<vmem>>, vector<128x128xbf16>
    %c0_452 = arith.constant 0 : index
    %c128 = arith.constant 128 : index
    %1225 = vector.load %arg2[%c0_452, %c128] : memref<128x256xbf16, #tpu.memory_space<vmem>>, vector<128x128xbf16>
    %cst_453 = arith.constant dense<0.000000e+00> : vector<128x128xf32>
    %1226 = tpu.matmul %1224, %1225, %cst_453 {dimension_numbers = #tpu.dot_dimension_numbers<[1], [0], [0], [1], [0, 0, 1, 1], [], []>} : vector<128x128xbf16>, vector<128x128xbf16>, vector<128x128xf32> -> vector<128x128xf32>
    %1227 = vector.shape_cast %1226 : vector<128x128xf32> to vector<16x8x128xf32>
    %1228 = vector.extract_strided_slice %1227 {offsets = [0, 0, 0], sizes = [1, 8, 128], strides = [1, 1, 1]} : vector<16x8x128xf32> to vector<1x8x128xf32>
    %1229 = vector.shape_cast %1228 : vector<1x8x128xf32> to vector<8x128xf32>
    %c0_454 = arith.constant 0 : index
    %1230 = memref.load %arg1[%c0_454] : memref<16xf32, #tpu.memory_space<smem>>
    %1231 = vector.broadcast %1230 : f32 to vector<8x128xf32>
    %1232 = arith.addf %1229, %1231 : vector<8x128xf32>
    %1233 = vector.extract_strided_slice %1227 {offsets = [1, 0, 0], sizes = [1, 8, 128], strides = [1, 1, 1]} : vector<16x8x128xf32> to vector<1x8x128xf32>
    %1234 = vector.shape_cast %1233 : vector<1x8x128xf32> to vector<8x128xf32>
    %c1_455 = arith.constant 1 : index
    %1235 = memref.load %arg1[%c1_455] : memref<16xf32, #tpu.memory_space<smem>>
    %1236 = vector.broadcast %1235 : f32 to vector<8x128xf32>
    %1237 = arith.addf %1234, %1236 : vector<8x128xf32>
    %1238 = vector.extract_strided_slice %1227 {offsets = [2, 0, 0], sizes = [1, 8, 128], strides = [1, 1, 1]} : vector<16x8x128xf32> to vector<1x8x128xf32>
    %1239 = vector.shape_cast %1238 : vector<1x8x128xf32> to vector<8x128xf32>
    %c2_456 = arith.constant 2 : index
    %1240 = memref.load %arg1[%c2_456] : memref<16xf32, #tpu.memory_space<smem>>
    %1241 = vector.broadcast %1240 : f32 to vector<8x128xf32>
    %1242 = arith.addf %1239, %1241 : vector<8x128xf32>
    %1243 = vector.extract_strided_slice %1227 {offsets = [3, 0, 0], sizes = [1, 8, 128], strides = [1, 1, 1]} : vector<16x8x128xf32> to vector<1x8x128xf32>
    %1244 = vector.shape_cast %1243 : vector<1x8x128xf32> to vector<8x128xf32>
    %c3_457 = arith.constant 3 : index
    %1245 = memref.load %arg1[%c3_457] : memref<16xf32, #tpu.memory_space<smem>>
    %1246 = vector.broadcast %1245 : f32 to vector<8x128xf32>
    %1247 = arith.addf %1244, %1246 : vector<8x128xf32>
    %c0_458 = arith.constant 0 : index
    %c128_459 = arith.constant 128 : index
    %1248 = vector.load %arg10[%c0_458, %c128_459] : memref<128x256xf32, #tpu.memory_space<vmem>>, vector<1x128xf32>
    %1249 = vector.broadcast %1248 : vector<1x128xf32> to vector<8x128xf32>
    %1250 = arith.mulf %1232, %1249 : vector<8x128xf32>
    %c8_460 = arith.constant 8 : index
    %c128_461 = arith.constant 128 : index
    %1251 = vector.load %arg10[%c8_460, %c128_461] : memref<128x256xf32, #tpu.memory_space<vmem>>, vector<1x128xf32>
    %1252 = vector.broadcast %1251 : vector<1x128xf32> to vector<8x128xf32>
    %1253 = arith.mulf %1237, %1252 : vector<8x128xf32>
    %1254 = arith.addf %1250, %1253 : vector<8x128xf32>
    %c16_462 = arith.constant 16 : index
    %c128_463 = arith.constant 128 : index
    %1255 = vector.load %arg10[%c16_462, %c128_463] : memref<128x256xf32, #tpu.memory_space<vmem>>, vector<1x128xf32>
    %1256 = vector.broadcast %1255 : vector<1x128xf32> to vector<8x128xf32>
    %1257 = arith.mulf %1242, %1256 : vector<8x128xf32>
    %1258 = arith.addf %1254, %1257 : vector<8x128xf32>
    %c24_464 = arith.constant 24 : index
    %c128_465 = arith.constant 128 : index
    %1259 = vector.load %arg10[%c24_464, %c128_465] : memref<128x256xf32, #tpu.memory_space<vmem>>, vector<1x128xf32>
    %1260 = vector.broadcast %1259 : vector<1x128xf32> to vector<8x128xf32>
    %1261 = arith.mulf %1247, %1260 : vector<8x128xf32>
    %1262 = arith.addf %1258, %1261 : vector<8x128xf32>
    %c1_466 = arith.constant 1 : index
    %c128_467 = arith.constant 128 : index
    %1263 = vector.load %arg10[%c1_466, %c128_467] : memref<128x256xf32, #tpu.memory_space<vmem>>, vector<1x128xf32>
    %1264 = vector.broadcast %1263 : vector<1x128xf32> to vector<8x128xf32>
    %1265 = arith.mulf %1232, %1264 : vector<8x128xf32>
    %c9_468 = arith.constant 9 : index
    %c128_469 = arith.constant 128 : index
    %1266 = vector.load %arg10[%c9_468, %c128_469] : memref<128x256xf32, #tpu.memory_space<vmem>>, vector<1x128xf32>
    %1267 = vector.broadcast %1266 : vector<1x128xf32> to vector<8x128xf32>
    %1268 = arith.mulf %1237, %1267 : vector<8x128xf32>
    %1269 = arith.addf %1265, %1268 : vector<8x128xf32>
    %c17_470 = arith.constant 17 : index
    %c128_471 = arith.constant 128 : index
    %1270 = vector.load %arg10[%c17_470, %c128_471] : memref<128x256xf32, #tpu.memory_space<vmem>>, vector<1x128xf32>
    %1271 = vector.broadcast %1270 : vector<1x128xf32> to vector<8x128xf32>
    %1272 = arith.mulf %1242, %1271 : vector<8x128xf32>
    %1273 = arith.addf %1269, %1272 : vector<8x128xf32>
    %c25_472 = arith.constant 25 : index
    %c128_473 = arith.constant 128 : index
    %1274 = vector.load %arg10[%c25_472, %c128_473] : memref<128x256xf32, #tpu.memory_space<vmem>>, vector<1x128xf32>
    %1275 = vector.broadcast %1274 : vector<1x128xf32> to vector<8x128xf32>
    %1276 = arith.mulf %1247, %1275 : vector<8x128xf32>
    %1277 = arith.addf %1273, %1276 : vector<8x128xf32>
    %c2_474 = arith.constant 2 : index
    %c128_475 = arith.constant 128 : index
    %1278 = vector.load %arg10[%c2_474, %c128_475] : memref<128x256xf32, #tpu.memory_space<vmem>>, vector<1x128xf32>
    %1279 = vector.broadcast %1278 : vector<1x128xf32> to vector<8x128xf32>
    %1280 = arith.mulf %1232, %1279 : vector<8x128xf32>
    %c10_476 = arith.constant 10 : index
    %c128_477 = arith.constant 128 : index
    %1281 = vector.load %arg10[%c10_476, %c128_477] : memref<128x256xf32, #tpu.memory_space<vmem>>, vector<1x128xf32>
    %1282 = vector.broadcast %1281 : vector<1x128xf32> to vector<8x128xf32>
    %1283 = arith.mulf %1237, %1282 : vector<8x128xf32>
    %1284 = arith.addf %1280, %1283 : vector<8x128xf32>
    %c18_478 = arith.constant 18 : index
    %c128_479 = arith.constant 128 : index
    %1285 = vector.load %arg10[%c18_478, %c128_479] : memref<128x256xf32, #tpu.memory_space<vmem>>, vector<1x128xf32>
    %1286 = vector.broadcast %1285 : vector<1x128xf32> to vector<8x128xf32>
    %1287 = arith.mulf %1242, %1286 : vector<8x128xf32>
    %1288 = arith.addf %1284, %1287 : vector<8x128xf32>
    %c26_480 = arith.constant 26 : index
    %c128_481 = arith.constant 128 : index
    %1289 = vector.load %arg10[%c26_480, %c128_481] : memref<128x256xf32, #tpu.memory_space<vmem>>, vector<1x128xf32>
    %1290 = vector.broadcast %1289 : vector<1x128xf32> to vector<8x128xf32>
    %1291 = arith.mulf %1247, %1290 : vector<8x128xf32>
    %1292 = arith.addf %1288, %1291 : vector<8x128xf32>
    %c3_482 = arith.constant 3 : index
    %c128_483 = arith.constant 128 : index
    %1293 = vector.load %arg10[%c3_482, %c128_483] : memref<128x256xf32, #tpu.memory_space<vmem>>, vector<1x128xf32>
    %1294 = vector.broadcast %1293 : vector<1x128xf32> to vector<8x128xf32>
    %1295 = arith.mulf %1232, %1294 : vector<8x128xf32>
    %c11_484 = arith.constant 11 : index
    %c128_485 = arith.constant 128 : index
    %1296 = vector.load %arg10[%c11_484, %c128_485] : memref<128x256xf32, #tpu.memory_space<vmem>>, vector<1x128xf32>
    %1297 = vector.broadcast %1296 : vector<1x128xf32> to vector<8x128xf32>
    %1298 = arith.mulf %1237, %1297 : vector<8x128xf32>
    %1299 = arith.addf %1295, %1298 : vector<8x128xf32>
    %c19_486 = arith.constant 19 : index
    %c128_487 = arith.constant 128 : index
    %1300 = vector.load %arg10[%c19_486, %c128_487] : memref<128x256xf32, #tpu.memory_space<vmem>>, vector<1x128xf32>
    %1301 = vector.broadcast %1300 : vector<1x128xf32> to vector<8x128xf32>
    %1302 = arith.mulf %1242, %1301 : vector<8x128xf32>
    %1303 = arith.addf %1299, %1302 : vector<8x128xf32>
    %c27_488 = arith.constant 27 : index
    %c128_489 = arith.constant 128 : index
    %1304 = vector.load %arg10[%c27_488, %c128_489] : memref<128x256xf32, #tpu.memory_space<vmem>>, vector<1x128xf32>
    %1305 = vector.broadcast %1304 : vector<1x128xf32> to vector<8x128xf32>
    %1306 = arith.mulf %1247, %1305 : vector<8x128xf32>
    %1307 = arith.addf %1303, %1306 : vector<8x128xf32>
    %c4_490 = arith.constant 4 : index
    %c128_491 = arith.constant 128 : index
    %1308 = vector.load %arg10[%c4_490, %c128_491] : memref<128x256xf32, #tpu.memory_space<vmem>>, vector<1x128xf32>
    %1309 = vector.broadcast %1308 : vector<1x128xf32> to vector<8x128xf32>
    %1310 = arith.mulf %1232, %1309 : vector<8x128xf32>
    %c12_492 = arith.constant 12 : index
    %c128_493 = arith.constant 128 : index
    %1311 = vector.load %arg10[%c12_492, %c128_493] : memref<128x256xf32, #tpu.memory_space<vmem>>, vector<1x128xf32>
    %1312 = vector.broadcast %1311 : vector<1x128xf32> to vector<8x128xf32>
    %1313 = arith.mulf %1237, %1312 : vector<8x128xf32>
    %1314 = arith.addf %1310, %1313 : vector<8x128xf32>
    %c20_494 = arith.constant 20 : index
    %c128_495 = arith.constant 128 : index
    %1315 = vector.load %arg10[%c20_494, %c128_495] : memref<128x256xf32, #tpu.memory_space<vmem>>, vector<1x128xf32>
    %1316 = vector.broadcast %1315 : vector<1x128xf32> to vector<8x128xf32>
    %1317 = arith.mulf %1242, %1316 : vector<8x128xf32>
    %1318 = arith.addf %1314, %1317 : vector<8x128xf32>
    %c28_496 = arith.constant 28 : index
    %c128_497 = arith.constant 128 : index
    %1319 = vector.load %arg10[%c28_496, %c128_497] : memref<128x256xf32, #tpu.memory_space<vmem>>, vector<1x128xf32>
    %1320 = vector.broadcast %1319 : vector<1x128xf32> to vector<8x128xf32>
    %1321 = arith.mulf %1247, %1320 : vector<8x128xf32>
    %1322 = arith.addf %1318, %1321 : vector<8x128xf32>
    %c5_498 = arith.constant 5 : index
    %c128_499 = arith.constant 128 : index
    %1323 = vector.load %arg10[%c5_498, %c128_499] : memref<128x256xf32, #tpu.memory_space<vmem>>, vector<1x128xf32>
    %1324 = vector.broadcast %1323 : vector<1x128xf32> to vector<8x128xf32>
    %1325 = arith.mulf %1232, %1324 : vector<8x128xf32>
    %c13_500 = arith.constant 13 : index
    %c128_501 = arith.constant 128 : index
    %1326 = vector.load %arg10[%c13_500, %c128_501] : memref<128x256xf32, #tpu.memory_space<vmem>>, vector<1x128xf32>
    %1327 = vector.broadcast %1326 : vector<1x128xf32> to vector<8x128xf32>
    %1328 = arith.mulf %1237, %1327 : vector<8x128xf32>
    %1329 = arith.addf %1325, %1328 : vector<8x128xf32>
    %c21_502 = arith.constant 21 : index
    %c128_503 = arith.constant 128 : index
    %1330 = vector.load %arg10[%c21_502, %c128_503] : memref<128x256xf32, #tpu.memory_space<vmem>>, vector<1x128xf32>
    %1331 = vector.broadcast %1330 : vector<1x128xf32> to vector<8x128xf32>
    %1332 = arith.mulf %1242, %1331 : vector<8x128xf32>
    %1333 = arith.addf %1329, %1332 : vector<8x128xf32>
    %c29_504 = arith.constant 29 : index
    %c128_505 = arith.constant 128 : index
    %1334 = vector.load %arg10[%c29_504, %c128_505] : memref<128x256xf32, #tpu.memory_space<vmem>>, vector<1x128xf32>
    %1335 = vector.broadcast %1334 : vector<1x128xf32> to vector<8x128xf32>
    %1336 = arith.mulf %1247, %1335 : vector<8x128xf32>
    %1337 = arith.addf %1333, %1336 : vector<8x128xf32>
    %c6_506 = arith.constant 6 : index
    %c128_507 = arith.constant 128 : index
    %1338 = vector.load %arg10[%c6_506, %c128_507] : memref<128x256xf32, #tpu.memory_space<vmem>>, vector<1x128xf32>
    %1339 = vector.broadcast %1338 : vector<1x128xf32> to vector<8x128xf32>
    %1340 = arith.mulf %1232, %1339 : vector<8x128xf32>
    %c14_508 = arith.constant 14 : index
    %c128_509 = arith.constant 128 : index
    %1341 = vector.load %arg10[%c14_508, %c128_509] : memref<128x256xf32, #tpu.memory_space<vmem>>, vector<1x128xf32>
    %1342 = vector.broadcast %1341 : vector<1x128xf32> to vector<8x128xf32>
    %1343 = arith.mulf %1237, %1342 : vector<8x128xf32>
    %1344 = arith.addf %1340, %1343 : vector<8x128xf32>
    %c22_510 = arith.constant 22 : index
    %c128_511 = arith.constant 128 : index
    %1345 = vector.load %arg10[%c22_510, %c128_511] : memref<128x256xf32, #tpu.memory_space<vmem>>, vector<1x128xf32>
    %1346 = vector.broadcast %1345 : vector<1x128xf32> to vector<8x128xf32>
    %1347 = arith.mulf %1242, %1346 : vector<8x128xf32>
    %1348 = arith.addf %1344, %1347 : vector<8x128xf32>
    %c30_512 = arith.constant 30 : index
    %c128_513 = arith.constant 128 : index
    %1349 = vector.load %arg10[%c30_512, %c128_513] : memref<128x256xf32, #tpu.memory_space<vmem>>, vector<1x128xf32>
    %1350 = vector.broadcast %1349 : vector<1x128xf32> to vector<8x128xf32>
    %1351 = arith.mulf %1247, %1350 : vector<8x128xf32>
    %1352 = arith.addf %1348, %1351 : vector<8x128xf32>
    %c7_514 = arith.constant 7 : index
    %c128_515 = arith.constant 128 : index
    %1353 = vector.load %arg10[%c7_514, %c128_515] : memref<128x256xf32, #tpu.memory_space<vmem>>, vector<1x128xf32>
    %1354 = vector.broadcast %1353 : vector<1x128xf32> to vector<8x128xf32>
    %1355 = arith.mulf %1232, %1354 : vector<8x128xf32>
    %c15_516 = arith.constant 15 : index
    %c128_517 = arith.constant 128 : index
    %1356 = vector.load %arg10[%c15_516, %c128_517] : memref<128x256xf32, #tpu.memory_space<vmem>>, vector<1x128xf32>
    %1357 = vector.broadcast %1356 : vector<1x128xf32> to vector<8x128xf32>
    %1358 = arith.mulf %1237, %1357 : vector<8x128xf32>
    %1359 = arith.addf %1355, %1358 : vector<8x128xf32>
    %c23_518 = arith.constant 23 : index
    %c128_519 = arith.constant 128 : index
    %1360 = vector.load %arg10[%c23_518, %c128_519] : memref<128x256xf32, #tpu.memory_space<vmem>>, vector<1x128xf32>
    %1361 = vector.broadcast %1360 : vector<1x128xf32> to vector<8x128xf32>
    %1362 = arith.mulf %1242, %1361 : vector<8x128xf32>
    %1363 = arith.addf %1359, %1362 : vector<8x128xf32>
    %c31_520 = arith.constant 31 : index
    %c128_521 = arith.constant 128 : index
    %1364 = vector.load %arg10[%c31_520, %c128_521] : memref<128x256xf32, #tpu.memory_space<vmem>>, vector<1x128xf32>
    %1365 = vector.broadcast %1364 : vector<1x128xf32> to vector<8x128xf32>
    %1366 = arith.mulf %1247, %1365 : vector<8x128xf32>
    %1367 = arith.addf %1363, %1366 : vector<8x128xf32>
    %1368 = arith.maximumf %1262, %1277 : vector<8x128xf32>
    %1369 = arith.maximumf %1368, %1292 : vector<8x128xf32>
    %1370 = arith.maximumf %1369, %1307 : vector<8x128xf32>
    %1371 = arith.maximumf %1370, %1322 : vector<8x128xf32>
    %1372 = arith.maximumf %1371, %1337 : vector<8x128xf32>
    %1373 = arith.maximumf %1372, %1352 : vector<8x128xf32>
    %1374 = arith.maximumf %1373, %1367 : vector<8x128xf32>
    %1375 = arith.subf %1262, %1374 : vector<8x128xf32>
    %1376 = math.exp %1375 : vector<8x128xf32>
    %1377 = arith.subf %1277, %1374 : vector<8x128xf32>
    %1378 = math.exp %1377 : vector<8x128xf32>
    %1379 = arith.subf %1292, %1374 : vector<8x128xf32>
    %1380 = math.exp %1379 : vector<8x128xf32>
    %1381 = arith.subf %1307, %1374 : vector<8x128xf32>
    %1382 = math.exp %1381 : vector<8x128xf32>
    %1383 = arith.subf %1322, %1374 : vector<8x128xf32>
    %1384 = math.exp %1383 : vector<8x128xf32>
    %1385 = arith.subf %1337, %1374 : vector<8x128xf32>
    %1386 = math.exp %1385 : vector<8x128xf32>
    %1387 = arith.subf %1352, %1374 : vector<8x128xf32>
    %1388 = math.exp %1387 : vector<8x128xf32>
    %1389 = arith.subf %1367, %1374 : vector<8x128xf32>
    %1390 = math.exp %1389 : vector<8x128xf32>
    %1391 = arith.addf %1376, %1378 : vector<8x128xf32>
    %1392 = arith.addf %1391, %1380 : vector<8x128xf32>
    %1393 = arith.addf %1392, %1382 : vector<8x128xf32>
    %1394 = arith.addf %1393, %1384 : vector<8x128xf32>
    %1395 = arith.addf %1394, %1386 : vector<8x128xf32>
    %1396 = arith.addf %1395, %1388 : vector<8x128xf32>
    %1397 = arith.addf %1396, %1390 : vector<8x128xf32>
    %1398 = tpu.reciprocal %1397 {approx = true} : vector<8x128xf32> -> vector<8x128xf32>
    %c0_522 = arith.constant 0 : index
    %c128_523 = arith.constant 128 : index
    %1399 = vector.load %arg11[%c0_522, %c128_523] : memref<128x256xf32, #tpu.memory_space<vmem>>, vector<1x128xf32>
    %1400 = vector.broadcast %1399 : vector<1x128xf32> to vector<8x128xf32>
    %1401 = arith.mulf %1376, %1400 : vector<8x128xf32>
    %c1_524 = arith.constant 1 : index
    %c128_525 = arith.constant 128 : index
    %1402 = vector.load %arg11[%c1_524, %c128_525] : memref<128x256xf32, #tpu.memory_space<vmem>>, vector<1x128xf32>
    %1403 = vector.broadcast %1402 : vector<1x128xf32> to vector<8x128xf32>
    %1404 = arith.mulf %1378, %1403 : vector<8x128xf32>
    %1405 = arith.addf %1401, %1404 : vector<8x128xf32>
    %c2_526 = arith.constant 2 : index
    %c128_527 = arith.constant 128 : index
    %1406 = vector.load %arg11[%c2_526, %c128_527] : memref<128x256xf32, #tpu.memory_space<vmem>>, vector<1x128xf32>
    %1407 = vector.broadcast %1406 : vector<1x128xf32> to vector<8x128xf32>
    %1408 = arith.mulf %1380, %1407 : vector<8x128xf32>
    %1409 = arith.addf %1405, %1408 : vector<8x128xf32>
    %c3_528 = arith.constant 3 : index
    %c128_529 = arith.constant 128 : index
    %1410 = vector.load %arg11[%c3_528, %c128_529] : memref<128x256xf32, #tpu.memory_space<vmem>>, vector<1x128xf32>
    %1411 = vector.broadcast %1410 : vector<1x128xf32> to vector<8x128xf32>
    %1412 = arith.mulf %1382, %1411 : vector<8x128xf32>
    %1413 = arith.addf %1409, %1412 : vector<8x128xf32>
    %c4_530 = arith.constant 4 : index
    %c128_531 = arith.constant 128 : index
    %1414 = vector.load %arg11[%c4_530, %c128_531] : memref<128x256xf32, #tpu.memory_space<vmem>>, vector<1x128xf32>
    %1415 = vector.broadcast %1414 : vector<1x128xf32> to vector<8x128xf32>
    %1416 = arith.mulf %1384, %1415 : vector<8x128xf32>
    %1417 = arith.addf %1413, %1416 : vector<8x128xf32>
    %c5_532 = arith.constant 5 : index
    %c128_533 = arith.constant 128 : index
    %1418 = vector.load %arg11[%c5_532, %c128_533] : memref<128x256xf32, #tpu.memory_space<vmem>>, vector<1x128xf32>
    %1419 = vector.broadcast %1418 : vector<1x128xf32> to vector<8x128xf32>
    %1420 = arith.mulf %1386, %1419 : vector<8x128xf32>
    %1421 = arith.addf %1417, %1420 : vector<8x128xf32>
    %c6_534 = arith.constant 6 : index
    %c128_535 = arith.constant 128 : index
    %1422 = vector.load %arg11[%c6_534, %c128_535] : memref<128x256xf32, #tpu.memory_space<vmem>>, vector<1x128xf32>
    %1423 = vector.broadcast %1422 : vector<1x128xf32> to vector<8x128xf32>
    %1424 = arith.mulf %1388, %1423 : vector<8x128xf32>
    %1425 = arith.addf %1421, %1424 : vector<8x128xf32>
    %c7_536 = arith.constant 7 : index
    %c128_537 = arith.constant 128 : index
    %1426 = vector.load %arg11[%c7_536, %c128_537] : memref<128x256xf32, #tpu.memory_space<vmem>>, vector<1x128xf32>
    %1427 = vector.broadcast %1426 : vector<1x128xf32> to vector<8x128xf32>
    %1428 = arith.mulf %1390, %1427 : vector<8x128xf32>
    %1429 = arith.addf %1425, %1428 : vector<8x128xf32>
    %1430 = arith.mulf %1429, %1398 : vector<8x128xf32>
    %c0_538 = arith.constant 0 : index
    %c128_539 = arith.constant 128 : index
    %1431 = vector.load %arg12[%c0_538, %c128_539] : memref<128x256xf32, #tpu.memory_space<vmem>>, vector<8x128xf32>
    tpu.vector_store %arg12[%c0_538, %c128_539], %1430 {strides = array<i32>} : memref<128x256xf32, #tpu.memory_space<vmem>>, vector<8x128xf32>,
    %c8_540 = arith.constant 8 : index
    %c128_541 = arith.constant 128 : index
    %1432 = vector.load %arg11[%c8_540, %c128_541] : memref<128x256xf32, #tpu.memory_space<vmem>>, vector<1x128xf32>
    %1433 = vector.broadcast %1432 : vector<1x128xf32> to vector<8x128xf32>
    %1434 = arith.mulf %1376, %1433 : vector<8x128xf32>
    %c9_542 = arith.constant 9 : index
    %c128_543 = arith.constant 128 : index
    %1435 = vector.load %arg11[%c9_542, %c128_543] : memref<128x256xf32, #tpu.memory_space<vmem>>, vector<1x128xf32>
    %1436 = vector.broadcast %1435 : vector<1x128xf32> to vector<8x128xf32>
    %1437 = arith.mulf %1378, %1436 : vector<8x128xf32>
    %1438 = arith.addf %1434, %1437 : vector<8x128xf32>
    %c10_544 = arith.constant 10 : index
    %c128_545 = arith.constant 128 : index
    %1439 = vector.load %arg11[%c10_544, %c128_545] : memref<128x256xf32, #tpu.memory_space<vmem>>, vector<1x128xf32>
    %1440 = vector.broadcast %1439 : vector<1x128xf32> to vector<8x128xf32>
    %1441 = arith.mulf %1380, %1440 : vector<8x128xf32>
    %1442 = arith.addf %1438, %1441 : vector<8x128xf32>
    %c11_546 = arith.constant 11 : index
    %c128_547 = arith.constant 128 : index
    %1443 = vector.load %arg11[%c11_546, %c128_547] : memref<128x256xf32, #tpu.memory_space<vmem>>, vector<1x128xf32>
    %1444 = vector.broadcast %1443 : vector<1x128xf32> to vector<8x128xf32>
    %1445 = arith.mulf %1382, %1444 : vector<8x128xf32>
    %1446 = arith.addf %1442, %1445 : vector<8x128xf32>
    %c12_548 = arith.constant 12 : index
    %c128_549 = arith.constant 128 : index
    %1447 = vector.load %arg11[%c12_548, %c128_549] : memref<128x256xf32, #tpu.memory_space<vmem>>, vector<1x128xf32>
    %1448 = vector.broadcast %1447 : vector<1x128xf32> to vector<8x128xf32>
    %1449 = arith.mulf %1384, %1448 : vector<8x128xf32>
    %1450 = arith.addf %1446, %1449 : vector<8x128xf32>
    %c13_550 = arith.constant 13 : index
    %c128_551 = arith.constant 128 : index
    %1451 = vector.load %arg11[%c13_550, %c128_551] : memref<128x256xf32, #tpu.memory_space<vmem>>, vector<1x128xf32>
    %1452 = vector.broadcast %1451 : vector<1x128xf32> to vector<8x128xf32>
    %1453 = arith.mulf %1386, %1452 : vector<8x128xf32>
    %1454 = arith.addf %1450, %1453 : vector<8x128xf32>
    %c14_552 = arith.constant 14 : index
    %c128_553 = arith.constant 128 : index
    %1455 = vector.load %arg11[%c14_552, %c128_553] : memref<128x256xf32, #tpu.memory_space<vmem>>, vector<1x128xf32>
    %1456 = vector.broadcast %1455 : vector<1x128xf32> to vector<8x128xf32>
    %1457 = arith.mulf %1388, %1456 : vector<8x128xf32>
    %1458 = arith.addf %1454, %1457 : vector<8x128xf32>
    %c15_554 = arith.constant 15 : index
    %c128_555 = arith.constant 128 : index
    %1459 = vector.load %arg11[%c15_554, %c128_555] : memref<128x256xf32, #tpu.memory_space<vmem>>, vector<1x128xf32>
    %1460 = vector.broadcast %1459 : vector<1x128xf32> to vector<8x128xf32>
    %1461 = arith.mulf %1390, %1460 : vector<8x128xf32>
    %1462 = arith.addf %1458, %1461 : vector<8x128xf32>
    %1463 = arith.mulf %1462, %1398 : vector<8x128xf32>
    %c8_556 = arith.constant 8 : index
    %c128_557 = arith.constant 128 : index
    %1464 = vector.load %arg12[%c8_556, %c128_557] : memref<128x256xf32, #tpu.memory_space<vmem>>, vector<8x128xf32>
    tpu.vector_store %arg12[%c8_556, %c128_557], %1463 {strides = array<i32>} : memref<128x256xf32, #tpu.memory_space<vmem>>, vector<8x128xf32>,
    %c16_558 = arith.constant 16 : index
    %c128_559 = arith.constant 128 : index
    %1465 = vector.load %arg11[%c16_558, %c128_559] : memref<128x256xf32, #tpu.memory_space<vmem>>, vector<1x128xf32>
    %1466 = vector.broadcast %1465 : vector<1x128xf32> to vector<8x128xf32>
    %1467 = arith.mulf %1376, %1466 : vector<8x128xf32>
    %c17_560 = arith.constant 17 : index
    %c128_561 = arith.constant 128 : index
    %1468 = vector.load %arg11[%c17_560, %c128_561] : memref<128x256xf32, #tpu.memory_space<vmem>>, vector<1x128xf32>
    %1469 = vector.broadcast %1468 : vector<1x128xf32> to vector<8x128xf32>
    %1470 = arith.mulf %1378, %1469 : vector<8x128xf32>
    %1471 = arith.addf %1467, %1470 : vector<8x128xf32>
    %c18_562 = arith.constant 18 : index
    %c128_563 = arith.constant 128 : index
    %1472 = vector.load %arg11[%c18_562, %c128_563] : memref<128x256xf32, #tpu.memory_space<vmem>>, vector<1x128xf32>
    %1473 = vector.broadcast %1472 : vector<1x128xf32> to vector<8x128xf32>
    %1474 = arith.mulf %1380, %1473 : vector<8x128xf32>
    %1475 = arith.addf %1471, %1474 : vector<8x128xf32>
    %c19_564 = arith.constant 19 : index
    %c128_565 = arith.constant 128 : index
    %1476 = vector.load %arg11[%c19_564, %c128_565] : memref<128x256xf32, #tpu.memory_space<vmem>>, vector<1x128xf32>
    %1477 = vector.broadcast %1476 : vector<1x128xf32> to vector<8x128xf32>
    %1478 = arith.mulf %1382, %1477 : vector<8x128xf32>
    %1479 = arith.addf %1475, %1478 : vector<8x128xf32>
    %c20_566 = arith.constant 20 : index
    %c128_567 = arith.constant 128 : index
    %1480 = vector.load %arg11[%c20_566, %c128_567] : memref<128x256xf32, #tpu.memory_space<vmem>>, vector<1x128xf32>
    %1481 = vector.broadcast %1480 : vector<1x128xf32> to vector<8x128xf32>
    %1482 = arith.mulf %1384, %1481 : vector<8x128xf32>
    %1483 = arith.addf %1479, %1482 : vector<8x128xf32>
    %c21_568 = arith.constant 21 : index
    %c128_569 = arith.constant 128 : index
    %1484 = vector.load %arg11[%c21_568, %c128_569] : memref<128x256xf32, #tpu.memory_space<vmem>>, vector<1x128xf32>
    %1485 = vector.broadcast %1484 : vector<1x128xf32> to vector<8x128xf32>
    %1486 = arith.mulf %1386, %1485 : vector<8x128xf32>
    %1487 = arith.addf %1483, %1486 : vector<8x128xf32>
    %c22_570 = arith.constant 22 : index
    %c128_571 = arith.constant 128 : index
    %1488 = vector.load %arg11[%c22_570, %c128_571] : memref<128x256xf32, #tpu.memory_space<vmem>>, vector<1x128xf32>
    %1489 = vector.broadcast %1488 : vector<1x128xf32> to vector<8x128xf32>
    %1490 = arith.mulf %1388, %1489 : vector<8x128xf32>
    %1491 = arith.addf %1487, %1490 : vector<8x128xf32>
    %c23_572 = arith.constant 23 : index
    %c128_573 = arith.constant 128 : index
    %1492 = vector.load %arg11[%c23_572, %c128_573] : memref<128x256xf32, #tpu.memory_space<vmem>>, vector<1x128xf32>
    %1493 = vector.broadcast %1492 : vector<1x128xf32> to vector<8x128xf32>
    %1494 = arith.mulf %1390, %1493 : vector<8x128xf32>
    %1495 = arith.addf %1491, %1494 : vector<8x128xf32>
    %1496 = arith.mulf %1495, %1398 : vector<8x128xf32>
    %c16_574 = arith.constant 16 : index
    %c128_575 = arith.constant 128 : index
    %1497 = vector.load %arg12[%c16_574, %c128_575] : memref<128x256xf32, #tpu.memory_space<vmem>>, vector<8x128xf32>
    tpu.vector_store %arg12[%c16_574, %c128_575], %1496 {strides = array<i32>} : memref<128x256xf32, #tpu.memory_space<vmem>>, vector<8x128xf32>,
    %c24_576 = arith.constant 24 : index
    %c128_577 = arith.constant 128 : index
    %1498 = vector.load %arg11[%c24_576, %c128_577] : memref<128x256xf32, #tpu.memory_space<vmem>>, vector<1x128xf32>
    %1499 = vector.broadcast %1498 : vector<1x128xf32> to vector<8x128xf32>
    %1500 = arith.mulf %1376, %1499 : vector<8x128xf32>
    %c25_578 = arith.constant 25 : index
    %c128_579 = arith.constant 128 : index
    %1501 = vector.load %arg11[%c25_578, %c128_579] : memref<128x256xf32, #tpu.memory_space<vmem>>, vector<1x128xf32>
    %1502 = vector.broadcast %1501 : vector<1x128xf32> to vector<8x128xf32>
    %1503 = arith.mulf %1378, %1502 : vector<8x128xf32>
    %1504 = arith.addf %1500, %1503 : vector<8x128xf32>
    %c26_580 = arith.constant 26 : index
    %c128_581 = arith.constant 128 : index
    %1505 = vector.load %arg11[%c26_580, %c128_581] : memref<128x256xf32, #tpu.memory_space<vmem>>, vector<1x128xf32>
    %1506 = vector.broadcast %1505 : vector<1x128xf32> to vector<8x128xf32>
    %1507 = arith.mulf %1380, %1506 : vector<8x128xf32>
    %1508 = arith.addf %1504, %1507 : vector<8x128xf32>
    %c27_582 = arith.constant 27 : index
    %c128_583 = arith.constant 128 : index
    %1509 = vector.load %arg11[%c27_582, %c128_583] : memref<128x256xf32, #tpu.memory_space<vmem>>, vector<1x128xf32>
    %1510 = vector.broadcast %1509 : vector<1x128xf32> to vector<8x128xf32>
    %1511 = arith.mulf %1382, %1510 : vector<8x128xf32>
    %1512 = arith.addf %1508, %1511 : vector<8x128xf32>
    %c28_584 = arith.constant 28 : index
    %c128_585 = arith.constant 128 : index
    %1513 = vector.load %arg11[%c28_584, %c128_585] : memref<128x256xf32, #tpu.memory_space<vmem>>, vector<1x128xf32>
    %1514 = vector.broadcast %1513 : vector<1x128xf32> to vector<8x128xf32>
    %1515 = arith.mulf %1384, %1514 : vector<8x128xf32>
    %1516 = arith.addf %1512, %1515 : vector<8x128xf32>
    %c29_586 = arith.constant 29 : index
    %c128_587 = arith.constant 128 : index
    %1517 = vector.load %arg11[%c29_586, %c128_587] : memref<128x256xf32, #tpu.memory_space<vmem>>, vector<1x128xf32>
    %1518 = vector.broadcast %1517 : vector<1x128xf32> to vector<8x128xf32>
    %1519 = arith.mulf %1386, %1518 : vector<8x128xf32>
    %1520 = arith.addf %1516, %1519 : vector<8x128xf32>
    %c30_588 = arith.constant 30 : index
    %c128_589 = arith.constant 128 : index
    %1521 = vector.load %arg11[%c30_588, %c128_589] : memref<128x256xf32, #tpu.memory_space<vmem>>, vector<1x128xf32>
    %1522 = vector.broadcast %1521 : vector<1x128xf32> to vector<8x128xf32>
    %1523 = arith.mulf %1388, %1522 : vector<8x128xf32>
    %1524 = arith.addf %1520, %1523 : vector<8x128xf32>
    %c31_590 = arith.constant 31 : index
    %c128_591 = arith.constant 128 : index
    %1525 = vector.load %arg11[%c31_590, %c128_591] : memref<128x256xf32, #tpu.memory_space<vmem>>, vector<1x128xf32>
    %1526 = vector.broadcast %1525 : vector<1x128xf32> to vector<8x128xf32>
    %1527 = arith.mulf %1390, %1526 : vector<8x128xf32>
    %1528 = arith.addf %1524, %1527 : vector<8x128xf32>
    %1529 = arith.mulf %1528, %1398 : vector<8x128xf32>
    %c24_592 = arith.constant 24 : index
    %c128_593 = arith.constant 128 : index
    %1530 = vector.load %arg12[%c24_592, %c128_593] : memref<128x256xf32, #tpu.memory_space<vmem>>, vector<8x128xf32>
    tpu.vector_store %arg12[%c24_592, %c128_593], %1529 {strides = array<i32>} : memref<128x256xf32, #tpu.memory_space<vmem>>, vector<8x128xf32>,
    %1531 = vector.extract_strided_slice %1227 {offsets = [4, 0, 0], sizes = [1, 8, 128], strides = [1, 1, 1]} : vector<16x8x128xf32> to vector<1x8x128xf32>
    %1532 = vector.shape_cast %1531 : vector<1x8x128xf32> to vector<8x128xf32>
    %c4_594 = arith.constant 4 : index
    %1533 = memref.load %arg1[%c4_594] : memref<16xf32, #tpu.memory_space<smem>>
    %1534 = vector.broadcast %1533 : f32 to vector<8x128xf32>
    %1535 = arith.addf %1532, %1534 : vector<8x128xf32>
    %1536 = vector.extract_strided_slice %1227 {offsets = [5, 0, 0], sizes = [1, 8, 128], strides = [1, 1, 1]} : vector<16x8x128xf32> to vector<1x8x128xf32>
    %1537 = vector.shape_cast %1536 : vector<1x8x128xf32> to vector<8x128xf32>
    %c5_595 = arith.constant 5 : index
    %1538 = memref.load %arg1[%c5_595] : memref<16xf32, #tpu.memory_space<smem>>
    %1539 = vector.broadcast %1538 : f32 to vector<8x128xf32>
    %1540 = arith.addf %1537, %1539 : vector<8x128xf32>
    %1541 = vector.extract_strided_slice %1227 {offsets = [6, 0, 0], sizes = [1, 8, 128], strides = [1, 1, 1]} : vector<16x8x128xf32> to vector<1x8x128xf32>
    %1542 = vector.shape_cast %1541 : vector<1x8x128xf32> to vector<8x128xf32>
    %c6_596 = arith.constant 6 : index
    %1543 = memref.load %arg1[%c6_596] : memref<16xf32, #tpu.memory_space<smem>>
    %1544 = vector.broadcast %1543 : f32 to vector<8x128xf32>
    %1545 = arith.addf %1542, %1544 : vector<8x128xf32>
    %1546 = vector.extract_strided_slice %1227 {offsets = [7, 0, 0], sizes = [1, 8, 128], strides = [1, 1, 1]} : vector<16x8x128xf32> to vector<1x8x128xf32>
    %1547 = vector.shape_cast %1546 : vector<1x8x128xf32> to vector<8x128xf32>
    %c7_597 = arith.constant 7 : index
    %1548 = memref.load %arg1[%c7_597] : memref<16xf32, #tpu.memory_space<smem>>
    %1549 = vector.broadcast %1548 : f32 to vector<8x128xf32>
    %1550 = arith.addf %1547, %1549 : vector<8x128xf32>
    %c32_598 = arith.constant 32 : index
    %c128_599 = arith.constant 128 : index
    %1551 = vector.load %arg10[%c32_598, %c128_599] : memref<128x256xf32, #tpu.memory_space<vmem>>, vector<1x128xf32>
    %1552 = vector.broadcast %1551 : vector<1x128xf32> to vector<8x128xf32>
    %1553 = arith.mulf %1535, %1552 : vector<8x128xf32>
    %c40_600 = arith.constant 40 : index
    %c128_601 = arith.constant 128 : index
    %1554 = vector.load %arg10[%c40_600, %c128_601] : memref<128x256xf32, #tpu.memory_space<vmem>>, vector<1x128xf32>
    %1555 = vector.broadcast %1554 : vector<1x128xf32> to vector<8x128xf32>
    %1556 = arith.mulf %1540, %1555 : vector<8x128xf32>
    %1557 = arith.addf %1553, %1556 : vector<8x128xf32>
    %c48_602 = arith.constant 48 : index
    %c128_603 = arith.constant 128 : index
    %1558 = vector.load %arg10[%c48_602, %c128_603] : memref<128x256xf32, #tpu.memory_space<vmem>>, vector<1x128xf32>
    %1559 = vector.broadcast %1558 : vector<1x128xf32> to vector<8x128xf32>
    %1560 = arith.mulf %1545, %1559 : vector<8x128xf32>
    %1561 = arith.addf %1557, %1560 : vector<8x128xf32>
    %c56_604 = arith.constant 56 : index
    %c128_605 = arith.constant 128 : index
    %1562 = vector.load %arg10[%c56_604, %c128_605] : memref<128x256xf32, #tpu.memory_space<vmem>>, vector<1x128xf32>
    %1563 = vector.broadcast %1562 : vector<1x128xf32> to vector<8x128xf32>
    %1564 = arith.mulf %1550, %1563 : vector<8x128xf32>
    %1565 = arith.addf %1561, %1564 : vector<8x128xf32>
    %c33_606 = arith.constant 33 : index
    %c128_607 = arith.constant 128 : index
    %1566 = vector.load %arg10[%c33_606, %c128_607] : memref<128x256xf32, #tpu.memory_space<vmem>>, vector<1x128xf32>
    %1567 = vector.broadcast %1566 : vector<1x128xf32> to vector<8x128xf32>
    %1568 = arith.mulf %1535, %1567 : vector<8x128xf32>
    %c41_608 = arith.constant 41 : index
    %c128_609 = arith.constant 128 : index
    %1569 = vector.load %arg10[%c41_608, %c128_609] : memref<128x256xf32, #tpu.memory_space<vmem>>, vector<1x128xf32>
    %1570 = vector.broadcast %1569 : vector<1x128xf32> to vector<8x128xf32>
    %1571 = arith.mulf %1540, %1570 : vector<8x128xf32>
    %1572 = arith.addf %1568, %1571 : vector<8x128xf32>
    %c49_610 = arith.constant 49 : index
    %c128_611 = arith.constant 128 : index
    %1573 = vector.load %arg10[%c49_610, %c128_611] : memref<128x256xf32, #tpu.memory_space<vmem>>, vector<1x128xf32>
    %1574 = vector.broadcast %1573 : vector<1x128xf32> to vector<8x128xf32>
    %1575 = arith.mulf %1545, %1574 : vector<8x128xf32>
    %1576 = arith.addf %1572, %1575 : vector<8x128xf32>
    %c57_612 = arith.constant 57 : index
    %c128_613 = arith.constant 128 : index
    %1577 = vector.load %arg10[%c57_612, %c128_613] : memref<128x256xf32, #tpu.memory_space<vmem>>, vector<1x128xf32>
    %1578 = vector.broadcast %1577 : vector<1x128xf32> to vector<8x128xf32>
    %1579 = arith.mulf %1550, %1578 : vector<8x128xf32>
    %1580 = arith.addf %1576, %1579 : vector<8x128xf32>
    %c34_614 = arith.constant 34 : index
    %c128_615 = arith.constant 128 : index
    %1581 = vector.load %arg10[%c34_614, %c128_615] : memref<128x256xf32, #tpu.memory_space<vmem>>, vector<1x128xf32>
    %1582 = vector.broadcast %1581 : vector<1x128xf32> to vector<8x128xf32>
    %1583 = arith.mulf %1535, %1582 : vector<8x128xf32>
    %c42_616 = arith.constant 42 : index
    %c128_617 = arith.constant 128 : index
    %1584 = vector.load %arg10[%c42_616, %c128_617] : memref<128x256xf32, #tpu.memory_space<vmem>>, vector<1x128xf32>
    %1585 = vector.broadcast %1584 : vector<1x128xf32> to vector<8x128xf32>
    %1586 = arith.mulf %1540, %1585 : vector<8x128xf32>
    %1587 = arith.addf %1583, %1586 : vector<8x128xf32>
    %c50_618 = arith.constant 50 : index
    %c128_619 = arith.constant 128 : index
    %1588 = vector.load %arg10[%c50_618, %c128_619] : memref<128x256xf32, #tpu.memory_space<vmem>>, vector<1x128xf32>
    %1589 = vector.broadcast %1588 : vector<1x128xf32> to vector<8x128xf32>
    %1590 = arith.mulf %1545, %1589 : vector<8x128xf32>
    %1591 = arith.addf %1587, %1590 : vector<8x128xf32>
    %c58_620 = arith.constant 58 : index
    %c128_621 = arith.constant 128 : index
    %1592 = vector.load %arg10[%c58_620, %c128_621] : memref<128x256xf32, #tpu.memory_space<vmem>>, vector<1x128xf32>
    %1593 = vector.broadcast %1592 : vector<1x128xf32> to vector<8x128xf32>
    %1594 = arith.mulf %1550, %1593 : vector<8x128xf32>
    %1595 = arith.addf %1591, %1594 : vector<8x128xf32>
    %c35_622 = arith.constant 35 : index
    %c128_623 = arith.constant 128 : index
    %1596 = vector.load %arg10[%c35_622, %c128_623] : memref<128x256xf32, #tpu.memory_space<vmem>>, vector<1x128xf32>
    %1597 = vector.broadcast %1596 : vector<1x128xf32> to vector<8x128xf32>
    %1598 = arith.mulf %1535, %1597 : vector<8x128xf32>
    %c43_624 = arith.constant 43 : index
    %c128_625 = arith.constant 128 : index
    %1599 = vector.load %arg10[%c43_624, %c128_625] : memref<128x256xf32, #tpu.memory_space<vmem>>, vector<1x128xf32>
    %1600 = vector.broadcast %1599 : vector<1x128xf32> to vector<8x128xf32>
    %1601 = arith.mulf %1540, %1600 : vector<8x128xf32>
    %1602 = arith.addf %1598, %1601 : vector<8x128xf32>
    %c51_626 = arith.constant 51 : index
    %c128_627 = arith.constant 128 : index
    %1603 = vector.load %arg10[%c51_626, %c128_627] : memref<128x256xf32, #tpu.memory_space<vmem>>, vector<1x128xf32>
    %1604 = vector.broadcast %1603 : vector<1x128xf32> to vector<8x128xf32>
    %1605 = arith.mulf %1545, %1604 : vector<8x128xf32>
    %1606 = arith.addf %1602, %1605 : vector<8x128xf32>
    %c59_628 = arith.constant 59 : index
    %c128_629 = arith.constant 128 : index
    %1607 = vector.load %arg10[%c59_628, %c128_629] : memref<128x256xf32, #tpu.memory_space<vmem>>, vector<1x128xf32>
    %1608 = vector.broadcast %1607 : vector<1x128xf32> to vector<8x128xf32>
    %1609 = arith.mulf %1550, %1608 : vector<8x128xf32>
    %1610 = arith.addf %1606, %1609 : vector<8x128xf32>
    %c36_630 = arith.constant 36 : index
    %c128_631 = arith.constant 128 : index
    %1611 = vector.load %arg10[%c36_630, %c128_631] : memref<128x256xf32, #tpu.memory_space<vmem>>, vector<1x128xf32>
    %1612 = vector.broadcast %1611 : vector<1x128xf32> to vector<8x128xf32>
    %1613 = arith.mulf %1535, %1612 : vector<8x128xf32>
    %c44_632 = arith.constant 44 : index
    %c128_633 = arith.constant 128 : index
    %1614 = vector.load %arg10[%c44_632, %c128_633] : memref<128x256xf32, #tpu.memory_space<vmem>>, vector<1x128xf32>
    %1615 = vector.broadcast %1614 : vector<1x128xf32> to vector<8x128xf32>
    %1616 = arith.mulf %1540, %1615 : vector<8x128xf32>
    %1617 = arith.addf %1613, %1616 : vector<8x128xf32>
    %c52_634 = arith.constant 52 : index
    %c128_635 = arith.constant 128 : index
    %1618 = vector.load %arg10[%c52_634, %c128_635] : memref<128x256xf32, #tpu.memory_space<vmem>>, vector<1x128xf32>
    %1619 = vector.broadcast %1618 : vector<1x128xf32> to vector<8x128xf32>
    %1620 = arith.mulf %1545, %1619 : vector<8x128xf32>
    %1621 = arith.addf %1617, %1620 : vector<8x128xf32>
    %c60_636 = arith.constant 60 : index
    %c128_637 = arith.constant 128 : index
    %1622 = vector.load %arg10[%c60_636, %c128_637] : memref<128x256xf32, #tpu.memory_space<vmem>>, vector<1x128xf32>
    %1623 = vector.broadcast %1622 : vector<1x128xf32> to vector<8x128xf32>
    %1624 = arith.mulf %1550, %1623 : vector<8x128xf32>
    %1625 = arith.addf %1621, %1624 : vector<8x128xf32>
    %c37_638 = arith.constant 37 : index
    %c128_639 = arith.constant 128 : index
    %1626 = vector.load %arg10[%c37_638, %c128_639] : memref<128x256xf32, #tpu.memory_space<vmem>>, vector<1x128xf32>
    %1627 = vector.broadcast %1626 : vector<1x128xf32> to vector<8x128xf32>
    %1628 = arith.mulf %1535, %1627 : vector<8x128xf32>
    %c45_640 = arith.constant 45 : index
    %c128_641 = arith.constant 128 : index
    %1629 = vector.load %arg10[%c45_640, %c128_641] : memref<128x256xf32, #tpu.memory_space<vmem>>, vector<1x128xf32>
    %1630 = vector.broadcast %1629 : vector<1x128xf32> to vector<8x128xf32>
    %1631 = arith.mulf %1540, %1630 : vector<8x128xf32>
    %1632 = arith.addf %1628, %1631 : vector<8x128xf32>
    %c53_642 = arith.constant 53 : index
    %c128_643 = arith.constant 128 : index
    %1633 = vector.load %arg10[%c53_642, %c128_643] : memref<128x256xf32, #tpu.memory_space<vmem>>, vector<1x128xf32>
    %1634 = vector.broadcast %1633 : vector<1x128xf32> to vector<8x128xf32>
    %1635 = arith.mulf %1545, %1634 : vector<8x128xf32>
    %1636 = arith.addf %1632, %1635 : vector<8x128xf32>
    %c61_644 = arith.constant 61 : index
    %c128_645 = arith.constant 128 : index
    %1637 = vector.load %arg10[%c61_644, %c128_645] : memref<128x256xf32, #tpu.memory_space<vmem>>, vector<1x128xf32>
    %1638 = vector.broadcast %1637 : vector<1x128xf32> to vector<8x128xf32>
    %1639 = arith.mulf %1550, %1638 : vector<8x128xf32>
    %1640 = arith.addf %1636, %1639 : vector<8x128xf32>
    %c38_646 = arith.constant 38 : index
    %c128_647 = arith.constant 128 : index
    %1641 = vector.load %arg10[%c38_646, %c128_647] : memref<128x256xf32, #tpu.memory_space<vmem>>, vector<1x128xf32>
    %1642 = vector.broadcast %1641 : vector<1x128xf32> to vector<8x128xf32>
    %1643 = arith.mulf %1535, %1642 : vector<8x128xf32>
    %c46_648 = arith.constant 46 : index
    %c128_649 = arith.constant 128 : index
    %1644 = vector.load %arg10[%c46_648, %c128_649] : memref<128x256xf32, #tpu.memory_space<vmem>>, vector<1x128xf32>
    %1645 = vector.broadcast %1644 : vector<1x128xf32> to vector<8x128xf32>
    %1646 = arith.mulf %1540, %1645 : vector<8x128xf32>
    %1647 = arith.addf %1643, %1646 : vector<8x128xf32>
    %c54_650 = arith.constant 54 : index
    %c128_651 = arith.constant 128 : index
    %1648 = vector.load %arg10[%c54_650, %c128_651] : memref<128x256xf32, #tpu.memory_space<vmem>>, vector<1x128xf32>
    %1649 = vector.broadcast %1648 : vector<1x128xf32> to vector<8x128xf32>
    %1650 = arith.mulf %1545, %1649 : vector<8x128xf32>
    %1651 = arith.addf %1647, %1650 : vector<8x128xf32>
    %c62_652 = arith.constant 62 : index
    %c128_653 = arith.constant 128 : index
    %1652 = vector.load %arg10[%c62_652, %c128_653] : memref<128x256xf32, #tpu.memory_space<vmem>>, vector<1x128xf32>
    %1653 = vector.broadcast %1652 : vector<1x128xf32> to vector<8x128xf32>
    %1654 = arith.mulf %1550, %1653 : vector<8x128xf32>
    %1655 = arith.addf %1651, %1654 : vector<8x128xf32>
    %c39_654 = arith.constant 39 : index
    %c128_655 = arith.constant 128 : index
    %1656 = vector.load %arg10[%c39_654, %c128_655] : memref<128x256xf32, #tpu.memory_space<vmem>>, vector<1x128xf32>
    %1657 = vector.broadcast %1656 : vector<1x128xf32> to vector<8x128xf32>
    %1658 = arith.mulf %1535, %1657 : vector<8x128xf32>
    %c47_656 = arith.constant 47 : index
    %c128_657 = arith.constant 128 : index
    %1659 = vector.load %arg10[%c47_656, %c128_657] : memref<128x256xf32, #tpu.memory_space<vmem>>, vector<1x128xf32>
    %1660 = vector.broadcast %1659 : vector<1x128xf32> to vector<8x128xf32>
    %1661 = arith.mulf %1540, %1660 : vector<8x128xf32>
    %1662 = arith.addf %1658, %1661 : vector<8x128xf32>
    %c55_658 = arith.constant 55 : index
    %c128_659 = arith.constant 128 : index
    %1663 = vector.load %arg10[%c55_658, %c128_659] : memref<128x256xf32, #tpu.memory_space<vmem>>, vector<1x128xf32>
    %1664 = vector.broadcast %1663 : vector<1x128xf32> to vector<8x128xf32>
    %1665 = arith.mulf %1545, %1664 : vector<8x128xf32>
    %1666 = arith.addf %1662, %1665 : vector<8x128xf32>
    %c63_660 = arith.constant 63 : index
    %c128_661 = arith.constant 128 : index
    %1667 = vector.load %arg10[%c63_660, %c128_661] : memref<128x256xf32, #tpu.memory_space<vmem>>, vector<1x128xf32>
    %1668 = vector.broadcast %1667 : vector<1x128xf32> to vector<8x128xf32>
    %1669 = arith.mulf %1550, %1668 : vector<8x128xf32>
    %1670 = arith.addf %1666, %1669 : vector<8x128xf32>
    %1671 = arith.maximumf %1565, %1580 : vector<8x128xf32>
    %1672 = arith.maximumf %1671, %1595 : vector<8x128xf32>
    %1673 = arith.maximumf %1672, %1610 : vector<8x128xf32>
    %1674 = arith.maximumf %1673, %1625 : vector<8x128xf32>
    %1675 = arith.maximumf %1674, %1640 : vector<8x128xf32>
    %1676 = arith.maximumf %1675, %1655 : vector<8x128xf32>
    %1677 = arith.maximumf %1676, %1670 : vector<8x128xf32>
    %1678 = arith.subf %1565, %1677 : vector<8x128xf32>
    %1679 = math.exp %1678 : vector<8x128xf32>
    %1680 = arith.subf %1580, %1677 : vector<8x128xf32>
    %1681 = math.exp %1680 : vector<8x128xf32>
    %1682 = arith.subf %1595, %1677 : vector<8x128xf32>
    %1683 = math.exp %1682 : vector<8x128xf32>
    %1684 = arith.subf %1610, %1677 : vector<8x128xf32>
    %1685 = math.exp %1684 : vector<8x128xf32>
    %1686 = arith.subf %1625, %1677 : vector<8x128xf32>
    %1687 = math.exp %1686 : vector<8x128xf32>
    %1688 = arith.subf %1640, %1677 : vector<8x128xf32>
    %1689 = math.exp %1688 : vector<8x128xf32>
    %1690 = arith.subf %1655, %1677 : vector<8x128xf32>
    %1691 = math.exp %1690 : vector<8x128xf32>
    %1692 = arith.subf %1670, %1677 : vector<8x128xf32>
    %1693 = math.exp %1692 : vector<8x128xf32>
    %1694 = arith.addf %1679, %1681 : vector<8x128xf32>
    %1695 = arith.addf %1694, %1683 : vector<8x128xf32>
    %1696 = arith.addf %1695, %1685 : vector<8x128xf32>
    %1697 = arith.addf %1696, %1687 : vector<8x128xf32>
    %1698 = arith.addf %1697, %1689 : vector<8x128xf32>
    %1699 = arith.addf %1698, %1691 : vector<8x128xf32>
    %1700 = arith.addf %1699, %1693 : vector<8x128xf32>
    %1701 = tpu.reciprocal %1700 {approx = true} : vector<8x128xf32> -> vector<8x128xf32>
    %c32_662 = arith.constant 32 : index
    %c128_663 = arith.constant 128 : index
    %1702 = vector.load %arg11[%c32_662, %c128_663] : memref<128x256xf32, #tpu.memory_space<vmem>>, vector<1x128xf32>
    %1703 = vector.broadcast %1702 : vector<1x128xf32> to vector<8x128xf32>
    %1704 = arith.mulf %1679, %1703 : vector<8x128xf32>
    %c33_664 = arith.constant 33 : index
    %c128_665 = arith.constant 128 : index
    %1705 = vector.load %arg11[%c33_664, %c128_665] : memref<128x256xf32, #tpu.memory_space<vmem>>, vector<1x128xf32>
    %1706 = vector.broadcast %1705 : vector<1x128xf32> to vector<8x128xf32>
    %1707 = arith.mulf %1681, %1706 : vector<8x128xf32>
    %1708 = arith.addf %1704, %1707 : vector<8x128xf32>
    %c34_666 = arith.constant 34 : index
    %c128_667 = arith.constant 128 : index
    %1709 = vector.load %arg11[%c34_666, %c128_667] : memref<128x256xf32, #tpu.memory_space<vmem>>, vector<1x128xf32>
    %1710 = vector.broadcast %1709 : vector<1x128xf32> to vector<8x128xf32>
    %1711 = arith.mulf %1683, %1710 : vector<8x128xf32>
    %1712 = arith.addf %1708, %1711 : vector<8x128xf32>
    %c35_668 = arith.constant 35 : index
    %c128_669 = arith.constant 128 : index
    %1713 = vector.load %arg11[%c35_668, %c128_669] : memref<128x256xf32, #tpu.memory_space<vmem>>, vector<1x128xf32>
    %1714 = vector.broadcast %1713 : vector<1x128xf32> to vector<8x128xf32>
    %1715 = arith.mulf %1685, %1714 : vector<8x128xf32>
    %1716 = arith.addf %1712, %1715 : vector<8x128xf32>
    %c36_670 = arith.constant 36 : index
    %c128_671 = arith.constant 128 : index
    %1717 = vector.load %arg11[%c36_670, %c128_671] : memref<128x256xf32, #tpu.memory_space<vmem>>, vector<1x128xf32>
    %1718 = vector.broadcast %1717 : vector<1x128xf32> to vector<8x128xf32>
    %1719 = arith.mulf %1687, %1718 : vector<8x128xf32>
    %1720 = arith.addf %1716, %1719 : vector<8x128xf32>
    %c37_672 = arith.constant 37 : index
    %c128_673 = arith.constant 128 : index
    %1721 = vector.load %arg11[%c37_672, %c128_673] : memref<128x256xf32, #tpu.memory_space<vmem>>, vector<1x128xf32>
    %1722 = vector.broadcast %1721 : vector<1x128xf32> to vector<8x128xf32>
    %1723 = arith.mulf %1689, %1722 : vector<8x128xf32>
    %1724 = arith.addf %1720, %1723 : vector<8x128xf32>
    %c38_674 = arith.constant 38 : index
    %c128_675 = arith.constant 128 : index
    %1725 = vector.load %arg11[%c38_674, %c128_675] : memref<128x256xf32, #tpu.memory_space<vmem>>, vector<1x128xf32>
    %1726 = vector.broadcast %1725 : vector<1x128xf32> to vector<8x128xf32>
    %1727 = arith.mulf %1691, %1726 : vector<8x128xf32>
    %1728 = arith.addf %1724, %1727 : vector<8x128xf32>
    %c39_676 = arith.constant 39 : index
    %c128_677 = arith.constant 128 : index
    %1729 = vector.load %arg11[%c39_676, %c128_677] : memref<128x256xf32, #tpu.memory_space<vmem>>, vector<1x128xf32>
    %1730 = vector.broadcast %1729 : vector<1x128xf32> to vector<8x128xf32>
    %1731 = arith.mulf %1693, %1730 : vector<8x128xf32>
    %1732 = arith.addf %1728, %1731 : vector<8x128xf32>
    %1733 = arith.mulf %1732, %1701 : vector<8x128xf32>
    %c32_678 = arith.constant 32 : index
    %c128_679 = arith.constant 128 : index
    %1734 = vector.load %arg12[%c32_678, %c128_679] : memref<128x256xf32, #tpu.memory_space<vmem>>, vector<8x128xf32>
    tpu.vector_store %arg12[%c32_678, %c128_679], %1733 {strides = array<i32>} : memref<128x256xf32, #tpu.memory_space<vmem>>, vector<8x128xf32>,
    %c40_680 = arith.constant 40 : index
    %c128_681 = arith.constant 128 : index
    %1735 = vector.load %arg11[%c40_680, %c128_681] : memref<128x256xf32, #tpu.memory_space<vmem>>, vector<1x128xf32>
    %1736 = vector.broadcast %1735 : vector<1x128xf32> to vector<8x128xf32>
    %1737 = arith.mulf %1679, %1736 : vector<8x128xf32>
    %c41_682 = arith.constant 41 : index
    %c128_683 = arith.constant 128 : index
    %1738 = vector.load %arg11[%c41_682, %c128_683] : memref<128x256xf32, #tpu.memory_space<vmem>>, vector<1x128xf32>
    %1739 = vector.broadcast %1738 : vector<1x128xf32> to vector<8x128xf32>
    %1740 = arith.mulf %1681, %1739 : vector<8x128xf32>
    %1741 = arith.addf %1737, %1740 : vector<8x128xf32>
    %c42_684 = arith.constant 42 : index
    %c128_685 = arith.constant 128 : index
    %1742 = vector.load %arg11[%c42_684, %c128_685] : memref<128x256xf32, #tpu.memory_space<vmem>>, vector<1x128xf32>
    %1743 = vector.broadcast %1742 : vector<1x128xf32> to vector<8x128xf32>
    %1744 = arith.mulf %1683, %1743 : vector<8x128xf32>
    %1745 = arith.addf %1741, %1744 : vector<8x128xf32>
    %c43_686 = arith.constant 43 : index
    %c128_687 = arith.constant 128 : index
    %1746 = vector.load %arg11[%c43_686, %c128_687] : memref<128x256xf32, #tpu.memory_space<vmem>>, vector<1x128xf32>
    %1747 = vector.broadcast %1746 : vector<1x128xf32> to vector<8x128xf32>
    %1748 = arith.mulf %1685, %1747 : vector<8x128xf32>
    %1749 = arith.addf %1745, %1748 : vector<8x128xf32>
    %c44_688 = arith.constant 44 : index
    %c128_689 = arith.constant 128 : index
    %1750 = vector.load %arg11[%c44_688, %c128_689] : memref<128x256xf32, #tpu.memory_space<vmem>>, vector<1x128xf32>
    %1751 = vector.broadcast %1750 : vector<1x128xf32> to vector<8x128xf32>
    %1752 = arith.mulf %1687, %1751 : vector<8x128xf32>
    %1753 = arith.addf %1749, %1752 : vector<8x128xf32>
    %c45_690 = arith.constant 45 : index
    %c128_691 = arith.constant 128 : index
    %1754 = vector.load %arg11[%c45_690, %c128_691] : memref<128x256xf32, #tpu.memory_space<vmem>>, vector<1x128xf32>
    %1755 = vector.broadcast %1754 : vector<1x128xf32> to vector<8x128xf32>
    %1756 = arith.mulf %1689, %1755 : vector<8x128xf32>
    %1757 = arith.addf %1753, %1756 : vector<8x128xf32>
    %c46_692 = arith.constant 46 : index
    %c128_693 = arith.constant 128 : index
    %1758 = vector.load %arg11[%c46_692, %c128_693] : memref<128x256xf32, #tpu.memory_space<vmem>>, vector<1x128xf32>
    %1759 = vector.broadcast %1758 : vector<1x128xf32> to vector<8x128xf32>
    %1760 = arith.mulf %1691, %1759 : vector<8x128xf32>
    %1761 = arith.addf %1757, %1760 : vector<8x128xf32>
    %c47_694 = arith.constant 47 : index
    %c128_695 = arith.constant 128 : index
    %1762 = vector.load %arg11[%c47_694, %c128_695] : memref<128x256xf32, #tpu.memory_space<vmem>>, vector<1x128xf32>
    %1763 = vector.broadcast %1762 : vector<1x128xf32> to vector<8x128xf32>
    %1764 = arith.mulf %1693, %1763 : vector<8x128xf32>
    %1765 = arith.addf %1761, %1764 : vector<8x128xf32>
    %1766 = arith.mulf %1765, %1701 : vector<8x128xf32>
    %c40_696 = arith.constant 40 : index
    %c128_697 = arith.constant 128 : index
    %1767 = vector.load %arg12[%c40_696, %c128_697] : memref<128x256xf32, #tpu.memory_space<vmem>>, vector<8x128xf32>
    tpu.vector_store %arg12[%c40_696, %c128_697], %1766 {strides = array<i32>} : memref<128x256xf32, #tpu.memory_space<vmem>>, vector<8x128xf32>,
    %c48_698 = arith.constant 48 : index
    %c128_699 = arith.constant 128 : index
    %1768 = vector.load %arg11[%c48_698, %c128_699] : memref<128x256xf32, #tpu.memory_space<vmem>>, vector<1x128xf32>
    %1769 = vector.broadcast %1768 : vector<1x128xf32> to vector<8x128xf32>
    %1770 = arith.mulf %1679, %1769 : vector<8x128xf32>
    %c49_700 = arith.constant 49 : index
    %c128_701 = arith.constant 128 : index
    %1771 = vector.load %arg11[%c49_700, %c128_701] : memref<128x256xf32, #tpu.memory_space<vmem>>, vector<1x128xf32>
    %1772 = vector.broadcast %1771 : vector<1x128xf32> to vector<8x128xf32>
    %1773 = arith.mulf %1681, %1772 : vector<8x128xf32>
    %1774 = arith.addf %1770, %1773 : vector<8x128xf32>
    %c50_702 = arith.constant 50 : index
    %c128_703 = arith.constant 128 : index
    %1775 = vector.load %arg11[%c50_702, %c128_703] : memref<128x256xf32, #tpu.memory_space<vmem>>, vector<1x128xf32>
    %1776 = vector.broadcast %1775 : vector<1x128xf32> to vector<8x128xf32>
    %1777 = arith.mulf %1683, %1776 : vector<8x128xf32>
    %1778 = arith.addf %1774, %1777 : vector<8x128xf32>
    %c51_704 = arith.constant 51 : index
    %c128_705 = arith.constant 128 : index
    %1779 = vector.load %arg11[%c51_704, %c128_705] : memref<128x256xf32, #tpu.memory_space<vmem>>, vector<1x128xf32>
    %1780 = vector.broadcast %1779 : vector<1x128xf32> to vector<8x128xf32>
    %1781 = arith.mulf %1685, %1780 : vector<8x128xf32>
    %1782 = arith.addf %1778, %1781 : vector<8x128xf32>
    %c52_706 = arith.constant 52 : index
    %c128_707 = arith.constant 128 : index
    %1783 = vector.load %arg11[%c52_706, %c128_707] : memref<128x256xf32, #tpu.memory_space<vmem>>, vector<1x128xf32>
    %1784 = vector.broadcast %1783 : vector<1x128xf32> to vector<8x128xf32>
    %1785 = arith.mulf %1687, %1784 : vector<8x128xf32>
    %1786 = arith.addf %1782, %1785 : vector<8x128xf32>
    %c53_708 = arith.constant 53 : index
    %c128_709 = arith.constant 128 : index
    %1787 = vector.load %arg11[%c53_708, %c128_709] : memref<128x256xf32, #tpu.memory_space<vmem>>, vector<1x128xf32>
    %1788 = vector.broadcast %1787 : vector<1x128xf32> to vector<8x128xf32>
    %1789 = arith.mulf %1689, %1788 : vector<8x128xf32>
    %1790 = arith.addf %1786, %1789 : vector<8x128xf32>
    %c54_710 = arith.constant 54 : index
    %c128_711 = arith.constant 128 : index
    %1791 = vector.load %arg11[%c54_710, %c128_711] : memref<128x256xf32, #tpu.memory_space<vmem>>, vector<1x128xf32>
    %1792 = vector.broadcast %1791 : vector<1x128xf32> to vector<8x128xf32>
    %1793 = arith.mulf %1691, %1792 : vector<8x128xf32>
    %1794 = arith.addf %1790, %1793 : vector<8x128xf32>
    %c55_712 = arith.constant 55 : index
    %c128_713 = arith.constant 128 : index
    %1795 = vector.load %arg11[%c55_712, %c128_713] : memref<128x256xf32, #tpu.memory_space<vmem>>, vector<1x128xf32>
    %1796 = vector.broadcast %1795 : vector<1x128xf32> to vector<8x128xf32>
    %1797 = arith.mulf %1693, %1796 : vector<8x128xf32>
    %1798 = arith.addf %1794, %1797 : vector<8x128xf32>
    %1799 = arith.mulf %1798, %1701 : vector<8x128xf32>
    %c48_714 = arith.constant 48 : index
    %c128_715 = arith.constant 128 : index
    %1800 = vector.load %arg12[%c48_714, %c128_715] : memref<128x256xf32, #tpu.memory_space<vmem>>, vector<8x128xf32>
    tpu.vector_store %arg12[%c48_714, %c128_715], %1799 {strides = array<i32>} : memref<128x256xf32, #tpu.memory_space<vmem>>, vector<8x128xf32>,
    %c56_716 = arith.constant 56 : index
    %c128_717 = arith.constant 128 : index
    %1801 = vector.load %arg11[%c56_716, %c128_717] : memref<128x256xf32, #tpu.memory_space<vmem>>, vector<1x128xf32>
    %1802 = vector.broadcast %1801 : vector<1x128xf32> to vector<8x128xf32>
    %1803 = arith.mulf %1679, %1802 : vector<8x128xf32>
    %c57_718 = arith.constant 57 : index
    %c128_719 = arith.constant 128 : index
    %1804 = vector.load %arg11[%c57_718, %c128_719] : memref<128x256xf32, #tpu.memory_space<vmem>>, vector<1x128xf32>
    %1805 = vector.broadcast %1804 : vector<1x128xf32> to vector<8x128xf32>
    %1806 = arith.mulf %1681, %1805 : vector<8x128xf32>
    %1807 = arith.addf %1803, %1806 : vector<8x128xf32>
    %c58_720 = arith.constant 58 : index
    %c128_721 = arith.constant 128 : index
    %1808 = vector.load %arg11[%c58_720, %c128_721] : memref<128x256xf32, #tpu.memory_space<vmem>>, vector<1x128xf32>
    %1809 = vector.broadcast %1808 : vector<1x128xf32> to vector<8x128xf32>
    %1810 = arith.mulf %1683, %1809 : vector<8x128xf32>
    %1811 = arith.addf %1807, %1810 : vector<8x128xf32>
    %c59_722 = arith.constant 59 : index
    %c128_723 = arith.constant 128 : index
    %1812 = vector.load %arg11[%c59_722, %c128_723] : memref<128x256xf32, #tpu.memory_space<vmem>>, vector<1x128xf32>
    %1813 = vector.broadcast %1812 : vector<1x128xf32> to vector<8x128xf32>
    %1814 = arith.mulf %1685, %1813 : vector<8x128xf32>
    %1815 = arith.addf %1811, %1814 : vector<8x128xf32>
    %c60_724 = arith.constant 60 : index
    %c128_725 = arith.constant 128 : index
    %1816 = vector.load %arg11[%c60_724, %c128_725] : memref<128x256xf32, #tpu.memory_space<vmem>>, vector<1x128xf32>
    %1817 = vector.broadcast %1816 : vector<1x128xf32> to vector<8x128xf32>
    %1818 = arith.mulf %1687, %1817 : vector<8x128xf32>
    %1819 = arith.addf %1815, %1818 : vector<8x128xf32>
    %c61_726 = arith.constant 61 : index
    %c128_727 = arith.constant 128 : index
    %1820 = vector.load %arg11[%c61_726, %c128_727] : memref<128x256xf32, #tpu.memory_space<vmem>>, vector<1x128xf32>
    %1821 = vector.broadcast %1820 : vector<1x128xf32> to vector<8x128xf32>
    %1822 = arith.mulf %1689, %1821 : vector<8x128xf32>
    %1823 = arith.addf %1819, %1822 : vector<8x128xf32>
    %c62_728 = arith.constant 62 : index
    %c128_729 = arith.constant 128 : index
    %1824 = vector.load %arg11[%c62_728, %c128_729] : memref<128x256xf32, #tpu.memory_space<vmem>>, vector<1x128xf32>
    %1825 = vector.broadcast %1824 : vector<1x128xf32> to vector<8x128xf32>
    %1826 = arith.mulf %1691, %1825 : vector<8x128xf32>
    %1827 = arith.addf %1823, %1826 : vector<8x128xf32>
    %c63_730 = arith.constant 63 : index
    %c128_731 = arith.constant 128 : index
    %1828 = vector.load %arg11[%c63_730, %c128_731] : memref<128x256xf32, #tpu.memory_space<vmem>>, vector<1x128xf32>
    %1829 = vector.broadcast %1828 : vector<1x128xf32> to vector<8x128xf32>
    %1830 = arith.mulf %1693, %1829 : vector<8x128xf32>
    %1831 = arith.addf %1827, %1830 : vector<8x128xf32>
    %1832 = arith.mulf %1831, %1701 : vector<8x128xf32>
    %c56_732 = arith.constant 56 : index
    %c128_733 = arith.constant 128 : index
    %1833 = vector.load %arg12[%c56_732, %c128_733] : memref<128x256xf32, #tpu.memory_space<vmem>>, vector<8x128xf32>
    tpu.vector_store %arg12[%c56_732, %c128_733], %1832 {strides = array<i32>} : memref<128x256xf32, #tpu.memory_space<vmem>>, vector<8x128xf32>,
    %1834 = vector.extract_strided_slice %1227 {offsets = [8, 0, 0], sizes = [1, 8, 128], strides = [1, 1, 1]} : vector<16x8x128xf32> to vector<1x8x128xf32>
    %1835 = vector.shape_cast %1834 : vector<1x8x128xf32> to vector<8x128xf32>
    %c8_734 = arith.constant 8 : index
    %1836 = memref.load %arg1[%c8_734] : memref<16xf32, #tpu.memory_space<smem>>
    %1837 = vector.broadcast %1836 : f32 to vector<8x128xf32>
    %1838 = arith.addf %1835, %1837 : vector<8x128xf32>
    %1839 = vector.extract_strided_slice %1227 {offsets = [9, 0, 0], sizes = [1, 8, 128], strides = [1, 1, 1]} : vector<16x8x128xf32> to vector<1x8x128xf32>
    %1840 = vector.shape_cast %1839 : vector<1x8x128xf32> to vector<8x128xf32>
    %c9_735 = arith.constant 9 : index
    %1841 = memref.load %arg1[%c9_735] : memref<16xf32, #tpu.memory_space<smem>>
    %1842 = vector.broadcast %1841 : f32 to vector<8x128xf32>
    %1843 = arith.addf %1840, %1842 : vector<8x128xf32>
    %1844 = vector.extract_strided_slice %1227 {offsets = [10, 0, 0], sizes = [1, 8, 128], strides = [1, 1, 1]} : vector<16x8x128xf32> to vector<1x8x128xf32>
    %1845 = vector.shape_cast %1844 : vector<1x8x128xf32> to vector<8x128xf32>
    %c10_736 = arith.constant 10 : index
    %1846 = memref.load %arg1[%c10_736] : memref<16xf32, #tpu.memory_space<smem>>
    %1847 = vector.broadcast %1846 : f32 to vector<8x128xf32>
    %1848 = arith.addf %1845, %1847 : vector<8x128xf32>
    %1849 = vector.extract_strided_slice %1227 {offsets = [11, 0, 0], sizes = [1, 8, 128], strides = [1, 1, 1]} : vector<16x8x128xf32> to vector<1x8x128xf32>
    %1850 = vector.shape_cast %1849 : vector<1x8x128xf32> to vector<8x128xf32>
    %c11_737 = arith.constant 11 : index
    %1851 = memref.load %arg1[%c11_737] : memref<16xf32, #tpu.memory_space<smem>>
    %1852 = vector.broadcast %1851 : f32 to vector<8x128xf32>
    %1853 = arith.addf %1850, %1852 : vector<8x128xf32>
    %c64_738 = arith.constant 64 : index
    %c128_739 = arith.constant 128 : index
    %1854 = vector.load %arg10[%c64_738, %c128_739] : memref<128x256xf32, #tpu.memory_space<vmem>>, vector<1x128xf32>
    %1855 = vector.broadcast %1854 : vector<1x128xf32> to vector<8x128xf32>
    %1856 = arith.mulf %1838, %1855 : vector<8x128xf32>
    %c72_740 = arith.constant 72 : index
    %c128_741 = arith.constant 128 : index
    %1857 = vector.load %arg10[%c72_740, %c128_741] : memref<128x256xf32, #tpu.memory_space<vmem>>, vector<1x128xf32>
    %1858 = vector.broadcast %1857 : vector<1x128xf32> to vector<8x128xf32>
    %1859 = arith.mulf %1843, %1858 : vector<8x128xf32>
    %1860 = arith.addf %1856, %1859 : vector<8x128xf32>
    %c80_742 = arith.constant 80 : index
    %c128_743 = arith.constant 128 : index
    %1861 = vector.load %arg10[%c80_742, %c128_743] : memref<128x256xf32, #tpu.memory_space<vmem>>, vector<1x128xf32>
    %1862 = vector.broadcast %1861 : vector<1x128xf32> to vector<8x128xf32>
    %1863 = arith.mulf %1848, %1862 : vector<8x128xf32>
    %1864 = arith.addf %1860, %1863 : vector<8x128xf32>
    %c88_744 = arith.constant 88 : index
    %c128_745 = arith.constant 128 : index
    %1865 = vector.load %arg10[%c88_744, %c128_745] : memref<128x256xf32, #tpu.memory_space<vmem>>, vector<1x128xf32>
    %1866 = vector.broadcast %1865 : vector<1x128xf32> to vector<8x128xf32>
    %1867 = arith.mulf %1853, %1866 : vector<8x128xf32>
    %1868 = arith.addf %1864, %1867 : vector<8x128xf32>
    %c65_746 = arith.constant 65 : index
    %c128_747 = arith.constant 128 : index
    %1869 = vector.load %arg10[%c65_746, %c128_747] : memref<128x256xf32, #tpu.memory_space<vmem>>, vector<1x128xf32>
    %1870 = vector.broadcast %1869 : vector<1x128xf32> to vector<8x128xf32>
    %1871 = arith.mulf %1838, %1870 : vector<8x128xf32>
    %c73_748 = arith.constant 73 : index
    %c128_749 = arith.constant 128 : index
    %1872 = vector.load %arg10[%c73_748, %c128_749] : memref<128x256xf32, #tpu.memory_space<vmem>>, vector<1x128xf32>
    %1873 = vector.broadcast %1872 : vector<1x128xf32> to vector<8x128xf32>
    %1874 = arith.mulf %1843, %1873 : vector<8x128xf32>
    %1875 = arith.addf %1871, %1874 : vector<8x128xf32>
    %c81_750 = arith.constant 81 : index
    %c128_751 = arith.constant 128 : index
    %1876 = vector.load %arg10[%c81_750, %c128_751] : memref<128x256xf32, #tpu.memory_space<vmem>>, vector<1x128xf32>
    %1877 = vector.broadcast %1876 : vector<1x128xf32> to vector<8x128xf32>
    %1878 = arith.mulf %1848, %1877 : vector<8x128xf32>
    %1879 = arith.addf %1875, %1878 : vector<8x128xf32>
    %c89_752 = arith.constant 89 : index
    %c128_753 = arith.constant 128 : index
    %1880 = vector.load %arg10[%c89_752, %c128_753] : memref<128x256xf32, #tpu.memory_space<vmem>>, vector<1x128xf32>
    %1881 = vector.broadcast %1880 : vector<1x128xf32> to vector<8x128xf32>
    %1882 = arith.mulf %1853, %1881 : vector<8x128xf32>
    %1883 = arith.addf %1879, %1882 : vector<8x128xf32>
    %c66_754 = arith.constant 66 : index
    %c128_755 = arith.constant 128 : index
    %1884 = vector.load %arg10[%c66_754, %c128_755] : memref<128x256xf32, #tpu.memory_space<vmem>>, vector<1x128xf32>
    %1885 = vector.broadcast %1884 : vector<1x128xf32> to vector<8x128xf32>
    %1886 = arith.mulf %1838, %1885 : vector<8x128xf32>
    %c74_756 = arith.constant 74 : index
    %c128_757 = arith.constant 128 : index
    %1887 = vector.load %arg10[%c74_756, %c128_757] : memref<128x256xf32, #tpu.memory_space<vmem>>, vector<1x128xf32>
    %1888 = vector.broadcast %1887 : vector<1x128xf32> to vector<8x128xf32>
    %1889 = arith.mulf %1843, %1888 : vector<8x128xf32>
    %1890 = arith.addf %1886, %1889 : vector<8x128xf32>
    %c82_758 = arith.constant 82 : index
    %c128_759 = arith.constant 128 : index
    %1891 = vector.load %arg10[%c82_758, %c128_759] : memref<128x256xf32, #tpu.memory_space<vmem>>, vector<1x128xf32>
    %1892 = vector.broadcast %1891 : vector<1x128xf32> to vector<8x128xf32>
    %1893 = arith.mulf %1848, %1892 : vector<8x128xf32>
    %1894 = arith.addf %1890, %1893 : vector<8x128xf32>
    %c90_760 = arith.constant 90 : index
    %c128_761 = arith.constant 128 : index
    %1895 = vector.load %arg10[%c90_760, %c128_761] : memref<128x256xf32, #tpu.memory_space<vmem>>, vector<1x128xf32>
    %1896 = vector.broadcast %1895 : vector<1x128xf32> to vector<8x128xf32>
    %1897 = arith.mulf %1853, %1896 : vector<8x128xf32>
    %1898 = arith.addf %1894, %1897 : vector<8x128xf32>
    %c67_762 = arith.constant 67 : index
    %c128_763 = arith.constant 128 : index
    %1899 = vector.load %arg10[%c67_762, %c128_763] : memref<128x256xf32, #tpu.memory_space<vmem>>, vector<1x128xf32>
    %1900 = vector.broadcast %1899 : vector<1x128xf32> to vector<8x128xf32>
    %1901 = arith.mulf %1838, %1900 : vector<8x128xf32>
    %c75_764 = arith.constant 75 : index
    %c128_765 = arith.constant 128 : index
    %1902 = vector.load %arg10[%c75_764, %c128_765] : memref<128x256xf32, #tpu.memory_space<vmem>>, vector<1x128xf32>
    %1903 = vector.broadcast %1902 : vector<1x128xf32> to vector<8x128xf32>
    %1904 = arith.mulf %1843, %1903 : vector<8x128xf32>
    %1905 = arith.addf %1901, %1904 : vector<8x128xf32>
    %c83_766 = arith.constant 83 : index
    %c128_767 = arith.constant 128 : index
    %1906 = vector.load %arg10[%c83_766, %c128_767] : memref<128x256xf32, #tpu.memory_space<vmem>>, vector<1x128xf32>
    %1907 = vector.broadcast %1906 : vector<1x128xf32> to vector<8x128xf32>
    %1908 = arith.mulf %1848, %1907 : vector<8x128xf32>
    %1909 = arith.addf %1905, %1908 : vector<8x128xf32>
    %c91_768 = arith.constant 91 : index
    %c128_769 = arith.constant 128 : index
    %1910 = vector.load %arg10[%c91_768, %c128_769] : memref<128x256xf32, #tpu.memory_space<vmem>>, vector<1x128xf32>
    %1911 = vector.broadcast %1910 : vector<1x128xf32> to vector<8x128xf32>
    %1912 = arith.mulf %1853, %1911 : vector<8x128xf32>
    %1913 = arith.addf %1909, %1912 : vector<8x128xf32>
    %c68_770 = arith.constant 68 : index
    %c128_771 = arith.constant 128 : index
    %1914 = vector.load %arg10[%c68_770, %c128_771] : memref<128x256xf32, #tpu.memory_space<vmem>>, vector<1x128xf32>
    %1915 = vector.broadcast %1914 : vector<1x128xf32> to vector<8x128xf32>
    %1916 = arith.mulf %1838, %1915 : vector<8x128xf32>
    %c76_772 = arith.constant 76 : index
    %c128_773 = arith.constant 128 : index
    %1917 = vector.load %arg10[%c76_772, %c128_773] : memref<128x256xf32, #tpu.memory_space<vmem>>, vector<1x128xf32>
    %1918 = vector.broadcast %1917 : vector<1x128xf32> to vector<8x128xf32>
    %1919 = arith.mulf %1843, %1918 : vector<8x128xf32>
    %1920 = arith.addf %1916, %1919 : vector<8x128xf32>
    %c84_774 = arith.constant 84 : index
    %c128_775 = arith.constant 128 : index
    %1921 = vector.load %arg10[%c84_774, %c128_775] : memref<128x256xf32, #tpu.memory_space<vmem>>, vector<1x128xf32>
    %1922 = vector.broadcast %1921 : vector<1x128xf32> to vector<8x128xf32>
    %1923 = arith.mulf %1848, %1922 : vector<8x128xf32>
    %1924 = arith.addf %1920, %1923 : vector<8x128xf32>
    %c92_776 = arith.constant 92 : index
    %c128_777 = arith.constant 128 : index
    %1925 = vector.load %arg10[%c92_776, %c128_777] : memref<128x256xf32, #tpu.memory_space<vmem>>, vector<1x128xf32>
    %1926 = vector.broadcast %1925 : vector<1x128xf32> to vector<8x128xf32>
    %1927 = arith.mulf %1853, %1926 : vector<8x128xf32>
    %1928 = arith.addf %1924, %1927 : vector<8x128xf32>
    %c69_778 = arith.constant 69 : index
    %c128_779 = arith.constant 128 : index
    %1929 = vector.load %arg10[%c69_778, %c128_779] : memref<128x256xf32, #tpu.memory_space<vmem>>, vector<1x128xf32>
    %1930 = vector.broadcast %1929 : vector<1x128xf32> to vector<8x128xf32>
    %1931 = arith.mulf %1838, %1930 : vector<8x128xf32>
    %c77_780 = arith.constant 77 : index
    %c128_781 = arith.constant 128 : index
    %1932 = vector.load %arg10[%c77_780, %c128_781] : memref<128x256xf32, #tpu.memory_space<vmem>>, vector<1x128xf32>
    %1933 = vector.broadcast %1932 : vector<1x128xf32> to vector<8x128xf32>
    %1934 = arith.mulf %1843, %1933 : vector<8x128xf32>
    %1935 = arith.addf %1931, %1934 : vector<8x128xf32>
    %c85_782 = arith.constant 85 : index
    %c128_783 = arith.constant 128 : index
    %1936 = vector.load %arg10[%c85_782, %c128_783] : memref<128x256xf32, #tpu.memory_space<vmem>>, vector<1x128xf32>
    %1937 = vector.broadcast %1936 : vector<1x128xf32> to vector<8x128xf32>
    %1938 = arith.mulf %1848, %1937 : vector<8x128xf32>
    %1939 = arith.addf %1935, %1938 : vector<8x128xf32>
    %c93_784 = arith.constant 93 : index
    %c128_785 = arith.constant 128 : index
    %1940 = vector.load %arg10[%c93_784, %c128_785] : memref<128x256xf32, #tpu.memory_space<vmem>>, vector<1x128xf32>
    %1941 = vector.broadcast %1940 : vector<1x128xf32> to vector<8x128xf32>
    %1942 = arith.mulf %1853, %1941 : vector<8x128xf32>
    %1943 = arith.addf %1939, %1942 : vector<8x128xf32>
    %c70_786 = arith.constant 70 : index
    %c128_787 = arith.constant 128 : index
    %1944 = vector.load %arg10[%c70_786, %c128_787] : memref<128x256xf32, #tpu.memory_space<vmem>>, vector<1x128xf32>
    %1945 = vector.broadcast %1944 : vector<1x128xf32> to vector<8x128xf32>
    %1946 = arith.mulf %1838, %1945 : vector<8x128xf32>
    %c78_788 = arith.constant 78 : index
    %c128_789 = arith.constant 128 : index
    %1947 = vector.load %arg10[%c78_788, %c128_789] : memref<128x256xf32, #tpu.memory_space<vmem>>, vector<1x128xf32>
    %1948 = vector.broadcast %1947 : vector<1x128xf32> to vector<8x128xf32>
    %1949 = arith.mulf %1843, %1948 : vector<8x128xf32>
    %1950 = arith.addf %1946, %1949 : vector<8x128xf32>
    %c86_790 = arith.constant 86 : index
    %c128_791 = arith.constant 128 : index
    %1951 = vector.load %arg10[%c86_790, %c128_791] : memref<128x256xf32, #tpu.memory_space<vmem>>, vector<1x128xf32>
    %1952 = vector.broadcast %1951 : vector<1x128xf32> to vector<8x128xf32>
    %1953 = arith.mulf %1848, %1952 : vector<8x128xf32>
    %1954 = arith.addf %1950, %1953 : vector<8x128xf32>
    %c94_792 = arith.constant 94 : index
    %c128_793 = arith.constant 128 : index
    %1955 = vector.load %arg10[%c94_792, %c128_793] : memref<128x256xf32, #tpu.memory_space<vmem>>, vector<1x128xf32>
    %1956 = vector.broadcast %1955 : vector<1x128xf32> to vector<8x128xf32>
    %1957 = arith.mulf %1853, %1956 : vector<8x128xf32>
    %1958 = arith.addf %1954, %1957 : vector<8x128xf32>
    %c71_794 = arith.constant 71 : index
    %c128_795 = arith.constant 128 : index
    %1959 = vector.load %arg10[%c71_794, %c128_795] : memref<128x256xf32, #tpu.memory_space<vmem>>, vector<1x128xf32>
    %1960 = vector.broadcast %1959 : vector<1x128xf32> to vector<8x128xf32>
    %1961 = arith.mulf %1838, %1960 : vector<8x128xf32>
    %c79_796 = arith.constant 79 : index
    %c128_797 = arith.constant 128 : index
    %1962 = vector.load %arg10[%c79_796, %c128_797] : memref<128x256xf32, #tpu.memory_space<vmem>>, vector<1x128xf32>
    %1963 = vector.broadcast %1962 : vector<1x128xf32> to vector<8x128xf32>
    %1964 = arith.mulf %1843, %1963 : vector<8x128xf32>
    %1965 = arith.addf %1961, %1964 : vector<8x128xf32>
    %c87_798 = arith.constant 87 : index
    %c128_799 = arith.constant 128 : index
    %1966 = vector.load %arg10[%c87_798, %c128_799] : memref<128x256xf32, #tpu.memory_space<vmem>>, vector<1x128xf32>
    %1967 = vector.broadcast %1966 : vector<1x128xf32> to vector<8x128xf32>
    %1968 = arith.mulf %1848, %1967 : vector<8x128xf32>
    %1969 = arith.addf %1965, %1968 : vector<8x128xf32>
    %c95_800 = arith.constant 95 : index
    %c128_801 = arith.constant 128 : index
    %1970 = vector.load %arg10[%c95_800, %c128_801] : memref<128x256xf32, #tpu.memory_space<vmem>>, vector<1x128xf32>
    %1971 = vector.broadcast %1970 : vector<1x128xf32> to vector<8x128xf32>
    %1972 = arith.mulf %1853, %1971 : vector<8x128xf32>
    %1973 = arith.addf %1969, %1972 : vector<8x128xf32>
    %1974 = arith.maximumf %1868, %1883 : vector<8x128xf32>
    %1975 = arith.maximumf %1974, %1898 : vector<8x128xf32>
    %1976 = arith.maximumf %1975, %1913 : vector<8x128xf32>
    %1977 = arith.maximumf %1976, %1928 : vector<8x128xf32>
    %1978 = arith.maximumf %1977, %1943 : vector<8x128xf32>
    %1979 = arith.maximumf %1978, %1958 : vector<8x128xf32>
    %1980 = arith.maximumf %1979, %1973 : vector<8x128xf32>
    %1981 = arith.subf %1868, %1980 : vector<8x128xf32>
    %1982 = math.exp %1981 : vector<8x128xf32>
    %1983 = arith.subf %1883, %1980 : vector<8x128xf32>
    %1984 = math.exp %1983 : vector<8x128xf32>
    %1985 = arith.subf %1898, %1980 : vector<8x128xf32>
    %1986 = math.exp %1985 : vector<8x128xf32>
    %1987 = arith.subf %1913, %1980 : vector<8x128xf32>
    %1988 = math.exp %1987 : vector<8x128xf32>
    %1989 = arith.subf %1928, %1980 : vector<8x128xf32>
    %1990 = math.exp %1989 : vector<8x128xf32>
    %1991 = arith.subf %1943, %1980 : vector<8x128xf32>
    %1992 = math.exp %1991 : vector<8x128xf32>
    %1993 = arith.subf %1958, %1980 : vector<8x128xf32>
    %1994 = math.exp %1993 : vector<8x128xf32>
    %1995 = arith.subf %1973, %1980 : vector<8x128xf32>
    %1996 = math.exp %1995 : vector<8x128xf32>
    %1997 = arith.addf %1982, %1984 : vector<8x128xf32>
    %1998 = arith.addf %1997, %1986 : vector<8x128xf32>
    %1999 = arith.addf %1998, %1988 : vector<8x128xf32>
    %2000 = arith.addf %1999, %1990 : vector<8x128xf32>
    %2001 = arith.addf %2000, %1992 : vector<8x128xf32>
    %2002 = arith.addf %2001, %1994 : vector<8x128xf32>
    %2003 = arith.addf %2002, %1996 : vector<8x128xf32>
    %2004 = tpu.reciprocal %2003 {approx = true} : vector<8x128xf32> -> vector<8x128xf32>
    %c64_802 = arith.constant 64 : index
    %c128_803 = arith.constant 128 : index
    %2005 = vector.load %arg11[%c64_802, %c128_803] : memref<128x256xf32, #tpu.memory_space<vmem>>, vector<1x128xf32>
    %2006 = vector.broadcast %2005 : vector<1x128xf32> to vector<8x128xf32>
    %2007 = arith.mulf %1982, %2006 : vector<8x128xf32>
    %c65_804 = arith.constant 65 : index
    %c128_805 = arith.constant 128 : index
    %2008 = vector.load %arg11[%c65_804, %c128_805] : memref<128x256xf32, #tpu.memory_space<vmem>>, vector<1x128xf32>
    %2009 = vector.broadcast %2008 : vector<1x128xf32> to vector<8x128xf32>
    %2010 = arith.mulf %1984, %2009 : vector<8x128xf32>
    %2011 = arith.addf %2007, %2010 : vector<8x128xf32>
    %c66_806 = arith.constant 66 : index
    %c128_807 = arith.constant 128 : index
    %2012 = vector.load %arg11[%c66_806, %c128_807] : memref<128x256xf32, #tpu.memory_space<vmem>>, vector<1x128xf32>
    %2013 = vector.broadcast %2012 : vector<1x128xf32> to vector<8x128xf32>
    %2014 = arith.mulf %1986, %2013 : vector<8x128xf32>
    %2015 = arith.addf %2011, %2014 : vector<8x128xf32>
    %c67_808 = arith.constant 67 : index
    %c128_809 = arith.constant 128 : index
    %2016 = vector.load %arg11[%c67_808, %c128_809] : memref<128x256xf32, #tpu.memory_space<vmem>>, vector<1x128xf32>
    %2017 = vector.broadcast %2016 : vector<1x128xf32> to vector<8x128xf32>
    %2018 = arith.mulf %1988, %2017 : vector<8x128xf32>
    %2019 = arith.addf %2015, %2018 : vector<8x128xf32>
    %c68_810 = arith.constant 68 : index
    %c128_811 = arith.constant 128 : index
    %2020 = vector.load %arg11[%c68_810, %c128_811] : memref<128x256xf32, #tpu.memory_space<vmem>>, vector<1x128xf32>
    %2021 = vector.broadcast %2020 : vector<1x128xf32> to vector<8x128xf32>
    %2022 = arith.mulf %1990, %2021 : vector<8x128xf32>
    %2023 = arith.addf %2019, %2022 : vector<8x128xf32>
    %c69_812 = arith.constant 69 : index
    %c128_813 = arith.constant 128 : index
    %2024 = vector.load %arg11[%c69_812, %c128_813] : memref<128x256xf32, #tpu.memory_space<vmem>>, vector<1x128xf32>
    %2025 = vector.broadcast %2024 : vector<1x128xf32> to vector<8x128xf32>
    %2026 = arith.mulf %1992, %2025 : vector<8x128xf32>
    %2027 = arith.addf %2023, %2026 : vector<8x128xf32>
    %c70_814 = arith.constant 70 : index
    %c128_815 = arith.constant 128 : index
    %2028 = vector.load %arg11[%c70_814, %c128_815] : memref<128x256xf32, #tpu.memory_space<vmem>>, vector<1x128xf32>
    %2029 = vector.broadcast %2028 : vector<1x128xf32> to vector<8x128xf32>
    %2030 = arith.mulf %1994, %2029 : vector<8x128xf32>
    %2031 = arith.addf %2027, %2030 : vector<8x128xf32>
    %c71_816 = arith.constant 71 : index
    %c128_817 = arith.constant 128 : index
    %2032 = vector.load %arg11[%c71_816, %c128_817] : memref<128x256xf32, #tpu.memory_space<vmem>>, vector<1x128xf32>
    %2033 = vector.broadcast %2032 : vector<1x128xf32> to vector<8x128xf32>
    %2034 = arith.mulf %1996, %2033 : vector<8x128xf32>
    %2035 = arith.addf %2031, %2034 : vector<8x128xf32>
    %2036 = arith.mulf %2035, %2004 : vector<8x128xf32>
    %c64_818 = arith.constant 64 : index
    %c128_819 = arith.constant 128 : index
    %2037 = vector.load %arg12[%c64_818, %c128_819] : memref<128x256xf32, #tpu.memory_space<vmem>>, vector<8x128xf32>
    tpu.vector_store %arg12[%c64_818, %c128_819], %2036 {strides = array<i32>} : memref<128x256xf32, #tpu.memory_space<vmem>>, vector<8x128xf32>,
    %c72_820 = arith.constant 72 : index
    %c128_821 = arith.constant 128 : index
    %2038 = vector.load %arg11[%c72_820, %c128_821] : memref<128x256xf32, #tpu.memory_space<vmem>>, vector<1x128xf32>
    %2039 = vector.broadcast %2038 : vector<1x128xf32> to vector<8x128xf32>
    %2040 = arith.mulf %1982, %2039 : vector<8x128xf32>
    %c73_822 = arith.constant 73 : index
    %c128_823 = arith.constant 128 : index
    %2041 = vector.load %arg11[%c73_822, %c128_823] : memref<128x256xf32, #tpu.memory_space<vmem>>, vector<1x128xf32>
    %2042 = vector.broadcast %2041 : vector<1x128xf32> to vector<8x128xf32>
    %2043 = arith.mulf %1984, %2042 : vector<8x128xf32>
    %2044 = arith.addf %2040, %2043 : vector<8x128xf32>
    %c74_824 = arith.constant 74 : index
    %c128_825 = arith.constant 128 : index
    %2045 = vector.load %arg11[%c74_824, %c128_825] : memref<128x256xf32, #tpu.memory_space<vmem>>, vector<1x128xf32>
    %2046 = vector.broadcast %2045 : vector<1x128xf32> to vector<8x128xf32>
    %2047 = arith.mulf %1986, %2046 : vector<8x128xf32>
    %2048 = arith.addf %2044, %2047 : vector<8x128xf32>
    %c75_826 = arith.constant 75 : index
    %c128_827 = arith.constant 128 : index
    %2049 = vector.load %arg11[%c75_826, %c128_827] : memref<128x256xf32, #tpu.memory_space<vmem>>, vector<1x128xf32>
    %2050 = vector.broadcast %2049 : vector<1x128xf32> to vector<8x128xf32>
    %2051 = arith.mulf %1988, %2050 : vector<8x128xf32>
    %2052 = arith.addf %2048, %2051 : vector<8x128xf32>
    %c76_828 = arith.constant 76 : index
    %c128_829 = arith.constant 128 : index
    %2053 = vector.load %arg11[%c76_828, %c128_829] : memref<128x256xf32, #tpu.memory_space<vmem>>, vector<1x128xf32>
    %2054 = vector.broadcast %2053 : vector<1x128xf32> to vector<8x128xf32>
    %2055 = arith.mulf %1990, %2054 : vector<8x128xf32>
    %2056 = arith.addf %2052, %2055 : vector<8x128xf32>
    %c77_830 = arith.constant 77 : index
    %c128_831 = arith.constant 128 : index
    %2057 = vector.load %arg11[%c77_830, %c128_831] : memref<128x256xf32, #tpu.memory_space<vmem>>, vector<1x128xf32>
    %2058 = vector.broadcast %2057 : vector<1x128xf32> to vector<8x128xf32>
    %2059 = arith.mulf %1992, %2058 : vector<8x128xf32>
    %2060 = arith.addf %2056, %2059 : vector<8x128xf32>
    %c78_832 = arith.constant 78 : index
    %c128_833 = arith.constant 128 : index
    %2061 = vector.load %arg11[%c78_832, %c128_833] : memref<128x256xf32, #tpu.memory_space<vmem>>, vector<1x128xf32>
    %2062 = vector.broadcast %2061 : vector<1x128xf32> to vector<8x128xf32>
    %2063 = arith.mulf %1994, %2062 : vector<8x128xf32>
    %2064 = arith.addf %2060, %2063 : vector<8x128xf32>
    %c79_834 = arith.constant 79 : index
    %c128_835 = arith.constant 128 : index
    %2065 = vector.load %arg11[%c79_834, %c128_835] : memref<128x256xf32, #tpu.memory_space<vmem>>, vector<1x128xf32>
    %2066 = vector.broadcast %2065 : vector<1x128xf32> to vector<8x128xf32>
    %2067 = arith.mulf %1996, %2066 : vector<8x128xf32>
    %2068 = arith.addf %2064, %2067 : vector<8x128xf32>
    %2069 = arith.mulf %2068, %2004 : vector<8x128xf32>
    %c72_836 = arith.constant 72 : index
    %c128_837 = arith.constant 128 : index
    %2070 = vector.load %arg12[%c72_836, %c128_837] : memref<128x256xf32, #tpu.memory_space<vmem>>, vector<8x128xf32>
    tpu.vector_store %arg12[%c72_836, %c128_837], %2069 {strides = array<i32>} : memref<128x256xf32, #tpu.memory_space<vmem>>, vector<8x128xf32>,
    %c80_838 = arith.constant 80 : index
    %c128_839 = arith.constant 128 : index
    %2071 = vector.load %arg11[%c80_838, %c128_839] : memref<128x256xf32, #tpu.memory_space<vmem>>, vector<1x128xf32>
    %2072 = vector.broadcast %2071 : vector<1x128xf32> to vector<8x128xf32>
    %2073 = arith.mulf %1982, %2072 : vector<8x128xf32>
    %c81_840 = arith.constant 81 : index
    %c128_841 = arith.constant 128 : index
    %2074 = vector.load %arg11[%c81_840, %c128_841] : memref<128x256xf32, #tpu.memory_space<vmem>>, vector<1x128xf32>
    %2075 = vector.broadcast %2074 : vector<1x128xf32> to vector<8x128xf32>
    %2076 = arith.mulf %1984, %2075 : vector<8x128xf32>
    %2077 = arith.addf %2073, %2076 : vector<8x128xf32>
    %c82_842 = arith.constant 82 : index
    %c128_843 = arith.constant 128 : index
    %2078 = vector.load %arg11[%c82_842, %c128_843] : memref<128x256xf32, #tpu.memory_space<vmem>>, vector<1x128xf32>
    %2079 = vector.broadcast %2078 : vector<1x128xf32> to vector<8x128xf32>
    %2080 = arith.mulf %1986, %2079 : vector<8x128xf32>
    %2081 = arith.addf %2077, %2080 : vector<8x128xf32>
    %c83_844 = arith.constant 83 : index
    %c128_845 = arith.constant 128 : index
    %2082 = vector.load %arg11[%c83_844, %c128_845] : memref<128x256xf32, #tpu.memory_space<vmem>>, vector<1x128xf32>
    %2083 = vector.broadcast %2082 : vector<1x128xf32> to vector<8x128xf32>
    %2084 = arith.mulf %1988, %2083 : vector<8x128xf32>
    %2085 = arith.addf %2081, %2084 : vector<8x128xf32>
    %c84_846 = arith.constant 84 : index
    %c128_847 = arith.constant 128 : index
    %2086 = vector.load %arg11[%c84_846, %c128_847] : memref<128x256xf32, #tpu.memory_space<vmem>>, vector<1x128xf32>
    %2087 = vector.broadcast %2086 : vector<1x128xf32> to vector<8x128xf32>
    %2088 = arith.mulf %1990, %2087 : vector<8x128xf32>
    %2089 = arith.addf %2085, %2088 : vector<8x128xf32>
    %c85_848 = arith.constant 85 : index
    %c128_849 = arith.constant 128 : index
    %2090 = vector.load %arg11[%c85_848, %c128_849] : memref<128x256xf32, #tpu.memory_space<vmem>>, vector<1x128xf32>
    %2091 = vector.broadcast %2090 : vector<1x128xf32> to vector<8x128xf32>
    %2092 = arith.mulf %1992, %2091 : vector<8x128xf32>
    %2093 = arith.addf %2089, %2092 : vector<8x128xf32>
    %c86_850 = arith.constant 86 : index
    %c128_851 = arith.constant 128 : index
    %2094 = vector.load %arg11[%c86_850, %c128_851] : memref<128x256xf32, #tpu.memory_space<vmem>>, vector<1x128xf32>
    %2095 = vector.broadcast %2094 : vector<1x128xf32> to vector<8x128xf32>
    %2096 = arith.mulf %1994, %2095 : vector<8x128xf32>
    %2097 = arith.addf %2093, %2096 : vector<8x128xf32>
    %c87_852 = arith.constant 87 : index
    %c128_853 = arith.constant 128 : index
    %2098 = vector.load %arg11[%c87_852, %c128_853] : memref<128x256xf32, #tpu.memory_space<vmem>>, vector<1x128xf32>
    %2099 = vector.broadcast %2098 : vector<1x128xf32> to vector<8x128xf32>
    %2100 = arith.mulf %1996, %2099 : vector<8x128xf32>
    %2101 = arith.addf %2097, %2100 : vector<8x128xf32>
    %2102 = arith.mulf %2101, %2004 : vector<8x128xf32>
    %c80_854 = arith.constant 80 : index
    %c128_855 = arith.constant 128 : index
    %2103 = vector.load %arg12[%c80_854, %c128_855] : memref<128x256xf32, #tpu.memory_space<vmem>>, vector<8x128xf32>
    tpu.vector_store %arg12[%c80_854, %c128_855], %2102 {strides = array<i32>} : memref<128x256xf32, #tpu.memory_space<vmem>>, vector<8x128xf32>,
    %c88_856 = arith.constant 88 : index
    %c128_857 = arith.constant 128 : index
    %2104 = vector.load %arg11[%c88_856, %c128_857] : memref<128x256xf32, #tpu.memory_space<vmem>>, vector<1x128xf32>
    %2105 = vector.broadcast %2104 : vector<1x128xf32> to vector<8x128xf32>
    %2106 = arith.mulf %1982, %2105 : vector<8x128xf32>
    %c89_858 = arith.constant 89 : index
    %c128_859 = arith.constant 128 : index
    %2107 = vector.load %arg11[%c89_858, %c128_859] : memref<128x256xf32, #tpu.memory_space<vmem>>, vector<1x128xf32>
    %2108 = vector.broadcast %2107 : vector<1x128xf32> to vector<8x128xf32>
    %2109 = arith.mulf %1984, %2108 : vector<8x128xf32>
    %2110 = arith.addf %2106, %2109 : vector<8x128xf32>
    %c90_860 = arith.constant 90 : index
    %c128_861 = arith.constant 128 : index
    %2111 = vector.load %arg11[%c90_860, %c128_861] : memref<128x256xf32, #tpu.memory_space<vmem>>, vector<1x128xf32>
    %2112 = vector.broadcast %2111 : vector<1x128xf32> to vector<8x128xf32>
    %2113 = arith.mulf %1986, %2112 : vector<8x128xf32>
    %2114 = arith.addf %2110, %2113 : vector<8x128xf32>
    %c91_862 = arith.constant 91 : index
    %c128_863 = arith.constant 128 : index
    %2115 = vector.load %arg11[%c91_862, %c128_863] : memref<128x256xf32, #tpu.memory_space<vmem>>, vector<1x128xf32>
    %2116 = vector.broadcast %2115 : vector<1x128xf32> to vector<8x128xf32>
    %2117 = arith.mulf %1988, %2116 : vector<8x128xf32>
    %2118 = arith.addf %2114, %2117 : vector<8x128xf32>
    %c92_864 = arith.constant 92 : index
    %c128_865 = arith.constant 128 : index
    %2119 = vector.load %arg11[%c92_864, %c128_865] : memref<128x256xf32, #tpu.memory_space<vmem>>, vector<1x128xf32>
    %2120 = vector.broadcast %2119 : vector<1x128xf32> to vector<8x128xf32>
    %2121 = arith.mulf %1990, %2120 : vector<8x128xf32>
    %2122 = arith.addf %2118, %2121 : vector<8x128xf32>
    %c93_866 = arith.constant 93 : index
    %c128_867 = arith.constant 128 : index
    %2123 = vector.load %arg11[%c93_866, %c128_867] : memref<128x256xf32, #tpu.memory_space<vmem>>, vector<1x128xf32>
    %2124 = vector.broadcast %2123 : vector<1x128xf32> to vector<8x128xf32>
    %2125 = arith.mulf %1992, %2124 : vector<8x128xf32>
    %2126 = arith.addf %2122, %2125 : vector<8x128xf32>
    %c94_868 = arith.constant 94 : index
    %c128_869 = arith.constant 128 : index
    %2127 = vector.load %arg11[%c94_868, %c128_869] : memref<128x256xf32, #tpu.memory_space<vmem>>, vector<1x128xf32>
    %2128 = vector.broadcast %2127 : vector<1x128xf32> to vector<8x128xf32>
    %2129 = arith.mulf %1994, %2128 : vector<8x128xf32>
    %2130 = arith.addf %2126, %2129 : vector<8x128xf32>
    %c95_870 = arith.constant 95 : index
    %c128_871 = arith.constant 128 : index
    %2131 = vector.load %arg11[%c95_870, %c128_871] : memref<128x256xf32, #tpu.memory_space<vmem>>, vector<1x128xf32>
    %2132 = vector.broadcast %2131 : vector<1x128xf32> to vector<8x128xf32>
    %2133 = arith.mulf %1996, %2132 : vector<8x128xf32>
    %2134 = arith.addf %2130, %2133 : vector<8x128xf32>
    %2135 = arith.mulf %2134, %2004 : vector<8x128xf32>
    %c88_872 = arith.constant 88 : index
    %c128_873 = arith.constant 128 : index
    %2136 = vector.load %arg12[%c88_872, %c128_873] : memref<128x256xf32, #tpu.memory_space<vmem>>, vector<8x128xf32>
    tpu.vector_store %arg12[%c88_872, %c128_873], %2135 {strides = array<i32>} : memref<128x256xf32, #tpu.memory_space<vmem>>, vector<8x128xf32>,
    %2137 = vector.extract_strided_slice %1227 {offsets = [12, 0, 0], sizes = [1, 8, 128], strides = [1, 1, 1]} : vector<16x8x128xf32> to vector<1x8x128xf32>
    %2138 = vector.shape_cast %2137 : vector<1x8x128xf32> to vector<8x128xf32>
    %c12_874 = arith.constant 12 : index
    %2139 = memref.load %arg1[%c12_874] : memref<16xf32, #tpu.memory_space<smem>>
    %2140 = vector.broadcast %2139 : f32 to vector<8x128xf32>
    %2141 = arith.addf %2138, %2140 : vector<8x128xf32>
    %2142 = vector.extract_strided_slice %1227 {offsets = [13, 0, 0], sizes = [1, 8, 128], strides = [1, 1, 1]} : vector<16x8x128xf32> to vector<1x8x128xf32>
    %2143 = vector.shape_cast %2142 : vector<1x8x128xf32> to vector<8x128xf32>
    %c13_875 = arith.constant 13 : index
    %2144 = memref.load %arg1[%c13_875] : memref<16xf32, #tpu.memory_space<smem>>
    %2145 = vector.broadcast %2144 : f32 to vector<8x128xf32>
    %2146 = arith.addf %2143, %2145 : vector<8x128xf32>
    %2147 = vector.extract_strided_slice %1227 {offsets = [14, 0, 0], sizes = [1, 8, 128], strides = [1, 1, 1]} : vector<16x8x128xf32> to vector<1x8x128xf32>
    %2148 = vector.shape_cast %2147 : vector<1x8x128xf32> to vector<8x128xf32>
    %c14_876 = arith.constant 14 : index
    %2149 = memref.load %arg1[%c14_876] : memref<16xf32, #tpu.memory_space<smem>>
    %2150 = vector.broadcast %2149 : f32 to vector<8x128xf32>
    %2151 = arith.addf %2148, %2150 : vector<8x128xf32>
    %2152 = vector.extract_strided_slice %1227 {offsets = [15, 0, 0], sizes = [1, 8, 128], strides = [1, 1, 1]} : vector<16x8x128xf32> to vector<1x8x128xf32>
    %2153 = vector.shape_cast %2152 : vector<1x8x128xf32> to vector<8x128xf32>
    %c15_877 = arith.constant 15 : index
    %2154 = memref.load %arg1[%c15_877] : memref<16xf32, #tpu.memory_space<smem>>
    %2155 = vector.broadcast %2154 : f32 to vector<8x128xf32>
    %2156 = arith.addf %2153, %2155 : vector<8x128xf32>
    %c96_878 = arith.constant 96 : index
    %c128_879 = arith.constant 128 : index
    %2157 = vector.load %arg10[%c96_878, %c128_879] : memref<128x256xf32, #tpu.memory_space<vmem>>, vector<1x128xf32>
    %2158 = vector.broadcast %2157 : vector<1x128xf32> to vector<8x128xf32>
    %2159 = arith.mulf %2141, %2158 : vector<8x128xf32>
    %c104_880 = arith.constant 104 : index
    %c128_881 = arith.constant 128 : index
    %2160 = vector.load %arg10[%c104_880, %c128_881] : memref<128x256xf32, #tpu.memory_space<vmem>>, vector<1x128xf32>
    %2161 = vector.broadcast %2160 : vector<1x128xf32> to vector<8x128xf32>
    %2162 = arith.mulf %2146, %2161 : vector<8x128xf32>
    %2163 = arith.addf %2159, %2162 : vector<8x128xf32>
    %c112_882 = arith.constant 112 : index
    %c128_883 = arith.constant 128 : index
    %2164 = vector.load %arg10[%c112_882, %c128_883] : memref<128x256xf32, #tpu.memory_space<vmem>>, vector<1x128xf32>
    %2165 = vector.broadcast %2164 : vector<1x128xf32> to vector<8x128xf32>
    %2166 = arith.mulf %2151, %2165 : vector<8x128xf32>
    %2167 = arith.addf %2163, %2166 : vector<8x128xf32>
    %c120_884 = arith.constant 120 : index
    %c128_885 = arith.constant 128 : index
    %2168 = vector.load %arg10[%c120_884, %c128_885] : memref<128x256xf32, #tpu.memory_space<vmem>>, vector<1x128xf32>
    %2169 = vector.broadcast %2168 : vector<1x128xf32> to vector<8x128xf32>
    %2170 = arith.mulf %2156, %2169 : vector<8x128xf32>
    %2171 = arith.addf %2167, %2170 : vector<8x128xf32>
    %c97_886 = arith.constant 97 : index
    %c128_887 = arith.constant 128 : index
    %2172 = vector.load %arg10[%c97_886, %c128_887] : memref<128x256xf32, #tpu.memory_space<vmem>>, vector<1x128xf32>
    %2173 = vector.broadcast %2172 : vector<1x128xf32> to vector<8x128xf32>
    %2174 = arith.mulf %2141, %2173 : vector<8x128xf32>
    %c105_888 = arith.constant 105 : index
    %c128_889 = arith.constant 128 : index
    %2175 = vector.load %arg10[%c105_888, %c128_889] : memref<128x256xf32, #tpu.memory_space<vmem>>, vector<1x128xf32>
    %2176 = vector.broadcast %2175 : vector<1x128xf32> to vector<8x128xf32>
    %2177 = arith.mulf %2146, %2176 : vector<8x128xf32>
    %2178 = arith.addf %2174, %2177 : vector<8x128xf32>
    %c113_890 = arith.constant 113 : index
    %c128_891 = arith.constant 128 : index
    %2179 = vector.load %arg10[%c113_890, %c128_891] : memref<128x256xf32, #tpu.memory_space<vmem>>, vector<1x128xf32>
    %2180 = vector.broadcast %2179 : vector<1x128xf32> to vector<8x128xf32>
    %2181 = arith.mulf %2151, %2180 : vector<8x128xf32>
    %2182 = arith.addf %2178, %2181 : vector<8x128xf32>
    %c121_892 = arith.constant 121 : index
    %c128_893 = arith.constant 128 : index
    %2183 = vector.load %arg10[%c121_892, %c128_893] : memref<128x256xf32, #tpu.memory_space<vmem>>, vector<1x128xf32>
    %2184 = vector.broadcast %2183 : vector<1x128xf32> to vector<8x128xf32>
    %2185 = arith.mulf %2156, %2184 : vector<8x128xf32>
    %2186 = arith.addf %2182, %2185 : vector<8x128xf32>
    %c98_894 = arith.constant 98 : index
    %c128_895 = arith.constant 128 : index
    %2187 = vector.load %arg10[%c98_894, %c128_895] : memref<128x256xf32, #tpu.memory_space<vmem>>, vector<1x128xf32>
    %2188 = vector.broadcast %2187 : vector<1x128xf32> to vector<8x128xf32>
    %2189 = arith.mulf %2141, %2188 : vector<8x128xf32>
    %c106_896 = arith.constant 106 : index
    %c128_897 = arith.constant 128 : index
    %2190 = vector.load %arg10[%c106_896, %c128_897] : memref<128x256xf32, #tpu.memory_space<vmem>>, vector<1x128xf32>
    %2191 = vector.broadcast %2190 : vector<1x128xf32> to vector<8x128xf32>
    %2192 = arith.mulf %2146, %2191 : vector<8x128xf32>
    %2193 = arith.addf %2189, %2192 : vector<8x128xf32>
    %c114_898 = arith.constant 114 : index
    %c128_899 = arith.constant 128 : index
    %2194 = vector.load %arg10[%c114_898, %c128_899] : memref<128x256xf32, #tpu.memory_space<vmem>>, vector<1x128xf32>
    %2195 = vector.broadcast %2194 : vector<1x128xf32> to vector<8x128xf32>
    %2196 = arith.mulf %2151, %2195 : vector<8x128xf32>
    %2197 = arith.addf %2193, %2196 : vector<8x128xf32>
    %c122_900 = arith.constant 122 : index
    %c128_901 = arith.constant 128 : index
    %2198 = vector.load %arg10[%c122_900, %c128_901] : memref<128x256xf32, #tpu.memory_space<vmem>>, vector<1x128xf32>
    %2199 = vector.broadcast %2198 : vector<1x128xf32> to vector<8x128xf32>
    %2200 = arith.mulf %2156, %2199 : vector<8x128xf32>
    %2201 = arith.addf %2197, %2200 : vector<8x128xf32>
    %c99_902 = arith.constant 99 : index
    %c128_903 = arith.constant 128 : index
    %2202 = vector.load %arg10[%c99_902, %c128_903] : memref<128x256xf32, #tpu.memory_space<vmem>>, vector<1x128xf32>
    %2203 = vector.broadcast %2202 : vector<1x128xf32> to vector<8x128xf32>
    %2204 = arith.mulf %2141, %2203 : vector<8x128xf32>
    %c107_904 = arith.constant 107 : index
    %c128_905 = arith.constant 128 : index
    %2205 = vector.load %arg10[%c107_904, %c128_905] : memref<128x256xf32, #tpu.memory_space<vmem>>, vector<1x128xf32>
    %2206 = vector.broadcast %2205 : vector<1x128xf32> to vector<8x128xf32>
    %2207 = arith.mulf %2146, %2206 : vector<8x128xf32>
    %2208 = arith.addf %2204, %2207 : vector<8x128xf32>
    %c115_906 = arith.constant 115 : index
    %c128_907 = arith.constant 128 : index
    %2209 = vector.load %arg10[%c115_906, %c128_907] : memref<128x256xf32, #tpu.memory_space<vmem>>, vector<1x128xf32>
    %2210 = vector.broadcast %2209 : vector<1x128xf32> to vector<8x128xf32>
    %2211 = arith.mulf %2151, %2210 : vector<8x128xf32>
    %2212 = arith.addf %2208, %2211 : vector<8x128xf32>
    %c123_908 = arith.constant 123 : index
    %c128_909 = arith.constant 128 : index
    %2213 = vector.load %arg10[%c123_908, %c128_909] : memref<128x256xf32, #tpu.memory_space<vmem>>, vector<1x128xf32>
    %2214 = vector.broadcast %2213 : vector<1x128xf32> to vector<8x128xf32>
    %2215 = arith.mulf %2156, %2214 : vector<8x128xf32>
    %2216 = arith.addf %2212, %2215 : vector<8x128xf32>
    %c100_910 = arith.constant 100 : index
    %c128_911 = arith.constant 128 : index
    %2217 = vector.load %arg10[%c100_910, %c128_911] : memref<128x256xf32, #tpu.memory_space<vmem>>, vector<1x128xf32>
    %2218 = vector.broadcast %2217 : vector<1x128xf32> to vector<8x128xf32>
    %2219 = arith.mulf %2141, %2218 : vector<8x128xf32>
    %c108_912 = arith.constant 108 : index
    %c128_913 = arith.constant 128 : index
    %2220 = vector.load %arg10[%c108_912, %c128_913] : memref<128x256xf32, #tpu.memory_space<vmem>>, vector<1x128xf32>
    %2221 = vector.broadcast %2220 : vector<1x128xf32> to vector<8x128xf32>
    %2222 = arith.mulf %2146, %2221 : vector<8x128xf32>
    %2223 = arith.addf %2219, %2222 : vector<8x128xf32>
    %c116_914 = arith.constant 116 : index
    %c128_915 = arith.constant 128 : index
    %2224 = vector.load %arg10[%c116_914, %c128_915] : memref<128x256xf32, #tpu.memory_space<vmem>>, vector<1x128xf32>
    %2225 = vector.broadcast %2224 : vector<1x128xf32> to vector<8x128xf32>
    %2226 = arith.mulf %2151, %2225 : vector<8x128xf32>
    %2227 = arith.addf %2223, %2226 : vector<8x128xf32>
    %c124_916 = arith.constant 124 : index
    %c128_917 = arith.constant 128 : index
    %2228 = vector.load %arg10[%c124_916, %c128_917] : memref<128x256xf32, #tpu.memory_space<vmem>>, vector<1x128xf32>
    %2229 = vector.broadcast %2228 : vector<1x128xf32> to vector<8x128xf32>
    %2230 = arith.mulf %2156, %2229 : vector<8x128xf32>
    %2231 = arith.addf %2227, %2230 : vector<8x128xf32>
    %c101_918 = arith.constant 101 : index
    %c128_919 = arith.constant 128 : index
    %2232 = vector.load %arg10[%c101_918, %c128_919] : memref<128x256xf32, #tpu.memory_space<vmem>>, vector<1x128xf32>
    %2233 = vector.broadcast %2232 : vector<1x128xf32> to vector<8x128xf32>
    %2234 = arith.mulf %2141, %2233 : vector<8x128xf32>
    %c109_920 = arith.constant 109 : index
    %c128_921 = arith.constant 128 : index
    %2235 = vector.load %arg10[%c109_920, %c128_921] : memref<128x256xf32, #tpu.memory_space<vmem>>, vector<1x128xf32>
    %2236 = vector.broadcast %2235 : vector<1x128xf32> to vector<8x128xf32>
    %2237 = arith.mulf %2146, %2236 : vector<8x128xf32>
    %2238 = arith.addf %2234, %2237 : vector<8x128xf32>
    %c117_922 = arith.constant 117 : index
    %c128_923 = arith.constant 128 : index
    %2239 = vector.load %arg10[%c117_922, %c128_923] : memref<128x256xf32, #tpu.memory_space<vmem>>, vector<1x128xf32>
    %2240 = vector.broadcast %2239 : vector<1x128xf32> to vector<8x128xf32>
    %2241 = arith.mulf %2151, %2240 : vector<8x128xf32>
    %2242 = arith.addf %2238, %2241 : vector<8x128xf32>
    %c125_924 = arith.constant 125 : index
    %c128_925 = arith.constant 128 : index
    %2243 = vector.load %arg10[%c125_924, %c128_925] : memref<128x256xf32, #tpu.memory_space<vmem>>, vector<1x128xf32>
    %2244 = vector.broadcast %2243 : vector<1x128xf32> to vector<8x128xf32>
    %2245 = arith.mulf %2156, %2244 : vector<8x128xf32>
    %2246 = arith.addf %2242, %2245 : vector<8x128xf32>
    %c102_926 = arith.constant 102 : index
    %c128_927 = arith.constant 128 : index
    %2247 = vector.load %arg10[%c102_926, %c128_927] : memref<128x256xf32, #tpu.memory_space<vmem>>, vector<1x128xf32>
    %2248 = vector.broadcast %2247 : vector<1x128xf32> to vector<8x128xf32>
    %2249 = arith.mulf %2141, %2248 : vector<8x128xf32>
    %c110_928 = arith.constant 110 : index
    %c128_929 = arith.constant 128 : index
    %2250 = vector.load %arg10[%c110_928, %c128_929] : memref<128x256xf32, #tpu.memory_space<vmem>>, vector<1x128xf32>
    %2251 = vector.broadcast %2250 : vector<1x128xf32> to vector<8x128xf32>
    %2252 = arith.mulf %2146, %2251 : vector<8x128xf32>
    %2253 = arith.addf %2249, %2252 : vector<8x128xf32>
    %c118_930 = arith.constant 118 : index
    %c128_931 = arith.constant 128 : index
    %2254 = vector.load %arg10[%c118_930, %c128_931] : memref<128x256xf32, #tpu.memory_space<vmem>>, vector<1x128xf32>
    %2255 = vector.broadcast %2254 : vector<1x128xf32> to vector<8x128xf32>
    %2256 = arith.mulf %2151, %2255 : vector<8x128xf32>
    %2257 = arith.addf %2253, %2256 : vector<8x128xf32>
    %c126_932 = arith.constant 126 : index
    %c128_933 = arith.constant 128 : index
    %2258 = vector.load %arg10[%c126_932, %c128_933] : memref<128x256xf32, #tpu.memory_space<vmem>>, vector<1x128xf32>
    %2259 = vector.broadcast %2258 : vector<1x128xf32> to vector<8x128xf32>
    %2260 = arith.mulf %2156, %2259 : vector<8x128xf32>
    %2261 = arith.addf %2257, %2260 : vector<8x128xf32>
    %c103_934 = arith.constant 103 : index
    %c128_935 = arith.constant 128 : index
    %2262 = vector.load %arg10[%c103_934, %c128_935] : memref<128x256xf32, #tpu.memory_space<vmem>>, vector<1x128xf32>
    %2263 = vector.broadcast %2262 : vector<1x128xf32> to vector<8x128xf32>
    %2264 = arith.mulf %2141, %2263 : vector<8x128xf32>
    %c111_936 = arith.constant 111 : index
    %c128_937 = arith.constant 128 : index
    %2265 = vector.load %arg10[%c111_936, %c128_937] : memref<128x256xf32, #tpu.memory_space<vmem>>, vector<1x128xf32>
    %2266 = vector.broadcast %2265 : vector<1x128xf32> to vector<8x128xf32>
    %2267 = arith.mulf %2146, %2266 : vector<8x128xf32>
    %2268 = arith.addf %2264, %2267 : vector<8x128xf32>
    %c119_938 = arith.constant 119 : index
    %c128_939 = arith.constant 128 : index
    %2269 = vector.load %arg10[%c119_938, %c128_939] : memref<128x256xf32, #tpu.memory_space<vmem>>, vector<1x128xf32>
    %2270 = vector.broadcast %2269 : vector<1x128xf32> to vector<8x128xf32>
    %2271 = arith.mulf %2151, %2270 : vector<8x128xf32>
    %2272 = arith.addf %2268, %2271 : vector<8x128xf32>
    %c127_940 = arith.constant 127 : index
    %c128_941 = arith.constant 128 : index
    %2273 = vector.load %arg10[%c127_940, %c128_941] : memref<128x256xf32, #tpu.memory_space<vmem>>, vector<1x128xf32>
    %2274 = vector.broadcast %2273 : vector<1x128xf32> to vector<8x128xf32>
    %2275 = arith.mulf %2156, %2274 : vector<8x128xf32>
    %2276 = arith.addf %2272, %2275 : vector<8x128xf32>
    %2277 = arith.maximumf %2171, %2186 : vector<8x128xf32>
    %2278 = arith.maximumf %2277, %2201 : vector<8x128xf32>
    %2279 = arith.maximumf %2278, %2216 : vector<8x128xf32>
    %2280 = arith.maximumf %2279, %2231 : vector<8x128xf32>
    %2281 = arith.maximumf %2280, %2246 : vector<8x128xf32>
    %2282 = arith.maximumf %2281, %2261 : vector<8x128xf32>
    %2283 = arith.maximumf %2282, %2276 : vector<8x128xf32>
    %2284 = arith.subf %2171, %2283 : vector<8x128xf32>
    %2285 = math.exp %2284 : vector<8x128xf32>
    %2286 = arith.subf %2186, %2283 : vector<8x128xf32>
    %2287 = math.exp %2286 : vector<8x128xf32>
    %2288 = arith.subf %2201, %2283 : vector<8x128xf32>
    %2289 = math.exp %2288 : vector<8x128xf32>
    %2290 = arith.subf %2216, %2283 : vector<8x128xf32>
    %2291 = math.exp %2290 : vector<8x128xf32>
    %2292 = arith.subf %2231, %2283 : vector<8x128xf32>
    %2293 = math.exp %2292 : vector<8x128xf32>
    %2294 = arith.subf %2246, %2283 : vector<8x128xf32>
    %2295 = math.exp %2294 : vector<8x128xf32>
    %2296 = arith.subf %2261, %2283 : vector<8x128xf32>
    %2297 = math.exp %2296 : vector<8x128xf32>
    %2298 = arith.subf %2276, %2283 : vector<8x128xf32>
    %2299 = math.exp %2298 : vector<8x128xf32>
    %2300 = arith.addf %2285, %2287 : vector<8x128xf32>
    %2301 = arith.addf %2300, %2289 : vector<8x128xf32>
    %2302 = arith.addf %2301, %2291 : vector<8x128xf32>
    %2303 = arith.addf %2302, %2293 : vector<8x128xf32>
    %2304 = arith.addf %2303, %2295 : vector<8x128xf32>
    %2305 = arith.addf %2304, %2297 : vector<8x128xf32>
    %2306 = arith.addf %2305, %2299 : vector<8x128xf32>
    %2307 = tpu.reciprocal %2306 {approx = true} : vector<8x128xf32> -> vector<8x128xf32>
    %c96_942 = arith.constant 96 : index
    %c128_943 = arith.constant 128 : index
    %2308 = vector.load %arg11[%c96_942, %c128_943] : memref<128x256xf32, #tpu.memory_space<vmem>>, vector<1x128xf32>
    %2309 = vector.broadcast %2308 : vector<1x128xf32> to vector<8x128xf32>
    %2310 = arith.mulf %2285, %2309 : vector<8x128xf32>
    %c97_944 = arith.constant 97 : index
    %c128_945 = arith.constant 128 : index
    %2311 = vector.load %arg11[%c97_944, %c128_945] : memref<128x256xf32, #tpu.memory_space<vmem>>, vector<1x128xf32>
    %2312 = vector.broadcast %2311 : vector<1x128xf32> to vector<8x128xf32>
    %2313 = arith.mulf %2287, %2312 : vector<8x128xf32>
    %2314 = arith.addf %2310, %2313 : vector<8x128xf32>
    %c98_946 = arith.constant 98 : index
    %c128_947 = arith.constant 128 : index
    %2315 = vector.load %arg11[%c98_946, %c128_947] : memref<128x256xf32, #tpu.memory_space<vmem>>, vector<1x128xf32>
    %2316 = vector.broadcast %2315 : vector<1x128xf32> to vector<8x128xf32>
    %2317 = arith.mulf %2289, %2316 : vector<8x128xf32>
    %2318 = arith.addf %2314, %2317 : vector<8x128xf32>
    %c99_948 = arith.constant 99 : index
    %c128_949 = arith.constant 128 : index
    %2319 = vector.load %arg11[%c99_948, %c128_949] : memref<128x256xf32, #tpu.memory_space<vmem>>, vector<1x128xf32>
    %2320 = vector.broadcast %2319 : vector<1x128xf32> to vector<8x128xf32>
    %2321 = arith.mulf %2291, %2320 : vector<8x128xf32>
    %2322 = arith.addf %2318, %2321 : vector<8x128xf32>
    %c100_950 = arith.constant 100 : index
    %c128_951 = arith.constant 128 : index
    %2323 = vector.load %arg11[%c100_950, %c128_951] : memref<128x256xf32, #tpu.memory_space<vmem>>, vector<1x128xf32>
    %2324 = vector.broadcast %2323 : vector<1x128xf32> to vector<8x128xf32>
    %2325 = arith.mulf %2293, %2324 : vector<8x128xf32>
    %2326 = arith.addf %2322, %2325 : vector<8x128xf32>
    %c101_952 = arith.constant 101 : index
    %c128_953 = arith.constant 128 : index
    %2327 = vector.load %arg11[%c101_952, %c128_953] : memref<128x256xf32, #tpu.memory_space<vmem>>, vector<1x128xf32>
    %2328 = vector.broadcast %2327 : vector<1x128xf32> to vector<8x128xf32>
    %2329 = arith.mulf %2295, %2328 : vector<8x128xf32>
    %2330 = arith.addf %2326, %2329 : vector<8x128xf32>
    %c102_954 = arith.constant 102 : index
    %c128_955 = arith.constant 128 : index
    %2331 = vector.load %arg11[%c102_954, %c128_955] : memref<128x256xf32, #tpu.memory_space<vmem>>, vector<1x128xf32>
    %2332 = vector.broadcast %2331 : vector<1x128xf32> to vector<8x128xf32>
    %2333 = arith.mulf %2297, %2332 : vector<8x128xf32>
    %2334 = arith.addf %2330, %2333 : vector<8x128xf32>
    %c103_956 = arith.constant 103 : index
    %c128_957 = arith.constant 128 : index
    %2335 = vector.load %arg11[%c103_956, %c128_957] : memref<128x256xf32, #tpu.memory_space<vmem>>, vector<1x128xf32>
    %2336 = vector.broadcast %2335 : vector<1x128xf32> to vector<8x128xf32>
    %2337 = arith.mulf %2299, %2336 : vector<8x128xf32>
    %2338 = arith.addf %2334, %2337 : vector<8x128xf32>
    %2339 = arith.mulf %2338, %2307 : vector<8x128xf32>
    %c96_958 = arith.constant 96 : index
    %c128_959 = arith.constant 128 : index
    %2340 = vector.load %arg12[%c96_958, %c128_959] : memref<128x256xf32, #tpu.memory_space<vmem>>, vector<8x128xf32>
    tpu.vector_store %arg12[%c96_958, %c128_959], %2339 {strides = array<i32>} : memref<128x256xf32, #tpu.memory_space<vmem>>, vector<8x128xf32>,
    %c104_960 = arith.constant 104 : index
    %c128_961 = arith.constant 128 : index
    %2341 = vector.load %arg11[%c104_960, %c128_961] : memref<128x256xf32, #tpu.memory_space<vmem>>, vector<1x128xf32>
    %2342 = vector.broadcast %2341 : vector<1x128xf32> to vector<8x128xf32>
    %2343 = arith.mulf %2285, %2342 : vector<8x128xf32>
    %c105_962 = arith.constant 105 : index
    %c128_963 = arith.constant 128 : index
    %2344 = vector.load %arg11[%c105_962, %c128_963] : memref<128x256xf32, #tpu.memory_space<vmem>>, vector<1x128xf32>
    %2345 = vector.broadcast %2344 : vector<1x128xf32> to vector<8x128xf32>
    %2346 = arith.mulf %2287, %2345 : vector<8x128xf32>
    %2347 = arith.addf %2343, %2346 : vector<8x128xf32>
    %c106_964 = arith.constant 106 : index
    %c128_965 = arith.constant 128 : index
    %2348 = vector.load %arg11[%c106_964, %c128_965] : memref<128x256xf32, #tpu.memory_space<vmem>>, vector<1x128xf32>
    %2349 = vector.broadcast %2348 : vector<1x128xf32> to vector<8x128xf32>
    %2350 = arith.mulf %2289, %2349 : vector<8x128xf32>
    %2351 = arith.addf %2347, %2350 : vector<8x128xf32>
    %c107_966 = arith.constant 107 : index
    %c128_967 = arith.constant 128 : index
    %2352 = vector.load %arg11[%c107_966, %c128_967] : memref<128x256xf32, #tpu.memory_space<vmem>>, vector<1x128xf32>
    %2353 = vector.broadcast %2352 : vector<1x128xf32> to vector<8x128xf32>
    %2354 = arith.mulf %2291, %2353 : vector<8x128xf32>
    %2355 = arith.addf %2351, %2354 : vector<8x128xf32>
    %c108_968 = arith.constant 108 : index
    %c128_969 = arith.constant 128 : index
    %2356 = vector.load %arg11[%c108_968, %c128_969] : memref<128x256xf32, #tpu.memory_space<vmem>>, vector<1x128xf32>
    %2357 = vector.broadcast %2356 : vector<1x128xf32> to vector<8x128xf32>
    %2358 = arith.mulf %2293, %2357 : vector<8x128xf32>
    %2359 = arith.addf %2355, %2358 : vector<8x128xf32>
    %c109_970 = arith.constant 109 : index
    %c128_971 = arith.constant 128 : index
    %2360 = vector.load %arg11[%c109_970, %c128_971] : memref<128x256xf32, #tpu.memory_space<vmem>>, vector<1x128xf32>
    %2361 = vector.broadcast %2360 : vector<1x128xf32> to vector<8x128xf32>
    %2362 = arith.mulf %2295, %2361 : vector<8x128xf32>
    %2363 = arith.addf %2359, %2362 : vector<8x128xf32>
    %c110_972 = arith.constant 110 : index
    %c128_973 = arith.constant 128 : index
    %2364 = vector.load %arg11[%c110_972, %c128_973] : memref<128x256xf32, #tpu.memory_space<vmem>>, vector<1x128xf32>
    %2365 = vector.broadcast %2364 : vector<1x128xf32> to vector<8x128xf32>
    %2366 = arith.mulf %2297, %2365 : vector<8x128xf32>
    %2367 = arith.addf %2363, %2366 : vector<8x128xf32>
    %c111_974 = arith.constant 111 : index
    %c128_975 = arith.constant 128 : index
    %2368 = vector.load %arg11[%c111_974, %c128_975] : memref<128x256xf32, #tpu.memory_space<vmem>>, vector<1x128xf32>
    %2369 = vector.broadcast %2368 : vector<1x128xf32> to vector<8x128xf32>
    %2370 = arith.mulf %2299, %2369 : vector<8x128xf32>
    %2371 = arith.addf %2367, %2370 : vector<8x128xf32>
    %2372 = arith.mulf %2371, %2307 : vector<8x128xf32>
    %c104_976 = arith.constant 104 : index
    %c128_977 = arith.constant 128 : index
    %2373 = vector.load %arg12[%c104_976, %c128_977] : memref<128x256xf32, #tpu.memory_space<vmem>>, vector<8x128xf32>
    tpu.vector_store %arg12[%c104_976, %c128_977], %2372 {strides = array<i32>} : memref<128x256xf32, #tpu.memory_space<vmem>>, vector<8x128xf32>,
    %c112_978 = arith.constant 112 : index
    %c128_979 = arith.constant 128 : index
    %2374 = vector.load %arg11[%c112_978, %c128_979] : memref<128x256xf32, #tpu.memory_space<vmem>>, vector<1x128xf32>
    %2375 = vector.broadcast %2374 : vector<1x128xf32> to vector<8x128xf32>
    %2376 = arith.mulf %2285, %2375 : vector<8x128xf32>
    %c113_980 = arith.constant 113 : index
    %c128_981 = arith.constant 128 : index
    %2377 = vector.load %arg11[%c113_980, %c128_981] : memref<128x256xf32, #tpu.memory_space<vmem>>, vector<1x128xf32>
    %2378 = vector.broadcast %2377 : vector<1x128xf32> to vector<8x128xf32>
    %2379 = arith.mulf %2287, %2378 : vector<8x128xf32>
    %2380 = arith.addf %2376, %2379 : vector<8x128xf32>
    %c114_982 = arith.constant 114 : index
    %c128_983 = arith.constant 128 : index
    %2381 = vector.load %arg11[%c114_982, %c128_983] : memref<128x256xf32, #tpu.memory_space<vmem>>, vector<1x128xf32>
    %2382 = vector.broadcast %2381 : vector<1x128xf32> to vector<8x128xf32>
    %2383 = arith.mulf %2289, %2382 : vector<8x128xf32>
    %2384 = arith.addf %2380, %2383 : vector<8x128xf32>
    %c115_984 = arith.constant 115 : index
    %c128_985 = arith.constant 128 : index
    %2385 = vector.load %arg11[%c115_984, %c128_985] : memref<128x256xf32, #tpu.memory_space<vmem>>, vector<1x128xf32>
    %2386 = vector.broadcast %2385 : vector<1x128xf32> to vector<8x128xf32>
    %2387 = arith.mulf %2291, %2386 : vector<8x128xf32>
    %2388 = arith.addf %2384, %2387 : vector<8x128xf32>
    %c116_986 = arith.constant 116 : index
    %c128_987 = arith.constant 128 : index
    %2389 = vector.load %arg11[%c116_986, %c128_987] : memref<128x256xf32, #tpu.memory_space<vmem>>, vector<1x128xf32>
    %2390 = vector.broadcast %2389 : vector<1x128xf32> to vector<8x128xf32>
    %2391 = arith.mulf %2293, %2390 : vector<8x128xf32>
    %2392 = arith.addf %2388, %2391 : vector<8x128xf32>
    %c117_988 = arith.constant 117 : index
    %c128_989 = arith.constant 128 : index
    %2393 = vector.load %arg11[%c117_988, %c128_989] : memref<128x256xf32, #tpu.memory_space<vmem>>, vector<1x128xf32>
    %2394 = vector.broadcast %2393 : vector<1x128xf32> to vector<8x128xf32>
    %2395 = arith.mulf %2295, %2394 : vector<8x128xf32>
    %2396 = arith.addf %2392, %2395 : vector<8x128xf32>
    %c118_990 = arith.constant 118 : index
    %c128_991 = arith.constant 128 : index
    %2397 = vector.load %arg11[%c118_990, %c128_991] : memref<128x256xf32, #tpu.memory_space<vmem>>, vector<1x128xf32>
    %2398 = vector.broadcast %2397 : vector<1x128xf32> to vector<8x128xf32>
    %2399 = arith.mulf %2297, %2398 : vector<8x128xf32>
    %2400 = arith.addf %2396, %2399 : vector<8x128xf32>
    %c119_992 = arith.constant 119 : index
    %c128_993 = arith.constant 128 : index
    %2401 = vector.load %arg11[%c119_992, %c128_993] : memref<128x256xf32, #tpu.memory_space<vmem>>, vector<1x128xf32>
    %2402 = vector.broadcast %2401 : vector<1x128xf32> to vector<8x128xf32>
    %2403 = arith.mulf %2299, %2402 : vector<8x128xf32>
    %2404 = arith.addf %2400, %2403 : vector<8x128xf32>
    %2405 = arith.mulf %2404, %2307 : vector<8x128xf32>
    %c112_994 = arith.constant 112 : index
    %c128_995 = arith.constant 128 : index
    %2406 = vector.load %arg12[%c112_994, %c128_995] : memref<128x256xf32, #tpu.memory_space<vmem>>, vector<8x128xf32>
    tpu.vector_store %arg12[%c112_994, %c128_995], %2405 {strides = array<i32>} : memref<128x256xf32, #tpu.memory_space<vmem>>, vector<8x128xf32>,
    %c120_996 = arith.constant 120 : index
    %c128_997 = arith.constant 128 : index
    %2407 = vector.load %arg11[%c120_996, %c128_997] : memref<128x256xf32, #tpu.memory_space<vmem>>, vector<1x128xf32>
    %2408 = vector.broadcast %2407 : vector<1x128xf32> to vector<8x128xf32>
    %2409 = arith.mulf %2285, %2408 : vector<8x128xf32>
    %c121_998 = arith.constant 121 : index
    %c128_999 = arith.constant 128 : index
    %2410 = vector.load %arg11[%c121_998, %c128_999] : memref<128x256xf32, #tpu.memory_space<vmem>>, vector<1x128xf32>
    %2411 = vector.broadcast %2410 : vector<1x128xf32> to vector<8x128xf32>
    %2412 = arith.mulf %2287, %2411 : vector<8x128xf32>
    %2413 = arith.addf %2409, %2412 : vector<8x128xf32>
    %c122_1000 = arith.constant 122 : index
    %c128_1001 = arith.constant 128 : index
    %2414 = vector.load %arg11[%c122_1000, %c128_1001] : memref<128x256xf32, #tpu.memory_space<vmem>>, vector<1x128xf32>
    %2415 = vector.broadcast %2414 : vector<1x128xf32> to vector<8x128xf32>
    %2416 = arith.mulf %2289, %2415 : vector<8x128xf32>
    %2417 = arith.addf %2413, %2416 : vector<8x128xf32>
    %c123_1002 = arith.constant 123 : index
    %c128_1003 = arith.constant 128 : index
    %2418 = vector.load %arg11[%c123_1002, %c128_1003] : memref<128x256xf32, #tpu.memory_space<vmem>>, vector<1x128xf32>
    %2419 = vector.broadcast %2418 : vector<1x128xf32> to vector<8x128xf32>
    %2420 = arith.mulf %2291, %2419 : vector<8x128xf32>
    %2421 = arith.addf %2417, %2420 : vector<8x128xf32>
    %c124_1004 = arith.constant 124 : index
    %c128_1005 = arith.constant 128 : index
    %2422 = vector.load %arg11[%c124_1004, %c128_1005] : memref<128x256xf32, #tpu.memory_space<vmem>>, vector<1x128xf32>
    %2423 = vector.broadcast %2422 : vector<1x128xf32> to vector<8x128xf32>
    %2424 = arith.mulf %2293, %2423 : vector<8x128xf32>
    %2425 = arith.addf %2421, %2424 : vector<8x128xf32>
    %c125_1006 = arith.constant 125 : index
    %c128_1007 = arith.constant 128 : index
    %2426 = vector.load %arg11[%c125_1006, %c128_1007] : memref<128x256xf32, #tpu.memory_space<vmem>>, vector<1x128xf32>
    %2427 = vector.broadcast %2426 : vector<1x128xf32> to vector<8x128xf32>
    %2428 = arith.mulf %2295, %2427 : vector<8x128xf32>
    %2429 = arith.addf %2425, %2428 : vector<8x128xf32>
    %c126_1008 = arith.constant 126 : index
    %c128_1009 = arith.constant 128 : index
    %2430 = vector.load %arg11[%c126_1008, %c128_1009] : memref<128x256xf32, #tpu.memory_space<vmem>>, vector<1x128xf32>
    %2431 = vector.broadcast %2430 : vector<1x128xf32> to vector<8x128xf32>
    %2432 = arith.mulf %2297, %2431 : vector<8x128xf32>
    %2433 = arith.addf %2429, %2432 : vector<8x128xf32>
    %c127_1010 = arith.constant 127 : index
    %c128_1011 = arith.constant 128 : index
    %2434 = vector.load %arg11[%c127_1010, %c128_1011] : memref<128x256xf32, #tpu.memory_space<vmem>>, vector<1x128xf32>
    %2435 = vector.broadcast %2434 : vector<1x128xf32> to vector<8x128xf32>
    %2436 = arith.mulf %2299, %2435 : vector<8x128xf32>
    %2437 = arith.addf %2433, %2436 : vector<8x128xf32>
    %2438 = arith.mulf %2437, %2307 : vector<8x128xf32>
    %c120_1012 = arith.constant 120 : index
    %c128_1013 = arith.constant 128 : index
    %2439 = vector.load %arg12[%c120_1012, %c128_1013] : memref<128x256xf32, #tpu.memory_space<vmem>>, vector<8x128xf32>
    tpu.vector_store %arg12[%c120_1012, %c128_1013], %2438 {strides = array<i32>} : memref<128x256xf32, #tpu.memory_space<vmem>>, vector<8x128xf32>,
    %c0_1014 = arith.constant 0 : index
    %c0_1015 = arith.constant 0 : index
    %2440 = vector.load %arg8[%c0_1014, %c0_1015] : memref<128x128xbf16, #tpu.memory_space<vmem>>, vector<128x128xbf16>
    %c0_1016 = arith.constant 0 : index
    %c0_1017 = arith.constant 0 : index
    %2441 = vector.load %arg12[%c0_1016, %c0_1017] : memref<128x256xf32, #tpu.memory_space<vmem>>, vector<128x256xf32>
    %2442 = arith.truncf %2441 : vector<128x256xf32> to vector<128x256xbf16>
    %cst_1018 = arith.constant dense<0.000000e+00> : vector<128x256xf32>
    %2443 = tpu.matmul %2440, %2442, %cst_1018 {dimension_numbers = #tpu.dot_dimension_numbers<[1], [0], [0], [1], [0, 0, 1, 1], [], []>} : vector<128x128xbf16>, vector<128x256xbf16>, vector<128x256xf32> -> vector<128x256xf32>
    %2444 = arith.truncf %2443 : vector<128x256xf32> to vector<128x256xbf16>
    %c0_1019 = arith.constant 0 : index
    %c0_1020 = arith.constant 0 : index
    %2445 = vector.load %arg9[%c0_1019, %c0_1020] : memref<128x256xbf16, #tpu.memory_space<vmem>>, vector<128x256xbf16>
    tpu.vector_store %arg9[%c0_1019, %c0_1020], %2444 {strides = array<i32>} : memref<128x256xbf16, #tpu.memory_space<vmem>>, vector<128x256xbf16>,
    return
  }
  func.func @transform_0(%arg0: i32) -> i32 {
    %c0_i32 = arith.constant 0 : i32
    %c0_i32_0 = arith.constant 0 : i32
    return %c0_i32 : i32
  }
  func.func @transform_1(%arg0: i32) -> (i32, i32) {
    %c0_i32 = arith.constant 0 : i32
    %c0_i32_0 = arith.constant 0 : i32
    return %c0_i32, %arg0 : i32, i32
  }
  func.func @transform_2(%arg0: i32) -> (i32, i32) {
    %c0_i32 = arith.constant 0 : i32
    %c0_i32_0 = arith.constant 0 : i32
    return %c0_i32, %arg0 : i32, i32
  }
  func.func @transform_3(%arg0: i32) -> (i32, i32) {
    %c0_i32 = arith.constant 0 : i32
    %c0_i32_0 = arith.constant 0 : i32
    return %c0_i32, %arg0 : i32, i32
  }
  func.func @transform_4(%arg0: i32) -> (i32, i32) {
    %c0_i32 = arith.constant 0 : i32
    %c0_i32_0 = arith.constant 0 : i32
    %c0_i32_1 = arith.constant 0 : i32
    return %c0_i32, %c0_i32_0 : i32, i32
  }
  func.func @transform_5(%arg0: i32) -> (i32, i32) {
    %c0_i32 = arith.constant 0 : i32
    %c0_i32_0 = arith.constant 0 : i32
    %c0_i32_1 = arith.constant 0 : i32
    return %c0_i32, %c0_i32_0 : i32, i32
  }
  func.func @transform_6(%arg0: i32) -> (i32, i32) {
    %c0_i32 = arith.constant 0 : i32
    %c0_i32_0 = arith.constant 0 : i32
    %c0_i32_1 = arith.constant 0 : i32
    return %c0_i32, %c0_i32_0 : i32, i32
  }
  func.func @transform_7(%arg0: i32) -> (i32, i32) {
    %c0_i32 = arith.constant 0 : i32
    %c0_i32_0 = arith.constant 0 : i32
    %c0_i32_1 = arith.constant 0 : i32
    return %c0_i32, %c0_i32_0 : i32, i32
  }
  func.func @transform_8(%arg0: i32) -> (i32, i32) {
    %c0_i32 = arith.constant 0 : i32
    %c0_i32_0 = arith.constant 0 : i32
    return %c0_i32, %arg0 : i32, i32
  }
}

</mosaic_0001>

<bundles_post_ra>
// kernel: tpu_custom_call.1
= control target key start
LH: loop header
LB: loop body
LE: loop exit
PB: predicated region body
PF: predicated region fallthrough
CT: control target
= control target key end

     0   :  { %13 = vsyncpa [#allocation8], 0  ;;  %s5924_s0 = inlined_call_operand.hbm [shape: f32[16], index: 0, kind: input, shape index: {}]   ;;  %s5925_s1 = inlined_call_operand.hbm [shape: bf16[128,256], index: 1, kind: input, shape index: {}]   ;;  %s5926_s2 = inlined_call_operand.hbm [shape: bf16[128,256], index: 2, kind: input, shape index: {}]   ;;  %s5927_s3 = inlined_call_operand.hbm [shape: bf16[128,256], index: 3, kind: input, shape index: {}]   ;;  %s5928_s4 = inlined_call_operand.hbm [shape: bf16[128,128], index: 4, kind: input, shape index: {}]   ;;  %s5929_s5 = inlined_call_operand.hbm [shape: bf16[128,128], index: 5, kind: input, shape index: {}]   ;;  %s5930_s6 = inlined_call_operand.hbm [shape: bf16[128,128], index: 6, kind: input, shape index: {}]   ;;  %s5931_s7 = inlined_call_operand.hbm [shape: bf16[128,128], index: 7, kind: input, shape index: {}]   ;;  %s5932_s8 = inlined_call_operand.hbm [shape: bf16[128,256], index: 8, kind: output, shape index: {}]  }
   0x1   :  { %14 = vsyncpa [#allocation6], 0 }
   0x2   :  { %15 = vsyncpa [#allocation11], 0 }
   0x3   :  { %16 = vsyncpa [#allocation14], 0 }
   0x4   :  { %17 = vsyncpa [#allocation17], 0 }
   0x5   :  { %18 = vsyncpa [#allocation7], 0  ;;  %s4171_s27 = smov [#allocation10]   ;;  %s4172_s29 = smov [#allocation13]  }
   0x6   :  { %s44_s28 = sshll.u32 %s4171_s27, 4  ;;  %s68_s30 = sshll.u32 %s4172_s29, 4  ;;  %s45_s28 = int_to_ptr.vmem [resolvable:$true] %s44_s28  ;;  %s69_s30 = int_to_ptr.vmem [resolvable:$true] %s68_s30 }
   0x7   :  { %s3999_s9 = scalar_lea.vmem %s45_s28, 2048  ;;  %p4004_p1 = scmp.lt.s32.totalorder %s45_s28, %s45_s28 }
   0x8   :  { %p4000_p0 = scmp.ne.s32.totalorder %s45_s28, %s3999_s9  ;;  %p4005_p2 = scmp.lt.s32.totalorder %s3999_s9, %s3999_s9 }
   0xa   :  { %p4006_p3 = por %p4005_p2, %p4004_p1 }
   0xc   :  { %p4007_p4 = pnand %p4006_p3, %p4000_p0 }
   0xe   :  { %4010 = shalt.err (!%p4007_p4)
}
   0xf   :  { %s4173_s10 = smov 128   ;;  %s4174_s11 = smov 8  }
  0x10   :  { %50 = dma.hbm_to_vmem [thread:$0]  %s5926_s2, 2048, %s45_s28, [#allocation11], %s4173_s10, %s4173_s10, %s4174_s11  }
  0x11   :  { %s4019_s14 = scalar_lea.vmem %s69_s30, 1024  ;;  %p4024_p6 = scmp.lt.s32.totalorder %s69_s30, %s69_s30 }
  0x12   :  { %p4020_p5 = scmp.ne.s32.totalorder %s69_s30, %s4019_s14  ;;  %p4025_p7 = scmp.lt.s32.totalorder %s4019_s14, %s4019_s14 }
  0x14   :  { %p4026_p8 = por %p4025_p7, %p4024_p6 }
  0x16   :  { %p4027_p9 = pnand %p4026_p8, %p4020_p5 }
  0x18   :  { %4030 = shalt.err (!%p4027_p9)
}
  0x19   :  { %s4175_s15 = smov 64   ;;  %s4176_s16 = smov 4  }
  0x1a   :  { %74 = dma.hbm_to_vmem [thread:$0]  %s5928_s4, 1024, %s69_s30, [#allocation14], %s4175_s15, %s4175_s15, %s4176_s16  }
  0x1b   :  { %s4177_s19 = smov [#allocation16]   ;;  %s4178_s2 = smov [#allocation9]  }
  0x1c   :  { %s92_s20 = sshll.u32 %s4177_s19, 4  ;;  %s32_s21 = sshll.u32 %s4178_s2, 4  ;;  %s93_s20 = int_to_ptr.vmem [resolvable:$true] %s92_s20  ;;  %s33_s21 = int_to_ptr.vmem [resolvable:$true] %s32_s21 }
  0x1d   :  { %s4039_s22 = scalar_lea.vmem %s93_s20, 1024  ;;  %p4044_p11 = scmp.lt.s32.totalorder %s93_s20, %s93_s20 }
  0x1e   :  { %p4040_p10 = scmp.ne.s32.totalorder %s93_s20, %s4039_s22  ;;  %p4045_p12 = scmp.lt.s32.totalorder %s4039_s22, %s4039_s22 }
  0x20   :  { %p4046_p13 = por %p4045_p12, %p4044_p11 }
  0x22   :  { %p4047_p0 = pnand %p4046_p13, %p4040_p10 }
  0x24   :  { %4050 = shalt.err (!%p4047_p0)
}
  0x25   :  { %98 = dma.hbm_to_vmem [thread:$0]  %s5930_s6, 1024, %s93_s20, [#allocation17], %s4175_s15, %s4175_s15, %s4176_s16  }
  0x26   :  { %s4179_s4 = smov [#allocation5]   ;;  %s4067_s27 = scalar_lea.vmem %s33_s21, 2048 }
  0x27   :  { %26 = dma.hbm_to_smem %s5924_s0, 16, %s4179_s4, [#allocation8]  }
  0x28   :  { %p4068_p1 = scmp.ne.s32.totalorder %s33_s21, %s4067_s27  ;;  %p4072_p2 = scmp.lt.s32.totalorder %s33_s21, %s33_s21 }
  0x29   :  { %p4073_p3 = scmp.lt.s32.totalorder %s4067_s27, %s4067_s27 }
  0x2b   :  { %p4074_p4 = por %p4073_p3, %p4072_p2 }
  0x2d   :  { %p4075_p5 = pnand %p4074_p4, %p4068_p1 }
  0x2f   :  { %4078 = shalt.err (!%p4075_p5)
}
  0x30   :  { %38 = dma.hbm_to_vmem [thread:$0]  %s5925_s1, 2048, %s33_s21, [#allocation6], %s4173_s10, %s4173_s10, %s4174_s11  }
  0x31   :  { %s4180_s6 = smov [#allocation12]   ;;  %s4181_s9 = smov [#allocation15]  }
  0x32   :  { %s56_s30 = sshll.u32 %s4180_s6, 4  ;;  %s80_s0 = sshll.u32 %s4181_s9, 4  ;;  %s57_s30 = int_to_ptr.vmem [resolvable:$true] %s56_s30  ;;  %s81_s0 = int_to_ptr.vmem [resolvable:$true] %s80_s0 }
  0x33   :  { %s4087_s12 = scalar_lea.vmem %s57_s30, 2048  ;;  %p4092_p7 = scmp.lt.s32.totalorder %s57_s30, %s57_s30 }
  0x34   :  { %p4088_p6 = scmp.ne.s32.totalorder %s57_s30, %s4087_s12  ;;  %p4093_p8 = scmp.lt.s32.totalorder %s4087_s12, %s4087_s12 }
  0x36   :  { %p4094_p9 = por %p4093_p8, %p4092_p7 }
  0x38   :  { %p4095_p10 = pnand %p4094_p9, %p4088_p6 }
  0x3a   :  { %4098 = shalt.err (!%p4095_p10)
}
  0x3b   :  { %62 = dma.hbm_to_vmem [thread:$0]  %s5927_s3, 2048, %s57_s30, [#allocation11], %s4173_s10, %s4173_s10, %s4174_s11  }
  0x3c   :  { %s4107_s1 = scalar_lea.vmem %s81_s0, 1024  ;;  %p4112_p12 = scmp.lt.s32.totalorder %s81_s0, %s81_s0 }
  0x3d   :  { %p4108_p11 = scmp.ne.s32.totalorder %s81_s0, %s4107_s1  ;;  %p4113_p13 = scmp.lt.s32.totalorder %s4107_s1, %s4107_s1 }
  0x3f   :  { %p4114_p0 = por %p4113_p13, %p4112_p12 }
  0x41   :  { %p4115_p1 = pnand %p4114_p0, %p4108_p11 }
  0x43   :  { %4118 = shalt.err (!%p4115_p1)
}
  0x44   :  { %86 = dma.hbm_to_vmem [thread:$0]  %s5929_s5, 1024, %s81_s0, [#allocation14], %s4175_s15, %s4175_s15, %s4176_s16  }
  0x45   :  { %s4182_s19 = smov [#allocation18]  }
  0x46   :  { %s104_s20 = sshll.u32 %s4182_s19, 4  ;;  %s105_s20 = int_to_ptr.vmem [resolvable:$true] %s104_s20 }
  0x47   :  { %s4127_s2 = scalar_lea.vmem %s105_s20, 1024  ;;  %p4132_p3 = scmp.lt.s32.totalorder %s105_s20, %s105_s20 }
  0x48   :  { %p4128_p2 = scmp.ne.s32.totalorder %s105_s20, %s4127_s2  ;;  %p4133_p4 = scmp.lt.s32.totalorder %s4127_s2, %s4127_s2 }
  0x4a   :  { %p4134_p5 = por %p4133_p4, %p4132_p3 }
  0x4c   :  { %p4135_p6 = pnand %p4134_p5, %p4128_p2 }
  0x4e   :  { %4138 = shalt.err (!%p4135_p6)
}
  0x4f   :  { %110 = dma.hbm_to_vmem [thread:$0]  %s5931_s7, 1024, %s105_s20, [#allocation17], %s4175_s15, %s4175_s15, %s4176_s16  }
  0x50   :  { %4159 = dma.done.wait [#allocation8], 16  }
  0x51   :  { %4160 = vsyncadd [#allocation8], 4294967280 }
  0x52   :  { %4161 = dma.done.wait [#allocation6], 2048  }
  0x53   :  { %4162 = vsyncadd [#allocation6], 4294965248 }
  0x54   :  { %4163 = dma.done.wait [#allocation11], 4096  }
  0x55   :  { %4164 = vsyncadd [#allocation11], 4294963200 }
  0x56   :  { %4165 = dma.done.wait [#allocation14], 2048  }
  0x57   :  { %4166 = vsyncadd [#allocation14], 4294965248 }
  0x58   :  { %4167 = dma.done.wait [#allocation17], 2048  }
  0x59   :  { %4168 = vsyncadd [#allocation17], 4294965248 }
  0x5a   :  { %135 = sfence }
  0x5b   :  { %v3743_v0 = vld [vmem:[#allocation10 + $0x74] ss:$8 sps:$4 sm:$0xff]   ;;  %v3745_v1 = vld [vmem:[#allocation10 + $0x70] ss:$8 sps:$4 sm:$0xff]   ;;  %v5933_v2 = vmov 0   ;;  %v3767_v19 = vld [vmem:[#allocation15] sm:$0xff]  }
  0x5c   :  { %329 = vmatprep.mubr.bf16.mxu0 %v5933_v2  ;;  %369 = vmatprep.mubr.bf16.mxu1 %v5933_v2  ;;  %v3746_v3 = vld [vmem:[#allocation10 + $0x64] ss:$8 sps:$4 sm:$0xff]   ;;  %v3748_v4 = vld [vmem:[#allocation10 + $0x60] ss:$8 sps:$4 sm:$0xff]   ;;  %v3749_v5 = vld [vmem:[#allocation10 + $0x54] ss:$8 sps:$4 sm:$0xff]  }
  0x5d   :  { %297 = vmatprep.subr.bf16.mxu0 %v3743_v0  ;;  %3713 = vmatprep.subr.bf16.mxu1 %v3743_v0  ;;  %v3751_v6 = vld [vmem:[#allocation10 + $0x50] ss:$8 sps:$4 sm:$0xff]   ;;  %v3752_v7 = vld [vmem:[#allocation10 + $0x44] ss:$8 sps:$4 sm:$0xff]   ;;  %v3754_v8 = vld [vmem:[#allocation10 + $0x40] ss:$8 sps:$4 sm:$0xff]  }
  0x5e   :  { %298 = vmatpush1.bf16.msra.mxu0 %v3745_v1  ;;  %3721 = vmatpush1.bf16.msra.mxu1 %v3745_v1  ;;  %v3755_v9 = vld [vmem:[#allocation10 + $0x34] ss:$8 sps:$4 sm:$0xff]   ;;  %v3757_v10 = vld [vmem:[#allocation10 + $0x30] ss:$8 sps:$4 sm:$0xff]   ;;  %v3758_v11 = vld [vmem:[#allocation10 + $0x24] ss:$8 sps:$4 sm:$0xff]  }
  0x5f   :  { %299 = vmatprep.subr.bf16.mxu0 %v3746_v3  ;;  %3714 = vmatprep.subr.bf16.mxu1 %v3746_v3  ;;  %v3760_v12 = vld [vmem:[#allocation10 + $0x20] ss:$8 sps:$4 sm:$0xff]   ;;  %v3761_v13 = vld [vmem:[#allocation10 + $0x14] ss:$8 sps:$4 sm:$0xff]   ;;  %v3763_v14 = vld [vmem:[#allocation10 + $0x10] ss:$8 sps:$4 sm:$0xff]  }
  0x60   :  { %v3764_v15 = vld [vmem:[#allocation10 + $0x4] ss:$8 sps:$4 sm:$0xff]   ;;  %v3766_v16 = vld [vmem:[#allocation10] ss:$8 sps:$4 sm:$0xff]   ;;  %v3771_v17 = vld [vmem:[#allocation12 + $0x74] ss:$8 sps:$4 sm:$0xff]  }
  0x61   :  { %v3772_v18 = vld [vmem:[#allocation9 + $0x70] ss:$8 sps:$4 sm:$0xff]   ;;  %v3768_v20 = vld [vmem:[#allocation15 + $0x20] sm:$0xff]   ;;  %v3781_v25 = vld [vmem:[#allocation12 + $0x54] ss:$8 sps:$4 sm:$0xff]   ;;  %s4292_s5 = sld [smem:[#allocation5]] }
  0x62   :  { %300 = vmatpush1.bf16.msra.mxu0 %v3748_v4  ;;  %3722 = vmatpush1.bf16.msra.mxu1 %v3748_v4  ;;  %v3769_v21 = vld [vmem:[#allocation12 + $0x70] ss:$8 sps:$4 sm:$0xff]   ;;  %v3775_v22 = vld [vmem:[#allocation12 + $0x64] ss:$8 sps:$4 sm:$0xff]   ;;  %v3776_v23 = vld [vmem:[#allocation9 + $0x60] ss:$8 sps:$4 sm:$0xff]  }
  0x63   :  { %301 = vmatprep.subr.bf16.mxu0 %v3749_v5  ;;  %3715 = vmatprep.subr.bf16.mxu1 %v3749_v5  ;;  %v3773_v24 = vld [vmem:[#allocation12 + $0x60] ss:$8 sps:$4 sm:$0xff]   ;;  %v3782_v27 = vld [vmem:[#allocation9 + $0x50] ss:$8 sps:$4 sm:$0xff]   ;;  %v3785_v30 = vld [vmem:[#allocation12 + $0x44] ss:$8 sps:$4 sm:$0xff]  }
  0x64   :  { %v3777_v26 = vld [vmem:[#allocation15 + $0x8] sm:$0xff]   ;;  %v3779_v29 = vld [vmem:[#allocation12 + $0x50] ss:$8 sps:$4 sm:$0xff]   ;;  %v3791_v33 = vld [vmem:[#allocation12 + $0x34] ss:$8 sps:$4 sm:$0xff]   ;;  %s4294_s7 = sld [smem:[#allocation5 + $0x1]] }
  0x65   :  { %v3778_v28 = vld [vmem:[#allocation15 + $0x28] sm:$0xff]   ;;  %v3787_v34 = vld [vmem:[#allocation15 + $0x10] sm:$0xff]   ;;  %v3797_v42 = vld [vmem:[#allocation15 + $0x18] sm:$0xff]   ;;  %s4296_s15 = sld [smem:[#allocation5 + $0x2]]  ;;  %s4184_s0 = smov [#allocation19]  }
  0x66   :  { %302 = vmatpush1.bf16.msra.mxu0 %v3751_v6  ;;  %3723 = vmatpush1.bf16.msra.mxu1 %v3751_v6  ;;  %v3786_v31 = vld [vmem:[#allocation9 + $0x40] ss:$8 sps:$4 sm:$0xff]   ;;  %v3792_v35 = vld [vmem:[#allocation9 + $0x30] ss:$8 sps:$4 sm:$0xff]   ;;  %v3795_v38 = vld [vmem:[#allocation12 + $0x24] ss:$8 sps:$4 sm:$0xff]  }
  0x67   :  { %303 = vmatprep.subr.bf16.mxu0 %v3752_v7  ;;  %3716 = vmatprep.subr.bf16.mxu1 %v3752_v7  ;;  %v3783_v32 = vld [vmem:[#allocation12 + $0x40] ss:$8 sps:$4 sm:$0xff]   ;;  %v3788_v36 = vld [vmem:[#allocation15 + $0x30] sm:$0xff]   ;;  %v3798_v44 = vld [vmem:[#allocation15 + $0x38] sm:$0xff]   ;;  %s4298_s16 = sld [smem:[#allocation5 + $0x3]]  ;;  %s3451_s12 = sshll.u32 %s4184_s0, 4  ;;  %s3452_s12 = int_to_ptr.vmem [resolvable:$true] %s3451_s12 }
  0x68   :  { %v3789_v37 = vld [vmem:[#allocation12 + $0x30] ss:$8 sps:$4 sm:$0xff]   ;;  %v3796_v39 = vld [vmem:[#allocation9 + $0x20] ss:$8 sps:$4 sm:$0xff]   ;;  %v3801_v41 = vld [vmem:[#allocation12 + $0x14] ss:$8 sps:$4 sm:$0xff]   ;;  %p4144_p8 = scmp.lt.s32.totalorder %s3452_s12, %s3452_s12 }
  0x69   :  { %v3793_v40 = vld [vmem:[#allocation12 + $0x20] ss:$8 sps:$4 sm:$0xff]   ;;  %v3802_v43 = vld [vmem:[#allocation9 + $0x10] ss:$8 sps:$4 sm:$0xff]   ;;  %v3805_v46 = vld [vmem:[#allocation12 + $0x4] ss:$8 sps:$4 sm:$0xff]  }
  0x6a   :  { %304 = vmatpush1.bf16.msra.mxu0 %v3754_v8  ;;  %3724 = vmatpush1.bf16.msra.mxu1 %v3754_v8  ;;  %v3799_v45 = vld [vmem:[#allocation12 + $0x10] ss:$8 sps:$4 sm:$0xff]   ;;  %v3806_v47 = vld [vmem:[#allocation9] ss:$8 sps:$4 sm:$0xff]   ;;  %v3810_v50 = vld [vmem:[#allocation9 + $0x74] ss:$8 sps:$4 sm:$0xff]  }
  0x6b   :  { %305 = vmatprep.subr.bf16.mxu0 %v3755_v9  ;;  %3717 = vmatprep.subr.bf16.mxu1 %v3755_v9  ;;  %v3807_v48 = vld [vmem:[#allocation13] sm:$0xff]   ;;  %v3809_v52 = vld [vmem:[#allocation13 + $0x8] sm:$0xff]   ;;  %v3811_v53 = vld [vmem:[#allocation13 + $0x10] sm:$0xff]   ;;  %s4300_s22 = sld [smem:[#allocation5 + $0x4]]  ;;  %s4139_s13 = scalar_lea.vmem %s3452_s12, 2048 }
  0x6c   :  { %v3803_v49 = vld [vmem:[#allocation12] ss:$8 sps:$4 sm:$0xff]   ;;  %v3814_v54 = vld [vmem:[#allocation9 + $0x64] ss:$8 sps:$4 sm:$0xff]   ;;  %v3813_v56 = vld [vmem:[#allocation13 + $0x18] sm:$0xff]   ;;  %s4302_s23 = sld [smem:[#allocation5 + $0x5]]  ;;  %p4140_p7 = scmp.ne.s32.totalorder %s3452_s12, %s4139_s13 }
  0x6d   :  { %v3808_v51 = vld [vmem:[#allocation16] sm:$0xff]   ;;  %v3812_v55 = vld [vmem:[#allocation16 + $0x8] sm:$0xff]   ;;  %v3818_v57 = vld [vmem:[#allocation9 + $0x54] ss:$8 sps:$4 sm:$0xff]   ;;  %s4304_s24 = sld [smem:[#allocation5 + $0x6]]  ;;  %p4145_p9 = scmp.lt.s32.totalorder %s4139_s13, %s4139_s13 }
  0x6e   :  { %306 = vmatpush1.bf16.msra.mxu0 %v3757_v10  ;;  %3725 = vmatpush1.bf16.msra.mxu1 %v3757_v10  ;;  %v3815_v58 = vld [vmem:[#allocation13 + $0x20] sm:$0xff]   ;;  %v3824_v60 = vld [vmem:[#allocation9 + $0x34] ss:$8 sps:$4 sm:$0xff]   ;;  %v3817_v62 = vld [vmem:[#allocation13 + $0x28] sm:$0xff]   ;;  %s4306_s4 = sld [smem:[#allocation5 + $0xa]] }
  0x6f   :  { %307 = vmatprep.subr.bf16.mxu0 %v3758_v11  ;;  %3718 = vmatprep.subr.bf16.mxu1 %v3758_v11  ;;  %v3822_v59 = vld [vmem:[#allocation9 + $0x44] ss:$8 sps:$4 sm:$0xff]   ;;  %v3816_v61 = vld [vmem:[#allocation16 + $0x10] sm:$0xff]   ;;  %v3820_v3 = vld [vmem:[#allocation16 + $0x18] sm:$0xff]   ;;  %s4308_s25 = sld [smem:[#allocation5 + $0x7]]  ;;  %p4146_p10 = por %p4145_p9, %p4144_p8 }
  0x70   :  { %v3819_v63 = vld [vmem:[#allocation13 + $0x30] sm:$0xff]   ;;  %v3826_v0 = vld [vmem:[#allocation9 + $0x24] ss:$8 sps:$4 sm:$0xff]   ;;  %v3821_v4 = vld [vmem:[#allocation13 + $0x38] sm:$0xff]   ;;  %s4310_s26 = sld [smem:[#allocation5 + $0x8]] }
  0x71   :  { %v3828_v1 = vld [vmem:[#allocation9 + $0x14] ss:$8 sps:$4 sm:$0xff]   ;;  %v3830_v5 = vld [vmem:[#allocation9 + $0x4] ss:$8 sps:$4 sm:$0xff]   ;;  %s4312_s27 = sld [smem:[#allocation5 + $0xb]]  ;;  %p4147_p11 = pnand %p4146_p10, %p4140_p7 }
  0x72   :  { %308 = vmatpush1.bf16.msra.mxu0 %v3760_v12  ;;  %3726 = vmatpush1.bf16.msra.mxu1 %v3760_v12  ;;  %v3823_v6 = vld [vmem:[#allocation16 + $0x20] sm:$0xff]   ;;  %v3825_v7 = vld [vmem:[#allocation16 + $0x28] sm:$0xff]   ;;  %v3827_v8 = vld [vmem:[#allocation16 + $0x30] sm:$0xff]   ;;  %s4314_s28 = sld [smem:[#allocation5 + $0x9]] }
  0x73   :  { %309 = vmatprep.subr.bf16.mxu0 %v3761_v13  ;;  %3719 = vmatprep.subr.bf16.mxu1 %v3761_v13  ;;  %v3829_v9 = vld [vmem:[#allocation16 + $0x38] sm:$0xff]   ;;  %v3831_v10 = vld [vmem:[#allocation13] sm:$0xff]   ;;  %v3832_v11 = vld [vmem:[#allocation13 + $0x8] sm:$0xff]   ;;  %s4319_s29 = sld [smem:[#allocation5 + $0xe]] }
  0x74   :  { %v3833_v12 = vld [vmem:[#allocation13 + $0x10] sm:$0xff]   ;;  %v3834_v13 = vld [vmem:[#allocation13 + $0x18] sm:$0xff]   ;;  %s4356_s6 = sld [smem:[#allocation5 + $0xc]] }
  0x75   :  { %s4358_s30 = sld [smem:[#allocation5 + $0xf]] }
  0x76   :  { %310 = vmatpush1.bf16.msra.mxu0 %v3763_v14  ;;  %3727 = vmatpush1.bf16.msra.mxu1 %v3763_v14  ;;  %v3835_v14 = vld [vmem:[#allocation13 + $0x20] sm:$0xff]   ;;  %s4360_s9 = sld [smem:[#allocation5 + $0xd]] }
  0x77   :  { %311 = vmatprep.subr.bf16.mxu0 %v3764_v15  ;;  %3720 = vmatprep.subr.bf16.mxu1 %v3764_v15  ;;  %v3836_v15 = vld [vmem:[#allocation13 + $0x28] sm:$0xff]  }
  0x7a   :  { %312 = vmatpush1.bf16.msra.mxu0 %v3766_v16  ;;  %3728 = vmatpush1.bf16.msra.mxu1 %v3766_v16  ;;  %v3837_v16 = vld [vmem:[#allocation13 + $0x30] sm:$0xff]  }
  0x7b   :  { %602 = vmatprep.subr.bf16.mxu1 %v3771_v17  ;;  %3649 = vmatprep.subr.bf16.mxu0 %v3772_v18  ;;  %v3838_v17 = vld [vmem:[#allocation13 + $0x38] sm:$0xff]  }
  0x7d   :  { %330 = vmatmul.mubr.bf16.vlgmr.msra.gmra.mxu0 %v3767_v19  ;;  %370 = vmatmul.mubr.bf16.vlgmr.msra.gmra.mxu1 %v3768_v20 }
  0x7e   :  { %603 = vmatpush1.bf16.msra.mxu1 %v3769_v21  ;;  %3650 = vmatpush3.bf16.msra.mxu0 %v3772_v18 }
  0x7f   :  { %604 = vmatprep.subr.bf16.mxu1 %v3775_v22  ;;  %3651 = vmatprep.subr.bf16.mxu0 %v3776_v23 }
  0x80   :  { %339 = vmatprep.mubr.bf16.mxu0 %v5933_v2  ;;  %379 = vmatprep.mubr.bf16.mxu1 %v5933_v2 }
  0x82   :  { %605 = vmatpush1.bf16.msra.mxu1 %v3773_v24  ;;  %3652 = vmatpush3.bf16.msra.mxu0 %v3776_v23 }
  0x83   :  { %606 = vmatprep.subr.bf16.mxu1 %v3781_v25  ;;  %3653 = vmatprep.subr.bf16.mxu0 %v3782_v27 }
  0x85   :  { %340 = vmatmul.mubr.bf16.gmra.mxu0 %v3777_v26  ;;  %380 = vmatmul.mubr.bf16.gmra.mxu1 %v3778_v28 }
  0x86   :  { %607 = vmatpush1.bf16.msra.mxu1 %v3779_v29  ;;  %3654 = vmatpush3.bf16.msra.mxu0 %v3782_v27 }
  0x87   :  { %608 = vmatprep.subr.bf16.mxu1 %v3785_v30  ;;  %3655 = vmatprep.subr.bf16.mxu0 %v3786_v31 }
  0x88   :  { %349 = vmatprep.mubr.bf16.mxu0 %v5933_v2  ;;  %389 = vmatprep.mubr.bf16.mxu1 %v5933_v2 }
  0x8a   :  { %609 = vmatpush1.bf16.msra.mxu1 %v3783_v32  ;;  %3656 = vmatpush3.bf16.msra.mxu0 %v3786_v31 }
  0x8b   :  { %610 = vmatprep.subr.bf16.mxu1 %v3791_v33  ;;  %3657 = vmatprep.subr.bf16.mxu0 %v3792_v35 }
  0x8d   :  { %350 = vmatmul.mubr.bf16.gmra.mxu0 %v3787_v34  ;;  %390 = vmatmul.mubr.bf16.gmra.mxu1 %v3788_v36 }
  0x8e   :  { %611 = vmatpush1.bf16.msra.mxu1 %v3789_v37  ;;  %3658 = vmatpush3.bf16.msra.mxu0 %v3792_v35 }
  0x8f   :  { %612 = vmatprep.subr.bf16.mxu1 %v3795_v38  ;;  %3659 = vmatprep.subr.bf16.mxu0 %v3796_v39 }
  0x90   :  { %359 = vmatprep.mubr.bf16.mxu0 %v5933_v2  ;;  %399 = vmatprep.mubr.bf16.mxu1 %v5933_v2 }
  0x92   :  { %613 = vmatpush1.bf16.msra.mxu1 %v3793_v40  ;;  %3660 = vmatpush3.bf16.msra.mxu0 %v3796_v39 }
  0x93   :  { %614 = vmatprep.subr.bf16.mxu1 %v3801_v41  ;;  %3661 = vmatprep.subr.bf16.mxu0 %v3802_v43 }
  0x95   :  { %360 = vmatmul.mubr.bf16.gmra.mxu0 %v3797_v42  ;;  %400 = vmatmul.mubr.bf16.gmra.mxu1 %v3798_v44 }
  0x96   :  { %615 = vmatpush1.bf16.msra.mxu1 %v3799_v45  ;;  %3662 = vmatpush3.bf16.msra.mxu0 %v3802_v43 }
  0x97   :  { %616 = vmatprep.subr.bf16.mxu1 %v3805_v46  ;;  %3663 = vmatprep.subr.bf16.mxu0 %v3806_v47 }
  0x98   :  { %634 = vmatprep.mubr.bf16.mxu1 %v5933_v2  ;;  %3665 = vmatprep.mubr.bf16.mxu0 %v3807_v48 }
  0x9a   :  { %617 = vmatpush1.bf16.msra.mxu1 %v3803_v49  ;;  %3664 = vmatpush3.bf16.msra.mxu0 %v3806_v47 }
  0x9b   :  { %3681 = vmatprep.subr.bf16.mxu1 %v3810_v50 }
  0x9d   :  { %635 = vmatmul.mubr.bf16.vlgmr.msra.gmra.mxu1 %v3808_v51  ;;  %3666 = vmatmul.mubr.bf16.vlgmr.msra.gmra.mxu0 %v3809_v52 }
  0x9e   :  { %3682 = vmatpush3.bf16.msra.mxu1 %v3810_v50  ;;  %644 = vmatprep.mubr.bf16.mxu1 %v5933_v2  ;;  %v5948_v50 = vstv %s4296_s15 }
  0x9f   :  { %3669 = vmatprep.mubr.bf16.mxu0 %v3811_v53  ;;  %3683 = vmatprep.subr.bf16.mxu1 %v3814_v54 }
  0xa2   :  { %3684 = vmatpush3.bf16.msra.mxu1 %v3814_v54 }
  0xa3   :  { %3685 = vmatprep.subr.bf16.mxu1 %v3818_v57 }
  0xa5   :  { %645 = vmatmul.mubr.bf16.gmra.mxu1 %v3812_v55  ;;  %3670 = vmatmul.mubr.bf16.gmra.mxu0 %v3813_v56 }
  0xa6   :  { %654 = vmatprep.mubr.bf16.mxu1 %v5933_v2  ;;  %3673 = vmatprep.mubr.bf16.mxu0 %v3815_v58 }
  0xa7   :  { %3686 = vmatpush3.bf16.msra.mxu1 %v3818_v57 }
  0xa8   :  { %3687 = vmatprep.subr.bf16.mxu1 %v3822_v59 }
  0xab   :  { %3688 = vmatpush3.bf16.msra.mxu1 %v3822_v59 }
  0xac   :  { %3689 = vmatprep.subr.bf16.mxu1 %v3824_v60 }
  0xad   :  { %655 = vmatmul.mubr.bf16.gmra.mxu1 %v3816_v61  ;;  %3674 = vmatmul.mubr.bf16.gmra.mxu0 %v3817_v62  ;;  %v5947_v62 = vstv %s4292_s5 }
  0xae   :  { %664 = vmatprep.mubr.bf16.mxu1 %v5933_v2  ;;  %3677 = vmatprep.mubr.bf16.mxu0 %v3819_v63  ;;  %v5946_v63 = vstv %s4298_s16 }
  0xaf   :  { %3690 = vmatpush3.bf16.msra.mxu1 %v3824_v60 }
  0xb0   :  { %3691 = vmatprep.subr.bf16.mxu1 %v3826_v0 }
  0xb3   :  { %3692 = vmatpush3.bf16.msra.mxu1 %v3826_v0  ;;  %v5945_v0 = vstv %s4294_s7 }
  0xb4   :  { %3693 = vmatprep.subr.bf16.mxu1 %v3828_v1 }
  0xb5   :  { %665 = vmatmul.mubr.bf16.gmra.mxu1 %v3820_v3  ;;  %3678 = vmatmul.mubr.bf16.gmra.mxu0 %v3821_v4 }
  0xb6   :  { %674 = vmatprep.mubr.bf16.mxu1 %v5933_v2  ;;  %3253 = vmatprep.mubr.bf16.mxu0 %v5933_v2 }
  0xb7   :  { %3694 = vmatpush3.bf16.msra.mxu1 %v3828_v1  ;;  %v5939_v1 = vstv %s4300_s22 }
  0xb8   :  { %3695 = vmatprep.subr.bf16.mxu1 %v3830_v5 }
  0xbb   :  { %3696 = vmatpush3.bf16.msra.mxu1 %v3830_v5 }
  0xbd   :  { %675 = vmatmul.mubr.bf16.gmra.mxu1 %v3823_v6  ;;  %v5940_v6 = vstv %s4304_s24 }
  0xbe   :  { %684 = vmatprep.mubr.bf16.mxu1 %v5933_v2 }
  0xc5   :  { %685 = vmatmul.mubr.bf16.gmra.mxu1 %v3825_v7  ;;  %v5938_v7 = vstv %s4308_s25 }
  0xc6   :  { %694 = vmatprep.mubr.bf16.mxu1 %v5933_v2 }
  0xcd   :  { %695 = vmatmul.mubr.bf16.gmra.mxu1 %v3827_v8  ;;  %v5937_v8 = vstv %s4302_s23 }
  0xce   :  { %704 = vmatprep.mubr.bf16.mxu1 %v5933_v2 }
  0xd5   :  { %705 = vmatmul.mubr.bf16.gmra.mxu1 %v3829_v9  ;;  %v5936_v9 = vstv %s4306_s4 }
  0xd6   :  { %3697 = vmatprep.mubr.bf16.mxu1 %v3831_v10 }
  0xdd   :  { %3698 = vmatmul.mubr.bf16.vlgmr.msra.gmra.mxu1 %v3832_v11 }
  0xde   :  { %3701 = vmatprep.mubr.bf16.mxu1 %v3833_v12 }
  0xe5   :  { %3702 = vmatmul.mubr.bf16.gmra.mxu1 %v3834_v13 }
  0xe6   :  { %3705 = vmatprep.mubr.bf16.mxu1 %v3835_v14 }
  0xed   :  { %3706 = vmatmul.mubr.bf16.gmra.mxu1 %v3836_v15 }
  0xee   :  { %3709 = vmatprep.mubr.bf16.mxu1 %v3837_v16  ;;  %v5935_v16 = vstv %s4310_s26 }
  0xf5   :  { %3710 = vmatmul.mubr.bf16.gmra.mxu1 %v3838_v17  ;;  %v5944_v17 = vstv %s4312_s27 }
 0x13d   :  { %v331_v18 = vpop.f32.mrf.mxu0  ;;  %v371_v19 = vpop.f32.mrf.mxu1 }
 0x13e   :  { %410 = vst [vmem:[#allocation2] sm:$0xff] %v331_v18  ;;  %426 = vst [vmem:[#allocation2 + $0x80] sm:$0xff] %v371_v19  ;;  %v5941_v18 = vstv %s4314_s28 }
 0x13f   :  { %v333_v20 = vpop.f32.mrf.mxu0  ;;  %v373_v21 = vpop.f32.mrf.mxu1 }
 0x140   :  { %411 = vst [vmem:[#allocation2 + $0x8] sm:$0xff] %v333_v20  ;;  %427 = vst [vmem:[#allocation2 + $0x88] sm:$0xff] %v373_v21 }
 0x141   :  { %v335_v22 = vpop.f32.mrf.mxu0  ;;  %v375_v23 = vpop.f32.mrf.mxu1 }
 0x142   :  { %412 = vst [vmem:[#allocation2 + $0x10] sm:$0xff] %v335_v22  ;;  %428 = vst [vmem:[#allocation2 + $0x90] sm:$0xff] %v375_v23 }
 0x143   :  { %v337_v24 = vpop.f32.mrf.mxu0  ;;  %v377_v25 = vpop.f32.mrf.mxu1 }
 0x144   :  { %413 = vst [vmem:[#allocation2 + $0x18] sm:$0xff] %v337_v24  ;;  %429 = vst [vmem:[#allocation2 + $0x98] sm:$0xff] %v377_v25 }
 0x145   :  { %v341_v26 = vpop.f32.mrf.mxu0  ;;  %v381_v27 = vpop.f32.mrf.mxu1  ;;  %v984_v55 = vld [vmem:[#allocation2] ss:$0 sm:$0xff]  ;;  %v995_v56 = vld [vmem:[#allocation2 + $0x1] ss:$0 sm:$0xff]  ;;  %v1006_v10 = vld [vmem:[#allocation2 + $0x2] ss:$0 sm:$0xff] }
 0x146   :  { %414 = vst [vmem:[#allocation2 + $0x20] sm:$0xff] %v341_v26  ;;  %430 = vst [vmem:[#allocation2 + $0xa0] sm:$0xff] %v381_v27  ;;  %v1017_v11 = vld [vmem:[#allocation2 + $0x3] ss:$0 sm:$0xff]  ;;  %v1028_v19 = vld [vmem:[#allocation2 + $0x4] ss:$0 sm:$0xff] }
 0x147   :  { %v343_v28 = vpop.f32.mrf.mxu0  ;;  %v383_v29 = vpop.f32.mrf.mxu1  ;;  %v1039_v20 = vld [vmem:[#allocation2 + $0x5] ss:$0 sm:$0xff]  ;;  %v1050_v21 = vld [vmem:[#allocation2 + $0x6] ss:$0 sm:$0xff]  ;;  %v1061_v26 = vld [vmem:[#allocation2 + $0x7] ss:$0 sm:$0xff] }
 0x148   :  { %415 = vst [vmem:[#allocation2 + $0x28] sm:$0xff] %v343_v28  ;;  %431 = vst [vmem:[#allocation2 + $0xa8] sm:$0xff] %v383_v29  ;;  %v1528_v2 = vld [vmem:[#allocation2 + $0x86] ss:$0 sm:$0xff] }
 0x149   :  { %v345_v30 = vpop.f32.mrf.mxu0  ;;  %v385_v31 = vpop.f32.mrf.mxu1  ;;  %v986_v27 = vld [vmem:[#allocation2 + $0x10] ss:$0 sm:$0xff]  ;;  %v997_v28 = vld [vmem:[#allocation2 + $0x11] ss:$0 sm:$0xff] }
 0x14a   :  { %416 = vst [vmem:[#allocation2 + $0x30] sm:$0xff] %v345_v30  ;;  %432 = vst [vmem:[#allocation2 + $0xb0] sm:$0xff] %v385_v31 }
 0x14b   :  { %v347_v32 = vpop.f32.mrf.mxu0  ;;  %v387_v33 = vpop.f32.mrf.mxu1 }
 0x14c   :  { %417 = vst [vmem:[#allocation2 + $0x38] sm:$0xff] %v347_v32  ;;  %433 = vst [vmem:[#allocation2 + $0xb8] sm:$0xff] %v387_v33 }
 0x14d   :  { %v351_v34 = vpop.f32.mrf.mxu0  ;;  %v391_v35 = vpop.f32.mrf.mxu1  ;;  %v989_v53 = vld [vmem:[#allocation2 + $0x20] ss:$0 sm:$0xff]  ;;  %v1000_v57 = vld [vmem:[#allocation2 + $0x21] ss:$0 sm:$0xff]  ;;  %v1011_v58 = vld [vmem:[#allocation2 + $0x22] ss:$0 sm:$0xff] }
 0x14e   :  { %418 = vst [vmem:[#allocation2 + $0x40] sm:$0xff] %v351_v34  ;;  %434 = vst [vmem:[#allocation2 + $0xc0] sm:$0xff] %v391_v35  ;;  %v1022_v59 = vld [vmem:[#allocation2 + $0x23] ss:$0 sm:$0xff]  ;;  %v1033_v3 = vld [vmem:[#allocation2 + $0x24] ss:$0 sm:$0xff] }
 0x14f   :  { %v353_v36 = vpop.f32.mrf.mxu0  ;;  %v393_v37 = vpop.f32.mrf.mxu1  ;;  %v1044_v4 = vld [vmem:[#allocation2 + $0x25] ss:$0 sm:$0xff]  ;;  %v1055_v5 = vld [vmem:[#allocation2 + $0x26] ss:$0 sm:$0xff]  ;;  %v1066_v12 = vld [vmem:[#allocation2 + $0x27] ss:$0 sm:$0xff] }
 0x150   :  { %419 = vst [vmem:[#allocation2 + $0x48] sm:$0xff] %v353_v36  ;;  %435 = vst [vmem:[#allocation2 + $0xc8] sm:$0xff] %v393_v37  ;;  %v1008_v35 = vld [vmem:[#allocation2 + $0x12] ss:$0 sm:$0xff]  ;;  %v1019_v36 = vld [vmem:[#allocation2 + $0x13] ss:$0 sm:$0xff] }
 0x151   :  { %v355_v38 = vpop.f32.mrf.mxu0  ;;  %v395_v39 = vpop.f32.mrf.mxu1  ;;  %v1030_v37 = vld [vmem:[#allocation2 + $0x14] ss:$0 sm:$0xff] }
 0x152   :  { %420 = vst [vmem:[#allocation2 + $0x50] sm:$0xff] %v355_v38  ;;  %436 = vst [vmem:[#allocation2 + $0xd0] sm:$0xff] %v395_v39  ;;  %v1041_v38 = vld [vmem:[#allocation2 + $0x15] ss:$0 sm:$0xff] }
 0x153   :  { %v357_v40 = vpop.f32.mrf.mxu0  ;;  %v397_v41 = vpop.f32.mrf.mxu1 }
 0x154   :  { %421 = vst [vmem:[#allocation2 + $0x58] sm:$0xff] %v357_v40  ;;  %437 = vst [vmem:[#allocation2 + $0xd8] sm:$0xff] %v397_v41 }
 0x155   :  { %v361_v42 = vpop.f32.mrf.mxu0  ;;  %v401_v43 = vpop.f32.mrf.mxu1 }
 0x156   :  { %422 = vst [vmem:[#allocation2 + $0x60] sm:$0xff] %v361_v42  ;;  %438 = vst [vmem:[#allocation2 + $0xe0] sm:$0xff] %v401_v43  ;;  %v1052_v43 = vld [vmem:[#allocation2 + $0x16] ss:$0 sm:$0xff] }
 0x157   :  { %v363_v44 = vpop.f32.mrf.mxu0  ;;  %v403_v45 = vpop.f32.mrf.mxu1 }
 0x158   :  { %423 = vst [vmem:[#allocation2 + $0x68] sm:$0xff] %v363_v44  ;;  %439 = vst [vmem:[#allocation2 + $0xe8] sm:$0xff] %v403_v45  ;;  %v992_v44 = vld [vmem:[#allocation2 + $0x30] ss:$0 sm:$0xff]  ;;  %v1003_v45 = vld [vmem:[#allocation2 + $0x31] ss:$0 sm:$0xff] }
 0x159   :  { %v365_v46 = vpop.f32.mrf.mxu0  ;;  %v405_v47 = vpop.f32.mrf.mxu1 }
 0x15a   :  { %424 = vst [vmem:[#allocation2 + $0x70] sm:$0xff] %v365_v46  ;;  %440 = vst [vmem:[#allocation2 + $0xf0] sm:$0xff] %v405_v47  ;;  %v1014_v46 = vld [vmem:[#allocation2 + $0x32] ss:$0 sm:$0xff] }
 0x15b   :  { %v367_v48 = vpop.f32.mrf.mxu0  ;;  %v407_v49 = vpop.f32.mrf.mxu1 }
 0x15c   :  { %425 = vst [vmem:[#allocation2 + $0x78] sm:$0xff] %v367_v48  ;;  %441 = vst [vmem:[#allocation2 + $0xf8] sm:$0xff] %v407_v49 }
 0x15d   :  { %v636_v51 = vpop.f32.mrf.mxu1  ;;  %v3667_v52 = vpop.f32.mrf.mxu0 }
 0x15e   :  { %715 = vst [vmem:[#allocation3] sm:$0xff] %v636_v51  ;;  %v980_v54 = vadd.f32 %v3667_v52, %v5948_v50 }
 0x15f   :  { %v638_v60 = vpop.f32.mrf.mxu1  ;;  %v909_v61 = vpop.f32.mrf.mxu0 }
 0x160   :  { %716 = vst [vmem:[#allocation3 + $0x8] sm:$0xff] %v638_v60  ;;  %v4329_v13 = vmul.f32 %v989_v53, %v980_v54  ;;  %v4334_v22 = vmul.f32 %v1000_v57, %v980_v54  ;;  %v4336_v23 = vmul.f32 %v1011_v58, %v980_v54  ;;  %v974_v24 = vadd.f32 %v5947_v62, %v909_v61  ;;  %v1025_v57 = vld [vmem:[#allocation2 + $0x33] ss:$0 sm:$0xff]  ;;  %v1036_v58 = vld [vmem:[#allocation2 + $0x34] ss:$0 sm:$0xff] }
 0x161   :  { %v640_v14 = vpop.f32.mrf.mxu1  ;;  %v3668_v15 = vpop.f32.mrf.mxu0  ;;  %v4342_v29 = vmul.f32 %v1022_v59, %v980_v54  ;;  %v4344_v30 = vmul.f32 %v1033_v3, %v980_v54  ;;  %v4346_v31 = vmul.f32 %v1044_v4, %v980_v54  ;;  %v4348_v32 = vmul.f32 %v1055_v5, %v980_v54  ;;  %v1063_v61 = vld [vmem:[#allocation2 + $0x17] ss:$0 sm:$0xff]  ;;  %v1058_v3 = vld [vmem:[#allocation2 + $0x36] ss:$0 sm:$0xff] }
 0x162   :  { %717 = vst [vmem:[#allocation3 + $0x10] sm:$0xff] %v640_v14  ;;  %v983_v25 = vadd.f32 %v3668_v15, %v5946_v63  ;;  %v4350_v39 = vmul.f32 %v1066_v12, %v980_v54  ;;  %v985_v40 = vmul.f32 %v984_v55, %v974_v24  ;;  %v996_v41 = vmul.f32 %v995_v56, %v974_v24  ;;  %v1047_v54 = vld [vmem:[#allocation2 + $0x35] ss:$0 sm:$0xff]  ;;  %v1069_v4 = vld [vmem:[#allocation2 + $0x37] ss:$0 sm:$0xff] }
 0x163   :  { %v642_v33 = vpop.f32.mrf.mxu1  ;;  %v912_v34 = vpop.f32.mrf.mxu0  ;;  %v1007_v42 = vmul.f32 %v1006_v10, %v974_v24  ;;  %v1018_v47 = vmul.f32 %v1017_v11, %v974_v24  ;;  %v1029_v48 = vmul.f32 %v1028_v19, %v974_v24  ;;  %v1040_v49 = vmul.f32 %v1039_v20, %v974_v24  ;;  %v1481_v63 = vld [vmem:[#allocation2 + $0xb1] ss:$0 sm:$0xff] }
 0x164   :  { %718 = vst [vmem:[#allocation3 + $0x18] sm:$0xff] %v642_v33  ;;  %v1051_v51 = vmul.f32 %v1050_v21, %v974_v24  ;;  %v1062_v59 = vmul.f32 %v1061_v26, %v974_v24  ;;  %v993_v55 = vmul.f32 %v992_v44, %v983_v25  ;;  %v1004_v56 = vmul.f32 %v1003_v45, %v983_v25 }
 0x165   :  { %v646_v52 = vpop.f32.mrf.mxu1  ;;  %v4352_v53 = vpop.f32.mrf.mxu0  ;;  %v977_v60 = vadd.f32 %v5945_v0, %v912_v34  ;;  %v1015_v5 = vmul.f32 %v1014_v46, %v983_v25  ;;  %v1026_v10 = vmul.f32 %v1025_v57, %v983_v25  ;;  %v1037_v11 = vmul.f32 %v1036_v58, %v983_v25  ;;  %v1470_v0 = vld [vmem:[#allocation2 + $0xb0] ss:$0 sm:$0xff] }
 0x166   :  { %719 = vst [vmem:[#allocation3 + $0x20] sm:$0xff] %v646_v52  ;;  %v1048_v12 = vmul.f32 %v1047_v54, %v983_v25  ;;  %v1059_v19 = vmul.f32 %v1058_v3, %v983_v25  ;;  %v1070_v20 = vmul.f32 %v1069_v4, %v983_v25 }
 0x167   :  { %v648_v14 = vpop.f32.mrf.mxu1  ;;  %v925_v15 = vpop.f32.mrf.mxu0  ;;  %v987_v21 = vmul.f32 %v986_v27, %v977_v60  ;;  %v998_v33 = vmul.f32 %v997_v28, %v977_v60  ;;  %v1009_v24 = vmul.f32 %v1008_v35, %v977_v60  ;;  %v1020_v26 = vmul.f32 %v1019_v36, %v977_v60 }
 0x168   :  { %720 = vst [vmem:[#allocation3 + $0x28] sm:$0xff] %v648_v14  ;;  %v1031_v34 = vmul.f32 %v1030_v37, %v977_v60  ;;  %v1042_v44 = vmul.f32 %v1041_v38, %v977_v60  ;;  %v1053_v58 = vmul.f32 %v1052_v43, %v977_v60  ;;  %v1064_v54 = vmul.f32 %v1063_v61, %v977_v60 }
 0x169   :  { %v650_v45 = vpop.f32.mrf.mxu1  ;;  %v3672_v52 = vpop.f32.mrf.mxu0  ;;  %v988_v46 = vadd.f32 %v987_v21, %v985_v40  ;;  %v999_v57 = vadd.f32 %v998_v33, %v996_v41  ;;  %v1010_v25 = vadd.f32 %v1009_v24, %v1007_v42  ;;  %v1021_v27 = vadd.f32 %v1020_v26, %v1018_v47 }
 0x16a   :  { %721 = vst [vmem:[#allocation3 + $0x30] sm:$0xff] %v650_v45  ;;  %v1032_v28 = vadd.f32 %v1031_v34, %v1029_v48  ;;  %v1043_v3 = vadd.f32 %v1042_v44, %v1040_v49  ;;  %v1054_v38 = vadd.f32 %v1053_v58, %v1051_v51  ;;  %v1065_v14 = vadd.f32 %v1064_v54, %v1062_v59  ;;  %v1278_v34 = vld [vmem:[#allocation2 + $0x45] ss:$0 sm:$0xff]  ;;  %v1289_v44 = vld [vmem:[#allocation2 + $0x46] ss:$0 sm:$0xff] }
 0x16b   :  { %v652_v4 = vpop.f32.mrf.mxu1  ;;  %v928_v35 = vpop.f32.mrf.mxu0  ;;  %v991_v36 = vadd.f32 %v4329_v13, %v988_v46  ;;  %v1002_v37 = vadd.f32 %v4334_v22, %v999_v57  ;;  %v1013_v40 = vadd.f32 %v4336_v23, %v1010_v25  ;;  %v1024_v41 = vadd.f32 %v4342_v29, %v1021_v27  ;;  %v1300_v45 = vld [vmem:[#allocation2 + $0x47] ss:$0 sm:$0xff] }
 0x16c   :  { %722 = vst [vmem:[#allocation3 + $0x38] sm:$0xff] %v652_v4  ;;  %v1035_v43 = vadd.f32 %v4344_v30, %v1032_v28  ;;  %v1046_v42 = vadd.f32 %v4346_v31, %v1043_v3  ;;  %v1057_v13 = vadd.f32 %v4348_v32, %v1054_v38  ;;  %v1068_v22 = vadd.f32 %v4350_v39, %v1065_v14 }
 0x16d   :  { %v656_v47 = vpop.f32.mrf.mxu1  ;;  %v3675_v48 = vpop.f32.mrf.mxu0  ;;  %v4368_v49 = vadd.f32 %v993_v55, %v991_v36  ;;  %v4370_v60 = vadd.f32 %v1004_v56, %v1002_v37  ;;  %v4374_v51 = vadd.f32 %v1015_v5, %v1013_v40  ;;  %v4376_v23 = vadd.f32 %v1026_v10, %v1024_v41  ;;  %v1223_v55 = vld [vmem:[#allocation2 + $0x40] ss:$0 sm:$0xff]  ;;  %v1234_v56 = vld [vmem:[#allocation2 + $0x41] ss:$0 sm:$0xff]  ;;  %v1245_v10 = vld [vmem:[#allocation2 + $0x42] ss:$0 sm:$0xff] }
 0x16e   :  { %723 = vst [vmem:[#allocation3 + $0x40] sm:$0xff] %v656_v47  ;;  %v4378_v29 = vadd.f32 %v1037_v11, %v1035_v43  ;;  %v4380_v30 = vadd.f32 %v1048_v12, %v1046_v42  ;;  %v4382_v32 = vadd.f32 %v1059_v19, %v1057_v13  ;;  %v4384_v39 = vadd.f32 %v1070_v20, %v1068_v22  ;;  %v1256_v11 = vld [vmem:[#allocation2 + $0x43] ss:$0 sm:$0xff]  ;;  %v1267_v12 = vld [vmem:[#allocation2 + $0x44] ss:$0 sm:$0xff] }
 0x16f   :  { %v658_v31 = vpop.f32.mrf.mxu1  ;;  %v941_v59 = vpop.f32.mrf.mxu0  ;;  %v1072_v61 = vmax.f32 %v4368_v49, %v4370_v60  ;;  %v1213_v5 = vadd.f32 %v5939_v1, %v925_v15  ;;  %v1458_v21 = vadd.f32 %v3675_v48, %v5936_v9  ;;  %v5943_v20 = vstv %s4319_s29  ;;  %v1467_v36 = vld [vmem:[#allocation2 + $0xa0] ss:$0 sm:$0xff]  ;;  %v1478_v37 = vld [vmem:[#allocation2 + $0xa1] ss:$0 sm:$0xff]  ;;  %v1489_v41 = vld [vmem:[#allocation2 + $0xa2] ss:$0 sm:$0xff] }
 0x170   :  { %5989 = vst [vmem:[#allocation26_spill] sm:$0xff] %v4378_v29  ;;  %5990 = vst [vmem:[#allocation27_spill] sm:$0xff] %v4380_v30  ;;  %v5942_v24 = vstv %s4356_s6  ;;  %v5949_v26 = vstv %s4358_s30  ;;  %v4401_v46 = vadd.f32 %v4352_v53, %v5940_v6  ;;  %v4405_v57 = vadd.f32 %v3672_v52, %v5938_v7  ;;  %v1462_v40 = vld [vmem:[#allocation2 + $0x80] ss:$0 sm:$0xff]  ;;  %v1500_v43 = vld [vmem:[#allocation2 + $0xa3] ss:$0 sm:$0xff] }
 0x171   :  { %5991 = vst [vmem:[#allocation28_spill] sm:$0xff] %v4382_v32  ;;  %5992 = vst [vmem:[#allocation29_spill] sm:$0xff] %v4384_v39  ;;  %v660_v33 = vpop.f32.mrf.mxu1  ;;  %v4392_v19 = vpop.f32.mrf.mxu0  ;;  %v1073_v15 = vmax.f32 %v1072_v61, %v4374_v51  ;;  %v4408_v54 = vmul.f32 %v1223_v55, %v1213_v5  ;;  %v4410_v25 = vmul.f32 %v1234_v56, %v1213_v5  ;;  %v1533_v55 = vld [vmem:[#allocation2 + $0xa6] ss:$0 sm:$0xff]  ;;  %v1544_v56 = vld [vmem:[#allocation2 + $0xa7] ss:$0 sm:$0xff] }
 0x172   :  { %724 = vst [vmem:[#allocation3 + $0x48] sm:$0xff] %v658_v31  ;;  %725 = vst [vmem:[#allocation3 + $0x50] sm:$0xff] %v660_v33  ;;  %v4414_v27 = vadd.f32 %v5937_v8, %v928_v35  ;;  %v1452_v28 = vadd.f32 %v5935_v16, %v941_v59  ;;  %v4419_v38 = vmul.f32 %v1245_v10, %v1213_v5  ;;  %v1511_v35 = vld [vmem:[#allocation2 + $0xa4] ss:$0 sm:$0xff]  ;;  %v1522_v59 = vld [vmem:[#allocation2 + $0xa5] ss:$0 sm:$0xff] }
 0x173   :  { %v662_v3 = vpop.f32.mrf.mxu1  ;;  %v944_v4 = vpop.f32.mrf.mxu0  ;;  %v1074_v53 = vmax.f32 %v1073_v15, %v4376_v23  ;;  %v4421_v52 = vmul.f32 %v1256_v11, %v1213_v5  ;;  %v4423_v14 = vmul.f32 %v1267_v12, %v1213_v5  ;;  %v4425_v42 = vmul.f32 %v1278_v34, %v1213_v5  ;;  %v1473_v33 = vld [vmem:[#allocation2 + $0x81] ss:$0 sm:$0xff]  ;;  %v1484_v34 = vld [vmem:[#allocation2 + $0x82] ss:$0 sm:$0xff]  ;;  %v1225_v9 = vld [vmem:[#allocation2 + $0x50] ss:$0 sm:$0xff] }
 0x174   :  { %726 = vst [vmem:[#allocation3 + $0x58] sm:$0xff] %v662_v3  ;;  %v4427_v47 = vmul.f32 %v1289_v44, %v1213_v5  ;;  %v4429_v48 = vmul.f32 %v1300_v45, %v1213_v5  ;;  %v4431_v13 = vmul.f32 %v1467_v36, %v1458_v21  ;;  %v4434_v10 = vmul.f32 %v1478_v37, %v1458_v21  ;;  %v1495_v5 = vld [vmem:[#allocation2 + $0x83] ss:$0 sm:$0xff]  ;;  %v1517_v37 = vld [vmem:[#allocation2 + $0x85] ss:$0 sm:$0xff] }
 0x175   :  { %v666_v22 = vpop.f32.mrf.mxu1  ;;  %v3679_v31 = vpop.f32.mrf.mxu0  ;;  %v1075_v61 = vmax.f32 %v1074_v53, %v4378_v29  ;;  %v4436_v11 = vmul.f32 %v1489_v41, %v1458_v21  ;;  %v4438_v12 = vmul.f32 %v1500_v43, %v1458_v21  ;;  %v4440_v44 = vmul.f32 %v1511_v35, %v1458_v21  ;;  %v1506_v53 = vld [vmem:[#allocation2 + $0x84] ss:$0 sm:$0xff]  ;;  %v1236_v8 = vld [vmem:[#allocation2 + $0x51] ss:$0 sm:$0xff]  ;;  %v1269_v7 = vld [vmem:[#allocation2 + $0x54] ss:$0 sm:$0xff] }
 0x176   :  { %727 = vst [vmem:[#allocation3 + $0x60] sm:$0xff] %v666_v22  ;;  %v4442_v45 = vmul.f32 %v1522_v59, %v1458_v21  ;;  %v4444_v15 = vmul.f32 %v1533_v55, %v1458_v21  ;;  %v4446_v3 = vmul.f32 %v1544_v56, %v1458_v21  ;;  %v4449_v43 = vmul.f32 %v1462_v40, %v1452_v28  ;;  %v1539_v55 = vld [vmem:[#allocation2 + $0x87] ss:$0 sm:$0xff] }
 0x177   :  { %v668_v36 = vpop.f32.mrf.mxu1  ;;  %v1076_v41 = vmax.f32 %v1075_v61, %v4380_v30  ;;  %v4451_v22 = vmul.f32 %v1473_v33, %v1452_v28  ;;  %v4453_v35 = vmul.f32 %v1484_v34, %v1452_v28  ;;  %v957_v59 = vpop.f32.mrf.mxu0  ;;  %v4455_v16 = vmul.f32 %v1495_v5, %v1452_v28  ;;  %v1272_v30 = vld [vmem:[#allocation2 + $0x64] ss:$0 sm:$0xff] }
 0x178   :  { %728 = vst [vmem:[#allocation3 + $0x68] sm:$0xff] %v668_v36  ;;  %v4457_v21 = vmul.f32 %v1506_v53, %v1452_v28  ;;  %v4459_v56 = vmul.f32 %v1517_v37, %v1452_v28  ;;  %v4461_v61 = vmul.f32 %v1528_v2, %v1452_v28  ;;  %v4464_v34 = vmul.f32 %v1539_v55, %v1452_v28  ;;  %v1247_v53 = vld [vmem:[#allocation2 + $0x52] ss:$0 sm:$0xff]  ;;  %v1258_v37 = vld [vmem:[#allocation2 + $0x53] ss:$0 sm:$0xff] }
 0x179   :  { %v670_v40 = vpop.f32.mrf.mxu1  ;;  %v1077_v33 = vmax.f32 %v1076_v41, %v4382_v32  ;;  %v4469_v36 = vadd.f32 %v4392_v19, %v5944_v17  ;;  %v4473_v5 = vadd.f32 %v5941_v18, %v944_v4  ;;  %v1226_v2 = vmul.f32 %v1225_v9, %v4414_v27  ;;  %v1280_v19 = vld [vmem:[#allocation2 + $0x55] ss:$0 sm:$0xff]  ;;  %v1291_v55 = vld [vmem:[#allocation2 + $0x56] ss:$0 sm:$0xff]  ;;  %v1464_v17 = vld [vmem:[#allocation2 + $0x90] ss:$0 sm:$0xff] }
 0x17a   :  { %729 = vst [vmem:[#allocation3 + $0x70] sm:$0xff] %v670_v40  ;;  %v1237_v1 = vmul.f32 %v1236_v8, %v4414_v27  ;;  %v4479_v6 = vadd.f32 %v3679_v31, %v5943_v20  ;;  %v4483_v28 = vadd.f32 %v5942_v24, %v957_v59  ;;  %v1248_v40 = vmul.f32 %v1247_v53, %v4414_v27  ;;  %v1228_v53 = vld [vmem:[#allocation2 + $0x60] ss:$0 sm:$0xff] }
 0x17b   :  { %v672_v41 = vpop.f32.mrf.mxu1  ;;  %v4486_v4 = vmax.f32 %v1077_v33, %v4384_v39  ;;  %v1259_v18 = vmul.f32 %v1258_v37, %v4414_v27  ;;  %v1270_v9 = vmul.f32 %v1269_v7, %v4414_v27  ;;  %v4492_v8 = vadd.f32 %v1226_v2, %v4408_v54  ;;  %v1302_v33 = vld [vmem:[#allocation2 + $0x57] ss:$0 sm:$0xff]  ;;  %v1514_v2 = vld [vmem:[#allocation2 + $0xb4] ss:$0 sm:$0xff]  ;;  %v1239_v39 = vld [vmem:[#allocation2 + $0x61] ss:$0 sm:$0xff] }
 0x17c   :  { %730 = vst [vmem:[#allocation3 + $0x78] sm:$0xff] %v672_v41  ;;  %v4495_v31 = vadd.f32 %v1237_v1, %v4410_v25  ;;  %v1281_v59 = vmul.f32 %v1280_v19, %v4414_v27  ;;  %v1292_v24 = vmul.f32 %v1291_v55, %v4414_v27  ;;  %v3680_v1 = vpop.f32.mrf.mxu0  ;;  %v4516_v62 = vadd.f32 %v1248_v40, %v4419_v38  ;;  %v1492_v41 = vld [vmem:[#allocation2 + $0xb2] ss:$0 sm:$0xff]  ;;  %v1503_v19 = vld [vmem:[#allocation2 + $0xb3] ss:$0 sm:$0xff] }
 0x17d   :  { %v676_v20 = vpop.f32.mrf.mxu1  ;;  %v4522_v50 = vadd.f32 %v1270_v9, %v4423_v14  ;;  %v1303_v54 = vmul.f32 %v1302_v33, %v4414_v27  ;;  %v1471_v38 = vmul.f32 %v1470_v0, %v4469_v36  ;;  %v4532_v40 = vadd.f32 %v3680_v1, %v5949_v26  ;;  %v1486_v14 = vld [vmem:[#allocation2 + $0x92] ss:$0 sm:$0xff]  ;;  %v1497_v9 = vld [vmem:[#allocation2 + $0x93] ss:$0 sm:$0xff]  ;;  %v1508_v0 = vld [vmem:[#allocation2 + $0x94] ss:$0 sm:$0xff] }
 0x17e   :  { %731 = vst [vmem:[#allocation3 + $0x80] sm:$0xff] %v676_v20  ;;  %v4519_v20 = vadd.f32 %v1259_v18, %v4421_v52  ;;  %v4525_v58 = vadd.f32 %v1281_v59, %v4425_v42  ;;  %v1293_v25 = vadd.f32 %v1292_v24, %v4427_v47  ;;  %v1475_v52 = vld [vmem:[#allocation2 + $0x91] ss:$0 sm:$0xff]  ;;  %v4535_v42 = vmul.f32 %v1481_v63, %v4469_v36  ;;  %v1519_v27 = vld [vmem:[#allocation2 + $0x95] ss:$0 sm:$0xff] }
 0x17f   :  { %v678_v55 = vpop.f32.mrf.mxu1  ;;  %v4538_v59 = vmul.f32 %v1492_v41, %v4469_v36  ;;  %v4544_v24 = vmul.f32 %v1514_v2, %v4469_v36  ;;  %v1530_v47 = vld [vmem:[#allocation2 + $0x96] ss:$0 sm:$0xff]  ;;  %v1304_v33 = vadd.f32 %v1303_v54, %v4429_v48  ;;  %v1465_v1 = vmul.f32 %v1464_v17, %v4473_v5  ;;  %v1541_v7 = vld [vmem:[#allocation2 + $0x97] ss:$0 sm:$0xff]  ;;  %v1250_v48 = vld [vmem:[#allocation2 + $0x62] ss:$0 sm:$0xff] }
 0x180   :  { %732 = vst [vmem:[#allocation3 + $0x88] sm:$0xff] %v678_v55  ;;  %v4541_v55 = vmul.f32 %v1503_v19, %v4469_v36  ;;  %v1476_v63 = vmul.f32 %v1475_v52, %v4473_v5  ;;  %v1487_v26 = vmul.f32 %v1486_v14, %v4473_v5  ;;  %v1498_v19 = vmul.f32 %v1497_v9, %v4473_v5  ;;  %v1261_v9 = vld [vmem:[#allocation2 + $0x63] ss:$0 sm:$0xff] }
 0x181   :  { %v680_v18 = vpop.f32.mrf.mxu1  ;;  %v1509_v37 = vmul.f32 %v1508_v0, %v4473_v5  ;;  %v1520_v2 = vmul.f32 %v1519_v27, %v4473_v5  ;;  %v1466_v17 = vadd.f32 %v1465_v1, %v4449_v43  ;;  %v1542_v14 = vmul.f32 %v1541_v7, %v4473_v5  ;;  %v1283_v0 = vld [vmem:[#allocation2 + $0x65] ss:$0 sm:$0xff]  ;;  %v1294_v43 = vld [vmem:[#allocation2 + $0x66] ss:$0 sm:$0xff]  ;;  %v1305_v1 = vld [vmem:[#allocation2 + $0x67] ss:$0 sm:$0xff] }
 0x182   :  { %733 = vst [vmem:[#allocation3 + $0x90] sm:$0xff] %v680_v18  ;;  %v1531_v18 = vmul.f32 %v1530_v47, %v4473_v5  ;;  %v1477_v54 = vadd.f32 %v1476_v63, %v4451_v22  ;;  %v1488_v52 = vadd.f32 %v1487_v26, %v4453_v35  ;;  %v1229_v27 = vmul.f32 %v1228_v53, %v4401_v46 }
 0x183   :  { %v682_v41 = vpop.f32.mrf.mxu1  ;;  %v1240_v47 = vmul.f32 %v1239_v39, %v4401_v46  ;;  %v1499_v29 = vadd.f32 %v1498_v19, %v4455_v16  ;;  %v1262_v22 = vmul.f32 %v1261_v9, %v4401_v46  ;;  %v1273_v26 = vmul.f32 %v1272_v30, %v4401_v46 }
 0x184   :  { %734 = vst [vmem:[#allocation3 + $0x98] sm:$0xff] %v682_v41  ;;  %v1251_v41 = vmul.f32 %v1250_v48, %v4401_v46  ;;  %v1284_v35 = vmul.f32 %v1283_v0, %v4401_v46  ;;  %v1469_v5 = vadd.f32 %v4431_v13, %v1466_v17  ;;  %v1295_v53 = vmul.f32 %v1294_v43, %v4401_v46  ;;  %v1253_v43 = vld [vmem:[#allocation2 + $0x72] ss:$0 sm:$0xff] }
 0x185   :  { %v686_v32 = vpop.f32.mrf.mxu1  ;;  %v1306_v39 = vmul.f32 %v1305_v1, %v4401_v46  ;;  %v4569_v63 = vadd.f32 %v1229_v27, %v4492_v8  ;;  %v4572_v16 = vadd.f32 %v1240_v47, %v4495_v31  ;;  %v4578_v30 = vadd.f32 %v1262_v22, %v4519_v20  ;;  %v1536_v27 = vld [vmem:[#allocation2 + $0xb6] ss:$0 sm:$0xff]  ;;  %v1264_v1 = vld [vmem:[#allocation2 + $0x73] ss:$0 sm:$0xff] }
 0x186   :  { %735 = vst [vmem:[#allocation3 + $0xa0] sm:$0xff] %v686_v32  ;;  %v4575_v32 = vadd.f32 %v1251_v41, %v4516_v62  ;;  %v4581_v13 = vadd.f32 %v1273_v26, %v4522_v50  ;;  %v4584_v19 = vadd.f32 %v1284_v35, %v4525_v58  ;;  %v4586_v48 = vadd.f32 %v1295_v53, %v1293_v25  ;;  %v1525_v62 = vld [vmem:[#allocation2 + $0xb5] ss:$0 sm:$0xff]  ;;  %v1547_v25 = vld [vmem:[#allocation2 + $0xb7] ss:$0 sm:$0xff] }
 0x187   :  { %v688_v7 = vpop.f32.mrf.mxu1  ;;  %v4588_v8 = vadd.f32 %v1306_v39, %v1304_v33  ;;  %v4590_v31 = vadd.f32 %v1471_v38, %v1469_v5  ;;  %v1480_v17 = vadd.f32 %v4434_v10, %v1477_v54  ;;  %v1491_v20 = vadd.f32 %v4436_v11, %v1488_v52  ;;  %v1706_v11 = vld [vmem:[#allocation2 + $0xe0] ss:$0 sm:$0xff]  ;;  %v1242_v41 = vld [vmem:[#allocation2 + $0x71] ss:$0 sm:$0xff]  ;;  %v1286_v5 = vld [vmem:[#allocation2 + $0x75] ss:$0 sm:$0xff] }
 0x188   :  { %736 = vst [vmem:[#allocation3 + $0xa8] sm:$0xff] %v688_v7  ;;  %v1502_v9 = vadd.f32 %v4438_v12, %v1499_v29  ;;  %v1510_v50 = vadd.f32 %v1509_v37, %v4457_v21  ;;  %v1521_v58 = vadd.f32 %v1520_v2, %v4459_v56  ;;  %v1526_v33 = vmul.f32 %v1525_v62, %v4469_v36  ;;  %v1717_v2 = vld [vmem:[#allocation2 + $0xe1] ss:$0 sm:$0xff]  ;;  %v1308_v62 = vld [vmem:[#allocation2 + $0x77] ss:$0 sm:$0xff] }
 0x189   :  { %v690_v46 = vpop.f32.mrf.mxu1  ;;  %v4599_v38 = vadd.f32 %v4535_v42, %v1480_v17  ;;  %v1532_v10 = vadd.f32 %v1531_v18, %v4461_v61  ;;  %v1543_v54 = vadd.f32 %v1542_v14, %v4464_v34  ;;  %v1537_v29 = vmul.f32 %v1536_v27, %v4469_v36  ;;  %v1739_v18 = vld [vmem:[#allocation2 + $0xe3] ss:$0 sm:$0xff] }
 0x18a   :  { %737 = vst [vmem:[#allocation3 + $0xb0] sm:$0xff] %v690_v46  ;;  %v1548_v12 = vmul.f32 %v1547_v25, %v4469_v36  ;;  %v1513_v21 = vadd.f32 %v4440_v44, %v1510_v50  ;;  %v1524_v56 = vadd.f32 %v4442_v45, %v1521_v58  ;;  %v4608_v52 = vadd.f32 %v4538_v59, %v1491_v20  ;;  %v1728_v36 = vld [vmem:[#allocation2 + $0xe2] ss:$0 sm:$0xff]  ;;  %v1231_v44 = vld [vmem:[#allocation2 + $0x70] ss:$0 sm:$0xff] }
 0x18b   :  { %v692_v0 = vpop.f32.mrf.mxu1  ;;  %v4611_v42 = vadd.f32 %v4541_v55, %v1502_v9  ;;  %v1550_v61 = vmax.f32 %v4590_v31, %v4599_v38  ;;  %v4616_v34 = vmul.f32 %v1706_v11, %v4479_v6  ;;  %v1535_v14 = vadd.f32 %v4444_v15, %v1532_v10  ;;  %v1275_v15 = vld [vmem:[#allocation2 + $0x74] ss:$0 sm:$0xff] }
 0x18c   :  { %738 = vst [vmem:[#allocation3 + $0xb8] sm:$0xff] %v692_v0  ;;  %v4619_v45 = vadd.f32 %v4544_v24, %v1513_v21  ;;  %v1546_v59 = vadd.f32 %v4446_v3, %v1543_v54  ;;  %v4624_v55 = vmul.f32 %v1717_v2, %v4479_v6  ;;  %v1232_v22 = vmul.f32 %v1231_v44, %v4405_v57  ;;  %v1297_v3 = vld [vmem:[#allocation2 + $0x76] ss:$0 sm:$0xff]  ;;  %v1761_v21 = vld [vmem:[#allocation2 + $0xe5] ss:$0 sm:$0xff] }
 0x18d   :  { %v696_v37 = vpop.f32.mrf.mxu1  ;;  %v4627_v26 = vadd.f32 %v1526_v33, %v1524_v56  ;;  %v1551_v35 = vmax.f32 %v1550_v61, %v4608_v52  ;;  %v4631_v24 = vmul.f32 %v1728_v36, %v4479_v6  ;;  %v1243_v7 = vmul.f32 %v1242_v41, %v4405_v57  ;;  %v1701_v2 = vld [vmem:[#allocation2 + $0xc0] ss:$0 sm:$0xff]  ;;  %v1783_v61 = vld [vmem:[#allocation2 + $0xe7] ss:$0 sm:$0xff] }
 0x18e   :  { %739 = vst [vmem:[#allocation3 + $0xc0] sm:$0xff] %v696_v37  ;;  %v1254_v53 = vmul.f32 %v1253_v43, %v4405_v57  ;;  %v1265_v39 = vmul.f32 %v1264_v1, %v4405_v57  ;;  %v4637_v46 = vmul.f32 %v1739_v18, %v4479_v6  ;;  %v1276_v20 = vmul.f32 %v1275_v15, %v4405_v57  ;;  %v1778_v15 = vld [vmem:[#allocation2 + $0xc7] ss:$0 sm:$0xff] }
 0x18f   :  { %v698_v47 = vpop.f32.mrf.mxu1  ;;  %v1287_v9 = vmul.f32 %v1286_v5, %v4405_v57  ;;  %v1298_v50 = vmul.f32 %v1297_v3, %v4405_v57  ;;  %v4643_v58 = vadd.f32 %v1232_v22, %v4569_v63  ;;  %v1309_v0 = vmul.f32 %v1308_v62, %v4405_v57  ;;  %v1756_v22 = vld [vmem:[#allocation2 + $0xc5] ss:$0 sm:$0xff] }
 0x190   :  { %740 = vst [vmem:[#allocation3 + $0xc8] sm:$0xff] %v698_v47  ;;  %v4647_v27 = vadd.f32 %v1243_v7, %v4572_v16  ;;  %v4650_v25 = vadd.f32 %v1254_v53, %v4575_v32  ;;  %v4653_v33 = vadd.f32 %v1265_v39, %v4578_v30  ;;  %v4656_v54 = vadd.f32 %v1276_v20, %v4581_v13  ;;  %v1750_v16 = vld [vmem:[#allocation2 + $0xe4] ss:$0 sm:$0xff]  ;;  %v1772_v32 = vld [vmem:[#allocation2 + $0xe6] ss:$0 sm:$0xff] }
 0x191   :  { %v700_v17 = vpop.f32.mrf.mxu1  ;;  %v4659_v11 = vadd.f32 %v1287_v9, %v4584_v19  ;;  %v4662_v63 = vadd.f32 %v1298_v50, %v4586_v48  ;;  %v1552_v57 = vmax.f32 %v1551_v35, %v4611_v42  ;;  %v4666_v56 = vadd.f32 %v1309_v0, %v4588_v8  ;;  %v1712_v48 = vld [vmem:[#allocation2 + $0xc1] ss:$0 sm:$0xff]  ;;  %v1767_v35 = vld [vmem:[#allocation2 + $0xc6] ss:$0 sm:$0xff]  ;;  %v1709_v53 = vld [vmem:[#allocation2 + $0xf0] ss:$0 sm:$0xff] }
 0x192   :  { %741 = vst [vmem:[#allocation3 + $0xd0] sm:$0xff] %v700_v17  ;;  %v1311_v30 = vmax.f32 %v4643_v58, %v4647_v27  ;;  %v4670_v13 = vadd.f32 %v1537_v29, %v1535_v14  ;;  %v4672_v37 = vadd.f32 %v1548_v12, %v1546_v59  ;;  %v4676_v18 = vmul.f32 %v1750_v16, %v4479_v6  ;;  %v1723_v29 = vld [vmem:[#allocation2 + $0xc2] ss:$0 sm:$0xff]  ;;  %v1734_v14 = vld [vmem:[#allocation2 + $0xc3] ss:$0 sm:$0xff] }
 0x193   :  { %v702_v10 = vpop.f32.mrf.mxu1  ;;  %v1553_v36 = vmax.f32 %v1552_v57, %v4619_v45  ;;  %v4679_v44 = vmul.f32 %v1761_v21, %v4479_v6  ;;  %v4682_v8 = vmul.f32 %v1772_v32, %v4479_v6  ;;  %v1745_v12 = vld [vmem:[#allocation2 + $0xc4] ss:$0 sm:$0xff]  ;;  %v4686_v47 = vmul.f32 %v1783_v61, %v4479_v6  ;;  %v1720_v39 = vld [vmem:[#allocation2 + $0xf1] ss:$0 sm:$0xff]  ;;  %v1731_v0 = vld [vmem:[#allocation2 + $0xf2] ss:$0 sm:$0xff] }
 0x194   :  { %742 = vst [vmem:[#allocation3 + $0xd8] sm:$0xff] %v702_v10  ;;  %v1312_v59 = vmax.f32 %v1311_v30, %v4650_v25  ;;  %v4689_v41 = vmul.f32 %v1701_v2, %v4483_v28  ;;  %v4692_v43 = vmul.f32 %v1712_v48, %v4483_v28  ;;  %v4696_v3 = vmul.f32 %v1723_v29, %v4483_v28  ;;  %v5997_v29 = vld [vmem:[#allocation26_spill] sm:$0xff] }
 0x195   :  { %v706_v19 = vpop.f32.mrf.mxu1  ;;  %v1554_v5 = vmax.f32 %v1553_v36, %v4627_v26  ;;  %v4699_v7 = vmul.f32 %v1734_v14, %v4483_v28  ;;  %v4702_v6 = vmul.f32 %v1745_v12, %v4483_v28  ;;  %v4706_v62 = vmul.f32 %v1756_v22, %v4483_v28 }
 0x196   :  { %743 = vst [vmem:[#allocation3 + $0xe0] sm:$0xff] %v706_v19  ;;  %v1313_v17 = vmax.f32 %v1312_v59, %v4653_v33  ;;  %v4709_v20 = vmul.f32 %v1767_v35, %v4483_v28  ;;  %v4712_v9 = vmul.f32 %v1778_v15, %v4483_v28  ;;  %v5993_v10 = vsub.f32 %v4368_v49, %v4486_v4  ;;  %v1742_v19 = vld [vmem:[#allocation2 + $0xf3] ss:$0 sm:$0xff] }
 0x197   :  { %v708_v1 = vpop.f32.mrf.mxu1  ;;  %v5994_v16 = vsub.f32 %v4370_v60, %v4486_v4  ;;  %v1555_v32 = vmax.f32 %v1554_v5, %v4670_v13  ;;  %v4722_v30 = vmul.f32 %v1709_v53, %v4532_v40  ;;  %v5995_v28 = vsub.f32 %v4374_v51, %v4486_v4  ;;  %v6001_v53 = vld [vmem:[#allocation28_spill] sm:$0xff] }
 0x198   :  { %744 = vst [vmem:[#allocation3 + $0xe8] sm:$0xff] %v708_v1  ;;  %v1080_v57 = vmul.f32 1.442695, %v5993_v10  ;;  %v5996_v48 = vsub.f32 %v4376_v23, %v4486_v4  ;;  %v1314_v61 = vmax.f32 %v1313_v17, %v4656_v54  ;;  %v4732_v60 = vmul.f32 %v1720_v39, %v4532_v40  ;;  %v1753_v23 = vld [vmem:[#allocation2 + $0xf4] ss:$0 sm:$0xff]  ;;  %v5999_v1 = vld [vmem:[#allocation27_spill] sm:$0xff] }
 0x199   :  { %v710_v50 = vpop.f32.mrf.mxu1  ;;  %v1083_v21 = vmul.f32 1.442695, %v5994_v16  ;;  %v1086_v2 = vmul.f32 1.442695, %v5995_v28  ;;  %v5998_v14 = vsub.f32 %v5997_v29, %v4486_v4  ;;  %v4738_v59 = vmul.f32 %v1731_v0, %v4532_v40  ;;  %v1764_v16 = vld [vmem:[#allocation2 + $0xf5] ss:$0 sm:$0xff] }
 0x19a   :  { %745 = vst [vmem:[#allocation3 + $0xf0] sm:$0xff] %v710_v50  ;;  %v1089_v49 = vmul.f32 1.442695, %v5996_v48  ;;  %3847 = vpow2.f32 %v1080_v57  ;;  %v4741_v51 = vmul.f32 %v1742_v19, %v4532_v40  ;;  %v6000_v22 = vsub.f32 %v5999_v1, %v4486_v4  ;;  %v6003_v50 = vld [vmem:[#allocation29_spill] sm:$0xff]  ;;  %v1786_v19 = vld [vmem:[#allocation2 + $0xf7] ss:$0 sm:$0xff] }
 0x19b   :  { %v712_v36 = vpop.f32.mrf.mxu1  ;;  %v1092_v12 = vmul.f32 1.442695, %v5998_v14  ;;  %3849 = vpow2.f32 %v1083_v21  ;;  %v1315_v15 = vmax.f32 %v1314_v61, %v4659_v11  ;;  %v4748_v5 = vmax.f32 %v1555_v32, %v4672_v37  ;;  %v1775_v21 = vld [vmem:[#allocation2 + $0xf6] ss:$0 sm:$0xff] }
 0x19c   :  { %746 = vst [vmem:[#allocation3 + $0xf8] sm:$0xff] %v712_v36  ;;  %v1095_v35 = vmul.f32 1.442695, %v6000_v22  ;;  %3851 = vpow2.f32 %v1086_v2  ;;  %v6002_v39 = vsub.f32 %v6001_v53, %v4486_v4  ;;  %v6004_v0 = vsub.f32 %v6003_v50, %v4486_v4 }
 0x19d   :  { %v4757_v57 = vmul.f32 %v1753_v23, %v4532_v40  ;;  %3853 = vpow2.f32 %v1089_v49  ;;  %v1316_v28 = vmax.f32 %v1315_v15, %v4662_v63  ;;  %v1557_v32 = vsub.f32 %v4590_v31, %v4748_v5  ;;  %v3699_v1 = vpop.f32.mrf.mxu1 }
 0x19e   :  { %v1098_v17 = vmul.f32 1.442695, %v6002_v39  ;;  %v1101_v10 = vmul.f32 1.442695, %v6004_v0  ;;  %v1560_v2 = vsub.f32 %v4599_v38, %v4748_v5  ;;  %3855 = vpow2.f32 %v1092_v12 }
 0x19f   :  { %v4765_v48 = vmul.f32 %v1764_v16, %v4532_v40  ;;  %v4768_v4 = vmul.f32 %v1775_v21, %v4532_v40  ;;  %v4771_v61 = vmul.f32 %v1786_v19, %v4532_v40  ;;  %3857 = vpow2.f32 %v1095_v35  ;;  %v1703_v21 = vld [vmem:[#allocation2 + $0xd0] ss:$0 sm:$0xff]  ;;  %v1714_v19 = vld [vmem:[#allocation2 + $0xd1] ss:$0 sm:$0xff] }
 0x1a0   :  { %v1317_v49 = vmax.f32 %v1316_v28, %v4666_v56  ;;  %v1563_v36 = vsub.f32 %v4608_v52, %v4748_v5  ;;  %v1566_v31 = vsub.f32 %v4611_v42, %v4748_v5  ;;  %3859 = vpow2.f32 %v1098_v17 }
 0x1a1   :  { %v1558_v38 = vmul.f32 1.442695, %v1557_v32  ;;  %v4778_v29 = vmul.f32 1.442695, %v1560_v2  ;;  %v1569_v14 = vsub.f32 %v4619_v45, %v4748_v5  ;;  %3861 = vpow2.f32 %v1101_v10 }
 0x1a2   :  { %v1318_v40 = vsub.f32 %v4643_v58, %v1317_v49  ;;  %v1321_v12 = vsub.f32 %v4647_v27, %v1317_v49  ;;  %v1324_v23 = vsub.f32 %v4650_v25, %v1317_v49  ;;  %v1327_v52 = vsub.f32 %v4653_v33, %v1317_v49  ;;  %v960_v58 = vpop.f32.mrf.mxu0 }
 0x1a3   :  { %v1330_v22 = vsub.f32 %v4656_v54, %v1317_v49  ;;  %v1333_v42 = vsub.f32 %v4659_v11, %v1317_v49  ;;  %v1336_v35 = vsub.f32 %v4662_v63, %v1317_v49  ;;  %v1339_v39 = vsub.f32 %v4666_v56, %v1317_v49  ;;  %v2090_v63 = vpop.f32.mrf.mxu1  ;;  %v1725_v49 = vld [vmem:[#allocation2 + $0xd2] ss:$0 sm:$0xff] }
 0x1a4   :  { %v1319_v15 = vmul.f32 1.442695, %v1318_v40  ;;  %v1322_v53 = vmul.f32 1.442695, %v1321_v12  ;;  %v1325_v45 = vmul.f32 1.442695, %v1324_v23  ;;  %3863 = vpow2.f32 %v1558_v38 }
 0x1a5   :  { %v1564_v27 = vmul.f32 1.442695, %v1563_v36  ;;  %v4790_v17 = vmul.f32 1.442695, %v1566_v31  ;;  %v4792_v25 = vmul.f32 1.442695, %v1569_v14  ;;  %v1572_v11 = vsub.f32 %v4627_v26, %v4748_v5 }
 0x1a6   :  { %3865 = vpow2.f32 %v1319_v15  ;;  %v1328_v33 = vmul.f32 1.442695, %v1327_v52  ;;  %v1331_v54 = vmul.f32 1.442695, %v1330_v22  ;;  %v1334_v50 = vmul.f32 1.442695, %v1333_v42 }
 0x1a7   :  { %3867 = vpow2.f32 %v1322_v53  ;;  %v1337_v0 = vmul.f32 1.442695, %v1336_v35  ;;  %v6005_v56 = vstv %s4360_s9  ;;  %v4800_v16 = vpop.eup %3847  ;;  %v1340_v28 = vmul.f32 1.442695, %v1339_v39  ;;  %v1736_v36 = vld [vmem:[#allocation2 + $0xd3] ss:$0 sm:$0xff] }
 0x1a8   :  { %v4798_v10 = vadd.f32 %v6005_v56, %v960_v58  ;;  %6006 = vst [vmem:[#allocation26_spill] sm:$0xff] %v4800_v16  ;;  %3869 = vpow2.f32 %v1325_v45  ;;  %v1575_v32 = vsub.f32 %v4670_v13, %v4748_v5  ;;  %v1578_v26 = vsub.f32 %v4672_v37, %v4748_v5  ;;  %v4806_v2 = vpop.eup %3849  ;;  %v1747_v22 = vld [vmem:[#allocation2 + $0xd4] ss:$0 sm:$0xff]  ;;  %v1758_v13 = vld [vmem:[#allocation2 + $0xd5] ss:$0 sm:$0xff] }
 0x1a9   :  { %6007 = vst [vmem:[#allocation27_spill] sm:$0xff] %v4806_v2  ;;  %v1573_v31 = vmul.f32 1.442695, %v1572_v11  ;;  %v6008_v14 = vstv %s4296_s15  ;;  %v6009_v12 = vstv %s4292_s5  ;;  %v4817_v52 = vpop.eup %3851  ;;  %3871 = vpow2.f32 %v1328_v33  ;;  %v4832_v11 = vpop.f32.mrf.mxu1 }
 0x1aa   :  { %v1704_v38 = vmul.f32 %v1703_v21, %v4798_v10  ;;  %v4811_v40 = vadd.f32 %v3699_v1, %v6008_v14  ;;  %v4815_v23 = vadd.f32 %v2090_v63, %v6009_v12  ;;  %6010 = vst [vmem:[#allocation28_spill] sm:$0xff] %v4817_v52  ;;  %v1715_v37 = vmul.f32 %v1714_v19, %v4798_v10  ;;  %v4822_v35 = vpop.eup %3853 }
 0x1ab   :  { %v1726_v5 = vmul.f32 %v1725_v49, %v4798_v10  ;;  %v1737_v42 = vmul.f32 %v1736_v36, %v4798_v10  ;;  %6011 = vst [vmem:[#allocation29_spill] sm:$0xff] %v4822_v35  ;;  %3873 = vpow2.f32 %v1331_v54  ;;  %v1748_v15 = vmul.f32 %v1747_v22, %v4798_v10  ;;  %v4827_v45 = vpop.eup %3855  ;;  %v2214_v22 = vld [vmem:[#allocation2 + $0x2c] ss:$0 sm:$0xff] }
 0x1ac   :  { %v1705_v1 = vadd.f32 %v1704_v38, %v4689_v41  ;;  %v1759_v53 = vmul.f32 %v1758_v13, %v4798_v10  ;;  %6012 = vst [vmem:[#allocation30_spill] sm:$0xff] %v4827_v45  ;;  %3875 = vpow2.f32 %v1334_v50  ;;  %v1716_v39 = vadd.f32 %v1715_v37, %v4692_v43  ;;  %v4834_v63 = vpop.eup %3857  ;;  %v2203_v38 = vld [vmem:[#allocation2 + $0x2b] ss:$0 sm:$0xff] }
 0x1ad   :  { %v1727_v58 = vadd.f32 %v1726_v5, %v4696_v3  ;;  %v1738_v33 = vadd.f32 %v1737_v42, %v4699_v7  ;;  %6013 = vst [vmem:[#allocation31_spill] sm:$0xff] %v4834_v63  ;;  %3877 = vpow2.f32 %v1337_v0  ;;  %v1749_v54 = vadd.f32 %v1748_v15, %v4702_v6  ;;  %v4839_v21 = vpop.eup %3859  ;;  %v2236_v42 = vld [vmem:[#allocation2 + $0x2e] ss:$0 sm:$0xff] }
 0x1ae   :  { %v1708_v41 = vadd.f32 %v4616_v34, %v1705_v1  ;;  %v1760_v56 = vadd.f32 %v1759_v53, %v4706_v62  ;;  %6014 = vst [vmem:[#allocation32_spill] sm:$0xff] %v4839_v21  ;;  %3879 = vpow2.f32 %v1340_v28  ;;  %v1719_v43 = vadd.f32 %v4624_v55, %v1716_v39  ;;  %v4844_v50 = vpop.eup %3861  ;;  %v1769_v62 = vld [vmem:[#allocation2 + $0xd6] ss:$0 sm:$0xff]  ;;  %v2247_v1 = vld [vmem:[#allocation2 + $0x2f] ss:$0 sm:$0xff] }
 0x1af   :  { %v1730_v3 = vadd.f32 %v4631_v24, %v1727_v58  ;;  %v1741_v7 = vadd.f32 %v4637_v46, %v1738_v33  ;;  %6015 = vst [vmem:[#allocation33_spill] sm:$0xff] %v4844_v50  ;;  %3881 = vpow2.f32 %v4778_v29  ;;  %v1752_v34 = vadd.f32 %v4676_v18, %v1749_v54  ;;  %v2093_v24 = vpop.f32.mrf.mxu1  ;;  %v1780_v46 = vld [vmem:[#allocation2 + $0xd7] ss:$0 sm:$0xff]  ;;  %v2176_v33 = vld [vmem:[#allocation2 + $0x9] ss:$0 sm:$0xff] }
 0x1b0   :  { %v4848_v0 = vadd.f32 %v4722_v30, %v1708_v41  ;;  %v1763_v6 = vadd.f32 %v4679_v44, %v1760_v56  ;;  %3883 = vpow2.f32 %v1564_v27  ;;  %v1576_v19 = vmul.f32 1.442695, %v1575_v32  ;;  %v2170_v27 = vld [vmem:[#allocation2 + $0x28] ss:$0 sm:$0xff]  ;;  %v2187_v41 = vld [vmem:[#allocation2 + $0xa] ss:$0 sm:$0xff] }
 0x1b1   :  { %v1579_v28 = vmul.f32 1.442695, %v1578_v26  ;;  %v4853_v55 = vadd.f32 %v4732_v60, %v1719_v43  ;;  %3885 = vpow2.f32 %v4790_v17  ;;  %v4857_v29 = vadd.f32 %v4738_v59, %v1730_v3  ;;  %v4863_v44 = vpop.eup %3863  ;;  %v2181_v26 = vld [vmem:[#allocation2 + $0x29] ss:$0 sm:$0xff]  ;;  %v2198_v54 = vld [vmem:[#allocation2 + $0xb] ss:$0 sm:$0xff] }
 0x1b2   :  { %v4860_v30 = vadd.f32 %v4741_v51, %v1741_v7  ;;  %v1770_v18 = vmul.f32 %v1769_v62, %v4798_v10  ;;  %3887 = vpow2.f32 %v4792_v25  ;;  %v4867_v60 = vadd.f32 %v4757_v57, %v1752_v34  ;;  %v2192_v57 = vld [vmem:[#allocation2 + $0x2a] ss:$0 sm:$0xff]  ;;  %v2209_v34 = vld [vmem:[#allocation2 + $0xc] ss:$0 sm:$0xff] }
 0x1b3   :  { %v1781_v32 = vmul.f32 %v1780_v46, %v4798_v10  ;;  %v1789_v17 = vmax.f32 %v4848_v0, %v4853_v55  ;;  %v4872_v59 = vpop.eup %3865  ;;  %3889 = vpow2.f32 %v1573_v31  ;;  %v4875_v51 = vadd.f32 %v4765_v48, %v1763_v6  ;;  %v3703_v31 = vpop.f32.mrf.mxu1 }
 0x1b4   :  { %6016 = vst [vmem:[#allocation34_spill] sm:$0xff] %v4872_v59  ;;  %v1771_v49 = vadd.f32 %v1770_v18, %v4709_v20  ;;  %v4879_v36 = vmul.f32 %v2170_v27, %v4811_v40  ;;  %v4881_v25 = vpop.eup %3867  ;;  %3891 = vpow2.f32 %v1576_v19  ;;  %v4886_v12 = vmul.f32 %v2181_v26, %v4811_v40  ;;  %v2225_v20 = vld [vmem:[#allocation2 + $0x2d] ss:$0 sm:$0xff]  ;;  %v2231_v18 = vld [vmem:[#allocation2 + $0xe] ss:$0 sm:$0xff] }
 0x1b5   :  { %6017 = vst [vmem:[#allocation35_spill] sm:$0xff] %v4881_v25  ;;  %v1782_v10 = vadd.f32 %v1781_v32, %v4712_v9  ;;  %v1790_v14 = vmax.f32 %v1789_v17, %v4857_v29  ;;  %v4888_v48 = vpop.eup %3869  ;;  %3893 = vpow2.f32 %v1579_v28  ;;  %v4892_v37 = vmul.f32 %v2192_v57, %v4811_v40  ;;  %v2165_v9 = vld [vmem:[#allocation2 + $0x8] ss:$0 sm:$0xff]  ;;  %v2106_v28 = vpop.f32.mrf.mxu1  ;;  %v2242_v27 = vld [vmem:[#allocation2 + $0xf] ss:$0 sm:$0xff] }
 0x1b6   :  { %6018 = vst [vmem:[#allocation36_spill] sm:$0xff] %v4888_v48  ;;  %v1774_v13 = vadd.f32 %v4682_v8, %v1771_v49  ;;  %v4895_v5 = vmul.f32 %v2203_v38, %v4811_v40  ;;  %v4900_v39 = vmul.f32 %v2214_v22, %v4811_v40  ;;  %v4903_v58 = vmul.f32 %v2225_v20, %v4811_v40  ;;  %v4905_v8 = vpop.eup %3871  ;;  %v2173_v22 = vld [vmem:[#allocation2 + $0x38] ss:$0 sm:$0xff]  ;;  %v2184_v20 = vld [vmem:[#allocation2 + $0x39] ss:$0 sm:$0xff] }
 0x1b7   :  { %v1785_v15 = vadd.f32 %v4686_v47, %v1782_v10  ;;  %v1791_v53 = vmax.f32 %v1790_v14, %v4860_v30  ;;  %6019 = vst [vmem:[#allocation37_spill] sm:$0xff] %v4905_v8  ;;  %v4911_v43 = vmul.f32 %v2236_v42, %v4811_v40  ;;  %v4914_v47 = vmul.f32 %v2247_v1, %v4811_v40  ;;  %v2220_v40 = vld [vmem:[#allocation2 + $0xd] ss:$0 sm:$0xff]  ;;  %v2167_v14 = vld [vmem:[#allocation2 + $0x18] ss:$0 sm:$0xff] }
 0x1b8   :  { %v4908_v56 = vadd.f32 %v4768_v4, %v1774_v13  ;;  %v2166_v3 = vmul.f32 %v2165_v9, %v4815_v23  ;;  %v4917_v7 = vpop.eup %3873  ;;  %v2177_v62 = vmul.f32 %v2176_v33, %v4815_v23  ;;  %v2188_v4 = vmul.f32 %v2187_v41, %v4815_v23  ;;  %v2206_v1 = vld [vmem:[#allocation2 + $0x3b] ss:$0 sm:$0xff] }
 0x1b9   :  { %6020 = vst [vmem:[#allocation38_spill] sm:$0xff] %v4917_v7  ;;  %v1792_v6 = vmax.f32 %v1791_v53, %v4867_v60  ;;  %v4923_v19 = vmul.f32 %v2198_v54, %v4815_v23  ;;  %v4925_v46 = vpop.eup %3875  ;;  %v4928_v32 = vadd.f32 %v4771_v61, %v1785_v15  ;;  %v4931_v17 = vmul.f32 %v2209_v34, %v4815_v23  ;;  %v2217_v15 = vld [vmem:[#allocation2 + $0x3c] ss:$0 sm:$0xff] }
 0x1ba   :  { %6021 = vst [vmem:[#allocation39_spill] sm:$0xff] %v4925_v46  ;;  %v6022_v26 = vstv %s4298_s16  ;;  %v6023_v57 = vstv %s4294_s7  ;;  %v4942_v10 = vpop.eup %3877  ;;  %v4946_v13 = vmul.f32 %v2220_v40, %v4815_v23  ;;  %v4949_v9 = vmul.f32 %v2231_v18, %v4815_v23  ;;  %v2178_v18 = vld [vmem:[#allocation2 + $0x19] ss:$0 sm:$0xff] }
 0x1bb   :  { %v4936_v49 = vadd.f32 %v4832_v11, %v6022_v26  ;;  %v4940_v38 = vadd.f32 %v2093_v24, %v6023_v57  ;;  %6024 = vst [vmem:[#allocation40_spill] sm:$0xff] %v4942_v10  ;;  %v1793_v61 = vmax.f32 %v1792_v6, %v4875_v51  ;;  %v4952_v11 = vmul.f32 %v2242_v27, %v4815_v23  ;;  %v4954_v42 = vpop.eup %3879  ;;  %v2195_v24 = vld [vmem:[#allocation2 + $0x3a] ss:$0 sm:$0xff]  ;;  %v2228_v27 = vld [vmem:[#allocation2 + $0x3d] ss:$0 sm:$0xff] }
 0x1bc   :  { %6025 = vst [vmem:[#allocation41_spill] sm:$0xff] %v4954_v42  ;;  %v6026_v41 = vstv %s4304_s24  ;;  %v6027_v34 = vstv %s4300_s22  ;;  %v4966_v40 = vpop.eup %3881  ;;  %v2189_v23 = vld [vmem:[#allocation2 + $0x1a] ss:$0 sm:$0xff] }
 0x1bd   :  { %v2174_v53 = vmul.f32 %v2173_v22, %v4936_v49  ;;  %v2185_v33 = vmul.f32 %v2184_v20, %v4936_v49  ;;  %v4960_v54 = vadd.f32 %v3703_v31, %v6026_v41  ;;  %v4964_v6 = vadd.f32 %v2106_v28, %v6027_v34  ;;  %6028 = vst [vmem:[#allocation42_spill] sm:$0xff] %v4966_v40  ;;  %v4976_v31 = vpop.eup %3883  ;;  %v2200_v20 = vld [vmem:[#allocation2 + $0x1b] ss:$0 sm:$0xff]  ;;  %v2211_v28 = vld [vmem:[#allocation2 + $0x1c] ss:$0 sm:$0xff] }
 0x1be   :  { %v1794_v26 = vmax.f32 %v1793_v61, %v4908_v56  ;;  %v2196_v57 = vmul.f32 %v2195_v24, %v4936_v49  ;;  %v4971_v50 = vmul.f32 %v2206_v1, %v4936_v49  ;;  %v4974_v22 = vmul.f32 %v2217_v15, %v4936_v49  ;;  %6029 = vst [vmem:[#allocation43_spill] sm:$0xff] %v4976_v31  ;;  %v2239_v41 = vld [vmem:[#allocation2 + $0x3e] ss:$0 sm:$0xff]  ;;  %v4984_v63 = vpop.eup %3885  ;;  %v2222_v1 = vld [vmem:[#allocation2 + $0x1d] ss:$0 sm:$0xff] }
 0x1bf   :  { %v4979_v34 = vmul.f32 %v2228_v27, %v4936_v49  ;;  %v2168_v21 = vmul.f32 %v2167_v14, %v4940_v38  ;;  %v2179_v61 = vmul.f32 %v2178_v18, %v4940_v38  ;;  %v2190_v24 = vmul.f32 %v2189_v23, %v4940_v38  ;;  %6030 = vst [vmem:[#allocation44_spill] sm:$0xff] %v4984_v63  ;;  %v4990_v2 = vpop.eup %3887 }
 0x1c0   :  { %v1795_v15 = vmax.f32 %v1794_v26, %v4928_v32  ;;  %v2240_v45 = vmul.f32 %v2239_v41, %v4936_v49  ;;  %v2201_v35 = vmul.f32 %v2200_v20, %v4940_v38  ;;  %v2212_v52 = vmul.f32 %v2211_v28, %v4940_v38  ;;  %6031 = vst [vmem:[#allocation45_spill] sm:$0xff] %v4990_v2  ;;  %v4993_v42 = vpop.eup %3889  ;;  %v2233_v28 = vld [vmem:[#allocation2 + $0x1e] ss:$0 sm:$0xff] }
 0x1c1   :  { %v2169_v27 = vadd.f32 %v2168_v21, %v2166_v3  ;;  %v2180_v16 = vadd.f32 %v2179_v61, %v2177_v62  ;;  %v2191_v14 = vadd.f32 %v2190_v24, %v2188_v4  ;;  %v2223_v18 = vmul.f32 %v2222_v1, %v4940_v38  ;;  %6032 = vst [vmem:[#allocation46_spill] sm:$0xff] %v4993_v42  ;;  %v4999_v20 = vpop.eup %3891 }
 0x1c2   :  { %v1796_v23 = vsub.f32 %v4848_v0, %v1795_v15  ;;  %v1799_v10 = vsub.f32 %v4853_v55, %v1795_v15  ;;  %v1802_v26 = vsub.f32 %v4857_v29, %v1795_v15  ;;  %v1805_v41 = vsub.f32 %v4860_v30, %v1795_v15  ;;  %6033 = vst [vmem:[#allocation47_spill] sm:$0xff] %v4999_v20  ;;  %v5005_v4 = vpop.eup %3893 }
 0x1c3   :  { %v1808_v46 = vsub.f32 %v4867_v60, %v1795_v15  ;;  %v1811_v21 = vsub.f32 %v4875_v51, %v1795_v15  ;;  %v1814_v3 = vsub.f32 %v4908_v56, %v1795_v15  ;;  %v1817_v62 = vsub.f32 %v4928_v32, %v1795_v15  ;;  %6034 = vst [vmem:[#allocation48_spill] sm:$0xff] %v5005_v4 }
 0x1c4   :  { %v1797_v0 = vmul.f32 1.442695, %v1796_v23  ;;  %v1800_v61 = vmul.f32 1.442695, %v1799_v10  ;;  %v2172_v55 = vadd.f32 %v4879_v36, %v2169_v27  ;;  %v2234_v29 = vmul.f32 %v2233_v28, %v4940_v38  ;;  %v2244_v36 = vld [vmem:[#allocation2 + $0x1f] ss:$0 sm:$0xff] }
 0x1c5   :  { %v1803_v30 = vmul.f32 1.442695, %v1802_v26  ;;  %v1806_v24 = vmul.f32 1.442695, %v1805_v41  ;;  %v1809_v1 = vmul.f32 1.442695, %v1808_v46  ;;  %v2183_v7 = vadd.f32 %v4886_v12, %v2180_v16 }
 0x1c6   :  { %3895 = vpow2.f32 %v1797_v0  ;;  %v1812_v60 = vmul.f32 1.442695, %v1811_v21  ;;  %v1815_v51 = vmul.f32 1.442695, %v1814_v3  ;;  %v5010_v8 = vadd.f32 %v2174_v53, %v2172_v55  ;;  %v2442_v23 = vld [vmem:[#allocation2 + $0x6b] ss:$0 sm:$0xff] }
 0x1c7   :  { %v1818_v56 = vmul.f32 1.442695, %v1817_v62  ;;  %v5012_v32 = vadd.f32 %v2185_v33, %v2183_v7  ;;  %v2194_v15 = vadd.f32 %v4892_v37, %v2191_v14  ;;  %v2202_v10 = vadd.f32 %v2201_v35, %v4923_v19  ;;  %v2420_v14 = vld [vmem:[#allocation2 + $0x69] ss:$0 sm:$0xff]  ;;  %v2464_v41 = vld [vmem:[#allocation2 + $0x6d] ss:$0 sm:$0xff] }
 0x1c8   :  { %3897 = vpow2.f32 %v1800_v61  ;;  %v2213_v27 = vadd.f32 %v2212_v52, %v4931_v17  ;;  %v2224_v46 = vadd.f32 %v2223_v18, %v4946_v13  ;;  %v2235_v16 = vadd.f32 %v2234_v29, %v4949_v9  ;;  %v3704_v9 = vpop.f32.mrf.mxu1  ;;  %v2431_v18 = vld [vmem:[#allocation2 + $0x6a] ss:$0 sm:$0xff]  ;;  %v2475_v28 = vld [vmem:[#allocation2 + $0x6e] ss:$0 sm:$0xff]  ;;  %v2415_v62 = vld [vmem:[#allocation2 + $0x49] ss:$0 sm:$0xff] }
 0x1c9   :  { %3899 = vpow2.f32 %v1803_v30  ;;  %v5019_v12 = vadd.f32 %v2196_v57, %v2194_v15  ;;  %v2205_v53 = vadd.f32 %v4895_v5, %v2202_v10  ;;  %v2245_v7 = vmul.f32 %v2244_v36, %v4940_v38  ;;  %v2250_v5 = vld [vmem:[#allocation2 + $0x3f] ss:$0 sm:$0xff]  ;;  %v2404_v57 = vld [vmem:[#allocation2 + $0x48] ss:$0 sm:$0xff]  ;;  %v2426_v0 = vld [vmem:[#allocation2 + $0x4a] ss:$0 sm:$0xff] }
 0x1ca   :  { %3901 = vpow2.f32 %v1806_v24  ;;  %v2216_v37 = vadd.f32 %v4900_v39, %v2213_v27  ;;  %v2227_v35 = vadd.f32 %v4903_v58, %v2224_v46  ;;  %v2238_v19 = vadd.f32 %v4911_v43, %v2235_v16  ;;  %v2409_v43 = vld [vmem:[#allocation2 + $0x68] ss:$0 sm:$0xff]  ;;  %v2486_v61 = vld [vmem:[#allocation2 + $0x6f] ss:$0 sm:$0xff]  ;;  %v2470_v46 = vld [vmem:[#allocation2 + $0x4e] ss:$0 sm:$0xff] }
 0x1cb   :  { %3903 = vpow2.f32 %v1809_v1  ;;  %v5027_v52 = vadd.f32 %v4971_v50, %v2205_v53  ;;  %v2246_v17 = vadd.f32 %v2245_v7, %v4952_v11  ;;  %v2253_v13 = vmax.f32 %v5010_v8, %v5012_v32  ;;  %v2109_v1 = vpop.f32.mrf.mxu1  ;;  %v2481_v16 = vld [vmem:[#allocation2 + $0x4f] ss:$0 sm:$0xff]  ;;  %v2412_v53 = vld [vmem:[#allocation2 + $0x78] ss:$0 sm:$0xff] }
 0x1cc   :  { %3905 = vpow2.f32 %v1812_v60  ;;  %v5033_v38 = vadd.f32 %v4974_v22, %v2216_v37  ;;  %v5036_v39 = vadd.f32 %v4979_v34, %v2227_v35  ;;  %v5038_v58 = vadd.f32 %v2240_v45, %v2238_v19  ;;  %v2453_v45 = vld [vmem:[#allocation2 + $0x6c] ss:$0 sm:$0xff]  ;;  %v2437_v60 = vld [vmem:[#allocation2 + $0x4b] ss:$0 sm:$0xff] }
 0x1cd   :  { %3907 = vpow2.f32 %v1815_v51  ;;  %v2251_v50 = vmul.f32 %v2250_v5, %v4936_v49  ;;  %v2249_v11 = vadd.f32 %v4914_v47, %v2246_v17  ;;  %v2254_v33 = vmax.f32 %v2253_v13, %v5019_v12  ;;  %v2448_v51 = vld [vmem:[#allocation2 + $0x4c] ss:$0 sm:$0xff]  ;;  %v2406_v17 = vld [vmem:[#allocation2 + $0x58] ss:$0 sm:$0xff]  ;;  %v2423_v13 = vld [vmem:[#allocation2 + $0x79] ss:$0 sm:$0xff] }
 0x1ce   :  { %3909 = vpow2.f32 %v1818_v56  ;;  %v5044_v22 = vmul.f32 %v2409_v43, %v4960_v54  ;;  %v6035_v34 = vstv %s4308_s25  ;;  %v5054_v49 = vmul.f32 %v2420_v14, %v4960_v54  ;;  %v2459_v56 = vld [vmem:[#allocation2 + $0x4d] ss:$0 sm:$0xff]  ;;  %v2445_v5 = vld [vmem:[#allocation2 + $0x7b] ss:$0 sm:$0xff]  ;;  %v2467_v14 = vld [vmem:[#allocation2 + $0x7d] ss:$0 sm:$0xff] }
 0x1cf   :  { %v5048_v26 = vadd.f32 %v3704_v9, %v6035_v34  ;;  %v5050_v21 = vadd.f32 %v2251_v50, %v2249_v11  ;;  %v2255_v47 = vmax.f32 %v2254_v33, %v5027_v52  ;;  %v5057_v3 = vmul.f32 %v2431_v18, %v4960_v54  ;;  %v2434_v9 = vld [vmem:[#allocation2 + $0x7a] ss:$0 sm:$0xff]  ;;  %v2478_v18 = vld [vmem:[#allocation2 + $0x7e] ss:$0 sm:$0xff] }
 0x1d0   :  { %v5060_v55 = vmul.f32 %v2442_v23, %v4960_v54  ;;  %v5063_v29 = vmul.f32 %v2453_v45, %v4960_v54  ;;  %v5066_v30 = vmul.f32 %v2464_v41, %v4960_v54  ;;  %v5069_v24 = vmul.f32 %v2475_v28, %v4960_v54 }
 0x1d1   :  { %v2256_v15 = vmax.f32 %v2255_v47, %v5033_v38  ;;  %v5073_v10 = vmul.f32 %v2486_v61, %v4960_v54  ;;  %v2405_v36 = vmul.f32 %v2404_v57, %v4964_v6  ;;  %v2416_v27 = vmul.f32 %v2415_v62, %v4964_v6  ;;  %v2456_v57 = vld [vmem:[#allocation2 + $0x7c] ss:$0 sm:$0xff]  ;;  %v3707_v47 = vpop.f32.mrf.mxu1  ;;  %v2439_v61 = vld [vmem:[#allocation2 + $0x5b] ss:$0 sm:$0xff] }
 0x1d2   :  { %v2427_v7 = vmul.f32 %v2426_v0, %v4964_v6  ;;  %v2438_v37 = vmul.f32 %v2437_v60, %v4964_v6  ;;  %v5080_v35 = vmul.f32 %v2448_v51, %v4964_v6  ;;  %v5083_v19 = vmul.f32 %v2459_v56, %v4964_v6  ;;  %v2428_v0 = vld [vmem:[#allocation2 + $0x5a] ss:$0 sm:$0xff] }
 0x1d3   :  { %v5085_v54 = vpop.eup %3895  ;;  %v2257_v43 = vmax.f32 %v2256_v15, %v5036_v39  ;;  %v5089_v50 = vmul.f32 %v2470_v46, %v4964_v6  ;;  %v5092_v11 = vmul.f32 %v2481_v16, %v4964_v6  ;;  %v2413_v33 = vmul.f32 %v2412_v53, %v5048_v26  ;;  %v2417_v6 = vld [vmem:[#allocation2 + $0x59] ss:$0 sm:$0xff]  ;;  %v2450_v46 = vld [vmem:[#allocation2 + $0x5c] ss:$0 sm:$0xff]  ;;  %v2461_v16 = vld [vmem:[#allocation2 + $0x5d] ss:$0 sm:$0xff] }
 0x1d4   :  { %v2424_v23 = vmul.f32 %v2423_v13, %v5048_v26  ;;  %v5097_v34 = vmul.f32 %v2434_v9, %v5048_v26  ;;  %v5100_v45 = vmul.f32 %v2445_v5, %v5048_v26  ;;  %v6036_v41 = vstv %s4302_s23 }
 0x1d5   :  { %v5104_v28 = vadd.f32 %v2109_v1, %v6036_v41  ;;  %v5106_v62 = vpop.eup %3897  ;;  %v2258_v60 = vmax.f32 %v2257_v43, %v5038_v58  ;;  %v5110_v51 = vmul.f32 %v2456_v57, %v5048_v26  ;;  %v5113_v56 = vmul.f32 %v2467_v14, %v5048_v26 }
 0x1d6   :  { %v5116_v15 = vmul.f32 %v2478_v18, %v5048_v26  ;;  %v5118_v1 = vpop.eup %3899  ;;  %v6037_v41 = vstv %s4306_s4  ;;  %v6044_v2 = vstv %s4319_s29 }
 0x1d7   :  { %v2407_v53 = vmul.f32 %v2406_v17, %v5104_v28  ;;  %v2418_v13 = vmul.f32 %v2417_v6, %v5104_v28  ;;  %v2429_v9 = vmul.f32 %v2428_v0, %v5104_v28  ;;  %v2440_v5 = vmul.f32 %v2439_v61, %v5104_v28  ;;  %v5124_v43 = vpop.eup %3901 }
 0x1d8   :  { %v2259_v57 = vmax.f32 %v2258_v60, %v5050_v21  ;;  %v2451_v14 = vmul.f32 %v2450_v46, %v5104_v28  ;;  %v2462_v18 = vmul.f32 %v2461_v16, %v5104_v28  ;;  %v5131_v48 = vadd.f32 %v3707_v47, %v6037_v41  ;;  %v5133_v25 = vpop.eup %3903  ;;  %v2472_v47 = vld [vmem:[#allocation2 + $0x5e] ss:$0 sm:$0xff] }
 0x1d9   :  { %v2408_v17 = vadd.f32 %v2407_v53, %v2405_v36  ;;  %v2419_v59 = vadd.f32 %v2418_v13, %v2416_v27  ;;  %v2430_v6 = vadd.f32 %v2429_v9, %v2427_v7  ;;  %v2441_v4 = vadd.f32 %v2440_v5, %v2438_v37  ;;  %v5135_v0 = vpop.eup %3905 }
 0x1da   :  { %v2260_v61 = vsub.f32 %v5010_v8, %v2259_v57  ;;  %v2263_v20 = vsub.f32 %v5012_v32, %v2259_v57  ;;  %v2266_v60 = vsub.f32 %v5019_v12, %v2259_v57  ;;  %v2269_v46 = vsub.f32 %v5027_v52, %v2259_v57  ;;  %v5141_v16 = vpop.eup %3907 }
 0x1db   :  { %v2272_v41 = vsub.f32 %v5033_v38, %v2259_v57  ;;  %v2275_v36 = vsub.f32 %v5036_v39, %v2259_v57  ;;  %v2278_v27 = vsub.f32 %v5038_v58, %v2259_v57  ;;  %v2281_v7 = vsub.f32 %v5050_v21, %v2259_v57  ;;  %v5147_v37 = vpop.eup %3909  ;;  %v2122_v38 = vpop.f32.mrf.mxu1 }
 0x1dc   :  { %v2261_v8 = vmul.f32 1.442695, %v2260_v61  ;;  %v2264_v53 = vmul.f32 1.442695, %v2263_v20  ;;  %v2411_v32 = vadd.f32 %v5044_v22, %v2408_v17  ;;  %v2473_v12 = vmul.f32 %v2472_v47, %v5104_v28  ;;  %v2483_v17 = vld [vmem:[#allocation2 + $0x5f] ss:$0 sm:$0xff] }
 0x1dd   :  { %v2267_v52 = vmul.f32 1.442695, %v2266_v60  ;;  %v2270_v13 = vmul.f32 1.442695, %v2269_v46  ;;  %v2273_v9 = vmul.f32 1.442695, %v2272_v41  ;;  %v2422_v5 = vadd.f32 %v5054_v49, %v2419_v59 }
 0x1de   :  { %3911 = vpow2.f32 %v2261_v8  ;;  %v2276_v39 = vmul.f32 1.442695, %v2275_v36  ;;  %v2279_v42 = vmul.f32 1.442695, %v2278_v27  ;;  %v5152_v58 = vadd.f32 %v2413_v33, %v2411_v32  ;;  %v2643_v47 = vld [vmem:[#allocation2 + $0x88] ss:$0 sm:$0xff] }
 0x1df   :  { %v2282_v21 = vmul.f32 1.442695, %v2281_v7  ;;  %v5154_v57 = vadd.f32 %v2424_v23, %v2422_v5  ;;  %v2433_v20 = vadd.f32 %v5057_v3, %v2430_v6  ;;  %v2444_v22 = vadd.f32 %v5060_v55, %v2441_v4  ;;  %v3708_v3 = vpop.f32.mrf.mxu1  ;;  %v2489_v6 = vld [vmem:[#allocation2 + $0x7f] ss:$0 sm:$0xff]  ;;  %v2681_v41 = vld [vmem:[#allocation2 + $0xab] ss:$0 sm:$0xff] }
 0x1e0   :  { %3913 = vpow2.f32 %v2264_v53  ;;  %v2452_v61 = vadd.f32 %v2451_v14, %v5080_v35  ;;  %v2463_v60 = vadd.f32 %v2462_v18, %v5083_v19  ;;  %v2474_v59 = vadd.f32 %v2473_v12, %v5089_v50  ;;  %v2692_v36 = vld [vmem:[#allocation2 + $0xac] ss:$0 sm:$0xff]  ;;  %v2703_v7 = vld [vmem:[#allocation2 + $0xad] ss:$0 sm:$0xff]  ;;  %v2725_v8 = vld [vmem:[#allocation2 + $0xaf] ss:$0 sm:$0xff] }
 0x1e1   :  { %3915 = vpow2.f32 %v2267_v52  ;;  %v5162_v49 = vadd.f32 %v5097_v34, %v2433_v20  ;;  %v5165_v33 = vadd.f32 %v5100_v45, %v2444_v22  ;;  %v2484_v23 = vmul.f32 %v2483_v17, %v5104_v28  ;;  %v2125_v46 = vpop.f32.mrf.mxu1  ;;  %v2676_v5 = vld [vmem:[#allocation2 + $0x8b] ss:$0 sm:$0xff]  ;;  %v2687_v22 = vld [vmem:[#allocation2 + $0x8c] ss:$0 sm:$0xff]  ;;  %v2698_v17 = vld [vmem:[#allocation2 + $0x8d] ss:$0 sm:$0xff] }
 0x1e2   :  { %3917 = vpow2.f32 %v2270_v13  ;;  %v2455_v4 = vadd.f32 %v5063_v29, %v2452_v61  ;;  %v2466_v55 = vadd.f32 %v5066_v30, %v2463_v60  ;;  %v2477_v35 = vadd.f32 %v5069_v24, %v2474_v59  ;;  %v2648_v30 = vld [vmem:[#allocation2 + $0xa8] ss:$0 sm:$0xff]  ;;  %v2659_v24 = vld [vmem:[#allocation2 + $0xa9] ss:$0 sm:$0xff]  ;;  %v2709_v61 = vld [vmem:[#allocation2 + $0x8e] ss:$0 sm:$0xff] }
 0x1e3   :  { %3919 = vpow2.f32 %v2273_v9  ;;  %v2490_v19 = vmul.f32 %v2489_v6, %v5048_v26  ;;  %v2485_v50 = vadd.f32 %v2484_v23, %v5092_v11  ;;  %v2492_v34 = vmax.f32 %v5152_v58, %v5154_v57  ;;  %v2654_v13 = vld [vmem:[#allocation2 + $0x89] ss:$0 sm:$0xff]  ;;  %v2665_v9 = vld [vmem:[#allocation2 + $0x8a] ss:$0 sm:$0xff]  ;;  %v3711_v6 = vpop.f32.mrf.mxu1 }
 0x1e4   :  { %3921 = vpow2.f32 %v2276_v39  ;;  %v5176_v45 = vadd.f32 %v5110_v51, %v2455_v4  ;;  %v5179_v28 = vadd.f32 %v5113_v56, %v2466_v55  ;;  %v5182_v29 = vadd.f32 %v5116_v15, %v2477_v35  ;;  %v2670_v51 = vld [vmem:[#allocation2 + $0xaa] ss:$0 sm:$0xff]  ;;  %v2720_v4 = vld [vmem:[#allocation2 + $0x8f] ss:$0 sm:$0xff]  ;;  %v2651_v55 = vld [vmem:[#allocation2 + $0xb8] ss:$0 sm:$0xff] }
 0x1e5   :  { %3923 = vpow2.f32 %v2279_v42  ;;  %v2488_v26 = vadd.f32 %v5073_v10, %v2485_v50  ;;  %v2493_v11 = vmax.f32 %v2492_v34, %v5162_v49  ;;  %v6038_v14 = vstv %s4310_s26  ;;  %v2714_v10 = vld [vmem:[#allocation2 + $0xae] ss:$0 sm:$0xff]  ;;  %v2662_v35 = vld [vmem:[#allocation2 + $0xb9] ss:$0 sm:$0xff] }
 0x1e6   :  { %v2633_v18 = vadd.f32 %v2122_v38, %v6038_v14  ;;  %3925 = vpow2.f32 %v2282_v21  ;;  %v5189_v56 = vmul.f32 %v2648_v30, %v5131_v48  ;;  %v5192_v15 = vmul.f32 %v2659_v24, %v5131_v48  ;;  %v2673_v24 = vld [vmem:[#allocation2 + $0xba] ss:$0 sm:$0xff] }
 0x1e7   :  { %v6039_v27 = vstv %s4312_s27  ;;  %v5196_v53 = vadd.f32 %v2490_v19, %v2488_v26  ;;  %v2494_v32 = vmax.f32 %v2493_v11, %v5165_v33  ;;  %v5200_v12 = vmul.f32 %v2670_v51, %v5131_v48  ;;  %v2684_v26 = vld [vmem:[#allocation2 + $0xbb] ss:$0 sm:$0xff]  ;;  %v2695_v11 = vld [vmem:[#allocation2 + $0xbc] ss:$0 sm:$0xff] }
 0x1e8   :  { %v2642_v42 = vadd.f32 %v3708_v3, %v6039_v27  ;;  %v5203_v52 = vmul.f32 %v2681_v41, %v5131_v48  ;;  %v5206_v38 = vmul.f32 %v2692_v36, %v5131_v48  ;;  %v5209_v39 = vmul.f32 %v2703_v7, %v5131_v48  ;;  %v2706_v36 = vld [vmem:[#allocation2 + $0xbd] ss:$0 sm:$0xff]  ;;  %v2717_v27 = vld [vmem:[#allocation2 + $0xbe] ss:$0 sm:$0xff]  ;;  %v2728_v7 = vld [vmem:[#allocation2 + $0xbf] ss:$0 sm:$0xff] }
 0x1e9   :  { %v5212_v21 = vmul.f32 %v2714_v10, %v5131_v48  ;;  %v5215_v20 = vmul.f32 %v2725_v8, %v5131_v48  ;;  %v2495_v60 = vmax.f32 %v2494_v32, %v5176_v45  ;;  %v2644_v59 = vmul.f32 %v2643_v47, %v2633_v18 }
 0x1ea   :  { %v2655_v23 = vmul.f32 %v2654_v13, %v2633_v18  ;;  %v2666_v3 = vmul.f32 %v2665_v9, %v2633_v18  ;;  %v2677_v19 = vmul.f32 %v2676_v5, %v2633_v18  ;;  %v5218_v50 = vmul.f32 %v2687_v22, %v2633_v18  ;;  %v2645_v22 = vld [vmem:[#allocation2 + $0x98] ss:$0 sm:$0xff] }
 0x1eb   :  { %v5220_v34 = vmul.f32 %v2698_v17, %v2633_v18  ;;  %v5222_v48 = vmul.f32 %v2709_v61, %v2633_v18  ;;  %v5224_v30 = vpop.eup %3911  ;;  %v2496_v14 = vmax.f32 %v2495_v60, %v5179_v28  ;;  %v5227_v47 = vmul.f32 %v2720_v4, %v2633_v18  ;;  %v2656_v18 = vld [vmem:[#allocation2 + $0x99] ss:$0 sm:$0xff]  ;;  %v2667_v17 = vld [vmem:[#allocation2 + $0x9a] ss:$0 sm:$0xff] }
 0x1ec   :  { %6040 = vst [vmem:[#allocation49_spill] sm:$0xff] %v5224_v30  ;;  %v2652_v51 = vmul.f32 %v2651_v55, %v2642_v42  ;;  %v2663_v41 = vmul.f32 %v2662_v35, %v2642_v42  ;;  %v5229_v10 = vmul.f32 %v2673_v24, %v2642_v42  ;;  %v5231_v8 = vmul.f32 %v2684_v26, %v2642_v42  ;;  %v2138_v35 = vpop.f32.mrf.mxu1  ;;  %v2678_v26 = vld [vmem:[#allocation2 + $0x9b] ss:$0 sm:$0xff] }
 0x1ed   :  { %v5233_v32 = vmul.f32 %v2695_v11, %v2642_v42  ;;  %v6041_v13 = vstv %s4314_s28  ;;  %v5239_v5 = vpop.eup %3913  ;;  %v2497_v61 = vmax.f32 %v2496_v14, %v5182_v29  ;;  %v5242_v60 = vmul.f32 %v2706_v36, %v2642_v42  ;;  %v2700_v11 = vld [vmem:[#allocation2 + $0x9d] ss:$0 sm:$0xff] }
 0x1ee   :  { %v5237_v9 = vadd.f32 %v2125_v46, %v6041_v13  ;;  %6042 = vst [vmem:[#allocation50_spill] sm:$0xff] %v5239_v5  ;;  %v5244_v4 = vmul.f32 %v2717_v27, %v2642_v42  ;;  %v5246_v55 = vmul.f32 %v2728_v7, %v2642_v42  ;;  %v5248_v24 = vpop.eup %3915  ;;  %v2689_v46 = vld [vmem:[#allocation2 + $0x9c] ss:$0 sm:$0xff]  ;;  %v5255_v14 = vadd.f32 %v3711_v6, %v6044_v2  ;;  %v2711_v27 = vld [vmem:[#allocation2 + $0x9e] ss:$0 sm:$0xff] }
 0x1ef   :  { %6043 = vst [vmem:[#allocation51_spill] sm:$0xff] %v5248_v24  ;;  %v5257_v36 = vpop.eup %3917  ;;  %v2498_v42 = vmax.f32 %v2497_v61, %v5196_v53 }
 0x1f0   :  { %v2646_v13 = vmul.f32 %v2645_v22, %v5237_v9  ;;  %v2657_v5 = vmul.f32 %v2656_v18, %v5237_v9  ;;  %v2668_v30 = vmul.f32 %v2667_v17, %v5237_v9  ;;  %6045 = vst [vmem:[#allocation52_spill] sm:$0xff] %v5257_v36  ;;  %v2679_v7 = vmul.f32 %v2678_v26, %v5237_v9  ;;  %v5263_v31 = vpop.eup %3919 }
 0x1f1   :  { %v2690_v24 = vmul.f32 %v2689_v46, %v5237_v9  ;;  %v2701_v63 = vmul.f32 %v2700_v11, %v5237_v9  ;;  %6046 = vst [vmem:[#allocation53_spill] sm:$0xff] %v5263_v31  ;;  %v2712_v17 = vmul.f32 %v2711_v27, %v5237_v9  ;;  %v5266_v2 = vpop.eup %3921  ;;  %v2499_v6 = vsub.f32 %v5152_v58, %v2498_v42  ;;  %v3712_v46 = vpop.f32.mrf.mxu1 }
 0x1f2   :  { %v2647_v22 = vadd.f32 %v2646_v13, %v2644_v59  ;;  %v2658_v18 = vadd.f32 %v2657_v5, %v2655_v23  ;;  %v2669_v40 = vadd.f32 %v2668_v30, %v2666_v3  ;;  %6047 = vst [vmem:[#allocation54_spill] sm:$0xff] %v5266_v2  ;;  %v2502_v36 = vsub.f32 %v5154_v57, %v2498_v42  ;;  %v5272_v11 = vpop.eup %3923 }
 0x1f3   :  { %v2505_v61 = vsub.f32 %v5162_v49, %v2498_v42  ;;  %v2508_v26 = vsub.f32 %v5165_v33, %v2498_v42  ;;  %6048 = vst [vmem:[#allocation55_spill] sm:$0xff] %v5272_v11  ;;  %v2511_v59 = vsub.f32 %v5176_v45, %v2498_v42  ;;  %v2514_v23 = vsub.f32 %v5179_v28, %v2498_v42  ;;  %v5278_v58 = vpop.eup %3925 }
 0x1f4   :  { %v2517_v3 = vsub.f32 %v5182_v29, %v2498_v42  ;;  %v2520_v30 = vsub.f32 %v5196_v53, %v2498_v42  ;;  %6049 = vst [vmem:[#allocation56_spill] sm:$0xff] %v5278_v58  ;;  %v2500_v57 = vmul.f32 1.442695, %v2499_v6  ;;  %v2503_v5 = vmul.f32 1.442695, %v2502_v36  ;;  %v2141_v6 = vpop.f32.mrf.mxu1 }
 0x1f5   :  { %v2650_v49 = vadd.f32 %v5189_v56, %v2647_v22  ;;  %v2680_v13 = vadd.f32 %v2679_v7, %v2677_v19  ;;  %v2506_v27 = vmul.f32 1.442695, %v2505_v61  ;;  %v2661_v33 = vadd.f32 %v5192_v15, %v2658_v18  ;;  %v2722_v19 = vld [vmem:[#allocation2 + $0x9f] ss:$0 sm:$0xff]  ;;  %v2893_v61 = vld [vmem:[#allocation2 + $0xc9] ss:$0 sm:$0xff] }
 0x1f6   :  { %v6050_v2 = vstv %s4356_s6  ;;  %v6051_v45 = vstv %s4358_s30  ;;  %3927 = vpow2.f32 %v2500_v57  ;;  %v2509_v28 = vmul.f32 1.442695, %v2508_v26  ;;  %v2909_v26 = vld [vmem:[#allocation2 + $0xea] ss:$0 sm:$0xff] }
 0x1f7   :  { %v5284_v11 = vadd.f32 %v2138_v35, %v6050_v2  ;;  %v5288_v31 = vadd.f32 %v3712_v46, %v6051_v45  ;;  %v2512_v29 = vmul.f32 1.442695, %v2511_v59  ;;  %v2515_v53 = vmul.f32 1.442695, %v2514_v23  ;;  %v2931_v46 = vld [vmem:[#allocation2 + $0xec] ss:$0 sm:$0xff] }
 0x1f8   :  { %3929 = vpow2.f32 %v2503_v5  ;;  %v5290_v42 = vadd.f32 %v2652_v51, %v2650_v49  ;;  %v5292_v36 = vadd.f32 %v2663_v41, %v2661_v33  ;;  %v2672_v56 = vadd.f32 %v5200_v12, %v2669_v40 }
 0x1f9   :  { %v2683_v15 = vadd.f32 %v5203_v52, %v2680_v13  ;;  %v2691_v35 = vadd.f32 %v2690_v24, %v5218_v50  ;;  %v2702_v7 = vadd.f32 %v2701_v63, %v5220_v34  ;;  %v2713_v22 = vadd.f32 %v2712_v17, %v5222_v48  ;;  %v2887_v52 = vld [vmem:[#allocation2 + $0xe8] ss:$0 sm:$0xff]  ;;  %v2904_v13 = vld [vmem:[#allocation2 + $0xca] ss:$0 sm:$0xff] }
 0x1fa   :  { %3931 = vpow2.f32 %v2506_v27  ;;  %v2518_v18 = vmul.f32 1.442695, %v2517_v3  ;;  %v2521_v2 = vmul.f32 1.442695, %v2520_v30  ;;  %v2723_v51 = vmul.f32 %v2722_v19, %v5237_v9  ;;  %v2882_v17 = vld [vmem:[#allocation2 + $0xc8] ss:$0 sm:$0xff] }
 0x1fb   :  { %3933 = vpow2.f32 %v2509_v28  ;;  %v2694_v41 = vadd.f32 %v5206_v38, %v2691_v35  ;;  %v2705_v40 = vadd.f32 %v5209_v39, %v2702_v7  ;;  %v2716_v12 = vadd.f32 %v5212_v21, %v2713_v22  ;;  %v2898_v21 = vld [vmem:[#allocation2 + $0xe9] ss:$0 sm:$0xff]  ;;  %v2953_v30 = vld [vmem:[#allocation2 + $0xee] ss:$0 sm:$0xff]  ;;  %v2926_v27 = vld [vmem:[#allocation2 + $0xcc] ss:$0 sm:$0xff] }
 0x1fc   :  { %3935 = vpow2.f32 %v2512_v29  ;;  %v5304_v63 = vadd.f32 %v5229_v10, %v2672_v56  ;;  %v2724_v50 = vadd.f32 %v2723_v51, %v5227_v47  ;;  %v2731_v34 = vmax.f32 %v5290_v42, %v5292_v36  ;;  %v2948_v56 = vld [vmem:[#allocation2 + $0xce] ss:$0 sm:$0xff]  ;;  %v2959_v19 = vld [vmem:[#allocation2 + $0xcf] ss:$0 sm:$0xff]  ;;  %v2884_v22 = vld [vmem:[#allocation2 + $0xd8] ss:$0 sm:$0xff] }
 0x1fd   :  { %3937 = vpow2.f32 %v2515_v53  ;;  %v5310_v48 = vadd.f32 %v5231_v8, %v2683_v15  ;;  %v5313_v38 = vmul.f32 %v2887_v52, %v5255_v14  ;;  %v6052_v39 = vstv %s4360_s9  ;;  %v2920_v8 = vld [vmem:[#allocation2 + $0xeb] ss:$0 sm:$0xff]  ;;  %v2937_v53 = vld [vmem:[#allocation2 + $0xcd] ss:$0 sm:$0xff]  ;;  %v2912_v52 = vld [vmem:[#allocation2 + $0xfa] ss:$0 sm:$0xff] }
 0x1fe   :  { %v5317_v9 = vadd.f32 %v2141_v6, %v6052_v39  ;;  %3939 = vpow2.f32 %v2518_v18  ;;  %v5320_v10 = vadd.f32 %v5233_v32, %v2694_v41  ;;  %v2727_v47 = vadd.f32 %v5215_v20, %v2724_v50  ;;  %v2942_v32 = vld [vmem:[#allocation2 + $0xed] ss:$0 sm:$0xff]  ;;  %v2964_v20 = vld [vmem:[#allocation2 + $0xef] ss:$0 sm:$0xff]  ;;  %v2890_v18 = vld [vmem:[#allocation2 + $0xf8] ss:$0 sm:$0xff] }
 0x1ff   :  { %v2732_v24 = vmax.f32 %v2731_v34, %v5304_v63  ;;  %3941 = vpow2.f32 %v2521_v2  ;;  %v5325_v59 = vadd.f32 %v5242_v60, %v2705_v40  ;;  %v5328_v23 = vadd.f32 %v5244_v4, %v2716_v12  ;;  %v2915_v4 = vld [vmem:[#allocation2 + $0xcb] ss:$0 sm:$0xff]  ;;  %v2901_v2 = vld [vmem:[#allocation2 + $0xf9] ss:$0 sm:$0xff]  ;;  %v2923_v50 = vld [vmem:[#allocation2 + $0xfb] ss:$0 sm:$0xff] }
 0x200   :  { %v5331_v3 = vmul.f32 %v2898_v21, %v5255_v14  ;;  %v5335_v5 = vmul.f32 %v2909_v26, %v5255_v14  ;;  %v5338_v49 = vmul.f32 %v2920_v8, %v5255_v14  ;;  %v5341_v60 = vmul.f32 %v2931_v46, %v5255_v14  ;;  %v2895_v12 = vld [vmem:[#allocation2 + $0xd9] ss:$0 sm:$0xff]  ;;  %v2945_v26 = vld [vmem:[#allocation2 + $0xfd] ss:$0 sm:$0xff] }
 0x201   :  { %v2733_v57 = vmax.f32 %v2732_v24, %v5310_v48  ;;  %v5344_v33 = vadd.f32 %v5246_v55, %v2727_v47  ;;  %v5347_v45 = vmul.f32 %v2942_v32, %v5255_v14  ;;  %v5350_v28 = vmul.f32 %v2953_v30, %v5255_v14 }
 0x202   :  { %v5353_v29 = vmul.f32 %v2964_v20, %v5255_v14  ;;  %v2883_v35 = vmul.f32 %v2882_v17, %v5284_v11  ;;  %v2894_v7 = vmul.f32 %v2893_v61, %v5284_v11  ;;  %v2905_v55 = vmul.f32 %v2904_v13, %v5284_v11  ;;  %v2906_v17 = vld [vmem:[#allocation2 + $0xda] ss:$0 sm:$0xff]  ;;  %v2934_v61 = vld [vmem:[#allocation2 + $0xfc] ss:$0 sm:$0xff]  ;;  %v2956_v20 = vld [vmem:[#allocation2 + $0xfe] ss:$0 sm:$0xff] }
 0x203   :  { %v2734_v15 = vmax.f32 %v2733_v57, %v5320_v10  ;;  %v2916_v51 = vmul.f32 %v2915_v4, %v5284_v11  ;;  %v2927_v6 = vmul.f32 %v2926_v27, %v5284_v11  ;;  %v2938_v14 = vmul.f32 %v2937_v53, %v5284_v11  ;;  %v5363_v40 = vpop.eup %3927 }
 0x204   :  { %v2949_v41 = vmul.f32 %v2948_v56, %v5284_v11  ;;  %v5367_v39 = vmul.f32 %v2959_v19, %v5284_v11  ;;  %v2891_v21 = vmul.f32 %v2890_v18, %v5288_v31  ;;  %v2902_v47 = vmul.f32 %v2901_v2, %v5288_v31  ;;  %v2917_v11 = vld [vmem:[#allocation2 + $0xdb] ss:$0 sm:$0xff]  ;;  %v2928_v56 = vld [vmem:[#allocation2 + $0xdc] ss:$0 sm:$0xff]  ;;  %v2939_v19 = vld [vmem:[#allocation2 + $0xdd] ss:$0 sm:$0xff] }
 0x205   :  { %v2735_v34 = vmax.f32 %v2734_v15, %v5325_v59  ;;  %v5371_v24 = vpop.eup %3929  ;;  %v2913_v8 = vmul.f32 %v2912_v52, %v5288_v31  ;;  %v5375_v46 = vmul.f32 %v2923_v50, %v5288_v31  ;;  %v2885_v32 = vmul.f32 %v2884_v22, %v5317_v9  ;;  %v2967_v15 = vld [vmem:[#allocation2 + $0xff] ss:$0 sm:$0xff]  ;;  %v2950_v50 = vld [vmem:[#allocation2 + $0xde] ss:$0 sm:$0xff] }
 0x206   :  { %v2896_v30 = vmul.f32 %v2895_v12, %v5317_v9  ;;  %v5381_v13 = vmul.f32 %v2934_v61, %v5288_v31  ;;  %v5384_v4 = vmul.f32 %v2945_v26, %v5288_v31  ;;  %v2907_v27 = vmul.f32 %v2906_v17, %v5317_v9 }
 0x207   :  { %v2736_v57 = vmax.f32 %v2735_v34, %v5328_v23  ;;  %v5387_v53 = vpop.eup %3931  ;;  %v5390_v22 = vmul.f32 %v2956_v20, %v5288_v31  ;;  %v2886_v18 = vadd.f32 %v2885_v32, %v2883_v35  ;;  %v2918_v12 = vmul.f32 %v2917_v11, %v5317_v9 }
 0x208   :  { %v2897_v2 = vadd.f32 %v2896_v30, %v2894_v7  ;;  %v5393_v52 = vpop.eup %3933  ;;  %v5397_v61 = vmul.f32 %v2967_v15, %v5288_v31  ;;  %v2929_v17 = vmul.f32 %v2928_v56, %v5317_v9  ;;  %v2940_v26 = vmul.f32 %v2939_v19, %v5317_v9 }
 0x209   :  { %v2737_v34 = vmax.f32 %v2736_v57, %v5344_v33  ;;  %v5401_v58 = vpop.eup %3935  ;;  %v2889_v20 = vadd.f32 %v5313_v38, %v2886_v18  ;;  %v2908_v7 = vadd.f32 %v2907_v27, %v2905_v55  ;;  %v2951_v32 = vmul.f32 %v2950_v50, %v5317_v9 }
 0x20a   :  { %6053 = vst [vmem:[#allocation57_spill] sm:$0xff] %v5401_v58  ;;  %v2900_v35 = vadd.f32 %v5331_v3, %v2897_v2  ;;  %v5406_v30 = vpop.eup %3937  ;;  %v2919_v55 = vadd.f32 %v2918_v12, %v2916_v51 }
 0x20b   :  { %6054 = vst [vmem:[#allocation58_spill] sm:$0xff] %v5406_v30  ;;  %v2738_v11 = vsub.f32 %v5290_v42, %v2737_v34  ;;  %v2741_v31 = vsub.f32 %v5292_v36, %v2737_v34  ;;  %v2744_v57 = vsub.f32 %v5304_v63, %v2737_v34  ;;  %v2747_v56 = vsub.f32 %v5310_v48, %v2737_v34  ;;  %v5412_v19 = vpop.eup %3939 }
 0x20c   :  { %6055 = vst [vmem:[#allocation59_spill] sm:$0xff] %v5412_v19  ;;  %v2750_v15 = vsub.f32 %v5320_v10, %v2737_v34  ;;  %v2753_v38 = vsub.f32 %v5325_v59, %v2737_v34  ;;  %v2756_v3 = vsub.f32 %v5328_v23, %v2737_v34  ;;  %v5417_v27 = vpop.eup %3941  ;;  %v2759_v42 = vsub.f32 %v5344_v33, %v2737_v34  ;;  %v2961_v23 = vld [vmem:[#allocation2 + $0xdf] ss:$0 sm:$0xff] }
 0x20d   :  { %6056 = vst [vmem:[#allocation60_spill] sm:$0xff] %v5417_v27  ;;  %v2739_v18 = vmul.f32 1.442695, %v2738_v11  ;;  %v2742_v2 = vmul.f32 1.442695, %v2741_v31  ;;  %v2930_v36 = vadd.f32 %v2929_v17, %v2927_v6  ;;  %v5420_v63 = vadd.f32 %v2891_v21, %v2889_v20 }
 0x20e   :  { %v2745_v50 = vmul.f32 1.442695, %v2744_v57  ;;  %v2941_v48 = vadd.f32 %v2940_v26, %v2938_v14  ;;  %v2952_v30 = vadd.f32 %v2951_v32, %v2949_v41  ;;  %v2748_v19 = vmul.f32 1.442695, %v2747_v56  ;;  %v1878_v17 = vld [vmem:[#allocation3 + $0xe0] ss:$0 sm:$0xff] }
 0x20f   :  { %v2751_v58 = vmul.f32 1.442695, %v2750_v15  ;;  %v5422_v10 = vadd.f32 %v2902_v47, %v2900_v35  ;;  %v2911_v59 = vadd.f32 %v5335_v5, %v2908_v7  ;;  %3943 = vpow2.f32 %v2739_v18  ;;  %v1883_v26 = vld [vmem:[#allocation3 + $0xe2] ss:$0 sm:$0xff]  ;;  %v1903_v15 = vld [vmem:[#allocation3 + $0xf0] ss:$0 sm:$0xff] }
 0x210   :  { %v2754_v51 = vmul.f32 1.442695, %v2753_v38  ;;  %v2757_v12 = vmul.f32 1.442695, %v2756_v3  ;;  %v2922_v11 = vadd.f32 %v5338_v49, %v2919_v55  ;;  %3945 = vpow2.f32 %v2742_v2  ;;  %v1905_v38 = vld [vmem:[#allocation3 + $0xf1] ss:$0 sm:$0xff] }
 0x211   :  { %v2760_v33 = vmul.f32 1.442695, %v2759_v42  ;;  %v2933_v6 = vadd.f32 %v5341_v60, %v2930_v36  ;;  %v2962_v21 = vmul.f32 %v2961_v23, %v5317_v9  ;;  %3947 = vpow2.f32 %v2745_v50  ;;  %v1880_v60 = vld [vmem:[#allocation3 + $0xe1] ss:$0 sm:$0xff]  ;;  %v1895_v55 = vld [vmem:[#allocation3 + $0xe6] ss:$0 sm:$0xff] }
 0x212   :  { %v5428_v14 = vadd.f32 %v2913_v8, %v2911_v59  ;;  %v2944_v41 = vadd.f32 %v5347_v45, %v2941_v48  ;;  %v2955_v47 = vadd.f32 %v5350_v28, %v2952_v30  ;;  %3949 = vpow2.f32 %v2748_v19  ;;  %v1886_v30 = vld [vmem:[#allocation3 + $0xe3] ss:$0 sm:$0xff]  ;;  %v1889_v19 = vld [vmem:[#allocation3 + $0xe4] ss:$0 sm:$0xff]  ;;  %v1898_v48 = vld [vmem:[#allocation3 + $0xe7] ss:$0 sm:$0xff] }
 0x213   :  { %v5433_v5 = vadd.f32 %v5375_v46, %v2922_v11  ;;  %v2963_v34 = vadd.f32 %v2962_v21, %v5367_v39  ;;  %v2970_v49 = vmax.f32 %v5420_v63, %v5422_v10  ;;  %3951 = vpow2.f32 %v2751_v58  ;;  %v1908_v59 = vld [vmem:[#allocation3 + $0xf2] ss:$0 sm:$0xff] }
 0x214   :  { %v1820_v9 = vadd.f32 %v5106_v62, %v5085_v54  ;;  %v1879_v8 = vmul.f32 %v5085_v54, %v1878_v17  ;;  %v1881_v45 = vmul.f32 %v5106_v62, %v1880_v60  ;;  %3953 = vpow2.f32 %v2754_v51  ;;  %v1830_v17 = vld [vmem:[#allocation3 + $0xc1] ss:$0 sm:$0xff] }
 0x215   :  { %v5443_v28 = vadd.f32 %v5381_v13, %v2933_v6  ;;  %v2966_v46 = vadd.f32 %v5353_v29, %v2963_v34  ;;  %v2971_v39 = vmax.f32 %v2970_v49, %v5428_v14  ;;  %3955 = vpow2.f32 %v2757_v12  ;;  %v1828_v6 = vld [vmem:[#allocation3 + $0xc0] ss:$0 sm:$0xff]  ;;  %v1914_v34 = vld [vmem:[#allocation3 + $0xf4] ss:$0 sm:$0xff] }
 0x216   :  { %v1821_v20 = vadd.f32 %v5118_v1, %v1820_v9  ;;  %v1882_v58 = vadd.f32 %v1881_v45, %v1879_v8  ;;  %v1884_v35 = vmul.f32 %v5118_v1, %v1883_v26  ;;  %3957 = vpow2.f32 %v2760_v33  ;;  %v1911_v33 = vld [vmem:[#allocation3 + $0xf3] ss:$0 sm:$0xff]  ;;  %v1923_v26 = vld [vmem:[#allocation3 + $0xf7] ss:$0 sm:$0xff] }
 0x217   :  { %v5450_v7 = vadd.f32 %v5384_v4, %v2944_v41  ;;  %v5453_v32 = vadd.f32 %v5390_v22, %v2955_v47  ;;  %v2972_v13 = vmax.f32 %v2971_v39, %v5433_v5  ;;  %v5457_v29 = vadd.f32 %v5397_v61, %v2966_v46  ;;  %v1892_v22 = vld [vmem:[#allocation3 + $0xe5] ss:$0 sm:$0xff]  ;;  %v1917_v46 = vld [vmem:[#allocation3 + $0xf5] ss:$0 sm:$0xff]  ;;  %v1920_v39 = vld [vmem:[#allocation3 + $0xf6] ss:$0 sm:$0xff] }
 0x218   :  { %v1822_v31 = vadd.f32 %v5124_v43, %v1821_v20  ;;  %v1885_v57 = vadd.f32 %v1884_v35, %v1882_v58  ;;  %v1887_v56 = vmul.f32 %v5124_v43, %v1886_v30  ;;  %v1890_v3 = vmul.f32 %v5133_v25, %v1889_v19 }
 0x219   :  { %v2973_v4 = vmax.f32 %v2972_v13, %v5443_v28  ;;  %v1904_v18 = vmul.f32 %v5085_v54, %v1903_v15  ;;  %v1906_v2 = vmul.f32 %v5106_v62, %v1905_v38  ;;  %v1893_v36 = vmul.f32 %v5135_v0, %v1892_v22  ;;  %v1839_v22 = vld [vmem:[#allocation3 + $0xc4] ss:$0 sm:$0xff] }
 0x21a   :  { %v1823_v61 = vadd.f32 %v5133_v25, %v1822_v31  ;;  %v1888_v42 = vadd.f32 %v1887_v56, %v1885_v57  ;;  %v1896_v50 = vmul.f32 %v5141_v16, %v1895_v55  ;;  %v5470_v51 = vmul.f32 %v5147_v37, %v1898_v48  ;;  %v1833_v57 = vld [vmem:[#allocation3 + $0xc2] ss:$0 sm:$0xff]  ;;  %v1836_v56 = vld [vmem:[#allocation3 + $0xc3] ss:$0 sm:$0xff] }
 0x21b   :  { %v2974_v23 = vmax.f32 %v2973_v4, %v5450_v7  ;;  %v1907_v12 = vadd.f32 %v1906_v2, %v1904_v18  ;;  %v1909_v11 = vmul.f32 %v5118_v1, %v1908_v59  ;;  %v1912_v47 = vmul.f32 %v5124_v43, %v1911_v33 }
 0x21c   :  { %v1824_v21 = vadd.f32 %v5135_v0, %v1823_v61  ;;  %v1891_v41 = vadd.f32 %v1890_v3, %v1888_v42  ;;  %v1829_v49 = vmul.f32 %v5085_v54, %v1828_v6  ;;  %v5476_v60 = vpop.eup %3943  ;;  %v1915_v45 = vmul.f32 %v5133_v25, %v1914_v34  ;;  %v1845_v34 = vld [vmem:[#allocation3 + $0xc6] ss:$0 sm:$0xff] }
 0x21d   :  { %v2975_v9 = vmax.f32 %v2974_v23, %v5453_v32  ;;  %v1910_v8 = vadd.f32 %v1909_v11, %v1907_v12  ;;  %v1831_v20 = vmul.f32 %v5106_v62, %v1830_v17  ;;  %v5481_v58 = vpop.eup %3945  ;;  %v1918_v13 = vmul.f32 %v5135_v0, %v1917_v46 }
 0x21e   :  { %v1825_v35 = vadd.f32 %v5141_v16, %v1824_v21  ;;  %v5486_v30 = vmul.f32 %v5141_v16, %v1920_v39  ;;  %v5489_v31 = vmul.f32 %v5147_v37, %v1923_v26  ;;  %v5491_v19 = vpop.eup %3947  ;;  %v1894_v38 = vadd.f32 %v1893_v36, %v1891_v41  ;;  %v1855_v39 = vld [vmem:[#allocation3 + $0xd1] ss:$0 sm:$0xff] }
 0x21f   :  { %v2976_v15 = vmax.f32 %v2975_v9, %v5457_v29  ;;  %v1834_v4 = vmul.f32 %v5118_v1, %v1833_v57  ;;  %v1837_v3 = vmul.f32 %v5124_v43, %v1836_v56  ;;  %v5496_v55 = vpop.eup %3949  ;;  %v1913_v2 = vadd.f32 %v1912_v47, %v1910_v8  ;;  %v1842_v47 = vld [vmem:[#allocation3 + $0xc5] ss:$0 sm:$0xff]  ;;  %v1853_v8 = vld [vmem:[#allocation3 + $0xd0] ss:$0 sm:$0xff] }
 0x220   :  { %v1826_v18 = vadd.f32 %v5147_v37, %v1825_v35  ;;  %v1832_v61 = vadd.f32 %v1831_v20, %v1829_v49  ;;  %v1840_v42 = vmul.f32 %v5133_v25, %v1839_v22  ;;  %v5500_v48 = vpop.eup %3951  ;;  %v1897_v9 = vadd.f32 %v1896_v50, %v1894_v38  ;;  %v1848_v22 = vld [vmem:[#allocation3 + $0xc7] ss:$0 sm:$0xff] }
 0x221   :  { %v2977_v59 = vsub.f32 %v5420_v63, %v2976_v15  ;;  %v2980_v23 = vsub.f32 %v5422_v10, %v2976_v15  ;;  %v2983_v36 = vsub.f32 %v5428_v14, %v2976_v15  ;;  %v2986_v12 = vsub.f32 %v5433_v5, %v2976_v15  ;;  %v5506_v11 = vpop.eup %3953 }
 0x222   :  { %v2989_v33 = vsub.f32 %v5443_v28, %v2976_v15  ;;  %v2992_v6 = vsub.f32 %v5450_v7, %v2976_v15  ;;  %v2995_v21 = vsub.f32 %v5453_v32, %v2976_v15  ;;  %v2998_v41 = vsub.f32 %v5457_v29, %v2976_v15  ;;  %v5512_v49 = vpop.eup %3955  ;;  %v1858_v15 = vld [vmem:[#allocation3 + $0xd2] ss:$0 sm:$0xff] }
 0x223   :  { %v2978_v63 = vmul.f32 1.442695, %v2977_v59  ;;  %v2981_v10 = vmul.f32 1.442695, %v2980_v23  ;;  %v2984_v17 = vmul.f32 1.442695, %v2983_v36  ;;  %3959 = vrcp.f32 %v1826_v18  ;;  %v5514_v14 = vpop.eup %3957 }
 0x224   :  { %v2987_v5 = vmul.f32 1.442695, %v2986_v12  ;;  %v1843_v28 = vmul.f32 %v5135_v0, %v1842_v47  ;;  %v1846_v7 = vmul.f32 %v5141_v16, %v1845_v34  ;;  %v2990_v32 = vmul.f32 1.442695, %v2989_v33  ;;  %v1861_v23 = vld [vmem:[#allocation3 + $0xd3] ss:$0 sm:$0xff] }
 0x225   :  { %3961 = vpow2.f32 %v2978_v63  ;;  %v2993_v29 = vmul.f32 1.442695, %v2992_v6  ;;  %v1916_v46 = vadd.f32 %v1915_v45, %v1913_v2  ;;  %v1835_v26 = vadd.f32 %v1834_v4, %v1832_v61  ;;  %v1864_v61 = vld [vmem:[#allocation3 + $0xd4] ss:$0 sm:$0xff]  ;;  %v2820_v36 = vld [vmem:[#allocation3 + $0xa8] ss:$0 sm:$0xff] }
 0x226   :  { %3963 = vpow2.f32 %v2981_v10  ;;  %v1854_v20 = vmul.f32 %v5085_v54, %v1853_v8  ;;  %v1856_v35 = vmul.f32 %v5106_v62, %v1855_v39  ;;  %v2996_v57 = vmul.f32 1.442695, %v2995_v21  ;;  %v1870_v21 = vld [vmem:[#allocation3 + $0xd6] ss:$0 sm:$0xff]  ;;  %v2825_v63 = vld [vmem:[#allocation3 + $0xaa] ss:$0 sm:$0xff] }
 0x227   :  { %3965 = vpow2.f32 %v2984_v17  ;;  %v2999_v56 = vmul.f32 1.442695, %v2998_v41  ;;  %v1919_v50 = vadd.f32 %v1918_v13, %v1916_v46  ;;  %v1838_v38 = vadd.f32 %v1837_v3, %v1835_v26  ;;  %v1873_v41 = vld [vmem:[#allocation3 + $0xd7] ss:$0 sm:$0xff]  ;;  %v2831_v8 = vld [vmem:[#allocation3 + $0xac] ss:$0 sm:$0xff] }
 0x228   :  { %3967 = vpow2.f32 %v2987_v5  ;;  %v1857_v18 = vadd.f32 %v1856_v35, %v1854_v20  ;;  %v1859_v59 = vmul.f32 %v5118_v1, %v1858_v15  ;;  %v1900_v45 = vadd.f32 %v5470_v51, %v1897_v9  ;;  %v2822_v51 = vld [vmem:[#allocation3 + $0xa9] ss:$0 sm:$0xff]  ;;  %v2837_v46 = vld [vmem:[#allocation3 + $0xae] ss:$0 sm:$0xff]  ;;  %v2840_v39 = vld [vmem:[#allocation3 + $0xaf] ss:$0 sm:$0xff] }
 0x229   :  { %3969 = vpow2.f32 %v2990_v32  ;;  %v1849_v4 = vmul.f32 %v5147_v37, %v1848_v22  ;;  %v1862_v54 = vmul.f32 %v5124_v43, %v1861_v23  ;;  %v1922_v62 = vadd.f32 %v5486_v30, %v1919_v50  ;;  %v1867_v43 = vld [vmem:[#allocation3 + $0xd5] ss:$0 sm:$0xff]  ;;  %v2834_v32 = vld [vmem:[#allocation3 + $0xad] ss:$0 sm:$0xff]  ;;  %v2845_v26 = vld [vmem:[#allocation3 + $0xb8] ss:$0 sm:$0xff] }
 0x22a   :  { %3971 = vpow2.f32 %v2993_v29  ;;  %v1841_v2 = vadd.f32 %v1840_v42, %v1838_v38  ;;  %v1860_v13 = vadd.f32 %v1859_v59, %v1857_v18  ;;  %v1865_v3 = vmul.f32 %v5133_v25, %v1864_v61  ;;  %v2850_v18 = vld [vmem:[#allocation3 + $0xba] ss:$0 sm:$0xff]  ;;  %v3059_v23 = vld [vmem:[#allocation3 + $0xe8] ss:$0 sm:$0xff] }
 0x22b   :  { %3973 = vpow2.f32 %v2996_v57  ;;  %v2762_v1 = vadd.f32 %v5481_v58, %v5476_v60  ;;  %v2821_v12 = vmul.f32 %v5476_v60, %v2820_v36  ;;  %v2823_v30 = vmul.f32 %v5481_v58, %v2822_v51  ;;  %v3086_v51 = vld [vmem:[#allocation3 + $0xf9] ss:$0 sm:$0xff] }
 0x22c   :  { %3975 = vpow2.f32 %v2999_v56  ;;  %v1844_v33 = vadd.f32 %v1843_v28, %v1841_v2  ;;  %v1863_v6 = vadd.f32 %v1862_v54, %v1860_v13  ;;  %v1868_v42 = vmul.f32 %v5135_v0, %v1867_v43  ;;  %v2828_v28 = vld [vmem:[#allocation3 + $0xab] ss:$0 sm:$0xff]  ;;  %v2847_v56 = vld [vmem:[#allocation3 + $0xb9] ss:$0 sm:$0xff]  ;;  %v3084_v54 = vld [vmem:[#allocation3 + $0xf8] ss:$0 sm:$0xff] }
 0x22d   :  { %v1871_v47 = vmul.f32 %v5141_v16, %v1870_v21  ;;  %v5533_v25 = vmul.f32 %v5147_v37, %v1873_v41  ;;  %v2763_v34 = vadd.f32 %v5491_v19, %v2762_v1  ;;  %v1925_v10 = vadd.f32 %v5489_v31, %v1922_v62  ;;  %v3009_v13 = vld [vmem:[#allocation3 + $0xc8] ss:$0 sm:$0xff]  ;;  %v3061_v1 = vld [vmem:[#allocation3 + $0xe9] ss:$0 sm:$0xff] }
 0x22e   :  { %v1847_v17 = vadd.f32 %v1846_v7, %v1844_v33  ;;  %v1866_v5 = vadd.f32 %v1865_v3, %v1863_v6  ;;  %v2824_v9 = vadd.f32 %v2823_v30, %v2821_v12  ;;  %v2826_v0 = vmul.f32 %v5491_v19, %v2825_v63  ;;  %v3011_v6 = vld [vmem:[#allocation3 + $0xc9] ss:$0 sm:$0xff]  ;;  %v3064_v30 = vld [vmem:[#allocation3 + $0xea] ss:$0 sm:$0xff] }
 0x22f   :  { %v2764_v29 = vadd.f32 %v5496_v55, %v2763_v34  ;;  %v2829_v16 = vmul.f32 %v5496_v55, %v2828_v28  ;;  %v5541_v37 = vmul.f32 %v5500_v48, %v2831_v8  ;;  %v5546_v31 = vmul.f32 %v5506_v11, %v2834_v32 }
 0x230   :  { %v5543_v20 = vpop.eup %3959  ;;  %v5549_v7 = vmul.f32 %v5512_v49, %v2837_v46  ;;  %v5552_v35 = vmul.f32 %v5514_v14, %v2840_v39  ;;  %v2846_v57 = vmul.f32 %v5476_v60, %v2845_v26  ;;  %v1850_v50 = vadd.f32 %v1849_v4, %v1847_v17  ;;  %v3089_v17 = vld [vmem:[#allocation3 + $0xfa] ss:$0 sm:$0xff]  ;;  %v3014_v26 = vld [vmem:[#allocation3 + $0xca] ss:$0 sm:$0xff] }
 0x231   :  { %v1869_v15 = vadd.f32 %v1868_v42, %v1866_v5  ;;  %v2827_v38 = vadd.f32 %v2826_v0, %v2824_v9  ;;  %v2848_v22 = vmul.f32 %v5481_v58, %v2847_v56  ;;  %v5557_v62 = vmul.f32 %v5543_v20, %v1900_v45  ;;  %v3067_v0 = vld [vmem:[#allocation3 + $0xeb] ss:$0 sm:$0xff] }
 0x232   :  { %v3962_v59 = vpop.eup %3961  ;;  %v5560_v2 = vmul.f32 %v5543_v20, %v1925_v10  ;;  %v5563_v61 = vadd.f32 %v5500_v48, %v2764_v29  ;;  %v5566_v4 = vmul.f32 %v5491_v19, %v2850_v18  ;;  %v5571_v45 = vmul.f32 %v5543_v20, %v1850_v50 }
 0x233   :  { %v5568_v36 = vpop.eup %3963  ;;  %v3060_v3 = vmul.f32 %v3962_v59, %v3059_v23  ;;  %v3085_v12 = vmul.f32 %v3962_v59, %v3084_v54  ;;  %v3010_v33 = vmul.f32 %v3962_v59, %v3009_v13  ;;  %v5582_v5 = vadd.f32 %v1871_v47, %v1869_v15  ;;  %v3092_v47 = vld [vmem:[#allocation3 + $0xfb] ss:$0 sm:$0xff]  ;;  %v3070_v23 = vld [vmem:[#allocation3 + $0xec] ss:$0 sm:$0xff] }
 0x234   :  { %v5573_v43 = vpop.eup %3965  ;;  %v3001_v21 = vadd.f32 %v5568_v36, %v3962_v59  ;;  %v3062_v41 = vmul.f32 %v5568_v36, %v3061_v1  ;;  %v3087_v42 = vmul.f32 %v5568_v36, %v3086_v51  ;;  %v3012_v34 = vmul.f32 %v5568_v36, %v3011_v6  ;;  %v3034_v1 = vld [vmem:[#allocation3 + $0xd8] ss:$0 sm:$0xff]  ;;  %v3073_v6 = vld [vmem:[#allocation3 + $0xed] ss:$0 sm:$0xff] }
 0x235   :  { %v5579_v63 = vpop.eup %3967  ;;  %v3065_v10 = vmul.f32 %v5573_v43, %v3064_v30  ;;  %v5584_v9 = vadd.f32 %v2829_v16, %v2827_v38  ;;  %v5586_v28 = vadd.f32 %v2848_v22, %v2846_v57  ;;  %v3090_v39 = vmul.f32 %v5573_v43, %v3089_v17 }
 0x236   :  { %v5588_v8 = vpop.eup %3969  ;;  %v3002_v32 = vadd.f32 %v5573_v43, %v3001_v21  ;;  %v3063_v29 = vadd.f32 %v3062_v41, %v3060_v3  ;;  %v3088_v46 = vadd.f32 %v3087_v42, %v3085_v12  ;;  %v3068_v50 = vmul.f32 %v5579_v63, %v3067_v0  ;;  %v3095_v3 = vld [vmem:[#allocation3 + $0xfc] ss:$0 sm:$0xff]  ;;  %v3076_v21 = vld [vmem:[#allocation3 + $0xee] ss:$0 sm:$0xff]  ;;  %v3017_v0 = vld [vmem:[#allocation3 + $0xcb] ss:$0 sm:$0xff] }
 0x237   :  { %v5592_v56 = vpop.eup %3971  ;;  %v3013_v57 = vadd.f32 %v3012_v34, %v3010_v33  ;;  %v3015_v15 = vmul.f32 %v5573_v43, %v3014_v26  ;;  %v3093_v13 = vmul.f32 %v5579_v63, %v3092_v47  ;;  %v3071_v51 = vmul.f32 %v5588_v8, %v3070_v23 }
 0x238   :  { %v5598_v38 = vpop.eup %3973  ;;  %v3003_v22 = vadd.f32 %v5579_v63, %v3002_v32  ;;  %v3066_v18 = vadd.f32 %v3065_v10, %v3063_v29  ;;  %v3091_v54 = vadd.f32 %v3090_v39, %v3088_v46  ;;  %v3096_v33 = vmul.f32 %v5588_v8, %v3095_v3  ;;  %v3098_v32 = vld [vmem:[#allocation3 + $0xfd] ss:$0 sm:$0xff]  ;;  %v3101_v29 = vld [vmem:[#allocation3 + $0xfe] ss:$0 sm:$0xff]  ;;  %v3079_v39 = vld [vmem:[#allocation3 + $0xef] ss:$0 sm:$0xff] }
 0x239   :  { %v3976_v12 = vpop.eup %3975  ;;  %v3016_v41 = vadd.f32 %v3015_v15, %v3013_v57  ;;  %v3035_v30 = vmul.f32 %v3962_v59, %v3034_v1  ;;  %v3074_v10 = vmul.f32 %v5592_v56, %v3073_v6  ;;  %v3077_v46 = vmul.f32 %v5598_v38, %v3076_v21  ;;  %v3023_v6 = vld [vmem:[#allocation3 + $0xcd] ss:$0 sm:$0xff] }
 0x23a   :  { %v3004_v42 = vadd.f32 %v5588_v8, %v3003_v22  ;;  %v3069_v34 = vadd.f32 %v3068_v50, %v3066_v18  ;;  %v3094_v17 = vadd.f32 %v3093_v13, %v3091_v54  ;;  %v3099_v26 = vmul.f32 %v5592_v56, %v3098_v32  ;;  %v3104_v22 = vld [vmem:[#allocation3 + $0xff] ss:$0 sm:$0xff]  ;;  %v3020_v18 = vld [vmem:[#allocation3 + $0xcc] ss:$0 sm:$0xff]  ;;  %v3036_v54 = vld [vmem:[#allocation3 + $0xd9] ss:$0 sm:$0xff] }
 0x23b   :  { %v3102_v47 = vmul.f32 %v5598_v38, %v3101_v29  ;;  %v3018_v23 = vmul.f32 %v5579_v63, %v3017_v0  ;;  %v3080_v15 = vmul.f32 %v3976_v12, %v3079_v39  ;;  %v3105_v13 = vmul.f32 %v3976_v12, %v3104_v22 }
 0x23c   :  { %v3005_v59 = vadd.f32 %v5592_v56, %v3004_v42  ;;  %v3072_v57 = vadd.f32 %v3071_v51, %v3069_v34  ;;  %v3097_v50 = vadd.f32 %v3096_v33, %v3094_v17  ;;  %v3021_v1 = vmul.f32 %v5588_v8, %v3020_v18  ;;  %v3026_v42 = vld [vmem:[#allocation3 + $0xce] ss:$0 sm:$0xff]  ;;  %v3039_v51 = vld [vmem:[#allocation3 + $0xda] ss:$0 sm:$0xff]  ;;  %v3029_v17 = vld [vmem:[#allocation3 + $0xcf] ss:$0 sm:$0xff] }
 0x23d   :  { %v3019_v3 = vadd.f32 %v3018_v23, %v3016_v41  ;;  %v3037_v21 = vmul.f32 %v5568_v36, %v3036_v54  ;;  %v3024_v0 = vmul.f32 %v5592_v56, %v3023_v6  ;;  %v3027_v33 = vmul.f32 %v5598_v38, %v3026_v42  ;;  %v3042_v23 = vld [vmem:[#allocation3 + $0xdb] ss:$0 sm:$0xff]  ;;  %v2859_v42 = vld [vmem:[#allocation3 + $0xbd] ss:$0 sm:$0xff] }
 0x23e   :  { %v3006_v32 = vadd.f32 %v5598_v38, %v3005_v59  ;;  %v3075_v29 = vadd.f32 %v3074_v10, %v3072_v57  ;;  %v3100_v16 = vadd.f32 %v3099_v26, %v3097_v50  ;;  %v3040_v41 = vmul.f32 %v5573_v43, %v3039_v51  ;;  %v3045_v59 = vld [vmem:[#allocation3 + $0xdc] ss:$0 sm:$0xff]  ;;  %v3048_v10 = vld [vmem:[#allocation3 + $0xdd] ss:$0 sm:$0xff]  ;;  %v3054_v43 = vld [vmem:[#allocation3 + $0xdf] ss:$0 sm:$0xff] }
 0x23f   :  { %v3022_v34 = vadd.f32 %v3021_v1, %v3019_v3  ;;  %v3038_v39 = vadd.f32 %v3037_v21, %v3035_v30  ;;  %v3030_v27 = vmul.f32 %v3976_v12, %v3029_v17  ;;  %v3043_v36 = vmul.f32 %v5579_v63, %v3042_v23  ;;  %v3051_v3 = vld [vmem:[#allocation3 + $0xde] ss:$0 sm:$0xff]  ;;  %v1641_v17 = vld [vmem:[#allocation3 + $0xa1] ss:$0 sm:$0xff] }
 0x240   :  { %v3007_v22 = vadd.f32 %v3976_v12, %v3006_v32  ;;  %v3078_v18 = vadd.f32 %v3077_v46, %v3075_v29  ;;  %v3046_v50 = vmul.f32 %v5588_v8, %v3045_v59  ;;  %v3049_v54 = vmul.f32 %v5592_v56, %v3048_v10  ;;  %v2853_v8 = vld [vmem:[#allocation3 + $0xbb] ss:$0 sm:$0xff]  ;;  %v1644_v59 = vld [vmem:[#allocation3 + $0xa2] ss:$0 sm:$0xff] }
 0x241   :  { %v3025_v26 = vadd.f32 %v3024_v0, %v3022_v34  ;;  %v3041_v57 = vadd.f32 %v3040_v41, %v3038_v39  ;;  %v3103_v1 = vadd.f32 %v3102_v47, %v3100_v16  ;;  %v3052_v30 = vmul.f32 %v5598_v38, %v3051_v3  ;;  %v6057_v34 = vld [vmem:[#allocation42_spill] sm:$0xff] }
 0x242   :  { %3977 = vrcp.f32 %v3007_v22  ;;  %v2766_v46 = vadd.f32 %v5506_v11, %v5563_v61  ;;  %v3055_v21 = vmul.f32 %v3976_v12, %v3054_v43  ;;  %v1875_v63 = vadd.f32 %v5533_v25, %v5582_v5  ;;  %v2856_v5 = vld [vmem:[#allocation3 + $0xbc] ss:$0 sm:$0xff]  ;;  %v1647_v3 = vld [vmem:[#allocation3 + $0xa3] ss:$0 sm:$0xff] }
 0x243   :  { %v3044_v6 = vadd.f32 %v3043_v36, %v3041_v57  ;;  %v2833_v32 = vadd.f32 %v5541_v37, %v5584_v9  ;;  %v5627_v29 = vadd.f32 %v3080_v15, %v3078_v18  ;;  %v2852_v16 = vadd.f32 %v5566_v4, %v5586_v28  ;;  %v2862_v18 = vld [vmem:[#allocation3 + $0xbe] ss:$0 sm:$0xff]  ;;  %v2865_v57 = vld [vmem:[#allocation3 + $0xbf] ss:$0 sm:$0xff] }
 0x244   :  { %v2767_v56 = vadd.f32 %v5512_v49, %v2766_v46  ;;  %v2854_v38 = vmul.f32 %v5496_v55, %v2853_v8  ;;  %v3028_v47 = vadd.f32 %v3027_v33, %v3025_v26  ;;  %v5634_v12 = vmul.f32 %v5543_v20, %v1875_v63  ;;  %v1639_v20 = vld [vmem:[#allocation3 + $0xa0] ss:$0 sm:$0xff]  ;;  %v1664_v63 = vld [vmem:[#allocation3 + $0xb0] ss:$0 sm:$0xff] }
 0x245   :  { %v3047_v61 = vadd.f32 %v3046_v50, %v3044_v6  ;;  %v2836_v25 = vadd.f32 %v5546_v31, %v2833_v32  ;;  %v3106_v0 = vadd.f32 %v3105_v13, %v3103_v1  ;;  %v2857_v15 = vmul.f32 %v5500_v48, %v2856_v5  ;;  %v1650_v6 = vld [vmem:[#allocation3 + $0xa4] ss:$0 sm:$0xff] }
 0x246   :  { %v2768_v37 = vadd.f32 %v5514_v14, %v2767_v56  ;;  %v2855_v9 = vadd.f32 %v2854_v38, %v2852_v16  ;;  %v2860_v28 = vmul.f32 %v5506_v11, %v2859_v42  ;;  %v1581_v33 = vadd.f32 %v6057_v34, %v4863_v44  ;;  %v6060_v56 = vld [vmem:[#allocation45_spill] sm:$0xff]  ;;  %v1653_v38 = vld [vmem:[#allocation3 + $0xa5] ss:$0 sm:$0xff] }
 0x247   :  { %v3050_v51 = vadd.f32 %v3049_v54, %v3047_v61  ;;  %v2839_v4 = vadd.f32 %v5549_v7, %v2836_v25  ;;  %v1640_v13 = vmul.f32 %v4863_v44, %v1639_v20  ;;  %v1642_v39 = vmul.f32 %v6057_v34, %v1641_v17  ;;  %v6058_v7 = vld [vmem:[#allocation43_spill] sm:$0xff]  ;;  %v1666_v61 = vld [vmem:[#allocation3 + $0xb1] ss:$0 sm:$0xff]  ;;  %v6061_v5 = vld [vmem:[#allocation46_spill] sm:$0xff] }
 0x248   :  { %3979 = vrcp.f32 %v2768_v37  ;;  %v2858_v31 = vadd.f32 %v2857_v15, %v2855_v9  ;;  %v3031_v41 = vadd.f32 %v3030_v27, %v3028_v47  ;;  %v3169_v22 = vpack.c.bf16 %v5634_v12, %v5571_v45  ;;  %v1656_v9 = vld [vmem:[#allocation3 + $0xa6] ss:$0 sm:$0xff]  ;;  %v1659_v15 = vld [vmem:[#allocation3 + $0xa7] ss:$0 sm:$0xff]  ;;  %v6063_v20 = vld [vmem:[#allocation48_spill] sm:$0xff] }
 0x249   :  { %v3053_v23 = vadd.f32 %v3052_v30, %v3050_v51  ;;  %v1582_v36 = vadd.f32 %v6058_v7, %v1581_v33  ;;  %v2863_v26 = vmul.f32 %v5512_v49, %v2862_v18  ;;  %v1643_v50 = vadd.f32 %v1642_v39, %v1640_v13  ;;  %v6059_v30 = vld [vmem:[#allocation44_spill] sm:$0xff] }
 0x24a   :  { %v2861_v10 = vadd.f32 %v2860_v28, %v2858_v31  ;;  %v1645_v54 = vmul.f32 %v6058_v7, %v1644_v59  ;;  %v5651_v1 = vadd.f32 %v5552_v35, %v2839_v4  ;;  %v2866_v27 = vmul.f32 %v5514_v14, %v2865_v57  ;;  %v1669_v51 = vld [vmem:[#allocation3 + $0xb2] ss:$0 sm:$0xff]  ;;  %v6062_v28 = vld [vmem:[#allocation47_spill] sm:$0xff]  ;;  %v1672_v13 = vld [vmem:[#allocation3 + $0xb3] ss:$0 sm:$0xff] }
 0x24b   :  { %v1583_v43 = vadd.f32 %v6059_v30, %v1582_v36  ;;  %v1648_v46 = vmul.f32 %v6059_v30, %v1647_v3  ;;  %v1651_v16 = vmul.f32 %v6060_v56, %v1650_v6  ;;  %v1665_v47 = vmul.f32 %v4863_v44, %v1664_v63  ;;  %v1678_v6 = vld [vmem:[#allocation3 + $0xb5] ss:$0 sm:$0xff] }
 0x24c   :  { %v2864_v32 = vadd.f32 %v2863_v26, %v2861_v10  ;;  %v1646_v8 = vadd.f32 %v1645_v54, %v1643_v50  ;;  %v3056_v25 = vadd.f32 %v3055_v21, %v3053_v23  ;;  %v1654_v37 = vmul.f32 %v6061_v5, %v1653_v38  ;;  %v2770_v50 = vld [vmem:[#allocation3 + $0x88] ss:$0 sm:$0xff] }
 0x24d   :  { %v1584_v35 = vadd.f32 %v6060_v56, %v1583_v43  ;;  %v1667_v42 = vmul.f32 %v6057_v34, %v1666_v61  ;;  %v1657_v33 = vmul.f32 %v6062_v28, %v1656_v9  ;;  %v5663_v17 = vmul.f32 %v6063_v20, %v1659_v15 }
 0x24e   :  { %v1649_v4 = vadd.f32 %v1648_v46, %v1646_v8  ;;  %v1670_v31 = vmul.f32 %v6058_v7, %v1669_v51  ;;  %v2867_v21 = vadd.f32 %v2866_v27, %v2864_v32  ;;  %v1673_v36 = vmul.f32 %v6059_v30, %v1672_v13  ;;  %v1675_v46 = vld [vmem:[#allocation3 + $0xb4] ss:$0 sm:$0xff]  ;;  %v2772_v27 = vld [vmem:[#allocation3 + $0x89] ss:$0 sm:$0xff] }
 0x24f   :  { %v3978_v39 = vpop.eup %3977  ;;  %v1585_v23 = vadd.f32 %v6061_v5, %v1584_v35  ;;  %v1668_v18 = vadd.f32 %v1667_v42, %v1665_v47  ;;  %v2771_v63 = vmul.f32 %v5476_v60, %v2770_v50  ;;  %v1676_v8 = vmul.f32 %v6060_v56, %v1675_v46  ;;  %v1681_v47 = vld [vmem:[#allocation3 + $0xb6] ss:$0 sm:$0xff]  ;;  %v2775_v35 = vld [vmem:[#allocation3 + $0x8a] ss:$0 sm:$0xff] }
 0x250   :  { %v3082_v59 = vmul.f32 %v3978_v39, %v5627_v29  ;;  %v3107_v10 = vmul.f32 %v3978_v39, %v3106_v0  ;;  %v3032_v26 = vmul.f32 %v3978_v39, %v3031_v41  ;;  %v3057_v57 = vmul.f32 %v3978_v39, %v3056_v25  ;;  %v1684_v25 = vld [vmem:[#allocation3 + $0xb7] ss:$0 sm:$0xff] }
 0x251   :  { %v1586_v54 = vadd.f32 %v6062_v28, %v1585_v23  ;;  %v1652_v3 = vadd.f32 %v1651_v16, %v1649_v4  ;;  %v1671_v43 = vadd.f32 %v1670_v31, %v1668_v18  ;;  %v1679_v38 = vmul.f32 %v6061_v5, %v1678_v6  ;;  %v2778_v4 = vld [vmem:[#allocation3 + $0x8b] ss:$0 sm:$0xff]  ;;  %v2795_v18 = vld [vmem:[#allocation3 + $0x98] ss:$0 sm:$0xff] }
 0x252   :  { %v3172_v32 = vpack.c.bf16 %v3107_v10, %v3082_v59  ;;  %v2773_v29 = vmul.f32 %v5481_v58, %v2772_v27  ;;  %v1682_v16 = vmul.f32 %v6062_v28, %v1681_v47  ;;  %v3170_v9 = vpack.c.bf16 %v3057_v57, %v3032_v26  ;;  %v2781_v26 = vld [vmem:[#allocation3 + $0x8c] ss:$0 sm:$0xff]  ;;  %v2784_v57 = vld [vmem:[#allocation3 + $0x8d] ss:$0 sm:$0xff]  ;;  %v2800_v27 = vld [vmem:[#allocation3 + $0x9a] ss:$0 sm:$0xff] }
 0x253   :  { %v1587_v0 = vadd.f32 %v6063_v20, %v1586_v54  ;;  %v1655_v41 = vadd.f32 %v1654_v37, %v1652_v3  ;;  %v1674_v61 = vadd.f32 %v1673_v36, %v1671_v43  ;;  %v1685_v15 = vmul.f32 %v6063_v20, %v1684_v25  ;;  %v2797_v54 = vld [vmem:[#allocation3 + $0x99] ss:$0 sm:$0xff]  ;;  %v2787_v3 = vld [vmem:[#allocation3 + $0x8e] ss:$0 sm:$0xff]  ;;  %v2790_v43 = vld [vmem:[#allocation3 + $0x8f] ss:$0 sm:$0xff] }
 0x254   :  { %3221 = vmatprep.subr.bf16.mxu0 %v3172_v32  ;;  %v2774_v42 = vadd.f32 %v2773_v29, %v2771_v63  ;;  %v2776_v51 = vmul.f32 %v5491_v19, %v2775_v35  ;;  %v6064_v13 = vpack.c.bf16 %v5560_v2, %v5557_v62  ;;  %v2779_v23 = vmul.f32 %v5496_v55, %v2778_v4  ;;  %v2803_v47 = vld [vmem:[#allocation3 + $0x9b] ss:$0 sm:$0xff]  ;;  %v1589_v29 = vld [vmem:[#allocation3 + $0x80] ss:$0 sm:$0xff]  ;;  %v2809_v25 = vld [vmem:[#allocation3 + $0x9d] ss:$0 sm:$0xff] }
 0x255   :  { %v5678_v31 = vpop.eup %3979  ;;  %3981 = vrcp.f32 %v1587_v0  ;;  %v1658_v37 = vadd.f32 %v1657_v33, %v1655_v41  ;;  %v1677_v39 = vadd.f32 %v1676_v8, %v1674_v61  ;;  %v2796_v50 = vmul.f32 %v5476_v60, %v2795_v18  ;;  %v2806_v61 = vld [vmem:[#allocation3 + $0x9c] ss:$0 sm:$0xff]  ;;  %v2812_v35 = vld [vmem:[#allocation3 + $0x9e] ss:$0 sm:$0xff] }
 0x256   :  { %3222 = vmatpush1.bf16.msra.mxu0 %v6064_v13  ;;  %v2843_v36 = vmul.f32 %v5678_v31, %v5651_v1  ;;  %v2868_v59 = vmul.f32 %v5678_v31, %v2867_v21  ;;  %v2777_v10 = vadd.f32 %v2776_v51, %v2774_v42  ;;  %v2782_v2 = vmul.f32 %v5500_v48, %v2781_v26  ;;  %v1594_v42 = vld [vmem:[#allocation3 + $0x82] ss:$0 sm:$0xff] }
 0x257   :  { %3223 = vmatprep.subr.bf16.mxu0 %v3170_v9  ;;  %v1680_v62 = vadd.f32 %v1679_v38, %v1677_v39  ;;  %v2785_v33 = vmul.f32 %v5506_v11, %v2784_v57  ;;  %v2798_v46 = vmul.f32 %v5481_v58, %v2797_v54  ;;  %v2788_v1 = vmul.f32 %v5512_v49, %v2787_v3  ;;  %v1591_v58 = vld [vmem:[#allocation3 + $0x81] ss:$0 sm:$0xff]  ;;  %v1614_v39 = vld [vmem:[#allocation3 + $0x90] ss:$0 sm:$0xff]  ;;  %v1603_v57 = vld [vmem:[#allocation3 + $0x85] ss:$0 sm:$0xff] }
 0x258   :  { %v3168_v6 = vpack.c.bf16 %v2868_v59, %v2843_v36  ;;  %v2780_v63 = vadd.f32 %v2779_v23, %v2777_v10  ;;  %v2791_v21 = vmul.f32 %v5514_v14, %v2790_v43  ;;  %v1661_v60 = vadd.f32 %v5663_v17, %v1658_v37  ;;  %v1597_v37 = vld [vmem:[#allocation3 + $0x83] ss:$0 sm:$0xff]  ;;  %v1600_v59 = vld [vmem:[#allocation3 + $0x84] ss:$0 sm:$0xff]  ;;  %v1619_v54 = vld [vmem:[#allocation3 + $0x92] ss:$0 sm:$0xff] }
 0x259   :  { %v1683_v32 = vadd.f32 %v1682_v16, %v1680_v62  ;;  %v2799_v8 = vadd.f32 %v2798_v46, %v2796_v50  ;;  %v2801_v38 = vmul.f32 %v5491_v19, %v2800_v27  ;;  %v2804_v41 = vmul.f32 %v5496_v55, %v2803_v47  ;;  %v2815_v16 = vld [vmem:[#allocation3 + $0x9f] ss:$0 sm:$0xff]  ;;  %v1606_v50 = vld [vmem:[#allocation3 + $0x86] ss:$0 sm:$0xff]  ;;  %v1622_v3 = vld [vmem:[#allocation3 + $0x93] ss:$0 sm:$0xff] }
 0x25a   :  { %3224 = vmatpush1.bf16.msra.mxu0 %v3169_v22  ;;  %v2783_v0 = vadd.f32 %v2782_v2, %v2780_v63  ;;  %v1590_v9 = vmul.f32 %v4863_v44, %v1589_v29  ;;  %v1592_v45 = vmul.f32 %v6057_v34, %v1591_v58  ;;  %v2807_v22 = vmul.f32 %v5500_v48, %v2806_v61  ;;  %v1625_v43 = vld [vmem:[#allocation3 + $0x94] ss:$0 sm:$0xff]  ;;  %v2581_v27 = vld [vmem:[#allocation3 + $0x68] ss:$0 sm:$0xff]  ;;  %v2583_v47 = vld [vmem:[#allocation3 + $0x69] ss:$0 sm:$0xff] }
 0x25b   :  { %3225 = vmatprep.subr.bf16.mxu0 %v3168_v6  ;;  %v2802_v12 = vadd.f32 %v2801_v38, %v2799_v8  ;;  %v2810_v17 = vmul.f32 %v5506_v11, %v2809_v25  ;;  %v2813_v19 = vmul.f32 %v5512_v49, %v2812_v35  ;;  %v2816_v4 = vmul.f32 %v5514_v14, %v2815_v16  ;;  %v1616_v11 = vld [vmem:[#allocation3 + $0x91] ss:$0 sm:$0xff]  ;;  %v2586_v25 = vld [vmem:[#allocation3 + $0x6a] ss:$0 sm:$0xff] }
 0x25c   :  { %v2786_v51 = vadd.f32 %v2785_v33, %v2783_v0  ;;  %v1593_v55 = vadd.f32 %v1592_v45, %v1590_v9  ;;  %v1595_v13 = vmul.f32 %v6058_v7, %v1594_v42  ;;  %v1686_v23 = vadd.f32 %v1685_v15, %v1683_v32  ;;  %v2589_v42 = vld [vmem:[#allocation3 + $0x6b] ss:$0 sm:$0xff] }
 0x25d   :  { %v2805_v18 = vadd.f32 %v2804_v41, %v2802_v12  ;;  %v1598_v36 = vmul.f32 %v6059_v30, %v1597_v37  ;;  %v1615_v48 = vmul.f32 %v4863_v44, %v1614_v39  ;;  %v1601_v26 = vmul.f32 %v6060_v56, %v1600_v59  ;;  %v6065_v59 = vld [vmem:[#allocation57_spill] sm:$0xff] }
 0x25e   :  { %v2789_v10 = vadd.f32 %v2788_v1, %v2786_v51  ;;  %v1596_v49 = vadd.f32 %v1595_v13, %v1593_v55  ;;  %v1617_v14 = vmul.f32 %v6057_v34, %v1616_v11  ;;  %v1604_v2 = vmul.f32 %v6061_v5, %v1603_v57  ;;  %v1628_v1 = vld [vmem:[#allocation3 + $0x95] ss:$0 sm:$0xff]  ;;  %v1631_v13 = vld [vmem:[#allocation3 + $0x96] ss:$0 sm:$0xff]  ;;  %v2606_v57 = vld [vmem:[#allocation3 + $0x78] ss:$0 sm:$0xff] }
 0x25f   :  { %v2808_v62 = vadd.f32 %v2807_v22, %v2805_v18  ;;  %v1607_v15 = vmul.f32 %v6062_v28, %v1606_v50  ;;  %v1620_v33 = vmul.f32 %v6058_v7, %v1619_v54  ;;  %v1623_v6 = vmul.f32 %v6059_v30, %v1622_v3  ;;  %v2608_v50 = vld [vmem:[#allocation3 + $0x79] ss:$0 sm:$0xff]  ;;  %v6066_v54 = vld [vmem:[#allocation58_spill] sm:$0xff] }
 0x260   :  { %v1599_v44 = vadd.f32 %v1598_v36, %v1596_v49  ;;  %v1618_v46 = vadd.f32 %v1617_v14, %v1615_v48  ;;  %v1626_v63 = vmul.f32 %v6060_v56, %v1625_v43  ;;  %v1629_v34 = vmul.f32 %v6061_v5, %v1628_v1  ;;  %v1634_v36 = vld [vmem:[#allocation3 + $0x97] ss:$0 sm:$0xff]  ;;  %v2592_v48 = vld [vmem:[#allocation3 + $0x6c] ss:$0 sm:$0xff]  ;;  %v2601_v1 = vld [vmem:[#allocation3 + $0x6f] ss:$0 sm:$0xff] }
 0x261   :  { %v2811_v32 = vadd.f32 %v2810_v17, %v2808_v62  ;;  %v2523_v8 = vadd.f32 %v5371_v24, %v5363_v40  ;;  %v2582_v38 = vmul.f32 %v5363_v40, %v2581_v27  ;;  %v2792_v29 = vadd.f32 %v2791_v21, %v2789_v10 }
 0x262   :  { %v5719_v7 = vpop.eup %3981  ;;  %v1602_v58 = vadd.f32 %v1601_v26, %v1599_v44  ;;  %v1621_v0 = vadd.f32 %v1620_v33, %v1618_v46  ;;  %v2584_v30 = vmul.f32 %v5371_v24, %v2583_v47  ;;  %v2587_v12 = vmul.f32 %v5387_v53, %v2586_v25  ;;  %v2598_v44 = vld [vmem:[#allocation3 + $0x6e] ss:$0 sm:$0xff]  ;;  %v6068_v47 = vld [vmem:[#allocation60_spill] sm:$0xff]  ;;  %v1400_v25 = vld [vmem:[#allocation3 + $0x60] ss:$0 sm:$0xff] }
 0x263   :  { %v1662_v56 = vmul.f32 %v5719_v7, %v1661_v60  ;;  %v1687_v41 = vmul.f32 %v5719_v7, %v1686_v23  ;;  %v2814_v61 = vadd.f32 %v2813_v19, %v2811_v32  ;;  %v2524_v5 = vadd.f32 %v5387_v53, %v2523_v8  ;;  %v1609_v60 = vld [vmem:[#allocation3 + $0x87] ss:$0 sm:$0xff]  ;;  %v6067_v46 = vld [vmem:[#allocation59_spill] sm:$0xff] }
 0x264   :  { %v1605_v35 = vadd.f32 %v1604_v2, %v1602_v58  ;;  %v1624_v9 = vadd.f32 %v1623_v6, %v1621_v0  ;;  %v2585_v45 = vadd.f32 %v2584_v30, %v2582_v38  ;;  %v2793_v21 = vmul.f32 %v5678_v31, %v2792_v29  ;;  %v2614_v58 = vld [vmem:[#allocation3 + $0x7b] ss:$0 sm:$0xff] }
 0x265   :  { %v3167_v22 = vpack.c.bf16 %v1687_v41, %v1662_v56  ;;  %v2817_v17 = vadd.f32 %v2816_v4, %v2814_v61  ;;  %v2525_v16 = vadd.f32 %v5393_v52, %v2524_v5  ;;  %v2590_v37 = vmul.f32 %v5393_v52, %v2589_v42  ;;  %v6069_v41 = vld [vmem:[#allocation34_spill] sm:$0xff]  ;;  %v6070_v61 = vld [vmem:[#allocation35_spill] sm:$0xff]  ;;  %v6071_v42 = vld [vmem:[#allocation36_spill] sm:$0xff] }
 0x266   :  { %v1608_v51 = vadd.f32 %v1607_v15, %v1605_v35  ;;  %v1627_v55 = vadd.f32 %v1626_v63, %v1624_v9  ;;  %v2588_v19 = vadd.f32 %v2587_v12, %v2585_v45  ;;  %v1610_v23 = vmul.f32 %v6063_v20, %v1609_v60  ;;  %v1402_v35 = vld [vmem:[#allocation3 + $0x61] ss:$0 sm:$0xff]  ;;  %v2617_v12 = vld [vmem:[#allocation3 + $0x7c] ss:$0 sm:$0xff]  ;;  %v1405_v60 = vld [vmem:[#allocation3 + $0x62] ss:$0 sm:$0xff] }
 0x267   :  { %3226 = vmatpush1.bf16.msra.mxu0 %v3167_v22  ;;  %v2818_v39 = vmul.f32 %v5678_v31, %v2817_v17  ;;  %v1632_v18 = vmul.f32 %v6062_v28, %v1631_v13  ;;  %v2526_v4 = vadd.f32 %v6065_v59, %v2525_v16  ;;  %v1635_v10 = vmul.f32 %v6063_v20, %v1634_v36  ;;  %v2595_v31 = vld [vmem:[#allocation3 + $0x6d] ss:$0 sm:$0xff]  ;;  %v2611_v20 = vld [vmem:[#allocation3 + $0x7a] ss:$0 sm:$0xff] }
 0x268   :  { %v1630_v11 = vadd.f32 %v1629_v34, %v1627_v55  ;;  %v2591_v49 = vadd.f32 %v2590_v37, %v2588_v19  ;;  %v2593_v26 = vmul.f32 %v6065_v59, %v2592_v48  ;;  %v2607_v2 = vmul.f32 %v5363_v40, %v2606_v57  ;;  %v2620_v19 = vld [vmem:[#allocation3 + $0x7d] ss:$0 sm:$0xff]  ;;  %v2623_v37 = vld [vmem:[#allocation3 + $0x7e] ss:$0 sm:$0xff] }
 0x269   :  { %v3166_v14 = vpack.c.bf16 %v2818_v39, %v2793_v21  ;;  %v2527_v62 = vadd.f32 %v6066_v54, %v2526_v4  ;;  %v2609_v28 = vmul.f32 %v5371_v24, %v2608_v50  ;;  %v1611_v15 = vadd.f32 %v1610_v23, %v1608_v51  ;;  %v2626_v4 = vld [vmem:[#allocation3 + $0x7f] ss:$0 sm:$0xff] }
 0x26a   :  { %v1633_v33 = vadd.f32 %v1632_v18, %v1630_v11  ;;  %v2594_v3 = vadd.f32 %v2593_v26, %v2591_v49  ;;  %v2596_v43 = vmul.f32 %v6066_v54, %v2595_v31  ;;  %v2599_v63 = vmul.f32 %v6067_v46, %v2598_v44  ;;  %v6072_v48 = vld [vmem:[#allocation37_spill] sm:$0xff]  ;;  %v1425_v49 = vld [vmem:[#allocation3 + $0x70] ss:$0 sm:$0xff]  ;;  %v1427_v31 = vld [vmem:[#allocation3 + $0x71] ss:$0 sm:$0xff] }
 0x26b   :  { %3227 = vmatprep.subr.bf16.mxu0 %v3166_v14  ;;  %v2528_v6 = vadd.f32 %v6067_v46, %v2527_v62  ;;  %v2610_v27 = vadd.f32 %v2609_v28, %v2607_v2  ;;  %v2612_v32 = vmul.f32 %v5387_v53, %v2611_v20  ;;  %v1612_v34 = vmul.f32 %v5719_v7, %v1611_v15  ;;  %v1411_v14 = vld [vmem:[#allocation3 + $0x64] ss:$0 sm:$0xff]  ;;  %v1420_v44 = vld [vmem:[#allocation3 + $0x67] ss:$0 sm:$0xff] }
 0x26c   :  { %v1636_v8 = vadd.f32 %v1635_v10, %v1633_v33  ;;  %v2597_v38 = vadd.f32 %v2596_v43, %v2594_v3  ;;  %v2602_v29 = vmul.f32 %v6068_v47, %v2601_v1  ;;  %v2615_v56 = vmul.f32 %v5393_v52, %v2614_v58  ;;  %v1408_v10 = vld [vmem:[#allocation3 + $0x63] ss:$0 sm:$0xff]  ;;  %v1414_v3 = vld [vmem:[#allocation3 + $0x65] ss:$0 sm:$0xff]  ;;  %v1417_v43 = vld [vmem:[#allocation3 + $0x66] ss:$0 sm:$0xff] }
 0x26d   :  { %v2529_v0 = vadd.f32 %v6068_v47, %v2528_v6  ;;  %v2613_v30 = vadd.f32 %v2612_v32, %v2610_v27  ;;  %v1342_v5 = vadd.f32 %v6070_v61, %v6069_v41  ;;  %v1401_v22 = vmul.f32 %v6069_v41, %v1400_v25  ;;  %v6073_v28 = vld [vmem:[#allocation38_spill] sm:$0xff]  ;;  %v6075_v27 = vld [vmem:[#allocation40_spill] sm:$0xff]  ;;  %v2533_v25 = vld [vmem:[#allocation3 + $0x49] ss:$0 sm:$0xff] }
 0x26e   :  { %v1637_v9 = vmul.f32 %v5719_v7, %v1636_v8  ;;  %v2600_v45 = vadd.f32 %v2599_v63, %v2597_v38  ;;  %v1403_v21 = vmul.f32 %v6070_v61, %v1402_v35  ;;  %v2618_v16 = vmul.f32 %v6065_v59, %v2617_v12  ;;  %v6074_v63 = vld [vmem:[#allocation39_spill] sm:$0xff]  ;;  %v1430_v38 = vld [vmem:[#allocation3 + $0x72] ss:$0 sm:$0xff] }
 0x26f   :  { %3983 = vrcp.f32 %v2529_v0  ;;  %v2616_v17 = vadd.f32 %v2615_v56, %v2613_v30  ;;  %v1343_v51 = vadd.f32 %v6071_v42, %v1342_v5  ;;  %v1406_v7 = vmul.f32 %v6071_v42, %v1405_v60  ;;  %v1433_v56 = vld [vmem:[#allocation3 + $0x73] ss:$0 sm:$0xff]  ;;  %v2531_v5 = vld [vmem:[#allocation3 + $0x48] ss:$0 sm:$0xff]  ;;  %v1439_v60 = vld [vmem:[#allocation3 + $0x75] ss:$0 sm:$0xff] }
 0x270   :  { %v3165_v55 = vpack.c.bf16 %v1637_v9, %v1612_v34  ;;  %v5753_v13 = vadd.f32 %v2602_v29, %v2600_v45  ;;  %v1404_v39 = vadd.f32 %v1403_v21, %v1401_v22  ;;  %v2621_v18 = vmul.f32 %v6066_v54, %v2620_v19  ;;  %v6076_v34 = vld [vmem:[#allocation41_spill] sm:$0xff]  ;;  %v1436_v45 = vld [vmem:[#allocation3 + $0x74] ss:$0 sm:$0xff] }
 0x271   :  { %v2619_v23 = vadd.f32 %v2618_v16, %v2616_v17  ;;  %v2624_v36 = vmul.f32 %v6067_v46, %v2623_v37  ;;  %v1344_v11 = vadd.f32 %v6072_v48, %v1343_v51  ;;  %v2627_v26 = vmul.f32 %v6068_v47, %v2626_v4 }
 0x272   :  { %3228 = vmatpush1.bf16.msra.mxu0 %v3165_v55  ;;  %v1407_v57 = vadd.f32 %v1406_v7, %v1404_v39  ;;  %v1409_v50 = vmul.f32 %v6072_v48, %v1408_v10  ;;  %v1426_v62 = vmul.f32 %v6069_v41, %v1425_v49  ;;  %v1412_v33 = vmul.f32 %v6073_v28, %v1411_v14  ;;  %v2536_v55 = vld [vmem:[#allocation3 + $0x4a] ss:$0 sm:$0xff]  ;;  %v1442_v39 = vld [vmem:[#allocation3 + $0x76] ss:$0 sm:$0xff]  ;;  %v1445_v7 = vld [vmem:[#allocation3 + $0x77] ss:$0 sm:$0xff] }
 0x273   :  { %v2622_v2 = vadd.f32 %v2621_v18, %v2619_v23  ;;  %v1345_v15 = vadd.f32 %v6073_v28, %v1344_v11  ;;  %v1428_v20 = vmul.f32 %v6070_v61, %v1427_v31  ;;  %v1415_v1 = vmul.f32 %v6074_v63, %v1414_v3  ;;  %v2539_v49 = vld [vmem:[#allocation3 + $0x4b] ss:$0 sm:$0xff]  ;;  %v2545_v3 = vld [vmem:[#allocation3 + $0x4d] ss:$0 sm:$0xff] }
 0x274   :  { %v1410_v6 = vadd.f32 %v1409_v50, %v1407_v57  ;;  %v1418_v32 = vmul.f32 %v6075_v27, %v1417_v43  ;;  %v1421_v8 = vmul.f32 %v6076_v34, %v1420_v44  ;;  %v1431_v30 = vmul.f32 %v6071_v42, %v1430_v38  ;;  %v2561_v44 = vld [vmem:[#allocation3 + $0x5a] ss:$0 sm:$0xff] }
 0x275   :  { %v2625_v29 = vadd.f32 %v2624_v36, %v2622_v2  ;;  %v1346_v58 = vadd.f32 %v6074_v63, %v1345_v15  ;;  %v1429_v0 = vadd.f32 %v1428_v20, %v1426_v62  ;;  %v1434_v9 = vmul.f32 %v6072_v48, %v1433_v56  ;;  %v2542_v62 = vld [vmem:[#allocation3 + $0x4c] ss:$0 sm:$0xff]  ;;  %v2558_v2 = vld [vmem:[#allocation3 + $0x59] ss:$0 sm:$0xff] }
 0x276   :  { %v1413_v35 = vadd.f32 %v1412_v33, %v1410_v6  ;;  %v2532_v12 = vmul.f32 %v5363_v40, %v2531_v5  ;;  %v2534_v22 = vmul.f32 %v5371_v24, %v2533_v25  ;;  %v1437_v51 = vmul.f32 %v6073_v28, %v1436_v45 }
 0x277   :  { %v2628_v21 = vadd.f32 %v2627_v26, %v2625_v29  ;;  %v1347_v17 = vadd.f32 %v6075_v27, %v1346_v58  ;;  %v1432_v16 = vadd.f32 %v1431_v30, %v1429_v0  ;;  %v1440_v37 = vmul.f32 %v6074_v63, %v1439_v60  ;;  %v2556_v26 = vld [vmem:[#allocation3 + $0x58] ss:$0 sm:$0xff]  ;;  %v2548_v0 = vld [vmem:[#allocation3 + $0x4e] ss:$0 sm:$0xff]  ;;  %v2551_v30 = vld [vmem:[#allocation3 + $0x4f] ss:$0 sm:$0xff] }
 0x278   :  { %v1416_v19 = vadd.f32 %v1415_v1, %v1413_v35  ;;  %v2535_v23 = vadd.f32 %v2534_v22, %v2532_v12  ;;  %v2537_v18 = vmul.f32 %v5387_v53, %v2536_v55  ;;  %v1443_v11 = vmul.f32 %v6075_v27, %v1442_v39  ;;  %v2567_v22 = vld [vmem:[#allocation3 + $0x5c] ss:$0 sm:$0xff]  ;;  %v2573_v55 = vld [vmem:[#allocation3 + $0x5e] ss:$0 sm:$0xff] }
 0x279   :  { %v1348_v36 = vadd.f32 %v6076_v34, %v1347_v17  ;;  %v1435_v4 = vadd.f32 %v1434_v9, %v1432_v16  ;;  %v1446_v10 = vmul.f32 %v6076_v34, %v1445_v7  ;;  %v2540_v14 = vmul.f32 %v5393_v52, %v2539_v49  ;;  %v1350_v9 = vld [vmem:[#allocation3 + $0x40] ss:$0 sm:$0xff]  ;;  %v1352_v17 = vld [vmem:[#allocation3 + $0x41] ss:$0 sm:$0xff] }
 0x27a   :  { %v1419_v57 = vadd.f32 %v1418_v32, %v1416_v19  ;;  %v2538_v50 = vadd.f32 %v2537_v18, %v2535_v23  ;;  %v2557_v31 = vmul.f32 %v5363_v40, %v2556_v26  ;;  %v2543_v33 = vmul.f32 %v6065_v59, %v2542_v62  ;;  %v2576_v19 = vld [vmem:[#allocation3 + $0x5f] ss:$0 sm:$0xff]  ;;  %v1355_v18 = vld [vmem:[#allocation3 + $0x42] ss:$0 sm:$0xff]  ;;  %v1375_v26 = vld [vmem:[#allocation3 + $0x50] ss:$0 sm:$0xff] }
 0x27b   :  { %3985 = vrcp.f32 %v1348_v36  ;;  %v1438_v15 = vadd.f32 %v1437_v51, %v1435_v4  ;;  %v2559_v43 = vmul.f32 %v5371_v24, %v2558_v2  ;;  %v2546_v32 = vmul.f32 %v6066_v54, %v2545_v3  ;;  %v2564_v24 = vld [vmem:[#allocation3 + $0x5b] ss:$0 sm:$0xff]  ;;  %v1358_v36 = vld [vmem:[#allocation3 + $0x43] ss:$0 sm:$0xff]  ;;  %v1367_v62 = vld [vmem:[#allocation3 + $0x46] ss:$0 sm:$0xff] }
 0x27c   :  { %v5784_v20 = vpop.eup %3983  ;;  %v5786_v6 = vadd.f32 %v1421_v8, %v1419_v57  ;;  %v2541_v1 = vadd.f32 %v2540_v14, %v2538_v50  ;;  %v2562_v38 = vmul.f32 %v5387_v53, %v2561_v44  ;;  %v2549_v25 = vmul.f32 %v6067_v46, %v2548_v0  ;;  %v1377_v57 = vld [vmem:[#allocation3 + $0x51] ss:$0 sm:$0xff]  ;;  %v1370_v3 = vld [vmem:[#allocation3 + $0x47] ss:$0 sm:$0xff] }
 0x27d   :  { %v2604_v40 = vmul.f32 %v5784_v20, %v5753_v13  ;;  %v2629_v29 = vmul.f32 %v5784_v20, %v2628_v21  ;;  %v1441_v58 = vadd.f32 %v1440_v37, %v1438_v15  ;;  %v2560_v56 = vadd.f32 %v2559_v43, %v2557_v31  ;;  %v2570_v13 = vld [vmem:[#allocation3 + $0x5d] ss:$0 sm:$0xff]  ;;  %v1380_v43 = vld [vmem:[#allocation3 + $0x52] ss:$0 sm:$0xff]  ;;  %v6078_v0 = vld [vmem:[#allocation50_spill] sm:$0xff] }
 0x27e   :  { %v2544_v5 = vadd.f32 %v2543_v33, %v2541_v1  ;;  %v2552_v8 = vmul.f32 %v6068_v47, %v2551_v30  ;;  %v2565_v35 = vmul.f32 %v5393_v52, %v2564_v24  ;;  %v1351_v21 = vmul.f32 %v6069_v41, %v1350_v9  ;;  %v2344_v24 = vld [vmem:[#allocation3 + $0x29] ss:$0 sm:$0xff] }
 0x27f   :  { %v3164_v45 = vpack.c.bf16 %v2629_v29, %v2604_v40  ;;  %v1444_v53 = vadd.f32 %v1443_v11, %v1441_v58  ;;  %v2563_v12 = vadd.f32 %v2562_v38, %v2560_v56  ;;  %v2568_v51 = vmul.f32 %v6065_v59, %v2567_v22  ;;  %v1383_v40 = vld [vmem:[#allocation3 + $0x53] ss:$0 sm:$0xff]  ;;  %v6077_v58 = vld [vmem:[#allocation49_spill] sm:$0xff]  ;;  %v2342_v56 = vld [vmem:[#allocation3 + $0x28] ss:$0 sm:$0xff] }
 0x280   :  { %v2547_v16 = vadd.f32 %v2546_v32, %v2544_v5  ;;  %v2571_v60 = vmul.f32 %v6066_v54, %v2570_v13  ;;  %v1353_v37 = vmul.f32 %v6070_v61, %v1352_v17  ;;  %v2574_v7 = vmul.f32 %v6067_v46, %v2573_v55  ;;  %v1361_v54 = vld [vmem:[#allocation3 + $0x44] ss:$0 sm:$0xff] }
 0x281   :  { %3229 = vmatprep.subr.bf16.mxu0 %v3164_v45  ;;  %v1447_v52 = vadd.f32 %v1446_v10, %v1444_v53  ;;  %v2566_v39 = vadd.f32 %v2565_v35, %v2563_v12  ;;  %v2577_v23 = vmul.f32 %v6068_v47, %v2576_v19  ;;  %v1356_v49 = vmul.f32 %v6071_v42, %v1355_v18  ;;  %v1364_v10 = vld [vmem:[#allocation3 + $0x45] ss:$0 sm:$0xff]  ;;  %v1389_v35 = vld [vmem:[#allocation3 + $0x55] ss:$0 sm:$0xff]  ;;  %v1392_v19 = vld [vmem:[#allocation3 + $0x56] ss:$0 sm:$0xff] }
 0x282   :  { %v2550_v4 = vadd.f32 %v2549_v25, %v2547_v16  ;;  %v1354_v11 = vadd.f32 %v1353_v37, %v1351_v21  ;;  %v1359_v59 = vmul.f32 %v6072_v48, %v1358_v36  ;;  %v1362_v14 = vmul.f32 %v6073_v28, %v1361_v54  ;;  %v6080_v37 = vld [vmem:[#allocation52_spill] sm:$0xff]  ;;  %v2353_v54 = vld [vmem:[#allocation3 + $0x2c] ss:$0 sm:$0xff] }
 0x283   :  { %v2569_v50 = vadd.f32 %v2568_v51, %v2566_v39  ;;  %v1376_v46 = vmul.f32 %v6069_v41, %v1375_v26  ;;  %v1378_v47 = vmul.f32 %v6070_v61, %v1377_v57  ;;  %v1365_v15 = vmul.f32 %v6074_v63, %v1364_v10  ;;  %v2367_v26 = vld [vmem:[#allocation3 + $0x38] ss:$0 sm:$0xff] }
 0x284   :  { %v2553_v31 = vadd.f32 %v2552_v8, %v2550_v4  ;;  %v1357_v2 = vadd.f32 %v1356_v49, %v1354_v11  ;;  %v1368_v33 = vmul.f32 %v6075_v27, %v1367_v62  ;;  %v1371_v1 = vmul.f32 %v6076_v34, %v1370_v3  ;;  %v1386_v8 = vld [vmem:[#allocation3 + $0x54] ss:$0 sm:$0xff]  ;;  %v2350_v11 = vld [vmem:[#allocation3 + $0x2b] ss:$0 sm:$0xff] }
 0x285   :  { %v2572_v44 = vadd.f32 %v2571_v60, %v2569_v50  ;;  %v1379_v32 = vadd.f32 %v1378_v47, %v1376_v46  ;;  %v1381_v38 = vmul.f32 %v6071_v42, %v1380_v43  ;;  %v1384_v61 = vmul.f32 %v6072_v48, %v1383_v40  ;;  %v6079_v48 = vld [vmem:[#allocation51_spill] sm:$0xff]  ;;  %v1395_v46 = vld [vmem:[#allocation3 + $0x57] ss:$0 sm:$0xff] }
 0x286   :  { %v2554_v29 = vmul.f32 %v5784_v20, %v2553_v31  ;;  %v1360_v41 = vadd.f32 %v1359_v59, %v1357_v2  ;;  %v2284_v30 = vadd.f32 %v6078_v0, %v6077_v58  ;;  %v2343_v9 = vmul.f32 %v6077_v58, %v2342_v56  ;;  %v2347_v60 = vld [vmem:[#allocation3 + $0x2a] ss:$0 sm:$0xff]  ;;  %v2356_v2 = vld [vmem:[#allocation3 + $0x2d] ss:$0 sm:$0xff]  ;;  %v2375_v56 = vld [vmem:[#allocation3 + $0x3b] ss:$0 sm:$0xff] }
 0x287   :  { %v2575_v5 = vadd.f32 %v2574_v7, %v2572_v44  ;;  %v1382_v25 = vadd.f32 %v1381_v38, %v1379_v32  ;;  %v2345_v45 = vmul.f32 %v6078_v0, %v2344_v24  ;;  %v1387_v12 = vmul.f32 %v6073_v28, %v1386_v8  ;;  %v6083_v40 = vld [vmem:[#allocation55_spill] sm:$0xff] }
 0x288   :  { %v3986_v42 = vpop.eup %3985  ;;  %v1363_v53 = vadd.f32 %v1362_v14, %v1360_v41  ;;  %v1390_v22 = vmul.f32 %v6074_v63, %v1389_v35  ;;  %v2285_v13 = vadd.f32 %v6079_v48, %v2284_v30  ;;  %v2348_v18 = vmul.f32 %v6079_v48, %v2347_v60  ;;  %v2359_v41 = vld [vmem:[#allocation3 + $0x2e] ss:$0 sm:$0xff] }
 0x289   :  { %v1423_v21 = vmul.f32 %v3986_v42, %v5786_v6  ;;  %v1448_v17 = vmul.f32 %v3986_v42, %v1447_v52  ;;  %v2578_v16 = vadd.f32 %v2577_v23, %v2575_v5  ;;  %v1385_v51 = vadd.f32 %v1384_v61, %v1382_v25  ;;  %v6081_v6 = vld [vmem:[#allocation53_spill] sm:$0xff]  ;;  %v2362_v61 = vld [vmem:[#allocation3 + $0x2f] ss:$0 sm:$0xff]  ;;  %v6084_v25 = vld [vmem:[#allocation56_spill] sm:$0xff] }
 0x28a   :  { %v1366_v55 = vadd.f32 %v1365_v15, %v1363_v53  ;;  %v2286_v39 = vadd.f32 %v6080_v37, %v2285_v13  ;;  %v2346_v7 = vadd.f32 %v2345_v45, %v2343_v9  ;;  %v1393_v63 = vmul.f32 %v6075_v27, %v1392_v19  ;;  %v6082_v27 = vld [vmem:[#allocation54_spill] sm:$0xff]  ;;  %v2378_v53 = vld [vmem:[#allocation3 + $0x3c] ss:$0 sm:$0xff] }
 0x28b   :  { %v3163_v36 = vpack.c.bf16 %v1448_v17, %v1423_v21  ;;  %v2579_v28 = vmul.f32 %v5784_v20, %v2578_v16  ;;  %v1388_v4 = vadd.f32 %v1387_v12, %v1385_v51  ;;  %v2351_v59 = vmul.f32 %v6080_v37, %v2350_v11  ;;  %v2369_v20 = vld [vmem:[#allocation3 + $0x39] ss:$0 sm:$0xff]  ;;  %v6085_v12 = vld [vmem:[#allocation26_spill] sm:$0xff] }
 0x28c   :  { %v1369_v49 = vadd.f32 %v1368_v33, %v1366_v55  ;;  %v2287_v52 = vadd.f32 %v6081_v6, %v2286_v39  ;;  %v2349_v23 = vadd.f32 %v2348_v18, %v2346_v7  ;;  %v2354_v14 = vmul.f32 %v6081_v6, %v2353_v54  ;;  %v2372_v33 = vld [vmem:[#allocation3 + $0x3a] ss:$0 sm:$0xff]  ;;  %v1161_v21 = vld [vmem:[#allocation3 + $0x20] ss:$0 sm:$0xff]  ;;  %v1163_v17 = vld [vmem:[#allocation3 + $0x21] ss:$0 sm:$0xff] }
 0x28d   :  { %3230 = vmatpush1.bf16.msra.mxu0 %v3163_v36  ;;  %v3162_v57 = vpack.c.bf16 %v2579_v28, %v2554_v29  ;;  %v1391_v50 = vadd.f32 %v1390_v22, %v1388_v4  ;;  %v2368_v10 = vmul.f32 %v6077_v58, %v2367_v26  ;;  %v2370_v15 = vmul.f32 %v6078_v0, %v2369_v20  ;;  %v6086_v22 = vld [vmem:[#allocation27_spill] sm:$0xff]  ;;  %v6087_v7 = vld [vmem:[#allocation28_spill] sm:$0xff]  ;;  %v1166_v36 = vld [vmem:[#allocation3 + $0x22] ss:$0 sm:$0xff] }
 0x28e   :  { %v1372_v62 = vadd.f32 %v1371_v1, %v1369_v49  ;;  %v2288_v47 = vadd.f32 %v6082_v27, %v2287_v52  ;;  %v2352_v31 = vadd.f32 %v2351_v59, %v2349_v23  ;;  %v1396_v43 = vmul.f32 %v6076_v34, %v1395_v46  ;;  %v2381_v4 = vld [vmem:[#allocation3 + $0x3d] ss:$0 sm:$0xff]  ;;  %v1169_v54 = vld [vmem:[#allocation3 + $0x23] ss:$0 sm:$0xff]  ;;  %v1186_v26 = vld [vmem:[#allocation3 + $0x30] ss:$0 sm:$0xff] }
 0x28f   :  { %3231 = vmatprep.subr.bf16.mxu0 %v3162_v57  ;;  %v1394_v3 = vadd.f32 %v1393_v63, %v1391_v50  ;;  %v2357_v44 = vmul.f32 %v6082_v27, %v2356_v2  ;;  %v2373_v32 = vmul.f32 %v6079_v48, %v2372_v33  ;;  %v2371_v30 = vadd.f32 %v2370_v15, %v2368_v10  ;;  %v6088_v23 = vld [vmem:[#allocation29_spill] sm:$0xff]  ;;  %v1188_v20 = vld [vmem:[#allocation3 + $0x31] ss:$0 sm:$0xff]  ;;  %v1172_v15 = vld [vmem:[#allocation3 + $0x24] ss:$0 sm:$0xff] }
 0x290   :  { %v1373_v38 = vmul.f32 %v3986_v42, %v1372_v62  ;;  %v2289_v29 = vadd.f32 %v6083_v40, %v2288_v47  ;;  %v2355_v1 = vadd.f32 %v2354_v14, %v2352_v31  ;;  %v2360_v5 = vmul.f32 %v6083_v40, %v2359_v41  ;;  %v2384_v57 = vld [vmem:[#allocation3 + $0x3e] ss:$0 sm:$0xff]  ;;  %v2387_v47 = vld [vmem:[#allocation3 + $0x3f] ss:$0 sm:$0xff]  ;;  %v6089_v31 = vld [vmem:[#allocation30_spill] sm:$0xff] }
 0x291   :  { %v1397_v24 = vadd.f32 %v1396_v43, %v1394_v3  ;;  %v2363_v8 = vmul.f32 %v6084_v25, %v2362_v61  ;;  %v2376_v35 = vmul.f32 %v6080_v37, %v2375_v56  ;;  %v2374_v45 = vadd.f32 %v2373_v32, %v2371_v30  ;;  %v1175_v33 = vld [vmem:[#allocation3 + $0x25] ss:$0 sm:$0xff]  ;;  %v1178_v30 = vld [vmem:[#allocation3 + $0x26] ss:$0 sm:$0xff] }
 0x292   :  { %v2290_v34 = vadd.f32 %v6084_v25, %v2289_v29  ;;  %v2358_v9 = vadd.f32 %v2357_v44, %v2355_v1  ;;  %v1103_v13 = vadd.f32 %v6086_v22, %v6085_v12  ;;  %v2379_v51 = vmul.f32 %v6081_v6, %v2378_v53  ;;  %v1191_v1 = vld [vmem:[#allocation3 + $0x32] ss:$0 sm:$0xff] }
 0x293   :  { %v1398_v16 = vmul.f32 %v3986_v42, %v1397_v24  ;;  %v1162_v60 = vmul.f32 %v6085_v12, %v1161_v21  ;;  %v1164_v55 = vmul.f32 %v6086_v22, %v1163_v17  ;;  %v2377_v39 = vadd.f32 %v2376_v35, %v2374_v45  ;;  %v1194_v45 = vld [vmem:[#allocation3 + $0x33] ss:$0 sm:$0xff] }
 0x294   :  { %3987 = vrcp.f32 %v2290_v34  ;;  %v2361_v19 = vadd.f32 %v2360_v5, %v2358_v9  ;;  %v1104_v18 = vadd.f32 %v6087_v7, %v1103_v13  ;;  %v1167_v11 = vmul.f32 %v6087_v7, %v1166_v36  ;;  %v2292_v5 = vld [vmem:[#allocation3 + $0x8] ss:$0 sm:$0xff]  ;;  %v6091_v34 = vld [vmem:[#allocation32_spill] sm:$0xff] }
 0x295   :  { %v3161_v28 = vpack.c.bf16 %v1398_v16, %v1373_v38  ;;  %v1165_v63 = vadd.f32 %v1164_v55, %v1162_v60  ;;  %v2380_v42 = vadd.f32 %v2379_v51, %v2377_v39  ;;  %v2382_v52 = vmul.f32 %v6082_v27, %v2381_v4  ;;  %v6090_v38 = vld [vmem:[#allocation31_spill] sm:$0xff]  ;;  %v1181_v16 = vld [vmem:[#allocation3 + $0x27] ss:$0 sm:$0xff]  ;;  %v6092_v39 = vld [vmem:[#allocation33_spill] sm:$0xff] }
 0x296   :  { %v5846_v49 = vadd.f32 %v2363_v8, %v2361_v19  ;;  %v1105_v59 = vadd.f32 %v6088_v23, %v1104_v18  ;;  %v1170_v14 = vmul.f32 %v6088_v23, %v1169_v54  ;;  %v1187_v10 = vmul.f32 %v6085_v12, %v1186_v26  ;;  %v2294_v8 = vld [vmem:[#allocation3 + $0x9] ss:$0 sm:$0xff]  ;;  %v2297_v55 = vld [vmem:[#allocation3 + $0xa] ss:$0 sm:$0xff]  ;;  %v1197_v36 = vld [vmem:[#allocation3 + $0x34] ss:$0 sm:$0xff] }
 0x297   :  { %3232 = vmatpush1.bf16.msra.mxu0 %v3161_v28  ;;  %v1168_v50 = vadd.f32 %v1167_v11, %v1165_v63  ;;  %v2383_v62 = vadd.f32 %v2382_v52, %v2380_v42  ;;  %v2385_v46 = vmul.f32 %v6083_v40, %v2384_v57  ;;  %v1189_v3 = vmul.f32 %v6086_v22, %v1188_v20  ;;  %v1200_v28 = vld [vmem:[#allocation3 + $0x35] ss:$0 sm:$0xff]  ;;  %v2300_v54 = vld [vmem:[#allocation3 + $0xb] ss:$0 sm:$0xff]  ;;  %v2317_v26 = vld [vmem:[#allocation3 + $0x18] ss:$0 sm:$0xff] }
 0x298   :  { %v1106_v2 = vadd.f32 %v6089_v31, %v1105_v59  ;;  %v2388_v43 = vmul.f32 %v6084_v25, %v2387_v47  ;;  %v1173_v32 = vmul.f32 %v6089_v31, %v1172_v15  ;;  %v1176_v29 = vmul.f32 %v6090_v38, %v1175_v33  ;;  %v2322_v33 = vld [vmem:[#allocation3 + $0x1a] ss:$0 sm:$0xff] }
 0x299   :  { %v1171_v44 = vadd.f32 %v1170_v14, %v1168_v50  ;;  %v2386_v41 = vadd.f32 %v2385_v46, %v2383_v62  ;;  %v1190_v56 = vadd.f32 %v1189_v3, %v1187_v10  ;;  %v1192_v24 = vmul.f32 %v6087_v7, %v1191_v1  ;;  %v1203_v50 = vld [vmem:[#allocation3 + $0x36] ss:$0 sm:$0xff]  ;;  %v2319_v62 = vld [vmem:[#allocation3 + $0x19] ss:$0 sm:$0xff] }
 0x29a   :  { %v1107_v61 = vadd.f32 %v6090_v38, %v1106_v2  ;;  %v1179_v9 = vmul.f32 %v6091_v34, %v1178_v30  ;;  %v2293_v53 = vmul.f32 %v6077_v58, %v2292_v5  ;;  %v2295_v13 = vmul.f32 %v6078_v0, %v2294_v8  ;;  %v2303_v2 = vld [vmem:[#allocation3 + $0xc] ss:$0 sm:$0xff]  ;;  %v2306_v30 = vld [vmem:[#allocation3 + $0xd] ss:$0 sm:$0xff] }
 0x29b   :  { %v1174_v35 = vadd.f32 %v1173_v32, %v1171_v44  ;;  %v2389_v21 = vadd.f32 %v2388_v43, %v2386_v41  ;;  %v1193_v51 = vadd.f32 %v1192_v24, %v1190_v56  ;;  %v1195_v60 = vmul.f32 %v6088_v23, %v1194_v45 }
 0x29c   :  { %v1108_v17 = vadd.f32 %v6091_v34, %v1107_v61  ;;  %v1182_v18 = vmul.f32 %v6092_v39, %v1181_v16  ;;  %v2296_v4 = vadd.f32 %v2295_v13, %v2293_v53  ;;  %v2298_v63 = vmul.f32 %v6079_v48, %v2297_v55  ;;  %v1206_v61 = vld [vmem:[#allocation3 + $0x37] ss:$0 sm:$0xff]  ;;  %v2309_v53 = vld [vmem:[#allocation3 + $0xe] ss:$0 sm:$0xff] }
 0x29d   :  { %v1177_v19 = vadd.f32 %v1176_v29, %v1174_v35  ;;  %v1196_v42 = vadd.f32 %v1195_v60, %v1193_v51  ;;  %v1198_v52 = vmul.f32 %v6089_v31, %v1197_v36  ;;  %v1201_v59 = vmul.f32 %v6090_v38, %v1200_v28  ;;  %v2328_v51 = vld [vmem:[#allocation3 + $0x1c] ss:$0 sm:$0xff]  ;;  %v1116_v36 = vld [vmem:[#allocation3 + $0x2] ss:$0 sm:$0xff] }
 0x29e   :  { %v1109_v11 = vadd.f32 %v6092_v39, %v1108_v17  ;;  %v2299_v14 = vadd.f32 %v2298_v63, %v2296_v4  ;;  %v2301_v10 = vmul.f32 %v6080_v37, %v2300_v54  ;;  %v2318_v20 = vmul.f32 %v6077_v58, %v2317_v26  ;;  %v2331_v63 = vld [vmem:[#allocation3 + $0x1d] ss:$0 sm:$0xff] }
 0x29f   :  { %v1180_v57 = vadd.f32 %v1179_v9, %v1177_v19  ;;  %v1199_v46 = vadd.f32 %v1198_v52, %v1196_v42  ;;  %v1204_v47 = vmul.f32 %v6091_v34, %v1203_v50  ;;  %v2320_v15 = vmul.f32 %v6078_v0, %v2319_v62  ;;  %v2325_v0 = vld [vmem:[#allocation3 + $0x1b] ss:$0 sm:$0xff]  ;;  %v1111_v9 = vld [vmem:[#allocation3] ss:$0 sm:$0xff]  ;;  %v2312_v19 = vld [vmem:[#allocation3 + $0xf] ss:$0 sm:$0xff] }
 0x2a0   :  { %3989 = vrcp.f32 %v1109_v11  ;;  %v2302_v44 = vadd.f32 %v2301_v10, %v2299_v14  ;;  %v2304_v32 = vmul.f32 %v6081_v6, %v2303_v2  ;;  %v2323_v29 = vmul.f32 %v6079_v48, %v2322_v33  ;;  %v1136_v52 = vld [vmem:[#allocation3 + $0x10] ss:$0 sm:$0xff] }
 0x2a1   :  { %v5874_v3 = vpop.eup %3987  ;;  %v5876_v43 = vadd.f32 %v1182_v18, %v1180_v57  ;;  %v1202_v41 = vadd.f32 %v1201_v59, %v1199_v46  ;;  %v2321_v56 = vadd.f32 %v2320_v15, %v2318_v20  ;;  %v1207_v24 = vmul.f32 %v6092_v39, %v1206_v61  ;;  %v1138_v59 = vld [vmem:[#allocation3 + $0x11] ss:$0 sm:$0xff]  ;;  %v1119_v57 = vld [vmem:[#allocation3 + $0x3] ss:$0 sm:$0xff]  ;;  %v1141_v46 = vld [vmem:[#allocation3 + $0x12] ss:$0 sm:$0xff] }
 0x2a2   :  { %v2365_v58 = vmul.f32 %v5874_v3, %v5846_v49  ;;  %v2390_v1 = vmul.f32 %v5874_v3, %v2389_v21  ;;  %v2305_v5 = vadd.f32 %v2304_v32, %v2302_v44  ;;  %v2307_v8 = vmul.f32 %v6082_v27, %v2306_v30  ;;  %v1113_v21 = vld [vmem:[#allocation3 + $0x1] ss:$0 sm:$0xff]  ;;  %v1122_v15 = vld [vmem:[#allocation3 + $0x4] ss:$0 sm:$0xff]  ;;  %v2337_v32 = vld [vmem:[#allocation3 + $0x1f] ss:$0 sm:$0xff] }
 0x2a3   :  { %v2326_v35 = vmul.f32 %v6080_v37, %v2325_v0  ;;  %v1205_v48 = vadd.f32 %v1204_v47, %v1202_v41  ;;  %v2324_v13 = vadd.f32 %v2323_v29, %v2321_v56  ;;  %v1112_v49 = vmul.f32 %v6085_v12, %v1111_v9  ;;  %v1125_v41 = vld [vmem:[#allocation3 + $0x5] ss:$0 sm:$0xff]  ;;  %v1147_v56 = vld [vmem:[#allocation3 + $0x14] ss:$0 sm:$0xff]  ;;  %v1128_v9 = vld [vmem:[#allocation3 + $0x6] ss:$0 sm:$0xff] }
 0x2a4   :  { %v3160_v45 = vpack.c.bf16 %v2390_v1, %v2365_v58  ;;  %v2308_v17 = vadd.f32 %v2307_v8, %v2305_v5  ;;  %v2310_v16 = vmul.f32 %v6083_v40, %v2309_v53  ;;  %v1114_v60 = vmul.f32 %v6086_v22, %v1113_v21  ;;  %v1150_v53 = vld [vmem:[#allocation3 + $0x15] ss:$0 sm:$0xff] }
 0x2a5   :  { %v1208_v55 = vadd.f32 %v1207_v24, %v1205_v48  ;;  %v2327_v18 = vadd.f32 %v2326_v35, %v2324_v13  ;;  %v2329_v37 = vmul.f32 %v6081_v6, %v2328_v51  ;;  %v2313_v4 = vmul.f32 %v6084_v25, %v2312_v19  ;;  %v2334_v6 = vld [vmem:[#allocation3 + $0x1e] ss:$0 sm:$0xff]  ;;  %v1153_v51 = vld [vmem:[#allocation3 + $0x16] ss:$0 sm:$0xff] }
 0x2a6   :  { %3233 = vmatprep.subr.bf16.mxu0 %v3160_v45  ;;  %v2311_v28 = vadd.f32 %v2310_v16, %v2308_v17  ;;  %v1115_v11 = vadd.f32 %v1114_v60, %v1112_v49  ;;  %v1117_v42 = vmul.f32 %v6087_v7, %v1116_v36  ;;  %v2332_v26 = vmul.f32 %v6082_v27, %v2331_v63  ;;  %v1131_v49 = vld [vmem:[#allocation3 + $0x7] ss:$0 sm:$0xff] }
 0x2a7   :  { %v2330_v54 = vadd.f32 %v2329_v37, %v2327_v18  ;;  %v1137_v50 = vmul.f32 %v6085_v12, %v1136_v52  ;;  %v1139_v14 = vmul.f32 %v6086_v22, %v1138_v59  ;;  %v1120_v62 = vmul.f32 %v6088_v23, %v1119_v57  ;;  %v1144_v22 = vld [vmem:[#allocation3 + $0x13] ss:$0 sm:$0xff]  ;;  %v1156_v18 = vld [vmem:[#allocation3 + $0x17] ss:$0 sm:$0xff]  ;;  %v3842_v52 = vld [vmem:[#allocation18 + $0x18] sm:$0xff]  }
 0x2a8   :  { %v2314_v10 = vadd.f32 %v2313_v4, %v2311_v28  ;;  %v1118_v20 = vadd.f32 %v1117_v42, %v1115_v11  ;;  %v2335_v2 = vmul.f32 %v6083_v40, %v2334_v6  ;;  %v1142_v44 = vmul.f32 %v6087_v7, %v1141_v46  ;;  %v3840_v42 = vld [vmem:[#allocation18 + $0x8] sm:$0xff]  }
 0x2a9   :  { %v2333_v47 = vadd.f32 %v2332_v26, %v2330_v54  ;;  %v1140_v33 = vadd.f32 %v1139_v14, %v1137_v50  ;;  %v1123_v12 = vmul.f32 %v6089_v31, %v1122_v15  ;;  %v2338_v1 = vmul.f32 %v6084_v25, %v2337_v32  ;;  %v3844_v59 = vld [vmem:[#allocation18 + $0x28] sm:$0xff]   ;;  %v3845_v54 = vld [vmem:[#allocation18 + $0x30] sm:$0xff]   ;;  %v3846_v26 = vld [vmem:[#allocation18 + $0x38] sm:$0xff]  }
 0x2aa   :  { %v2315_v27 = vmul.f32 %v5874_v3, %v2314_v10  ;;  %v1121_v29 = vadd.f32 %v1120_v62, %v1118_v20  ;;  %v1145_v30 = vmul.f32 %v6088_v23, %v1144_v22  ;;  %v1126_v24 = vmul.f32 %v6090_v38, %v1125_v41 }
 0x2ab   :  { %v2336_v58 = vadd.f32 %v2335_v2, %v2333_v47  ;;  %v1143_v61 = vadd.f32 %v1142_v44, %v1140_v33  ;;  %v1148_v7 = vmul.f32 %v6089_v31, %v1147_v56  ;;  %v1129_v25 = vmul.f32 %v6091_v34, %v1128_v9 }
 0x2ac   :  { %v1124_v0 = vadd.f32 %v1123_v12, %v1121_v29  ;;  %v1151_v17 = vmul.f32 %v6090_v38, %v1150_v53  ;;  %v1132_v31 = vmul.f32 %v6092_v39, %v1131_v49  ;;  %v1157_v36 = vmul.f32 %v6092_v39, %v1156_v18  ;;  %v3839_v38 = vld [vmem:[#allocation18] sm:$0xff]  }
 0x2ad   :  { %v3990_v40 = vpop.eup %3989  ;;  %v2339_v35 = vadd.f32 %v2338_v1, %v2336_v58  ;;  %v1146_v45 = vadd.f32 %v1145_v30, %v1143_v61  ;;  %v6093_v11 = vmov 0   ;;  %v3843_v39 = vld [vmem:[#allocation18 + $0x20] sm:$0xff]  }
 0x2ae   :  { %v1184_v5 = vmul.f32 %v3990_v40, %v5876_v43  ;;  %v1209_v8 = vmul.f32 %v3990_v40, %v1208_v55  ;;  %v1127_v48 = vadd.f32 %v1126_v24, %v1124_v0  ;;  %v1154_v55 = vmul.f32 %v6091_v34, %v1153_v51  ;;  %v3841_v34 = vld [vmem:[#allocation18 + $0x10] sm:$0xff]  }
 0x2af   :  { %v2340_v23 = vmul.f32 %v5874_v3, %v2339_v35  ;;  %v1149_v21 = vadd.f32 %v1148_v7, %v1146_v45 }
 0x2b0   :  { %v3159_v13 = vpack.c.bf16 %v1209_v8, %v1184_v5  ;;  %v1130_v16 = vadd.f32 %v1129_v25, %v1127_v48 }
 0x2b1   :  { %v3158_v43 = vpack.c.bf16 %v2340_v23, %v2315_v27  ;;  %v1152_v60 = vadd.f32 %v1151_v17, %v1149_v21 }
 0x2b2   :  { %3234 = vmatpush1.bf16.msra.mxu0 %v3159_v13  ;;  %v1133_v19 = vadd.f32 %v1132_v31, %v1130_v16 }
 0x2b3   :  { %3235 = vmatprep.subr.bf16.mxu0 %v3158_v43  ;;  %v1155_v37 = vadd.f32 %v1154_v55, %v1152_v60 }
 0x2b4   :  { %v1134_v3 = vmul.f32 %v3990_v40, %v1133_v19 }
 0x2b5   :  { %v1158_v28 = vadd.f32 %v1157_v36, %v1155_v37 }
 0x2b7   :  { %v1159_v4 = vmul.f32 %v3990_v40, %v1158_v28 }
 0x2b9   :  { %v3157_v63 = vpack.c.bf16 %v1159_v4, %v1134_v3 }
 0x2bb   :  { %3236 = vmatpush1.bf16.msra.mxu0 %v3157_v63 }
 0x2be   :  { %3254 = vmatmul.mubr.bf16.vlgmr.msra.gmra.mxu0 %v3839_v38 }
 0x2bf   :  { %3263 = vmatprep.mubr.bf16.mxu0 %v6093_v11 }
 0x2c6   :  { %3264 = vmatmul.mubr.bf16.gmra.mxu0 %v3840_v42 }
 0x2c7   :  { %3273 = vmatprep.mubr.bf16.mxu0 %v6093_v11 }
 0x2ce   :  { %3274 = vmatmul.mubr.bf16.gmra.mxu0 %v3841_v34 }
 0x2cf   :  { %3283 = vmatprep.mubr.bf16.mxu0 %v6093_v11 }
 0x2d6   :  { %3284 = vmatmul.mubr.bf16.gmra.mxu0 %v3842_v52 }
 0x2d7   :  { %3293 = vmatprep.mubr.bf16.mxu0 %v6093_v11 }
 0x2de   :  { %3294 = vmatmul.mubr.bf16.gmra.mxu0 %v3843_v39 }
 0x2df   :  { %3303 = vmatprep.mubr.bf16.mxu0 %v6093_v11 }
 0x2e6   :  { %3304 = vmatmul.mubr.bf16.gmra.mxu0 %v3844_v59 }
 0x2e7   :  { %3313 = vmatprep.mubr.bf16.mxu0 %v6093_v11 }
 0x2ee   :  { %3314 = vmatmul.mubr.bf16.gmra.mxu0 %v3845_v54 }
 0x2ef   :  { %3323 = vmatprep.mubr.bf16.mxu0 %v6093_v11 }
 0x2f6   :  { %3324 = vmatmul.mubr.bf16.gmra.mxu0 %v3846_v26 }
 0x37e   :  { %v3255_v57 = vpop.f32.mrf.mxu0 }
 0x380   :  { %v3257_v50 = vpop.f32.mrf.mxu0 }
 0x381   :  { %v3601_v14 = vpack.c.bf16 %v3257_v50, %v3255_v57 }
 0x382   :  { %v3259_v10 = vpop.f32.mrf.mxu0 }
 0x383   :  { %3430 = vst [vmem:[#allocation19] sm:$0xff] %v3601_v14 }
 0x384   :  { %v3261_v6 = vpop.f32.mrf.mxu0 }
 0x385   :  { %v3602_v20 = vpack.c.bf16 %v3261_v6, %v3259_v10 }
 0x386   :  { %v3265_v62 = vpop.f32.mrf.mxu0 }
 0x387   :  { %3431 = vst [vmem:[#allocation19 + $0x8] sm:$0xff] %v3602_v20 }
 0x388   :  { %v3267_v46 = vpop.f32.mrf.mxu0 }
 0x389   :  { %v3603_v47 = vpack.c.bf16 %v3267_v46, %v3265_v62 }
 0x38a   :  { %v3269_v2 = vpop.f32.mrf.mxu0 }
 0x38b   :  { %3432 = vst [vmem:[#allocation19 + $0x10] sm:$0xff] %v3603_v47 }
 0x38c   :  { %v3271_v15 = vpop.f32.mrf.mxu0 }
 0x38d   :  { %v3604_v33 = vpack.c.bf16 %v3271_v15, %v3269_v2 }
 0x38e   :  { %v3275_v44 = vpop.f32.mrf.mxu0 }
 0x38f   :  { %3433 = vst [vmem:[#allocation19 + $0x18] sm:$0xff] %v3604_v33 }
 0x390   :  { %v3277_v27 = vpop.f32.mrf.mxu0 }
 0x391   :  { %v3605_v32 = vpack.c.bf16 %v3277_v27, %v3275_v44 }
 0x392   :  { %v3279_v29 = vpop.f32.mrf.mxu0 }
 0x393   :  { %3434 = vst [vmem:[#allocation19 + $0x20] sm:$0xff] %v3605_v32 }
 0x394   :  { %v3281_v12 = vpop.f32.mrf.mxu0 }
 0x395   :  { %v3606_v22 = vpack.c.bf16 %v3281_v12, %v3279_v29 }
 0x396   :  { %v3285_v58 = vpop.f32.mrf.mxu0 }
 0x397   :  { %3435 = vst [vmem:[#allocation19 + $0x28] sm:$0xff] %v3606_v22 }
 0x398   :  { %v3287_v1 = vpop.f32.mrf.mxu0 }
 0x399   :  { %v3607_v41 = vpack.c.bf16 %v3287_v1, %v3285_v58 }
 0x39a   :  { %v3289_v61 = vpop.f32.mrf.mxu0 }
 0x39b   :  { %3436 = vst [vmem:[#allocation19 + $0x30] sm:$0xff] %v3607_v41 }
 0x39c   :  { %v3291_v30 = vpop.f32.mrf.mxu0 }
 0x39d   :  { %v3608_v56 = vpack.c.bf16 %v3291_v30, %v3289_v61 }
 0x39e   :  { %v3295_v40 = vpop.f32.mrf.mxu0 }
 0x39f   :  { %3437 = vst [vmem:[#allocation19 + $0x38] sm:$0xff] %v3608_v56 }
 0x3a0   :  { %v3297_v0 = vpop.f32.mrf.mxu0 }
 0x3a1   :  { %v3609_v24 = vpack.c.bf16 %v3297_v0, %v3295_v40 }
 0x3a2   :  { %v3299_v7 = vpop.f32.mrf.mxu0 }
 0x3a3   :  { %3438 = vst [vmem:[#allocation19 + $0x40] sm:$0xff] %v3609_v24 }
 0x3a4   :  { %v3301_v5 = vpop.f32.mrf.mxu0 }
 0x3a5   :  { %v3610_v8 = vpack.c.bf16 %v3301_v5, %v3299_v7 }
 0x3a6   :  { %v3305_v35 = vpop.f32.mrf.mxu0 }
 0x3a7   :  { %3439 = vst [vmem:[#allocation19 + $0x48] sm:$0xff] %v3610_v8 }
 0x3a8   :  { %v3307_v9 = vpop.f32.mrf.mxu0 }
 0x3a9   :  { %v3611_v45 = vpack.c.bf16 %v3307_v9, %v3305_v35 }
 0x3aa   :  { %v3309_v48 = vpop.f32.mrf.mxu0 }
 0x3ab   :  { %3440 = vst [vmem:[#allocation19 + $0x50] sm:$0xff] %v3611_v45 }
 0x3ac   :  { %v3311_v25 = vpop.f32.mrf.mxu0 }
 0x3ad   :  { %v3612_v53 = vpack.c.bf16 %v3311_v25, %v3309_v48 }
 0x3ae   :  { %v3315_v13 = vpop.f32.mrf.mxu0 }
 0x3af   :  { %3441 = vst [vmem:[#allocation19 + $0x58] sm:$0xff] %v3612_v53 }
 0x3b0   :  { %v3317_v23 = vpop.f32.mrf.mxu0 }
 0x3b1   :  { %v3613_v49 = vpack.c.bf16 %v3317_v23, %v3315_v13 }
 0x3b2   :  { %v3319_v21 = vpop.f32.mrf.mxu0 }
 0x3b3   :  { %3442 = vst [vmem:[#allocation19 + $0x60] sm:$0xff] %v3613_v49 }
 0x3b4   :  { %v3321_v17 = vpop.f32.mrf.mxu0 }
 0x3b5   :  { %v3614_v16 = vpack.c.bf16 %v3321_v17, %v3319_v21 }
 0x3b6   :  { %v3325_v31 = vpop.f32.mrf.mxu0 }
 0x3b7   :  { %3443 = vst [vmem:[#allocation19 + $0x68] sm:$0xff] %v3614_v16 }
 0x3b8   :  { %v3327_v51 = vpop.f32.mrf.mxu0 }
 0x3b9   :  { %v3615_v43 = vpack.c.bf16 %v3327_v51, %v3325_v31 }
 0x3ba   :  { %v3329_v60 = vpop.f32.mrf.mxu0 }
 0x3bb   :  { %3444 = vst [vmem:[#allocation19 + $0x70] sm:$0xff] %v3615_v43 }
 0x3bc   :  { %v3331_v55 = vpop.f32.mrf.mxu0 }
 0x3bd   :  { %v3616_v19 = vpack.c.bf16 %v3331_v55, %v3329_v60 }
 0x3bf   :  { %3445 = vst [vmem:[#allocation19 + $0x78] sm:$0xff] %v3616_v19 }
 0x3c0   :  { %4150 = shalt.err (!%p4147_p11)
}
 0x3c1   :  { %3457 = dma.vmem_to_hbm [thread:$0]  %s3452_s12, 2048, %s5932_s8, [#allocation7], %s4173_s10, %s4173_s10, %s4174_s11  }
 0x3c2   :  { %4169 = dma.done.wait [#allocation7], 2048  }
 0x3c3   :  { %4170 = vsyncadd [#allocation7], 4294965248 }
 0x3c4   :  { %3461 = vsyncpa [#allocation6], 1 }
 0x3c5   :  { %3462 = vsyncpa [#allocation11], 1 }
 0x3c6   :  { %3463 = vsyncpa [#allocation14], 1 }
 0x3c7   :  { %3464 = vsyncpa [#allocation17], 1 }
 0x3c8   :  { %3465 = vsyncpa [#allocation7], 1 }
 0x3c9   :  { %3466 = vsyncpa [#allocation8], 1 }

</bundles_post_ra>
